<compile_context>
chip_gen: v5e
topology: v5e:2x2
jax: 0.10.0
libtpu: 0.0.40
codegen_flags: <defaults>
</compile_context>

<pallas_src>
import jax
import jax.numpy as jnp
from jax.experimental import pallas as pl
from jax.experimental.pallas import tpu as pltpu


# ----------------------------------------------------------------------------
# Geometry forced by the module (view(-1,192) -> 30x45 frames,
# Linear(304,192) -> 2452 audio samples x 2 channels).
# ----------------------------------------------------------------------------
H0, W0 = 30, 45          # input frame
H1, W1 = 14, 22          # conv1 out (k3 s2)
H2, W2 = 6, 10           # conv2 out (k3 s2)
H3, W3 = 4, 8            # conv3 valid region of the dense 6x10 grid (k3 s1)
H4, W4 = 2, 6            # conv4 valid region (k3 s1) -> 16*2*6 = 192 features
LA0 = 2452               # audio samples (2 channels)

P1 = H1 * W1             # 308 columns of the 14x22 grid
P2 = H2 * W2             # 60 columns of the 6x10 grid
PAD1 = 384               # >= P1 + max tap shift (2*22 + 2 = 46)
PAD2 = 128               # >= P2 + max tap shift (2*10 + 2 = 22)


# ----------------------------------------------------------------------------
# The single fused kernel (one sample per grid step)
# ----------------------------------------------------------------------------
def _duel_qnet_kernel(
    # per-sample activations
    pv_ref,              # (1, 9, 308)  conv1 patch matrix (bf16)
    au_ref,              # (1, 1, 4904) raw audio, flattened (s, c) (bf16)
    # vision convs: BN-folded weights (cols ordered (tap, cin)) + BN shifts
    w1, s1, w2, s2, sel2, w3, s3, w4, s4,
    # fuse layer: expanded vision block, fully-folded audio block, total bias
    wvf, waf, bfuse,
    # fused dueling heads (block-diagonal)
    wh1, bh1, wh2, bh2,
    # output
    o_ref,               # (1, 1, A)
    # VMEM scratch
    h1, p2, h2, p3, h3, p4, vflat,
):
    f32 = jnp.float32
    bf16 = jnp.bfloat16

    def mm(a, b):
        return jnp.dot(a.astype(bf16), b.astype(bf16), preferred_element_type=f32)

    # Zero the padded activation scratches every step: the shifted full-grid
    # reads below must see zeros past the real grid, and with a "parallel"
    # batch axis each core owns its own scratch (so no one-time init).
    h1[...] = jnp.zeros_like(h1)
    h2[...] = jnp.zeros_like(h2)
    h3[...] = jnp.zeros_like(h3)

    # ---------------- conv1 + folded BN + ReLU: one matmul --------------------
    pv = pv_ref[0]                                               # (9, 308)
    h1[:, 0:P1] = jnp.maximum(mm(w1[...], pv) + s1[...], 0.0)    # (8, 308)

    # ---------------- conv2 (k3 s2): dense conv on the 14x22 grid -------------
    # 9 contiguous shifted copies into a (72, 308) patch scratch, one K=72
    # matmul, then the stride-2 downsample as a 0/1 selection matmul.
    for dy in range(3):
        for dx in range(3):
            t = dy * 3 + dx
            s = dy * W1 + dx
            p2[t * 8:(t + 1) * 8, :] = h1[:, s:s + P1]
    y2 = mm(w2[...], p2[...])                                    # (8, 308)
    h2[:, 0:P2] = jnp.maximum(mm(y2, sel2[...]) + s2[...], 0.0)  # (8, 60)

    # ---------------- conv3 (k3 s1), dense on the 6x10 grid -------------------
    # (columns with y>=4 or x>=8 are finite garbage, never read by valid conv4)
    for dy in range(3):
        for dx in range(3):
            t = dy * 3 + dx
            s = dy * W2 + dx
            p3[t * 8:(t + 1) * 8, :] = h2[:, s:s + P2]
    h3[:, 0:P2] = jnp.maximum(mm(w3[...], p3[...]) + s3[...], 0.0)

    # ---------------- conv4 (k3 s1), dense on the 6x10 grid -------------------
    for dy in range(3):
        for dx in range(3):
            t = dy * 3 + dx
            s = dy * W2 + dx
            p4[t * 8:(t + 1) * 8, :] = h3[:, s:s + P2]
    y4 = jnp.maximum(mm(w4[...], p4[...]) + s4[...], 0.0)        # (16, 60)

    # ---------------- fuse Linear(384, 192) -----------------------------------
    # Flatten conv4's dense grid into one (1, 960) lane row; the view(-1,192),
    # the valid-position gather and torch.cat are folded into wvf (zero rows
    # kill the 48 invalid grid columns).  Audio branch is a single matmul from
    # the raw audio straight into fuse space (exact affine fold).
    for c in range(16):
        vflat[0:1, c * P2:(c + 1) * P2] = y4[c:c + 1, :]
    a_row = au_ref[0]                                            # (1, 4904)
    f = mm(vflat[...], wvf[...]) + mm(a_row, waf[...]) + bfuse[...]   # (1, 192)

    # ---------------- dueling heads (block-diagonal, hidden = 128 lanes) ------
    hmid = jnp.maximum(mm(f, wh1[...]) + bh1[...], 0.0)          # (1, 128)
    o = mm(hmid, wh2[...]) + bh2[...]                            # (1, 1+A)
    sv = o[:, 0:1]
    adv = o[:, 1:]
    o_ref[0] = (sv + adv - jnp.mean(adv, axis=1, keepdims=True)).astype(o_ref.dtype)


# ----------------------------------------------------------------------------
# JAX glue: conv1 patch matrix (depends only on the raw frame)
# ----------------------------------------------------------------------------
def _vision_patches(x):
    # x: (N, 1, 30, 45) -> (N, 9, 308); rows = (dy, dx), cols = oy*22 + ox.
    v = x[:, 0]
    taps = []
    for dy in range(3):
        for dx in range(3):
            taps.append(v[:, dy:dy + 2 * (H1 - 1) + 1:2,
                            dx:dx + 2 * (W1 - 1) + 1:2])         # (N, 14, 22)
    return jnp.stack(taps, axis=1).reshape(x.shape[0], 9, P1)


# ----------------------------------------------------------------------------
# One-time parameter preparation (BN fold, audio-branch fold, layout packing)
# ----------------------------------------------------------------------------
def prepare_params(p, eps=1e-5):
    f32, bf16 = jnp.float32, jnp.bfloat16

    # Vision convs: fold eval-mode BN, reorder weight cols to (tap, cin).
    def fold2d(w, bn):
        gamma, beta, mean, var = bn
        scale = gamma / jnp.sqrt(var + eps)
        cout, cin, kh, kw = w.shape
        wm = jnp.transpose(w.reshape(cout, cin, kh * kw), (0, 2, 1))
        wm = wm.reshape(cout, kh * kw * cin) * scale[:, None]
        return wm, (beta - mean * scale).reshape(cout, 1)

    w1, s1 = fold2d(p["conv1_w"], p["bn1"])
    w2, s2 = fold2d(p["conv2_w"], p["bn2"])
    w3, s3 = fold2d(p["conv3_w"], p["bn3"])
    w4, s4 = fold2d(p["conv4_w"], p["bn4"])

    # 0/1 selection matrix realizing conv2's stride-2 downsample as a matmul.
    oy, ox = jnp.meshgrid(jnp.arange(H2), jnp.arange(W2), indexing="ij")
    src = (2 * oy * W1 + 2 * ox).reshape(-1)
    sel2 = jnp.zeros((P1, P2), f32).at[src, jnp.arange(P2)].set(1.0)

    # Audio branch: Conv1d(2,8,k8,s4) -> Conv1d(8,16,k8,s4) -> Conv1d(16,16,k8,s8)
    # -> Flatten -> Linear(304,192) has no nonlinearity, so it composes exactly
    # into one affine map from the raw (2452, 2) audio; the fuse layer's audio
    # row-block is folded in as well.
    W1a, b1a = p["aconv1_w"], p["aconv1_b"]                  # (8, 2, 8)
    W2a, b2a = p["aconv2_w"], p["aconv2_b"]                  # (16, 8, 8)
    W3a, b3a = p["aconv3_w"], p["aconv3_b"]                  # (16, 16, 8)
    G3 = p["alin_w"].reshape(192, 16, 19)                    # (o, c3, l3)
    b_acc = p["alin_b"] + jnp.einsum("ocl,c->o", G3, b3a)
    # aconv3: stride == kernel (non-overlapping): l2 = 8*l3 + t3
    G2 = jnp.einsum("ocl,cdt->odlt", G3, W3a).reshape(192, 16, 152)
    b_acc = b_acc + jnp.einsum("ocl,c->o", G2, b2a)
    # aconv2: stride 4, kernel 8 (transposed-conv scatter: l1 = 4*l2 + t2)
    tmp = jnp.einsum("ocl,cdt->odtl", G2, W2a)               # (o, c1, t2, l2)
    G1 = jnp.zeros((192, 8, 612), f32)
    for t in range(8):
        G1 = G1.at[:, :, t:t + 4 * 152:4].add(tmp[:, :, t, :])
    b_acc = b_acc + jnp.einsum("ocl,c->o", G1, b1a)
    # aconv1: stride 4, kernel 8 (s = 4*l1 + t1)
    tmp = jnp.einsum("ocl,cdt->odtl", G1, W1a)               # (o, c0, t1, l1)
    G0 = jnp.zeros((192, 2, LA0), f32)
    for t in range(8):
        G0 = G0.at[:, :, t:t + 4 * 612:4].add(tmp[:, :, t, :])
    W_audio = jnp.transpose(G0, (2, 1, 0)).reshape(2 * LA0, 192)   # row = s*2 + c

    # Fold the fuse layer's audio block: raw audio -> fuse output directly.
    Wf = p["fuse_w"]                                         # (192, 384)
    waf = W_audio @ Wf[:, 192:].T                            # (4904, 192)
    bfuse = (p["fuse_b"] + Wf[:, 192:] @ b_acc).reshape(1, 192)

    # Fuse vision block expanded over conv4's dense 6x10 grid: zero rows kill
    # the invalid positions (this realizes view(-1,192) + torch.cat as weights).
    Wfv = Wf[:, :192].reshape(192, 16, H4, W4)               # (o, c, y, x)
    wvf = jnp.zeros((192, 16, H2, W2), f32).at[:, :, 0:H4, 0:W4].set(Wfv)
    wvf = jnp.transpose(wvf, (1, 2, 3, 0)).reshape(16 * P2, 192)   # row = c*60+y*10+x

    # Dueling heads fused into block-diagonal matmuls:
    #   hidden cols [0:64] = state head, [64:128] = advantage head;
    #   output col 0 = state value, cols 1: = advantages.
    acts = p["a_w2"].shape[0]
    wh1 = jnp.zeros((192, 128), f32)
    wh1 = wh1.at[0:96, 0:64].set(p["s_w1"].T).at[96:192, 64:128].set(p["a_w1"].T)
    bh1 = jnp.concatenate([p["s_b1"], p["a_b1"]]).reshape(1, 128)
    wh2 = jnp.zeros((128, 1 + acts), f32)
    wh2 = wh2.at[0:64, 0:1].set(p["s_w2"].T).at[64:128, 1:].set(p["a_w2"].T)
    bh2 = jnp.concatenate([p["s_b2"], p["a_b2"]]).reshape(1, 1 + acts)

    # bf16 matmul weights (f32 accumulate in-kernel); shifts/biases stay f32.
    return (
        w1.astype(bf16), s1.astype(f32), w2.astype(bf16), s2.astype(f32),
        sel2.astype(bf16), w3.astype(bf16), s3.astype(f32),
        w4.astype(bf16), s4.astype(f32),
        wvf.astype(bf16), waf.astype(bf16), bfuse.astype(f32),
        wh1.astype(bf16), bh1.astype(f32), wh2.astype(bf16), bh2.astype(f32),
    )


# ----------------------------------------------------------------------------
# Forward
# ----------------------------------------------------------------------------
def duel_qnet_forward(prepped, x, audio):
    n = x.shape[0]
    actions = prepped[-1].shape[1] - 1               # bh2 is (1, 1+A)

    pv = _vision_patches(x).astype(jnp.bfloat16)               # (n, 9, 308)
    au = audio.reshape(n, 1, 2 * LA0).astype(jnp.bfloat16)     # (n, 1, 4904)

    in_specs = [
        pl.BlockSpec((1, 9, P1), lambda i: (i, 0, 0)),
        pl.BlockSpec((1, 1, 2 * LA0), lambda i: (i, 0, 0)),
    ] + [pl.BlockSpec(w.shape, lambda i: (0, 0)) for w in prepped]

    scratch = [
        pltpu.VMEM((8, PAD1), jnp.float32),      # h1: conv1 out, zero-padded
        pltpu.VMEM((72, P1), jnp.float32),       # conv2 patch (tap, cin) x pos
        pltpu.VMEM((8, PAD2), jnp.float32),      # h2: conv2 out, zero-padded
        pltpu.VMEM((72, P2), jnp.float32),       # conv3 patch
        pltpu.VMEM((8, PAD2), jnp.float32),      # h3: conv3 out (dense grid)
        pltpu.VMEM((72, P2), jnp.float32),       # conv4 patch
        pltpu.VMEM((1, 16 * P2), jnp.float32),   # flattened conv4 grid (1, 960)
    ]

    out = pl.pallas_call(
        _duel_qnet_kernel,
        out_shape=jax.ShapeDtypeStruct((n, 1, actions), jnp.float32),
        grid=(n,),
        in_specs=in_specs,
        out_specs=pl.BlockSpec((1, 1, actions), lambda i: (i, 0, 0)),
        scratch_shapes=scratch,
        compiler_params=pltpu.CompilerParams(
            dimension_semantics=("parallel",)),
    )(pv, au, *prepped)
    return out[:, 0, :]


# ----------------------------------------------------------------------------
# Pure-JAX reference (mirrors the PyTorch forward literally; eval-mode BN)
# ----------------------------------------------------------------------------
def _reference_forward(p, x, audio, eps=1e-5):
    n = x.shape[0]

    def conv2d_bn_relu(x, w, bn, stride):
        gamma, beta, mean, var = bn
        cout, cin, k, _ = w.shape
        N, C, H, W = x.shape
        Ho, Wo = (H - k) // stride + 1, (W - k) // stride + 1
        cols = []
        for dy in range(k):
            for dx in range(k):
                cols.append(x[:, :, dy:dy + (Ho - 1) * stride + 1:stride,
                                     dx:dx + (Wo - 1) * stride + 1:stride])
        pm = jnp.stack(cols, axis=2).transpose(0, 3, 4, 1, 2)
        pm = pm.reshape(N * Ho * Wo, C * k * k)
        scale = gamma / jnp.sqrt(var + eps)
        shift = beta - mean * scale
        y = jnp.maximum(pm @ (w.reshape(cout, -1).T * scale[None, :])
                        + shift[None, :], 0.0)
        return y.reshape(N, Ho, Wo, cout).transpose(0, 3, 1, 2)

    def conv1d(x, w, b, stride):
        cout, cin, k = w.shape
        N, C, L = x.shape
        Lo = (L - k) // stride + 1
        cols = [x[:, :, d:d + (Lo - 1) * stride + 1:stride] for d in range(k)]
        pm = jnp.stack(cols, axis=2).transpose(0, 3, 1, 2).reshape(N * Lo, C * k)
        y = pm @ w.reshape(cout, -1).T + b[None, :]
        return y.reshape(N, Lo, cout).transpose(0, 2, 1)

    a = jnp.transpose(audio, (0, 2, 1))
    a = conv1d(a, p["aconv1_w"], p["aconv1_b"], 4)
    a = conv1d(a, p["aconv2_w"], p["aconv2_b"], 4)
    a = conv1d(a, p["aconv3_w"], p["aconv3_b"], 8)
    a = a.reshape(n, -1) @ p["alin_w"].T + p["alin_b"]

    v = conv2d_bn_relu(x, p["conv1_w"], p["bn1"], 2)
    v = conv2d_bn_relu(v, p["conv2_w"], p["bn2"], 2)
    v = conv2d_bn_relu(v, p["conv3_w"], p["bn3"], 1)
    v = conv2d_bn_relu(v, p["conv4_w"], p["bn4"], 1)
    f = jnp.concatenate([v.reshape(n, -1), a], axis=1) @ p["fuse_w"].T + p["fuse_b"]

    x1, x2 = f[:, :96], f[:, 96:]
    hs = jnp.maximum(x1 @ p["s_w1"].T + p["s_b1"], 0.0)
    sv = hs @ p["s_w2"].T + p["s_b2"]
    ha = jnp.maximum(x2 @ p["a_w1"].T + p["a_b1"], 0.0)
    adv = ha @ p["a_w2"].T + p["a_b2"]
    return sv + adv - jnp.mean(adv, axis=1, keepdims=True)


# ----------------------------------------------------------------------------
# Deterministic synthetic parameters (PyTorch layouts, shapes from __init__)
# ----------------------------------------------------------------------------
def init_params(key, actions):
    keys = iter(jax.random.split(key, 40))

    def w(shape, s=0.05):
        return jax.random.normal(next(keys), shape, jnp.float32) * s

    def bn(c):
        return (1.0 + w((c,), 0.1), w((c,), 0.1),
                w((c,), 0.1), 1.0 + jnp.abs(w((c,), 0.1)))

    return {
        "conv1_w": w((8, 1, 3, 3)),  "bn1": bn(8),
        "conv2_w": w((8, 8, 3, 3)),  "bn2": bn(8),
        "conv3_w": w((8, 8, 3, 3)),  "bn3": bn(8),
        "conv4_w": w((16, 8, 3, 3)), "bn4": bn(16),
        "aconv1_w": w((8, 2, 8)),   "aconv1_b": w((8,)),
        "aconv2_w": w((16, 8, 8)),  "aconv2_b": w((16,)),
        "aconv3_w": w((16, 16, 8)), "aconv3_b": w((16,)),
        "alin_w": w((192, 304)), "alin_b": w((192,)),
        "fuse_w": w((192, 384)), "fuse_b": w((192,)),
        "s_w1": w((64, 96)), "s_b1": w((64,)),
        "s_w2": w((1, 64)),  "s_b2": w((1,)),
        "a_w1": w((64, 96)), "a_b1": w((64,)),
        "a_w2": w((actions, 64)), "a_b2": w((actions,)),
    }


if __name__ == "__main__":
    ACTIONS = 8
    key = jax.random.PRNGKey(0)
    kx, ka, kp = jax.random.split(key, 3)

    x = jax.random.normal(kx, (2, 1, H0, W0), dtype=jnp.float32)
    audio = jax.random.normal(ka, (2, LA0, 2), dtype=jnp.float32)
    params = init_params(kp, ACTIONS)

    prepped = prepare_params(params)            # one-time weight folding
    fwd = jax.jit(duel_qnet_forward)
    out = jax.block_until_ready(fwd(prepped, x, audio))

    assert out.shape == (2, ACTIONS), out.shape
    assert bool(jnp.all(jnp.isfinite(out)))
    ref = _reference_forward(params, x, audio)
    err = float(jnp.max(jnp.abs(out - ref)))
    # tolerance covers bf16 matmul operands (f32 accumulation) + the exact
    # affine folds (BN, audio branch, fuse/head packing).
    assert err < 5e-3, f"mismatch vs reference: {err}"
    print("KERNEL_OK")
</pallas_src>

<mosaic_0001>
module attributes {stable_mosaic.version = 11 : i64} {
  func.func @_duel_qnet_kernel(%arg0: i32, %arg1: memref<1x9x308xbf16, #tpu.memory_space<vmem>>, %arg2: memref<1x1x4904xbf16, #tpu.memory_space<vmem>>, %arg3: memref<8x9xbf16, #tpu.memory_space<vmem>>, %arg4: memref<8x1xf32, #tpu.memory_space<vmem>>, %arg5: memref<8x72xbf16, #tpu.memory_space<vmem>>, %arg6: memref<8x1xf32, #tpu.memory_space<vmem>>, %arg7: memref<308x60xbf16, #tpu.memory_space<vmem>>, %arg8: memref<8x72xbf16, #tpu.memory_space<vmem>>, %arg9: memref<8x1xf32, #tpu.memory_space<vmem>>, %arg10: memref<16x72xbf16, #tpu.memory_space<vmem>>, %arg11: memref<16x1xf32, #tpu.memory_space<vmem>>, %arg12: memref<960x192xbf16, #tpu.memory_space<vmem>>, %arg13: memref<4904x192xbf16, #tpu.memory_space<vmem>>, %arg14: memref<1x192xf32, #tpu.memory_space<vmem>>, %arg15: memref<192x128xbf16, #tpu.memory_space<vmem>>, %arg16: memref<1x128xf32, #tpu.memory_space<vmem>>, %arg17: memref<128x9xbf16, #tpu.memory_space<vmem>>, %arg18: memref<1x9xf32, #tpu.memory_space<vmem>>, %arg19: memref<1x1x8xf32, #tpu.memory_space<vmem>>, %arg20: memref<8x384xf32, #tpu.memory_space<vmem>>, %arg21: memref<72x308xf32, #tpu.memory_space<vmem>>, %arg22: memref<8x128xf32, #tpu.memory_space<vmem>>, %arg23: memref<72x60xf32, #tpu.memory_space<vmem>>, %arg24: memref<8x128xf32, #tpu.memory_space<vmem>>, %arg25: memref<72x60xf32, #tpu.memory_space<vmem>>, %arg26: memref<1x960xf32, #tpu.memory_space<vmem>>) attributes {dimension_semantics = [#tpu.dimension_semantics<parallel>], iteration_bounds = array<i64: 2>, scalar_prefetch = 0 : i64, scratch_operands = 7 : i64, tpu.core_type = #tpu.core_type<tc>, window_params = [{transform_indices = @transform_0, window_bounds = array<i64: 1, 9, 308>}, {transform_indices = @transform_1, window_bounds = array<i64: 1, 1, 4904>}, {pipeline_mode = #tpu.pipeline_mode<synchronous>, transform_indices = @transform_2, window_bounds = array<i64: 8, 9>}, {pipeline_mode = #tpu.pipeline_mode<synchronous>, transform_indices = @transform_3, window_bounds = array<i64: 8, 1>}, {pipeline_mode = #tpu.pipeline_mode<synchronous>, transform_indices = @transform_4, window_bounds = array<i64: 8, 72>}, {pipeline_mode = #tpu.pipeline_mode<synchronous>, transform_indices = @transform_5, window_bounds = array<i64: 8, 1>}, {pipeline_mode = #tpu.pipeline_mode<synchronous>, transform_indices = @transform_6, window_bounds = array<i64: 308, 60>}, {pipeline_mode = #tpu.pipeline_mode<synchronous>, transform_indices = @transform_7, window_bounds = array<i64: 8, 72>}, {pipeline_mode = #tpu.pipeline_mode<synchronous>, transform_indices = @transform_8, window_bounds = array<i64: 8, 1>}, {pipeline_mode = #tpu.pipeline_mode<synchronous>, transform_indices = @transform_9, window_bounds = array<i64: 16, 72>}, {pipeline_mode = #tpu.pipeline_mode<synchronous>, transform_indices = @transform_10, window_bounds = array<i64: 16, 1>}, {pipeline_mode = #tpu.pipeline_mode<synchronous>, transform_indices = @transform_11, window_bounds = array<i64: 960, 192>}, {pipeline_mode = #tpu.pipeline_mode<synchronous>, transform_indices = @transform_12, window_bounds = array<i64: 4904, 192>}, {pipeline_mode = #tpu.pipeline_mode<synchronous>, transform_indices = @transform_13, window_bounds = array<i64: 1, 192>}, {pipeline_mode = #tpu.pipeline_mode<synchronous>, transform_indices = @transform_14, window_bounds = array<i64: 192, 128>}, {pipeline_mode = #tpu.pipeline_mode<synchronous>, transform_indices = @transform_15, window_bounds = array<i64: 1, 128>}, {pipeline_mode = #tpu.pipeline_mode<synchronous>, transform_indices = @transform_16, window_bounds = array<i64: 128, 9>}, {pipeline_mode = #tpu.pipeline_mode<synchronous>, transform_indices = @transform_17, window_bounds = array<i64: 1, 9>}, {transform_indices = @transform_18, window_bounds = array<i64: 1, 1, 8>}]} {
    %cst = arith.constant 0.000000e+00 : f32
    %0 = vector.broadcast %cst : f32 to vector<8x384xf32>
    %c0 = arith.constant 0 : index
    %c0_0 = arith.constant 0 : index
    %1 = vector.load %arg20[%c0, %c0_0] : memref<8x384xf32, #tpu.memory_space<vmem>>, vector<8x384xf32>
    tpu.vector_store %arg20[%c0, %c0_0], %0 {strides = array<i32>} : memref<8x384xf32, #tpu.memory_space<vmem>>, vector<8x384xf32>,
    %cst_1 = arith.constant 0.000000e+00 : f32
    %2 = vector.broadcast %cst_1 : f32 to vector<8x128xf32>
    %c0_2 = arith.constant 0 : index
    %c0_3 = arith.constant 0 : index
    %3 = vector.load %arg22[%c0_2, %c0_3] : memref<8x128xf32, #tpu.memory_space<vmem>>, vector<8x128xf32>
    tpu.vector_store %arg22[%c0_2, %c0_3], %2 {strides = array<i32>} : memref<8x128xf32, #tpu.memory_space<vmem>>, vector<8x128xf32>,
    %cst_4 = arith.constant 0.000000e+00 : f32
    %4 = vector.broadcast %cst_4 : f32 to vector<8x128xf32>
    %c0_5 = arith.constant 0 : index
    %c0_6 = arith.constant 0 : index
    %5 = vector.load %arg24[%c0_5, %c0_6] : memref<8x128xf32, #tpu.memory_space<vmem>>, vector<8x128xf32>
    tpu.vector_store %arg24[%c0_5, %c0_6], %4 {strides = array<i32>} : memref<8x128xf32, #tpu.memory_space<vmem>>, vector<8x128xf32>,
    %c0_7 = arith.constant 0 : index
    %c0_8 = arith.constant 0 : index
    %c0_9 = arith.constant 0 : index
    %6 = vector.load %arg1[%c0_7, %c0_8, %c0_9] : memref<1x9x308xbf16, #tpu.memory_space<vmem>>, vector<1x9x308xbf16>
    %7 = vector.shape_cast %6 : vector<1x9x308xbf16> to vector<9x308xbf16>
    %c0_10 = arith.constant 0 : index
    %c0_11 = arith.constant 0 : index
    %8 = vector.load %arg3[%c0_10, %c0_11] : memref<8x9xbf16, #tpu.memory_space<vmem>>, vector<8x9xbf16>
    %cst_12 = arith.constant dense<0.000000e+00> : vector<8x308xf32>
    %9 = tpu.matmul %8, %7, %cst_12 {dimension_numbers = #tpu.dot_dimension_numbers<[1], [0], [0], [1], [0, 0, 1, 1], [], []>} : vector<8x9xbf16>, vector<9x308xbf16>, vector<8x308xf32> -> vector<8x308xf32>
    %c0_13 = arith.constant 0 : index
    %c0_14 = arith.constant 0 : index
    %10 = vector.load %arg4[%c0_13, %c0_14] : memref<8x1xf32, #tpu.memory_space<vmem>>, vector<8x1xf32>
    %11 = vector.broadcast %10 : vector<8x1xf32> to vector<8x308xf32>
    %12 = arith.addf %9, %11 : vector<8x308xf32>
    %cst_15 = arith.constant 0.000000e+00 : f32
    %13 = vector.broadcast %cst_15 : f32 to vector<8x308xf32>
    %14 = arith.maximumf %12, %13 : vector<8x308xf32>
    %c0_16 = arith.constant 0 : index
    %c0_17 = arith.constant 0 : index
    %15 = vector.load %arg20[%c0_16, %c0_17] : memref<8x384xf32, #tpu.memory_space<vmem>>, vector<8x308xf32>
    tpu.vector_store %arg20[%c0_16, %c0_17], %14 {strides = array<i32>} : memref<8x384xf32, #tpu.memory_space<vmem>>, vector<8x308xf32>,
    %c0_18 = arith.constant 0 : index
    %c0_19 = arith.constant 0 : index
    %16 = vector.load %arg20[%c0_18, %c0_19] : memref<8x384xf32, #tpu.memory_space<vmem>>, vector<8x308xf32>
    %c0_20 = arith.constant 0 : index
    %c0_21 = arith.constant 0 : index
    %17 = vector.load %arg21[%c0_20, %c0_21] : memref<72x308xf32, #tpu.memory_space<vmem>>, vector<8x308xf32>
    tpu.vector_store %arg21[%c0_20, %c0_21], %16 {strides = array<i32>} : memref<72x308xf32, #tpu.memory_space<vmem>>, vector<8x308xf32>,
    %c0_22 = arith.constant 0 : index
    %c1 = arith.constant 1 : index
    %18 = vector.load %arg20[%c0_22, %c1] : memref<8x384xf32, #tpu.memory_space<vmem>>, vector<8x308xf32>
    %c8 = arith.constant 8 : index
    %c0_23 = arith.constant 0 : index
    %19 = vector.load %arg21[%c8, %c0_23] : memref<72x308xf32, #tpu.memory_space<vmem>>, vector<8x308xf32>
    tpu.vector_store %arg21[%c8, %c0_23], %18 {strides = array<i32>} : memref<72x308xf32, #tpu.memory_space<vmem>>, vector<8x308xf32>,
    %c0_24 = arith.constant 0 : index
    %c2 = arith.constant 2 : index
    %20 = vector.load %arg20[%c0_24, %c2] : memref<8x384xf32, #tpu.memory_space<vmem>>, vector<8x308xf32>
    %c16 = arith.constant 16 : index
    %c0_25 = arith.constant 0 : index
    %21 = vector.load %arg21[%c16, %c0_25] : memref<72x308xf32, #tpu.memory_space<vmem>>, vector<8x308xf32>
    tpu.vector_store %arg21[%c16, %c0_25], %20 {strides = array<i32>} : memref<72x308xf32, #tpu.memory_space<vmem>>, vector<8x308xf32>,
    %c0_26 = arith.constant 0 : index
    %c22 = arith.constant 22 : index
    %22 = vector.load %arg20[%c0_26, %c22] : memref<8x384xf32, #tpu.memory_space<vmem>>, vector<8x308xf32>
    %c24 = arith.constant 24 : index
    %c0_27 = arith.constant 0 : index
    %23 = vector.load %arg21[%c24, %c0_27] : memref<72x308xf32, #tpu.memory_space<vmem>>, vector<8x308xf32>
    tpu.vector_store %arg21[%c24, %c0_27], %22 {strides = array<i32>} : memref<72x308xf32, #tpu.memory_space<vmem>>, vector<8x308xf32>,
    %c0_28 = arith.constant 0 : index
    %c23 = arith.constant 23 : index
    %24 = vector.load %arg20[%c0_28, %c23] : memref<8x384xf32, #tpu.memory_space<vmem>>, vector<8x308xf32>
    %c32 = arith.constant 32 : index
    %c0_29 = arith.constant 0 : index
    %25 = vector.load %arg21[%c32, %c0_29] : memref<72x308xf32, #tpu.memory_space<vmem>>, vector<8x308xf32>
    tpu.vector_store %arg21[%c32, %c0_29], %24 {strides = array<i32>} : memref<72x308xf32, #tpu.memory_space<vmem>>, vector<8x308xf32>,
    %c0_30 = arith.constant 0 : index
    %c24_31 = arith.constant 24 : index
    %26 = vector.load %arg20[%c0_30, %c24_31] : memref<8x384xf32, #tpu.memory_space<vmem>>, vector<8x308xf32>
    %c40 = arith.constant 40 : index
    %c0_32 = arith.constant 0 : index
    %27 = vector.load %arg21[%c40, %c0_32] : memref<72x308xf32, #tpu.memory_space<vmem>>, vector<8x308xf32>
    tpu.vector_store %arg21[%c40, %c0_32], %26 {strides = array<i32>} : memref<72x308xf32, #tpu.memory_space<vmem>>, vector<8x308xf32>,
    %c0_33 = arith.constant 0 : index
    %c44 = arith.constant 44 : index
    %28 = vector.load %arg20[%c0_33, %c44] : memref<8x384xf32, #tpu.memory_space<vmem>>, vector<8x308xf32>
    %c48 = arith.constant 48 : index
    %c0_34 = arith.constant 0 : index
    %29 = vector.load %arg21[%c48, %c0_34] : memref<72x308xf32, #tpu.memory_space<vmem>>, vector<8x308xf32>
    tpu.vector_store %arg21[%c48, %c0_34], %28 {strides = array<i32>} : memref<72x308xf32, #tpu.memory_space<vmem>>, vector<8x308xf32>,
    %c0_35 = arith.constant 0 : index
    %c45 = arith.constant 45 : index
    %30 = vector.load %arg20[%c0_35, %c45] : memref<8x384xf32, #tpu.memory_space<vmem>>, vector<8x308xf32>
    %c56 = arith.constant 56 : index
    %c0_36 = arith.constant 0 : index
    %31 = vector.load %arg21[%c56, %c0_36] : memref<72x308xf32, #tpu.memory_space<vmem>>, vector<8x308xf32>
    tpu.vector_store %arg21[%c56, %c0_36], %30 {strides = array<i32>} : memref<72x308xf32, #tpu.memory_space<vmem>>, vector<8x308xf32>,
    %c0_37 = arith.constant 0 : index
    %c46 = arith.constant 46 : index
    %32 = vector.load %arg20[%c0_37, %c46] : memref<8x384xf32, #tpu.memory_space<vmem>>, vector<8x308xf32>
    %c64 = arith.constant 64 : index
    %c0_38 = arith.constant 0 : index
    %33 = vector.load %arg21[%c64, %c0_38] : memref<72x308xf32, #tpu.memory_space<vmem>>, vector<8x308xf32>
    tpu.vector_store %arg21[%c64, %c0_38], %32 {strides = array<i32>} : memref<72x308xf32, #tpu.memory_space<vmem>>, vector<8x308xf32>,
    %c0_39 = arith.constant 0 : index
    %c0_40 = arith.constant 0 : index
    %34 = vector.load %arg5[%c0_39, %c0_40] : memref<8x72xbf16, #tpu.memory_space<vmem>>, vector<8x72xbf16>
    %c0_41 = arith.constant 0 : index
    %c0_42 = arith.constant 0 : index
    %35 = vector.load %arg21[%c0_41, %c0_42] : memref<72x308xf32, #tpu.memory_space<vmem>>, vector<72x308xf32>
    %36 = arith.truncf %35 : vector<72x308xf32> to vector<72x308xbf16>
    %cst_43 = arith.constant dense<0.000000e+00> : vector<8x308xf32>
    %37 = tpu.matmul %34, %36, %cst_43 {dimension_numbers = #tpu.dot_dimension_numbers<[1], [0], [0], [1], [0, 0, 1, 1], [], []>} : vector<8x72xbf16>, vector<72x308xbf16>, vector<8x308xf32> -> vector<8x308xf32>
    %c0_44 = arith.constant 0 : index
    %c0_45 = arith.constant 0 : index
    %38 = vector.load %arg7[%c0_44, %c0_45] : memref<308x60xbf16, #tpu.memory_space<vmem>>, vector<308x60xbf16>
    %39 = arith.truncf %37 : vector<8x308xf32> to vector<8x308xbf16>
    %cst_46 = arith.constant dense<0.000000e+00> : vector<8x60xf32>
    %40 = tpu.matmul %39, %38, %cst_46 {dimension_numbers = #tpu.dot_dimension_numbers<[1], [0], [0], [1], [0, 0, 1, 1], [], []>} : vector<8x308xbf16>, vector<308x60xbf16>, vector<8x60xf32> -> vector<8x60xf32>
    %c0_47 = arith.constant 0 : index
    %c0_48 = arith.constant 0 : index
    %41 = vector.load %arg6[%c0_47, %c0_48] : memref<8x1xf32, #tpu.memory_space<vmem>>, vector<8x1xf32>
    %42 = vector.broadcast %41 : vector<8x1xf32> to vector<8x60xf32>
    %43 = arith.addf %40, %42 : vector<8x60xf32>
    %cst_49 = arith.constant 0.000000e+00 : f32
    %44 = vector.broadcast %cst_49 : f32 to vector<8x60xf32>
    %45 = arith.maximumf %43, %44 : vector<8x60xf32>
    %c0_50 = arith.constant 0 : index
    %c0_51 = arith.constant 0 : index
    %46 = vector.load %arg22[%c0_50, %c0_51] : memref<8x128xf32, #tpu.memory_space<vmem>>, vector<8x60xf32>
    tpu.vector_store %arg22[%c0_50, %c0_51], %45 {strides = array<i32>} : memref<8x128xf32, #tpu.memory_space<vmem>>, vector<8x60xf32>,
    %c0_52 = arith.constant 0 : index
    %c0_53 = arith.constant 0 : index
    %47 = vector.load %arg22[%c0_52, %c0_53] : memref<8x128xf32, #tpu.memory_space<vmem>>, vector<8x60xf32>
    %c0_54 = arith.constant 0 : index
    %c0_55 = arith.constant 0 : index
    %48 = vector.load %arg23[%c0_54, %c0_55] : memref<72x60xf32, #tpu.memory_space<vmem>>, vector<8x60xf32>
    tpu.vector_store %arg23[%c0_54, %c0_55], %47 {strides = array<i32>} : memref<72x60xf32, #tpu.memory_space<vmem>>, vector<8x60xf32>,
    %c0_56 = arith.constant 0 : index
    %c1_57 = arith.constant 1 : index
    %49 = vector.load %arg22[%c0_56, %c1_57] : memref<8x128xf32, #tpu.memory_space<vmem>>, vector<8x60xf32>
    %c8_58 = arith.constant 8 : index
    %c0_59 = arith.constant 0 : index
    %50 = vector.load %arg23[%c8_58, %c0_59] : memref<72x60xf32, #tpu.memory_space<vmem>>, vector<8x60xf32>
    tpu.vector_store %arg23[%c8_58, %c0_59], %49 {strides = array<i32>} : memref<72x60xf32, #tpu.memory_space<vmem>>, vector<8x60xf32>,
    %c0_60 = arith.constant 0 : index
    %c2_61 = arith.constant 2 : index
    %51 = vector.load %arg22[%c0_60, %c2_61] : memref<8x128xf32, #tpu.memory_space<vmem>>, vector<8x60xf32>
    %c16_62 = arith.constant 16 : index
    %c0_63 = arith.constant 0 : index
    %52 = vector.load %arg23[%c16_62, %c0_63] : memref<72x60xf32, #tpu.memory_space<vmem>>, vector<8x60xf32>
    tpu.vector_store %arg23[%c16_62, %c0_63], %51 {strides = array<i32>} : memref<72x60xf32, #tpu.memory_space<vmem>>, vector<8x60xf32>,
    %c0_64 = arith.constant 0 : index
    %c10 = arith.constant 10 : index
    %53 = vector.load %arg22[%c0_64, %c10] : memref<8x128xf32, #tpu.memory_space<vmem>>, vector<8x60xf32>
    %c24_65 = arith.constant 24 : index
    %c0_66 = arith.constant 0 : index
    %54 = vector.load %arg23[%c24_65, %c0_66] : memref<72x60xf32, #tpu.memory_space<vmem>>, vector<8x60xf32>
    tpu.vector_store %arg23[%c24_65, %c0_66], %53 {strides = array<i32>} : memref<72x60xf32, #tpu.memory_space<vmem>>, vector<8x60xf32>,
    %c0_67 = arith.constant 0 : index
    %c11 = arith.constant 11 : index
    %55 = vector.load %arg22[%c0_67, %c11] : memref<8x128xf32, #tpu.memory_space<vmem>>, vector<8x60xf32>
    %c32_68 = arith.constant 32 : index
    %c0_69 = arith.constant 0 : index
    %56 = vector.load %arg23[%c32_68, %c0_69] : memref<72x60xf32, #tpu.memory_space<vmem>>, vector<8x60xf32>
    tpu.vector_store %arg23[%c32_68, %c0_69], %55 {strides = array<i32>} : memref<72x60xf32, #tpu.memory_space<vmem>>, vector<8x60xf32>,
    %c0_70 = arith.constant 0 : index
    %c12 = arith.constant 12 : index
    %57 = vector.load %arg22[%c0_70, %c12] : memref<8x128xf32, #tpu.memory_space<vmem>>, vector<8x60xf32>
    %c40_71 = arith.constant 40 : index
    %c0_72 = arith.constant 0 : index
    %58 = vector.load %arg23[%c40_71, %c0_72] : memref<72x60xf32, #tpu.memory_space<vmem>>, vector<8x60xf32>
    tpu.vector_store %arg23[%c40_71, %c0_72], %57 {strides = array<i32>} : memref<72x60xf32, #tpu.memory_space<vmem>>, vector<8x60xf32>,
    %c0_73 = arith.constant 0 : index
    %c20 = arith.constant 20 : index
    %59 = vector.load %arg22[%c0_73, %c20] : memref<8x128xf32, #tpu.memory_space<vmem>>, vector<8x60xf32>
    %c48_74 = arith.constant 48 : index
    %c0_75 = arith.constant 0 : index
    %60 = vector.load %arg23[%c48_74, %c0_75] : memref<72x60xf32, #tpu.memory_space<vmem>>, vector<8x60xf32>
    tpu.vector_store %arg23[%c48_74, %c0_75], %59 {strides = array<i32>} : memref<72x60xf32, #tpu.memory_space<vmem>>, vector<8x60xf32>,
    %c0_76 = arith.constant 0 : index
    %c21 = arith.constant 21 : index
    %61 = vector.load %arg22[%c0_76, %c21] : memref<8x128xf32, #tpu.memory_space<vmem>>, vector<8x60xf32>
    %c56_77 = arith.constant 56 : index
    %c0_78 = arith.constant 0 : index
    %62 = vector.load %arg23[%c56_77, %c0_78] : memref<72x60xf32, #tpu.memory_space<vmem>>, vector<8x60xf32>
    tpu.vector_store %arg23[%c56_77, %c0_78], %61 {strides = array<i32>} : memref<72x60xf32, #tpu.memory_space<vmem>>, vector<8x60xf32>,
    %c0_79 = arith.constant 0 : index
    %c22_80 = arith.constant 22 : index
    %63 = vector.load %arg22[%c0_79, %c22_80] : memref<8x128xf32, #tpu.memory_space<vmem>>, vector<8x60xf32>
    %c64_81 = arith.constant 64 : index
    %c0_82 = arith.constant 0 : index
    %64 = vector.load %arg23[%c64_81, %c0_82] : memref<72x60xf32, #tpu.memory_space<vmem>>, vector<8x60xf32>
    tpu.vector_store %arg23[%c64_81, %c0_82], %63 {strides = array<i32>} : memref<72x60xf32, #tpu.memory_space<vmem>>, vector<8x60xf32>,
    %c0_83 = arith.constant 0 : index
    %c0_84 = arith.constant 0 : index
    %65 = vector.load %arg8[%c0_83, %c0_84] : memref<8x72xbf16, #tpu.memory_space<vmem>>, vector<8x72xbf16>
    %c0_85 = arith.constant 0 : index
    %c0_86 = arith.constant 0 : index
    %66 = vector.load %arg23[%c0_85, %c0_86] : memref<72x60xf32, #tpu.memory_space<vmem>>, vector<72x60xf32>
    %67 = arith.truncf %66 : vector<72x60xf32> to vector<72x60xbf16>
    %cst_87 = arith.constant dense<0.000000e+00> : vector<8x60xf32>
    %68 = tpu.matmul %65, %67, %cst_87 {dimension_numbers = #tpu.dot_dimension_numbers<[1], [0], [0], [1], [0, 0, 1, 1], [], []>} : vector<8x72xbf16>, vector<72x60xbf16>, vector<8x60xf32> -> vector<8x60xf32>
    %c0_88 = arith.constant 0 : index
    %c0_89 = arith.constant 0 : index
    %69 = vector.load %arg9[%c0_88, %c0_89] : memref<8x1xf32, #tpu.memory_space<vmem>>, vector<8x1xf32>
    %70 = vector.broadcast %69 : vector<8x1xf32> to vector<8x60xf32>
    %71 = arith.addf %68, %70 : vector<8x60xf32>
    %cst_90 = arith.constant 0.000000e+00 : f32
    %72 = vector.broadcast %cst_90 : f32 to vector<8x60xf32>
    %73 = arith.maximumf %71, %72 : vector<8x60xf32>
    %c0_91 = arith.constant 0 : index
    %c0_92 = arith.constant 0 : index
    %74 = vector.load %arg24[%c0_91, %c0_92] : memref<8x128xf32, #tpu.memory_space<vmem>>, vector<8x60xf32>
    tpu.vector_store %arg24[%c0_91, %c0_92], %73 {strides = array<i32>} : memref<8x128xf32, #tpu.memory_space<vmem>>, vector<8x60xf32>,
    %c0_93 = arith.constant 0 : index
    %c0_94 = arith.constant 0 : index
    %75 = vector.load %arg24[%c0_93, %c0_94] : memref<8x128xf32, #tpu.memory_space<vmem>>, vector<8x60xf32>
    %c0_95 = arith.constant 0 : index
    %c0_96 = arith.constant 0 : index
    %76 = vector.load %arg25[%c0_95, %c0_96] : memref<72x60xf32, #tpu.memory_space<vmem>>, vector<8x60xf32>
    tpu.vector_store %arg25[%c0_95, %c0_96], %75 {strides = array<i32>} : memref<72x60xf32, #tpu.memory_space<vmem>>, vector<8x60xf32>,
    %c0_97 = arith.constant 0 : index
    %c1_98 = arith.constant 1 : index
    %77 = vector.load %arg24[%c0_97, %c1_98] : memref<8x128xf32, #tpu.memory_space<vmem>>, vector<8x60xf32>
    %c8_99 = arith.constant 8 : index
    %c0_100 = arith.constant 0 : index
    %78 = vector.load %arg25[%c8_99, %c0_100] : memref<72x60xf32, #tpu.memory_space<vmem>>, vector<8x60xf32>
    tpu.vector_store %arg25[%c8_99, %c0_100], %77 {strides = array<i32>} : memref<72x60xf32, #tpu.memory_space<vmem>>, vector<8x60xf32>,
    %c0_101 = arith.constant 0 : index
    %c2_102 = arith.constant 2 : index
    %79 = vector.load %arg24[%c0_101, %c2_102] : memref<8x128xf32, #tpu.memory_space<vmem>>, vector<8x60xf32>
    %c16_103 = arith.constant 16 : index
    %c0_104 = arith.constant 0 : index
    %80 = vector.load %arg25[%c16_103, %c0_104] : memref<72x60xf32, #tpu.memory_space<vmem>>, vector<8x60xf32>
    tpu.vector_store %arg25[%c16_103, %c0_104], %79 {strides = array<i32>} : memref<72x60xf32, #tpu.memory_space<vmem>>, vector<8x60xf32>,
    %c0_105 = arith.constant 0 : index
    %c10_106 = arith.constant 10 : index
    %81 = vector.load %arg24[%c0_105, %c10_106] : memref<8x128xf32, #tpu.memory_space<vmem>>, vector<8x60xf32>
    %c24_107 = arith.constant 24 : index
    %c0_108 = arith.constant 0 : index
    %82 = vector.load %arg25[%c24_107, %c0_108] : memref<72x60xf32, #tpu.memory_space<vmem>>, vector<8x60xf32>
    tpu.vector_store %arg25[%c24_107, %c0_108], %81 {strides = array<i32>} : memref<72x60xf32, #tpu.memory_space<vmem>>, vector<8x60xf32>,
    %c0_109 = arith.constant 0 : index
    %c11_110 = arith.constant 11 : index
    %83 = vector.load %arg24[%c0_109, %c11_110] : memref<8x128xf32, #tpu.memory_space<vmem>>, vector<8x60xf32>
    %c32_111 = arith.constant 32 : index
    %c0_112 = arith.constant 0 : index
    %84 = vector.load %arg25[%c32_111, %c0_112] : memref<72x60xf32, #tpu.memory_space<vmem>>, vector<8x60xf32>
    tpu.vector_store %arg25[%c32_111, %c0_112], %83 {strides = array<i32>} : memref<72x60xf32, #tpu.memory_space<vmem>>, vector<8x60xf32>,
    %c0_113 = arith.constant 0 : index
    %c12_114 = arith.constant 12 : index
    %85 = vector.load %arg24[%c0_113, %c12_114] : memref<8x128xf32, #tpu.memory_space<vmem>>, vector<8x60xf32>
    %c40_115 = arith.constant 40 : index
    %c0_116 = arith.constant 0 : index
    %86 = vector.load %arg25[%c40_115, %c0_116] : memref<72x60xf32, #tpu.memory_space<vmem>>, vector<8x60xf32>
    tpu.vector_store %arg25[%c40_115, %c0_116], %85 {strides = array<i32>} : memref<72x60xf32, #tpu.memory_space<vmem>>, vector<8x60xf32>,
    %c0_117 = arith.constant 0 : index
    %c20_118 = arith.constant 20 : index
    %87 = vector.load %arg24[%c0_117, %c20_118] : memref<8x128xf32, #tpu.memory_space<vmem>>, vector<8x60xf32>
    %c48_119 = arith.constant 48 : index
    %c0_120 = arith.constant 0 : index
    %88 = vector.load %arg25[%c48_119, %c0_120] : memref<72x60xf32, #tpu.memory_space<vmem>>, vector<8x60xf32>
    tpu.vector_store %arg25[%c48_119, %c0_120], %87 {strides = array<i32>} : memref<72x60xf32, #tpu.memory_space<vmem>>, vector<8x60xf32>,
    %c0_121 = arith.constant 0 : index
    %c21_122 = arith.constant 21 : index
    %89 = vector.load %arg24[%c0_121, %c21_122] : memref<8x128xf32, #tpu.memory_space<vmem>>, vector<8x60xf32>
    %c56_123 = arith.constant 56 : index
    %c0_124 = arith.constant 0 : index
    %90 = vector.load %arg25[%c56_123, %c0_124] : memref<72x60xf32, #tpu.memory_space<vmem>>, vector<8x60xf32>
    tpu.vector_store %arg25[%c56_123, %c0_124], %89 {strides = array<i32>} : memref<72x60xf32, #tpu.memory_space<vmem>>, vector<8x60xf32>,
    %c0_125 = arith.constant 0 : index
    %c22_126 = arith.constant 22 : index
    %91 = vector.load %arg24[%c0_125, %c22_126] : memref<8x128xf32, #tpu.memory_space<vmem>>, vector<8x60xf32>
    %c64_127 = arith.constant 64 : index
    %c0_128 = arith.constant 0 : index
    %92 = vector.load %arg25[%c64_127, %c0_128] : memref<72x60xf32, #tpu.memory_space<vmem>>, vector<8x60xf32>
    tpu.vector_store %arg25[%c64_127, %c0_128], %91 {strides = array<i32>} : memref<72x60xf32, #tpu.memory_space<vmem>>, vector<8x60xf32>,
    %c0_129 = arith.constant 0 : index
    %c0_130 = arith.constant 0 : index
    %93 = vector.load %arg10[%c0_129, %c0_130] : memref<16x72xbf16, #tpu.memory_space<vmem>>, vector<16x72xbf16>
    %c0_131 = arith.constant 0 : index
    %c0_132 = arith.constant 0 : index
    %94 = vector.load %arg25[%c0_131, %c0_132] : memref<72x60xf32, #tpu.memory_space<vmem>>, vector<72x60xf32>
    %95 = arith.truncf %94 : vector<72x60xf32> to vector<72x60xbf16>
    %cst_133 = arith.constant dense<0.000000e+00> : vector<16x60xf32>
    %96 = tpu.matmul %93, %95, %cst_133 {dimension_numbers = #tpu.dot_dimension_numbers<[1], [0], [0], [1], [0, 0, 1, 1], [], []>} : vector<16x72xbf16>, vector<72x60xbf16>, vector<16x60xf32> -> vector<16x60xf32>
    %c0_134 = arith.constant 0 : index
    %c0_135 = arith.constant 0 : index
    %97 = vector.load %arg11[%c0_134, %c0_135] : memref<16x1xf32, #tpu.memory_space<vmem>>, vector<16x1xf32>
    %98 = vector.broadcast %97 : vector<16x1xf32> to vector<16x60xf32>
    %99 = arith.addf %96, %98 : vector<16x60xf32>
    %cst_136 = arith.constant 0.000000e+00 : f32
    %100 = vector.broadcast %cst_136 : f32 to vector<16x60xf32>
    %101 = arith.maximumf %99, %100 : vector<16x60xf32>
    %102 = vector.extract_strided_slice %101 {offsets = [0, 0], sizes = [1, 60], strides = [1, 1]} : vector<16x60xf32> to vector<1x60xf32>
    %c0_137 = arith.constant 0 : index
    %c0_138 = arith.constant 0 : index
    %103 = vector.load %arg26[%c0_137, %c0_138] : memref<1x960xf32, #tpu.memory_space<vmem>>, vector<1x60xf32>
    tpu.vector_store %arg26[%c0_137, %c0_138], %102 {strides = array<i32>} : memref<1x960xf32, #tpu.memory_space<vmem>>, vector<1x60xf32>,
    %104 = vector.extract_strided_slice %101 {offsets = [1, 0], sizes = [1, 60], strides = [1, 1]} : vector<16x60xf32> to vector<1x60xf32>
    %c0_139 = arith.constant 0 : index
    %c60 = arith.constant 60 : index
    %105 = vector.load %arg26[%c0_139, %c60] : memref<1x960xf32, #tpu.memory_space<vmem>>, vector<1x60xf32>
    tpu.vector_store %arg26[%c0_139, %c60], %104 {strides = array<i32>} : memref<1x960xf32, #tpu.memory_space<vmem>>, vector<1x60xf32>,
    %106 = vector.extract_strided_slice %101 {offsets = [2, 0], sizes = [1, 60], strides = [1, 1]} : vector<16x60xf32> to vector<1x60xf32>
    %c0_140 = arith.constant 0 : index
    %c120 = arith.constant 120 : index
    %107 = vector.load %arg26[%c0_140, %c120] : memref<1x960xf32, #tpu.memory_space<vmem>>, vector<1x60xf32>
    tpu.vector_store %arg26[%c0_140, %c120], %106 {strides = array<i32>} : memref<1x960xf32, #tpu.memory_space<vmem>>, vector<1x60xf32>,
    %108 = vector.extract_strided_slice %101 {offsets = [3, 0], sizes = [1, 60], strides = [1, 1]} : vector<16x60xf32> to vector<1x60xf32>
    %c0_141 = arith.constant 0 : index
    %c180 = arith.constant 180 : index
    %109 = vector.load %arg26[%c0_141, %c180] : memref<1x960xf32, #tpu.memory_space<vmem>>, vector<1x60xf32>
    tpu.vector_store %arg26[%c0_141, %c180], %108 {strides = array<i32>} : memref<1x960xf32, #tpu.memory_space<vmem>>, vector<1x60xf32>,
    %110 = vector.extract_strided_slice %101 {offsets = [4, 0], sizes = [1, 60], strides = [1, 1]} : vector<16x60xf32> to vector<1x60xf32>
    %c0_142 = arith.constant 0 : index
    %c240 = arith.constant 240 : index
    %111 = vector.load %arg26[%c0_142, %c240] : memref<1x960xf32, #tpu.memory_space<vmem>>, vector<1x60xf32>
    tpu.vector_store %arg26[%c0_142, %c240], %110 {strides = array<i32>} : memref<1x960xf32, #tpu.memory_space<vmem>>, vector<1x60xf32>,
    %112 = vector.extract_strided_slice %101 {offsets = [5, 0], sizes = [1, 60], strides = [1, 1]} : vector<16x60xf32> to vector<1x60xf32>
    %c0_143 = arith.constant 0 : index
    %c300 = arith.constant 300 : index
    %113 = vector.load %arg26[%c0_143, %c300] : memref<1x960xf32, #tpu.memory_space<vmem>>, vector<1x60xf32>
    tpu.vector_store %arg26[%c0_143, %c300], %112 {strides = array<i32>} : memref<1x960xf32, #tpu.memory_space<vmem>>, vector<1x60xf32>,
    %114 = vector.extract_strided_slice %101 {offsets = [6, 0], sizes = [1, 60], strides = [1, 1]} : vector<16x60xf32> to vector<1x60xf32>
    %c0_144 = arith.constant 0 : index
    %c360 = arith.constant 360 : index
    %115 = vector.load %arg26[%c0_144, %c360] : memref<1x960xf32, #tpu.memory_space<vmem>>, vector<1x60xf32>
    tpu.vector_store %arg26[%c0_144, %c360], %114 {strides = array<i32>} : memref<1x960xf32, #tpu.memory_space<vmem>>, vector<1x60xf32>,
    %116 = vector.extract_strided_slice %101 {offsets = [7, 0], sizes = [1, 60], strides = [1, 1]} : vector<16x60xf32> to vector<1x60xf32>
    %c0_145 = arith.constant 0 : index
    %c420 = arith.constant 420 : index
    %117 = vector.load %arg26[%c0_145, %c420] : memref<1x960xf32, #tpu.memory_space<vmem>>, vector<1x60xf32>
    tpu.vector_store %arg26[%c0_145, %c420], %116 {strides = array<i32>} : memref<1x960xf32, #tpu.memory_space<vmem>>, vector<1x60xf32>,
    %118 = vector.extract_strided_slice %101 {offsets = [8, 0], sizes = [1, 60], strides = [1, 1]} : vector<16x60xf32> to vector<1x60xf32>
    %c0_146 = arith.constant 0 : index
    %c480 = arith.constant 480 : index
    %119 = vector.load %arg26[%c0_146, %c480] : memref<1x960xf32, #tpu.memory_space<vmem>>, vector<1x60xf32>
    tpu.vector_store %arg26[%c0_146, %c480], %118 {strides = array<i32>} : memref<1x960xf32, #tpu.memory_space<vmem>>, vector<1x60xf32>,
    %120 = vector.extract_strided_slice %101 {offsets = [9, 0], sizes = [1, 60], strides = [1, 1]} : vector<16x60xf32> to vector<1x60xf32>
    %c0_147 = arith.constant 0 : index
    %c540 = arith.constant 540 : index
    %121 = vector.load %arg26[%c0_147, %c540] : memref<1x960xf32, #tpu.memory_space<vmem>>, vector<1x60xf32>
    tpu.vector_store %arg26[%c0_147, %c540], %120 {strides = array<i32>} : memref<1x960xf32, #tpu.memory_space<vmem>>, vector<1x60xf32>,
    %122 = vector.extract_strided_slice %101 {offsets = [10, 0], sizes = [1, 60], strides = [1, 1]} : vector<16x60xf32> to vector<1x60xf32>
    %c0_148 = arith.constant 0 : index
    %c600 = arith.constant 600 : index
    %123 = vector.load %arg26[%c0_148, %c600] : memref<1x960xf32, #tpu.memory_space<vmem>>, vector<1x60xf32>
    tpu.vector_store %arg26[%c0_148, %c600], %122 {strides = array<i32>} : memref<1x960xf32, #tpu.memory_space<vmem>>, vector<1x60xf32>,
    %124 = vector.extract_strided_slice %101 {offsets = [11, 0], sizes = [1, 60], strides = [1, 1]} : vector<16x60xf32> to vector<1x60xf32>
    %c0_149 = arith.constant 0 : index
    %c660 = arith.constant 660 : index
    %125 = vector.load %arg26[%c0_149, %c660] : memref<1x960xf32, #tpu.memory_space<vmem>>, vector<1x60xf32>
    tpu.vector_store %arg26[%c0_149, %c660], %124 {strides = array<i32>} : memref<1x960xf32, #tpu.memory_space<vmem>>, vector<1x60xf32>,
    %126 = vector.extract_strided_slice %101 {offsets = [12, 0], sizes = [1, 60], strides = [1, 1]} : vector<16x60xf32> to vector<1x60xf32>
    %c0_150 = arith.constant 0 : index
    %c720 = arith.constant 720 : index
    %127 = vector.load %arg26[%c0_150, %c720] : memref<1x960xf32, #tpu.memory_space<vmem>>, vector<1x60xf32>
    tpu.vector_store %arg26[%c0_150, %c720], %126 {strides = array<i32>} : memref<1x960xf32, #tpu.memory_space<vmem>>, vector<1x60xf32>,
    %128 = vector.extract_strided_slice %101 {offsets = [13, 0], sizes = [1, 60], strides = [1, 1]} : vector<16x60xf32> to vector<1x60xf32>
    %c0_151 = arith.constant 0 : index
    %c780 = arith.constant 780 : index
    %129 = vector.load %arg26[%c0_151, %c780] : memref<1x960xf32, #tpu.memory_space<vmem>>, vector<1x60xf32>
    tpu.vector_store %arg26[%c0_151, %c780], %128 {strides = array<i32>} : memref<1x960xf32, #tpu.memory_space<vmem>>, vector<1x60xf32>,
    %130 = vector.extract_strided_slice %101 {offsets = [14, 0], sizes = [1, 60], strides = [1, 1]} : vector<16x60xf32> to vector<1x60xf32>
    %c0_152 = arith.constant 0 : index
    %c840 = arith.constant 840 : index
    %131 = vector.load %arg26[%c0_152, %c840] : memref<1x960xf32, #tpu.memory_space<vmem>>, vector<1x60xf32>
    tpu.vector_store %arg26[%c0_152, %c840], %130 {strides = array<i32>} : memref<1x960xf32, #tpu.memory_space<vmem>>, vector<1x60xf32>,
    %132 = vector.extract_strided_slice %101 {offsets = [15, 0], sizes = [1, 60], strides = [1, 1]} : vector<16x60xf32> to vector<1x60xf32>
    %c0_153 = arith.constant 0 : index
    %c900 = arith.constant 900 : index
    %133 = vector.load %arg26[%c0_153, %c900] : memref<1x960xf32, #tpu.memory_space<vmem>>, vector<1x60xf32>
    tpu.vector_store %arg26[%c0_153, %c900], %132 {strides = array<i32>} : memref<1x960xf32, #tpu.memory_space<vmem>>, vector<1x60xf32>,
    %c0_154 = arith.constant 0 : index
    %c0_155 = arith.constant 0 : index
    %c0_156 = arith.constant 0 : index
    %134 = vector.load %arg2[%c0_154, %c0_155, %c0_156] : memref<1x1x4904xbf16, #tpu.memory_space<vmem>>, vector<1x1x4904xbf16>
    %135 = vector.shape_cast %134 : vector<1x1x4904xbf16> to vector<1x4904xbf16>
    %c0_157 = arith.constant 0 : index
    %c0_158 = arith.constant 0 : index
    %136 = vector.load %arg26[%c0_157, %c0_158] : memref<1x960xf32, #tpu.memory_space<vmem>>, vector<1x960xf32>
    %c0_159 = arith.constant 0 : index
    %c0_160 = arith.constant 0 : index
    %137 = vector.load %arg12[%c0_159, %c0_160] : memref<960x192xbf16, #tpu.memory_space<vmem>>, vector<960x192xbf16>
    %138 = arith.truncf %136 : vector<1x960xf32> to vector<1x960xbf16>
    %cst_161 = arith.constant dense<0.000000e+00> : vector<1x192xf32>
    %139 = tpu.matmul %138, %137, %cst_161 {dimension_numbers = #tpu.dot_dimension_numbers<[1], [0], [0], [1], [0, 0, 1, 1], [], []>} : vector<1x960xbf16>, vector<960x192xbf16>, vector<1x192xf32> -> vector<1x192xf32>
    %c0_162 = arith.constant 0 : index
    %c0_163 = arith.constant 0 : index
    %140 = vector.load %arg13[%c0_162, %c0_163] : memref<4904x192xbf16, #tpu.memory_space<vmem>>, vector<4904x192xbf16>
    %cst_164 = arith.constant dense<0.000000e+00> : vector<1x192xf32>
    %141 = tpu.matmul %135, %140, %cst_164 {dimension_numbers = #tpu.dot_dimension_numbers<[1], [0], [0], [1], [0, 0, 1, 1], [], []>} : vector<1x4904xbf16>, vector<4904x192xbf16>, vector<1x192xf32> -> vector<1x192xf32>
    %142 = arith.addf %139, %141 : vector<1x192xf32>
    %c0_165 = arith.constant 0 : index
    %c0_166 = arith.constant 0 : index
    %143 = vector.load %arg14[%c0_165, %c0_166] : memref<1x192xf32, #tpu.memory_space<vmem>>, vector<1x192xf32>
    %144 = arith.addf %142, %143 : vector<1x192xf32>
    %c0_167 = arith.constant 0 : index
    %c0_168 = arith.constant 0 : index
    %145 = vector.load %arg15[%c0_167, %c0_168] : memref<192x128xbf16, #tpu.memory_space<vmem>>, vector<192x128xbf16>
    %146 = arith.truncf %144 : vector<1x192xf32> to vector<1x192xbf16>
    %cst_169 = arith.constant dense<0.000000e+00> : vector<1x128xf32>
    %147 = tpu.matmul %146, %145, %cst_169 {dimension_numbers = #tpu.dot_dimension_numbers<[1], [0], [0], [1], [0, 0, 1, 1], [], []>} : vector<1x192xbf16>, vector<192x128xbf16>, vector<1x128xf32> -> vector<1x128xf32>
    %c0_170 = arith.constant 0 : index
    %c0_171 = arith.constant 0 : index
    %148 = vector.load %arg16[%c0_170, %c0_171] : memref<1x128xf32, #tpu.memory_space<vmem>>, vector<1x128xf32>
    %149 = arith.addf %147, %148 : vector<1x128xf32>
    %cst_172 = arith.constant 0.000000e+00 : f32
    %150 = vector.broadcast %cst_172 : f32 to vector<1x128xf32>
    %151 = arith.maximumf %149, %150 : vector<1x128xf32>
    %c0_173 = arith.constant 0 : index
    %c0_174 = arith.constant 0 : index
    %152 = vector.load %arg17[%c0_173, %c0_174] : memref<128x9xbf16, #tpu.memory_space<vmem>>, vector<128x9xbf16>
    %153 = arith.truncf %151 : vector<1x128xf32> to vector<1x128xbf16>
    %cst_175 = arith.constant dense<0.000000e+00> : vector<1x9xf32>
    %154 = tpu.matmul %153, %152, %cst_175 {dimension_numbers = #tpu.dot_dimension_numbers<[1], [0], [0], [1], [0, 0, 1, 1], [], []>} : vector<1x128xbf16>, vector<128x9xbf16>, vector<1x9xf32> -> vector<1x9xf32>
    %c0_176 = arith.constant 0 : index
    %c0_177 = arith.constant 0 : index
    %155 = vector.load %arg18[%c0_176, %c0_177] : memref<1x9xf32, #tpu.memory_space<vmem>>, vector<1x9xf32>
    %156 = arith.addf %154, %155 : vector<1x9xf32>
    %157 = vector.extract_strided_slice %156 {offsets = [0, 0], sizes = [1, 1], strides = [1, 1]} : vector<1x9xf32> to vector<1x1xf32>
    %158 = vector.extract_strided_slice %156 {offsets = [0, 1], sizes = [1, 8], strides = [1, 1]} : vector<1x9xf32> to vector<1x8xf32>
    %159 = vector.broadcast %157 : vector<1x1xf32> to vector<1x8xf32>
    %160 = arith.addf %159, %158 : vector<1x8xf32>
    %cst_178 = arith.constant dense<0.000000e+00> : vector<1xf32>
    %161 = vector.multi_reduction <add>, %158, %cst_178 [1] : vector<1x8xf32> to vector<1xf32>
    %162 = vector.shape_cast %161 : vector<1xf32> to vector<1x1xf32>
    %cst_179 = arith.constant 8.000000e+00 : f32
    %163 = vector.broadcast %cst_179 : f32 to vector<1x1xf32>
    %164 = arith.divf %162, %163 : vector<1x1xf32>
    %165 = vector.broadcast %164 : vector<1x1xf32> to vector<1x8xf32>
    %166 = arith.subf %160, %165 : vector<1x8xf32>
    %c0_180 = arith.constant 0 : index
    %c0_181 = arith.constant 0 : index
    %c0_182 = arith.constant 0 : index
    %167 = vector.load %arg19[%c0_180, %c0_181, %c0_182] : memref<1x1x8xf32, #tpu.memory_space<vmem>>, vector<1x1x8xf32>
    %168 = vector.shape_cast %167 : vector<1x1x8xf32> to vector<1x8xf32>
    %169 = vector.shape_cast %166 : vector<1x8xf32> to vector<1x1x8xf32>
    tpu.vector_store %arg19[%c0_180, %c0_181, %c0_182], %169 {strides = array<i32>} : memref<1x1x8xf32, #tpu.memory_space<vmem>>, vector<1x1x8xf32>,
    return
  }
  func.func @transform_0(%arg0: i32) -> (i32, i32, i32) {
    %c0_i32 = arith.constant 0 : i32
    %c0_i32_0 = arith.constant 0 : i32
    %c0_i32_1 = arith.constant 0 : i32
    return %arg0, %c0_i32, %c0_i32_0 : i32, i32, i32
  }
  func.func @transform_1(%arg0: i32) -> (i32, i32, i32) {
    %c0_i32 = arith.constant 0 : i32
    %c0_i32_0 = arith.constant 0 : i32
    %c0_i32_1 = arith.constant 0 : i32
    return %arg0, %c0_i32, %c0_i32_0 : i32, i32, i32
  }
  func.func @transform_2(%arg0: i32) -> (i32, i32) {
    %c0_i32 = arith.constant 0 : i32
    %c0_i32_0 = arith.constant 0 : i32
    %c0_i32_1 = arith.constant 0 : i32
    return %c0_i32, %c0_i32_0 : i32, i32
  }
  func.func @transform_3(%arg0: i32) -> (i32, i32) {
    %c0_i32 = arith.constant 0 : i32
    %c0_i32_0 = arith.constant 0 : i32
    %c0_i32_1 = arith.constant 0 : i32
    return %c0_i32, %c0_i32_0 : i32, i32
  }
  func.func @transform_4(%arg0: i32) -> (i32, i32) {
    %c0_i32 = arith.constant 0 : i32
    %c0_i32_0 = arith.constant 0 : i32
    %c0_i32_1 = arith.constant 0 : i32
    return %c0_i32, %c0_i32_0 : i32, i32
  }
  func.func @transform_5(%arg0: i32) -> (i32, i32) {
    %c0_i32 = arith.constant 0 : i32
    %c0_i32_0 = arith.constant 0 : i32
    %c0_i32_1 = arith.constant 0 : i32
    return %c0_i32, %c0_i32_0 : i32, i32
  }
  func.func @transform_6(%arg0: i32) -> (i32, i32) {
    %c0_i32 = arith.constant 0 : i32
    %c0_i32_0 = arith.constant 0 : i32
    %c0_i32_1 = arith.constant 0 : i32
    return %c0_i32, %c0_i32_0 : i32, i32
  }
  func.func @transform_7(%arg0: i32) -> (i32, i32) {
    %c0_i32 = arith.constant 0 : i32
    %c0_i32_0 = arith.constant 0 : i32
    %c0_i32_1 = arith.constant 0 : i32
    return %c0_i32, %c0_i32_0 : i32, i32
  }
  func.func @transform_8(%arg0: i32) -> (i32, i32) {
    %c0_i32 = arith.constant 0 : i32
    %c0_i32_0 = arith.constant 0 : i32
    %c0_i32_1 = arith.constant 0 : i32
    return %c0_i32, %c0_i32_0 : i32, i32
  }
  func.func @transform_9(%arg0: i32) -> (i32, i32) {
    %c0_i32 = arith.constant 0 : i32
    %c0_i32_0 = arith.constant 0 : i32
    %c0_i32_1 = arith.constant 0 : i32
    return %c0_i32, %c0_i32_0 : i32, i32
  }
  func.func @transform_10(%arg0: i32) -> (i32, i32) {
    %c0_i32 = arith.constant 0 : i32
    %c0_i32_0 = arith.constant 0 : i32
    %c0_i32_1 = arith.constant 0 : i32
    return %c0_i32, %c0_i32_0 : i32, i32
  }
  func.func @transform_11(%arg0: i32) -> (i32, i32) {
    %c0_i32 = arith.constant 0 : i32
    %c0_i32_0 = arith.constant 0 : i32
    %c0_i32_1 = arith.constant 0 : i32
    return %c0_i32, %c0_i32_0 : i32, i32
  }
  func.func @transform_12(%arg0: i32) -> (i32, i32) {
    %c0_i32 = arith.constant 0 : i32
    %c0_i32_0 = arith.constant 0 : i32
    %c0_i32_1 = arith.constant 0 : i32
    return %c0_i32, %c0_i32_0 : i32, i32
  }
  func.func @transform_13(%arg0: i32) -> (i32, i32) {
    %c0_i32 = arith.constant 0 : i32
    %c0_i32_0 = arith.constant 0 : i32
    %c0_i32_1 = arith.constant 0 : i32
    return %c0_i32, %c0_i32_0 : i32, i32
  }
  func.func @transform_14(%arg0: i32) -> (i32, i32) {
    %c0_i32 = arith.constant 0 : i32
    %c0_i32_0 = arith.constant 0 : i32
    %c0_i32_1 = arith.constant 0 : i32
    return %c0_i32, %c0_i32_0 : i32, i32
  }
  func.func @transform_15(%arg0: i32) -> (i32, i32) {
    %c0_i32 = arith.constant 0 : i32
    %c0_i32_0 = arith.constant 0 : i32
    %c0_i32_1 = arith.constant 0 : i32
    return %c0_i32, %c0_i32_0 : i32, i32
  }
  func.func @transform_16(%arg0: i32) -> (i32, i32) {
    %c0_i32 = arith.constant 0 : i32
    %c0_i32_0 = arith.constant 0 : i32
    %c0_i32_1 = arith.constant 0 : i32
    return %c0_i32, %c0_i32_0 : i32, i32
  }
  func.func @transform_17(%arg0: i32) -> (i32, i32) {
    %c0_i32 = arith.constant 0 : i32
    %c0_i32_0 = arith.constant 0 : i32
    %c0_i32_1 = arith.constant 0 : i32
    return %c0_i32, %c0_i32_0 : i32, i32
  }
  func.func @transform_18(%arg0: i32) -> (i32, i32, i32) {
    %c0_i32 = arith.constant 0 : i32
    %c0_i32_0 = arith.constant 0 : i32
    %c0_i32_1 = arith.constant 0 : i32
    return %arg0, %c0_i32, %c0_i32_0 : i32, i32, i32
  }
}

</mosaic_0001>

<bundles_post_ra>
// kernel: duel_qnet_forward.1
= control target key start
LH: loop header
LB: loop body
LE: loop exit
PB: predicated region body
PF: predicated region fallthrough
CT: control target
= control target key end

     0   :  { %s17127_s0 = inlined_call_operand.vmem [shape: bf16[2,9,308], index: 0, kind: input, shape index: {}]   ;;  %s17128_s1 = inlined_call_operand.vmem [shape: bf16[2,1,4904], index: 1, kind: input, shape index: {}]   ;;  %s17129_s2 = inlined_call_operand.vmem [shape: bf16[8,9], index: 2, kind: input, shape index: {}]   ;;  %s17130_s3 = inlined_call_operand.vmem [shape: f32[8,1], index: 3, kind: input, shape index: {}]   ;;  %s17131_s4 = inlined_call_operand.vmem [shape: bf16[8,72], index: 4, kind: input, shape index: {}]   ;;  %s17132_s5 = inlined_call_operand.vmem [shape: f32[8,1], index: 5, kind: input, shape index: {}]   ;;  %s17133_s6 = inlined_call_operand.vmem [shape: bf16[308,60], index: 6, kind: input, shape index: {}]   ;;  %s17134_s7 = inlined_call_operand.vmem [shape: bf16[8,72], index: 7, kind: input, shape index: {}]   ;;  %s17135_s8 = inlined_call_operand.vmem [shape: f32[8,1], index: 8, kind: input, shape index: {}]   ;;  %s17136_s9 = inlined_call_operand.vmem [shape: bf16[16,72], index: 9, kind: input, shape index: {}]   ;;  %s17137_s10 = inlined_call_operand.vmem [shape: f32[16,1], index: 10, kind: input, shape index: {}]   ;;  %s17138_s11 = inlined_call_operand.vmem [shape: bf16[960,192], index: 11, kind: input, shape index: {}]   ;;  %s17139_s12 = inlined_call_operand.vmem [shape: bf16[4904,192], index: 12, kind: input, shape index: {}]   ;;  %s17140_s13 = inlined_call_operand.vmem [shape: f32[1,192], index: 13, kind: input, shape index: {}]   ;;  %s17141_s14 = inlined_call_operand.vmem [shape: bf16[192,128], index: 14, kind: input, shape index: {}]   ;;  %s17142_s15 = inlined_call_operand.vmem [shape: f32[1,128], index: 15, kind: input, shape index: {}]   ;;  %s17143_s16 = inlined_call_operand.vmem [shape: bf16[128,9], index: 16, kind: input, shape index: {}]   ;;  %s17144_s17 = inlined_call_operand.vmem [shape: f32[1,9], index: 17, kind: input, shape index: {}]   ;;  %s17145_s18 = inlined_call_operand.hbm [shape: f32[2,1,8], index: 18, kind: output, shape index: {}]  }
   0x1   :  { %17156 = sst [smem:[#allocation15_spill]] %s17127_s0 }
   0x2   :  { %17157 = sst [smem:[#allocation16_spill]] %s17128_s1 }
   0x3   :  { %17158 = sst [smem:[#allocation17_spill]] %s17129_s2 }
   0x4   :  { %17159 = sst [smem:[#allocation18_spill]] %s17130_s3 }
   0x5   :  { %17160 = sst [smem:[#allocation19_spill]] %s17131_s4 }
   0x6   :  { %17161 = sst [smem:[#allocation20_spill]] %s17132_s5 }
   0x7   :  { %17162 = sst [smem:[#allocation21_spill]] %s17133_s6 }
   0x8   :  { %17163 = sst [smem:[#allocation22_spill]] %s17134_s7 }
   0x9   :  { %23 = vsyncpa [#allocation10], 0 }
   0xa   :  { %25 = vsyncpa [#allocation10 + $0x1], 0  ;;  %s11781_s27 = smov 0   ;;  %s11783_s28 = smov 0  }
   0xb   :  { %s11785_s29 = smov 0   ;;  %s11787_s30 = smov 0  }
   0xc LB: > { %17164 = sst [smem:[#allocation12_spill]] %s11649_s29  ;;  %s11802_s0 = sadd.s32 4294967295, %s11653_s30   ;;  %s11653_s30 = sphi %s11787_s30, %s17241_s30   ;;  %s11649_s29 = sphi %s11785_s29, %s17243_s29   ;;  %s11645_s28 = sphi %s11783_s28, %s17245_s28   ;;  %s11641_s27 = sphi %s11781_s27, %s17244_s27  }
   0xd   : > { %s7610_s19 = sadd.s32 4294967294, %s11653_s30   ;;  %s11806_s1 = sadd.s32 1, %s11653_s30  }
   0xe   : > { %17165 = sst [smem:[#allocation13_spill]] %s11806_s1  ;;  %s426_s20 = sadd.s32 1, %s11649_s29 }
   0xf   : > { %s423_s21 = ssub.s32 %s11653_s30, %s11806_s1  ;;  %p436_p0 = scmp.ne.s32.totalorder %s11649_s29, %s11645_s28 }
  0x10   : > { %p424_p1 = scmp.eq.s32.totalorder %s423_s21, 0  ;;  %p437_p2 = scmp.eq.s32.totalorder %s11802_s0, 1 }
  0x11   : > { %p442_p3 = scmp.ne.s32.totalorder %s11645_s28, %s11641_s27  ;;  %p443_p4 = scmp.eq.s32.totalorder %s7610_s19, 1 }
  0x12   : > { %s11817_s22 = scalar_select %p424_p1, %s11649_s29, %s426_s20  }
  0x13   : > { %p11819_p5 = por %p437_p2, %p436_p0  ;;  %p11823_p6 = por %p443_p4, %p442_p3 }
  0x14   : > { %17166 = sst [smem:[#allocation14_spill]] %s11817_s22  ;;  %p7613_p7 = scmp.ge.s32.totalorder %s11653_s30, 1 }
  0x15   : > { %p524_p8 = scmp.lt.s32.totalorder %s11653_s30, 3 }
  0x17   : > { %p525_p9 = pnand %p7613_p7, %p524_p8 }
  0x18   : > { %p581_p10 = scmp.lt.s32.totalorder (!%p525_p9), %s11802_s0, 1  ;;  %s17169_s3 = sld [smem:[#allocation18_spill]] (!%p525_p9) }
  0x19   : > { %528 = sbr.rel (%p525_p9) target bundleno = 2757 (0xac5), region = 92  ;;  %s17170_s22 = sld [smem:[#allocation15_spill]] (!%p525_p9) }
  0x1a   : > { %s17147_s20 = smov (!%p525_p9), 104   ;;  %s17150_s21 = smov (!%p525_p9), 126  }
  0x1b   : > { %s17152_s24 = smov (!%p525_p9), 106   ;;  %s17148_s25 = smov (!%p525_p9), 127  }
  0x1c   : > { %s17172_s4 = sld [smem:[#allocation19_spill]] (!%p525_p9)  ;;  %s11666_s1 = smov (!%p525_p9), 107  }
  0x1d   : > { %s17173_s6 = sld [smem:[#allocation21_spill]] (!%p525_p9) }
  0x1e   : > { %vm624_vm0 = vcmask 1043456   ;;  %v601_v0 = vld [vmem:[%s17169_s3] sm:$0xff]  ;;  %s11834_s26 = scalar_select %p581_p10, %s11802_s0, 1  ;;  %v11655_v1 = vmov 0   ;;  %vm625_vm1 = vcmask 1044480   ;;  %v11656_v2 = vmov 65535  }
  0x1f   : > { %11578 = vset.pattern.permute.xlu0 %v11655_v1  ;;  %11579 = vset.pattern.permute.xlu1 %v11655_v1  ;;  %v626_v3 = vsel %vm624_vm0, 4294967295, %v11656_v2  ;;  %s17171_s3 = sld [smem:[#allocation17_spill]]  ;;  %vm620_vm2 = vcmask 72704   ;;  %v11657_v18 = vmov 0.0   ;;  %vm681_vm3 = vcmask 424960  }
  0x20   : > { %604 = vperm.xlu0 %11578, %v601_v0   ;;  %11580 = vset.pattern.permute.xlu2 %v11655_v1  ;;  %s11506_s19 = smul.u32 24, %s11834_s26  ;;  %v627_v4 = vsel %vm625_vm1, %v626_v3, 0  ;;  %593 = vst [vmem:[#allocation2 + $0x10] sm:$0xff] %v11657_v18  ;;  %vm848_vm4 = vcmask 670720   ;;  %vm827_vm5 = vcmask 678912   ;;  %vm806_vm6 = vcmask 687104  }
  0x21   : > { %594 = vst [vmem:[#allocation4] sm:$0xff] %v11657_v18  ;;  %vm764_vm7 = vcmask 859136   ;;  %vm785_vm8 = vcmask 850944   ;;  %vm722_vm9 = vcmask 1031168   ;;  %vm743_vm10 = vcmask 867328   ;;  %s17174_s5 = sld [smem:[#allocation20_spill]] }
  0x22   : > { %s585_s29 = scalar_lea.vmem %s17170_s22, %s11506_s19  ;;  %595 = vst [vmem:[#allocation6] sm:$0xff] %v11657_v18  ;;  %s11660_s22 = smov 83   ;;  %vm701_vm11 = vcmask 1039360   ;;  %vm900_vm12 = vcmask 588800   ;;  %vm1120_vm13 = vcmask 1041408   ;;  %vm1164_vm14 = vcmask 490496  }
  0x23   : > { %v7617_v5 = vld [vmem:[%s585_s29] sm:$0xf]  ;;  %v10732_v6 = vld [vmem:[%s585_s29 + $0x8] sm:$0x10]  ;;  %v10731_v7 = vld [vmem:[%s585_s29 + $0x4] sm:$0xf] }
  0x24   : > { %v7618_v8 = vor.u32 %v10732_v6, %v7617_v5  ;;  %v7619_v9 = vld [vmem:[%s585_s29 + $0xc] sm:$0x10]  ;;  %v7625_v12 = vld [vmem:[%s585_s29 + $0x8] sm:$0xf]  ;;  %v10733_v13 = vld [vmem:[%s585_s29 + $0x10] sm:$0x10] }
  0x25   : > { %v7622_v11 = vor.u32 %v10731_v7, %v7619_v9  ;;  %v7626_v14 = vor.u32 %v10733_v13, %v7625_v12  ;;  %v600_v16 = vld [vmem:[%s17171_s3] sm:$0xf]  ;;  %s11658_s3 = smov 82   ;;  %s11659_s29 = smov 84   ;;  %v10741_v9 = vld [vmem:[%s17173_s6 + $0x38] sm:$0xff]  ;;  %v10740_v12 = vld [vmem:[%s17173_s6 + $0x30] sm:$0xff] }
  0x26   : > { %v629_v10 = vand.u32 %v7618_v8, %v627_v4  ;;  %s11661_s19 = smov 105   ;;  %v11914_v8 = vld [vmem:[%s17172_s4] sm:$0xf]  ;;  %s17175_s4 = smov 106  }
  0x27   : > { %v632_v15 = vand.u32 %v7622_v11, %v627_v4  ;;  %v635_v17 = vand.u32 %v7626_v14, %v627_v4  ;;  %v10748_v14 = vld [vmem:[%s17173_s6 + $0x70] sm:$0xff]  ;;  %s17178_s7 = sld [smem:[#allocation22_spill]] }
  0x28   : > { %644 = vmatpush.bf16.msra.mxu0 %v629_v10  ;;  %v10749_v10 = vld [vmem:[%s17173_s6 + $0x78] sm:$0xff] }
  0x29   : > { %657 = vmatpush.bf16.msra.mxu1 %v632_v15  ;;  %670 = vmatpush.bf16.msra.mxu2 %v635_v17 }
  0x2b   : > { %7627 = vmatmul.msk.bf16.vlgmr.msra.gmra.mxu0 %vm620_vm2, %v600_v16 }
  0x2c   : > { %7628 = vmatmul.msk.bf16.vlgmr.msra.gmra.mxu1 %vm620_vm2, %v600_v16  ;;  %7629 = vmatmul.msk.bf16.vlgmr.msra.gmra.mxu2 %vm620_vm2, %v600_v16 }
  0x2d   : > { %1124 = vmatpush.bf16.msrb.mxu2 %v10741_v9 }
  0x31   : > { %1125 = vmatpush.bf16.msrb.mxu2 %v10740_v12 }
  0x92   : > { %v605_v19 = vpop.permute.xlu0 %604 }
  0xa8   : > { %v646_v20 = vpop.f32.mrf.mxu0 }
  0xa9   : > { %v647_v21 = vadd.f32 %v646_v20, %v605_v19  ;;  %v659_v22 = vpop.f32.mrf.mxu1  ;;  %v10739_v20 = vld [vmem:[%s17173_s6 + $0x28] sm:$0xff] }
  0xaa   : > { %v660_v24 = vadd.f32 %v659_v22, %v605_v19  ;;  %v10747_v22 = vld [vmem:[%s17173_s6 + $0x68] sm:$0xff]  ;;  %1126 = vmatpush.bf16.msrb.mxu2 %v10739_v20 }
  0xab   : > { %v11844_v23 = vmax.f32 %v647_v21, 0.0 }
  0xac   : > { %v11846_v25 = vmax.f32 %v660_v24, 0.0  ;;  %v990_v24 = vld [vmem:[%s17173_s6 + $0x98] sm:$0x3] }
  0xad   : > { %842 = vrot.lane.b32.xlu0 %v11844_v23, %s11658_s3 }
  0xae   : > { %844 = vrot.lane.b32.xlu1 %v11846_v25, %s11658_s3  ;;  %802 = vrot.lane.b32.xlu2 %v11846_v25, %s11659_s29 }
  0xaf   : > { %v672_v27 = vpop.f32.mrf.mxu2 }
  0xb0   : > { %v648_v26 = vpop.f32.mrf.mxu0  ;;  %v673_v28 = vadd.f32 %v672_v27, %v605_v19 }
  0xb1   : > { %v661_v29 = vpop.f32.mrf.mxu1  ;;  %v10738_v26 = vld [vmem:[%s17173_s6 + $0x20] sm:$0xff] }
  0xb2   : > { %v678_v30 = vmax.f32 %v673_v28, 0.0  ;;  %v10746_v29 = vld [vmem:[%s17173_s6 + $0x60] sm:$0xff]  ;;  %1127 = vmatpush.bf16.msrb.mxu2 %v10738_v26 }
  0xb4   : > { %682 = vst.msk [vmem:[#allocation2 + $0x10] sm:$0xff] %vm681_vm3, %v678_v30  ;;  %v1077_v30 = vunpack.c.l.b16 %v990_v24 }
  0xb5   : > { %823 = vrot.lane.b32.xlu0 %v11846_v25, %s11660_s22 }
  0xb6   : > { %800 = vrot.lane.b32.xlu1 %v11844_v23, %s11659_s29  ;;  %821 = vrot.lane.b32.xlu2 %v11844_v23, %s11660_s22 }
  0xb7   : > { %v674_v31 = vpop.f32.mrf.mxu2 }
  0xbb   : > { %v817_v32 = vld [vmem:[#allocation2 + $0x10] sm:$0xff] }
  0xbc   : > { %688 = vst.msk [vmem:[#allocation3 + $0x10] sm:$0xff] %vm681_vm3, %v817_v32 }
  0xbd   : > { %760 = vrot.lane.b32.xlu0 %v11846_v25, %s11661_s19 }
  0xbe   : > { %779 = vrot.lane.b32.xlu1 %v11844_v23, %s17147_s20  ;;  %758 = vrot.lane.b32.xlu2 %v11844_v23, %s11661_s19 }
  0xc5   : > { %716 = vrot.lane.b32.xlu0 %v11844_v23, %s17150_s21 }
  0xc6   : > { %781 = vrot.lane.b32.xlu2 %v11846_v25, %s17147_s20  ;;  %718 = vrot.lane.b32.xlu1 %v11846_v25, %s17150_s21 }
  0xcd   : > { %739 = vrot.lane.b32.xlu0 %v11846_v25, %s17152_s24 }
  0xce   : > { %737 = vrot.lane.b32.xlu2 %v11844_v23, %s17152_s24  ;;  %697 = vrot.lane.b32.xlu1 %v11846_v25, %s17148_s25 }
  0xd5   : > { %695 = vrot.lane.b32.xlu0 %v11844_v23, %s17148_s25 }
  0xd6   : > { %825 = vrot.lane.b32.xlu2 %v817_v32, %s11660_s22  ;;  %846 = vrot.lane.b32.xlu1 %v817_v32, %s11658_s3  ;;  %s11670_s3 = smov 118  }
  0xdd   : > { %783 = vrot.lane.b32.xlu0 %v817_v32, %s17147_s20  ;;  %s11667_s20 = smov 108  }
  0xde   : > { %762 = vrot.lane.b32.xlu2 %v817_v32, %s11661_s19  ;;  %804 = vrot.lane.b32.xlu1 %v817_v32, %s11659_s29  ;;  %s17177_s29 = smov 127  }
  0xe5   : > { %699 = vrot.lane.b32.xlu0 %v817_v32, %s17148_s25  ;;  %s11669_s25 = smov 116  }
  0xe6   : > { %741 = vrot.lane.b32.xlu2 %v817_v32, %s17152_s24  ;;  %720 = vrot.lane.b32.xlu1 %v817_v32, %s17150_s21  ;;  %s11668_s21 = smov 117   ;;  %s17176_s24 = smov 126  }
 0x108   : > { %v11884_v33 = vpop.permute.xlu2 %802 }
 0x110   : > { %v822_v34 = vpop.permute.xlu2 %821 }
 0x118   : > { %v759_v35 = vpop.permute.xlu2 %758 }
 0x11f   : > { %v843_v36 = vpop.permute.xlu0 %842 }
 0x120   : > { %v845_v37 = vpop.permute.xlu1 %844  ;;  %v11886_v38 = vpop.permute.xlu2 %781 }
 0x121   : > { %v849_v39 = vsel %vm848_vm4, %v843_v36, %v845_v37 }
 0x122   : > { %v897_v40 = vpack.c.bf16 %v849_v39, %v849_v39 }
 0x124   : > { %v905_v41 = vsel %vm624_vm0, %v897_v40, 0  ;;  %v10745_v40 = vld [vmem:[%s17173_s6 + $0x58] sm:$0xff] }
 0x125   : > { %916 = vmatpush.bf16.msra.mxu3 %v905_v41  ;;  %v1097_v41 = vpack.c.b16 %v1077_v30, %v1077_v30 }
 0x127   : > { %v824_v42 = vpop.permute.xlu0 %823 }
 0x128   : > { %v828_v43 = vsel %vm827_vm5, %v822_v34, %v824_v42  ;;  %v801_v44 = vpop.permute.xlu1 %800  ;;  %v738_v45 = vpop.permute.xlu2 %737 }
 0x129   : > { %v807_v46 = vsel %vm806_vm6, %v801_v44, %v11884_v33  ;;  %v10736_v44 = vld [vmem:[%s17173_s6 + $0x10] sm:$0xff] }
 0x12a   : > { %v894_v47 = vpack.c.bf16 %v828_v43, %v807_v46  ;;  %v1122_v46 = vsel %vm1120_vm13, %v1097_v41, 0 }
 0x12c   : > { %917 = vmatpush.bf16.msra.mxu3 %v894_v47 }
 0x12f   : > { %v761_v48 = vpop.permute.xlu0 %760 }
 0x130   : > { %v765_v49 = vsel %vm764_vm7, %v759_v35, %v761_v48  ;;  %v780_v50 = vpop.permute.xlu1 %779  ;;  %v826_v51 = vpop.permute.xlu2 %825 }
 0x131   : > { %v786_v52 = vsel %vm785_vm8, %v780_v50, %v11886_v38  ;;  %v829_v53 = vsel %vm827_vm5, %v824_v42, %v826_v51  ;;  %835 = vst.msk [vmem:[#allocation3 + $0xb8] sm:$0xff] %vm681_vm3, %v826_v51  ;;  %v10735_v50 = vld [vmem:[%s17173_s6 + $0x8] sm:$0xff] }
 0x132   : > { %v891_v54 = vpack.c.bf16 %v786_v52, %v765_v49  ;;  %v860_v52 = vld [vmem:[#allocation3 + $0x10] sm:$0xff] }
 0x134   : > { %918 = vmatpush.bf16.msra.mxu3 %v891_v54  ;;  %v10744_v54 = vld [vmem:[%s17173_s6 + $0x50] sm:$0xff] }
 0x137   : > { %v717_v55 = vpop.permute.xlu0 %716 }
 0x138   : > { %v763_v56 = vpop.permute.xlu2 %762  ;;  %v11898_v57 = vpop.permute.xlu1 %718  ;;  %v881_v34 = vld [vmem:[#allocation3 + $0xb8] sm:$0xff] }
 0x139   : > { %v766_v58 = vsel %vm764_vm7, %v761_v48, %v763_v56  ;;  %772 = vst.msk [vmem:[#allocation3 + $0x70] sm:$0xff] %vm681_vm3, %v763_v56  ;;  %v723_v59 = vsel %vm722_vm9, %v717_v55, %v11898_v57  ;;  %v10752_v55 = vld [vmem:[%s17173_s6 + $0x90] sm:$0xff]  ;;  %v10743_v56 = vld [vmem:[%s17173_s6 + $0x48] sm:$0xff] }
 0x13f   : > { %v740_v60 = vpop.permute.xlu0 %739 }
 0x140   : > { %v744_v61 = vsel %vm743_vm10, %v738_v45, %v740_v60  ;;  %v742_v62 = vpop.permute.xlu2 %741  ;;  %v698_v63 = vpop.permute.xlu1 %697  ;;  %v872_v42 = vld [vmem:[#allocation3 + $0x70] sm:$0xff] }
 0x141   : > { %v888_v0 = vpack.c.bf16 %v744_v61, %v723_v59  ;;  %751 = vst.msk [vmem:[#allocation3 + $0x58] sm:$0xff] %vm681_vm3, %v742_v62  ;;  %v11905_v1 = vsel %vm743_vm10, %v740_v60, %v742_v62  ;;  %v10750_v59 = vld [vmem:[%s17173_s6 + $0x80] sm:$0xff] }
 0x142   : > { %v994_v60 = vld [vmem:[%s17174_s5] sm:$0xff]  ;;  %s11674_s5 = smov 52  }
 0x143   : > { %919 = vmatpush.bf16.msra.mxu3 %v888_v0  ;;  %997 = vperm.xlu1 %11579, %v994_v60  }
 0x147   : > { %v696_v2 = vpop.permute.xlu0 %695 }
 0x148   : > { %v702_v3 = vsel %vm701_vm11, %v696_v2, %v698_v63  ;;  %v847_v4 = vpop.permute.xlu1 %846  ;;  %v869_v48 = vld [vmem:[#allocation3 + $0x58] sm:$0xff] }
 0x149   : > { %v885_v5 = vpack.c.bf16 %v702_v3, %v11844_v23  ;;  %v850_v6 = vsel %vm848_vm4, %v845_v37, %v847_v4  ;;  %856 = vst.msk [vmem:[#allocation3 + $0xd0] sm:$0xff] %vm681_vm3, %v847_v4  ;;  %v10737_v37 = vld [vmem:[%s17173_s6 + $0x18] sm:$0xff]  ;;  %vm1385_vm4 = vcmask 982016  }
 0x14a   : > { %v898_v7 = vpack.c.bf16 %v850_v6, %v850_v6  ;;  %1128 = vmatpush.bf16.msrb.mxu2 %v10737_v37 }
 0x14b   : > { %920 = vmatpush.bf16.msra.mxu3 %v885_v5 }
 0x14c   : > { %v908_v11 = vsel %vm624_vm0, %v898_v7, 0 }
 0x14d   : > { %929 = vmatpush.bf16.msrb.mxu0 %v908_v11 }
 0x14e   : > { %7630 = vmatmul.msk.bf16.vlgmr.msra.gmra.mxu3 %vm900_vm12, %v11914_v8  ;;  %1129 = vmatpush.bf16.msrb.mxu2 %v10736_v44 }
 0x14f   : > { %v784_v13 = vpop.permute.xlu0 %783  ;;  %1137 = vmatpush.bf16.msrb.mxu3 %v10749_v10 }
 0x150   : > { %v787_v15 = vsel %vm785_vm8, %v11886_v38, %v784_v13  ;;  %793 = vst.msk [vmem:[#allocation3 + $0x88] sm:$0xff] %vm681_vm3, %v784_v13  ;;  %v805_v16 = vpop.permute.xlu1 %804  ;;  %v884_v17 = vld [vmem:[#allocation3 + $0xd0] sm:$0xff] }
 0x151   : > { %v808_v18 = vsel %vm806_vm6, %v11884_v33, %v805_v16  ;;  %814 = vst.msk [vmem:[#allocation3 + $0xa0] sm:$0xff] %vm681_vm3, %v805_v16  ;;  %v899_v19 = vpack.c.bf16 %v884_v17, %v884_v17  ;;  %v892_v28 = vpack.c.bf16 %v787_v15, %v766_v58  ;;  %v10742_v58 = vld [vmem:[%s17173_s6 + $0x40] sm:$0xff] }
 0x152   : > { %v895_v21 = vpack.c.bf16 %v829_v53, %v808_v18  ;;  %1130 = vmatpush.bf16.msrb.mxu2 %v10735_v50  ;;  %v10734_v53 = vld [vmem:[%s17173_s6] sm:$0xff] }
 0x153   : > { %1138 = vmatpush.bf16.msrb.mxu3 %v10748_v14  ;;  %v911_v23 = vsel %vm624_vm0, %v899_v19, 0  ;;  %v1231_v18 = vld [vmem:[%s17135_s8] sm:$0xff] }
 0x154   : > { %942 = vmatpush.bf16.msrb.mxu1 %v911_v23  ;;  %930 = vmatpush.bf16.msrb.mxu0 %v895_v21  ;;  %v1324_v50 = vld [vmem:[%s17137_s10] sm:$0xff] }
 0x156   : > { %1131 = vmatpush.bf16.msrb.mxu2 %v10734_v53 }
 0x157   : > { %v700_v27 = vpop.permute.xlu0 %699  ;;  %1139 = vmatpush.bf16.msrb.mxu3 %v10747_v22  ;;  %v875_v38 = vld [vmem:[#allocation3 + $0x88] sm:$0xff] }
 0x158   : > { %v703_v31 = vsel %vm701_vm11, %v698_v63, %v700_v27  ;;  %709 = vst.msk [vmem:[#allocation3 + $0x28] sm:$0xff] %vm681_vm3, %v700_v27  ;;  %v721_v32 = vpop.permute.xlu1 %720  ;;  %v878_v33 = vld [vmem:[#allocation3 + $0xa0] sm:$0xff]  ;;  %931 = vmatpush.bf16.msrb.mxu0 %v892_v28  ;;  %v893_v43 = vpack.c.bf16 %v875_v38, %v872_v42 }
 0x159   : > { %v724_v35 = vsel %vm722_vm9, %v11898_v57, %v721_v32  ;;  %730 = vst.msk [vmem:[#allocation3 + $0x40] sm:$0xff] %vm681_vm3, %v721_v32  ;;  %v896_v36 = vpack.c.bf16 %v881_v34, %v878_v33  ;;  %v886_v45 = vpack.c.bf16 %v703_v31, %v11846_v25  ;;  %v10751_v57 = vld [vmem:[%s17173_s6 + $0x88] sm:$0xff]  ;;  %s11677_s6 = smov 36  }
 0x15a   : > { %v889_v39 = vpack.c.bf16 %v11905_v1, %v724_v35 }
 0x15b   : > { %1140 = vmatpush.bf16.msrb.mxu3 %v10746_v29  ;;  %943 = vmatpush.bf16.msrb.mxu1 %v896_v36 }
 0x15c   : > { %932 = vmatpush.bf16.msrb.mxu0 %v889_v39 }
 0x15f   : > { %1141 = vmatpush.bf16.msrb.mxu3 %v10745_v40  ;;  %944 = vmatpush.bf16.msrb.mxu1 %v893_v43  ;;  %v863_v51 = vld [vmem:[#allocation3 + $0x28] sm:$0xff]  ;;  %v1216_v43 = vld [vmem:[%s17178_s7] sm:$0xf]  ;;  %s11683_s7 = smov 72  }
 0x160   : > { %v866_v47 = vld [vmem:[#allocation3 + $0x40] sm:$0xff]  ;;  %933 = vmatpush.bf16.msrb.mxu0 %v886_v45  ;;  %v887_v25 = vpack.c.bf16 %v863_v51, %v860_v52 }
 0x161   : > { %v890_v49 = vpack.c.bf16 %v869_v48, %v866_v47 }
 0x163   : > { %945 = vmatpush.bf16.msrb.mxu1 %v890_v49  ;;  %7631 = vmatmul.msk.bf16.vlgmr.msrb.gmra.mxu0 %vm900_vm12, %v11914_v8 }
 0x164   : > { %1154 = vmatpush.bf16.msra.mxu0 %v1122_v46  ;;  %1142 = vmatpush.bf16.msrb.mxu3 %v10744_v54 }
 0x167   : > { %946 = vmatpush.bf16.msrb.mxu1 %v887_v25 }
 0x168   : > { %1155 = vmatpush.bf16.msra.mxu0 %v10752_v55  ;;  %1143 = vmatpush.bf16.msrb.mxu3 %v10743_v56  ;;  %v1325_v56 = vld [vmem:[%s17137_s10 + $0x8] sm:$0xff] }
 0x16a   : > { %7632 = vmatmul.msk.bf16.vlgmr.msrb.gmra.mxu1 %vm900_vm12, %v11914_v8 }
 0x16c   : > { %1156 = vmatpush.bf16.msra.mxu0 %v10751_v57  ;;  %1144 = vmatpush.bf16.msrb.mxu3 %v10742_v58 }
 0x170   : > { %1157 = vmatpush.bf16.msra.mxu0 %v10750_v59 }
 0x1b5   : > { %v998_v8 = vpop.permute.xlu1 %997 }
 0x1d1   : > { %v922_v61 = vpop.f32.mrf.mxu3 }
 0x1d2   : > { %v991_v62 = vpack.c.bf16 %v922_v61, %v922_v61 }
 0x1d4   : > { %1132 = vmatmul.bf16.vlgmr.msrb.gmra.mxu2 %v991_v62 }
 0x1d9   : > { %v924_v63 = vpop.f32.mrf.mxu3 }
 0x1e0   : > { %v935_v0 = vpop.f32.mrf.mxu0 }
 0x1e1   : > { %v992_v1 = vpack.c.bf16 %v935_v0, %v935_v0 }
 0x1e3   : > { %1145 = vmatmul.bf16.vlgmr.msrb.gmra.mxu3 %v992_v1 }
 0x1e7   : > { %v948_v2 = vpop.f32.mrf.mxu1 }
 0x1e8   : > { %v993_v3 = vpack.c.bf16 %v948_v2, %v948_v2  ;;  %v937_v4 = vpop.f32.mrf.mxu0 }
 0x1ea   : > { %7709 = vmatmul.msk.bf16.vlgmr.msra.gmra.mxu0 %vm681_vm3, %v993_v3 }
 0x1ef   : > { %v950_v5 = vpop.f32.mrf.mxu1 }
 0x257   : > { %v1133_v6 = vpop.f32.mrf.mxu2 }
 0x258   : > { %v1134_v9 = vadd.f32 %v1133_v6, %v998_v8 }
 0x25f   : > { %v1135_v7 = vpop.f32.mrf.mxu2 }
 0x266   : > { %v1146_v10 = vpop.f32.mrf.mxu3 }
 0x267   : > { %v1159_v11 = vpop.f32.mrf.mxu0  ;;  %v1147_v12 = vadd.f32 %v1146_v10, %v1134_v9  ;;  %v10753_v10 = vld [vmem:[%s17136_s9] sm:$0xff] }
 0x269   : > { %v1160_v13 = vadd.f32 %v1159_v11, %v1147_v12  ;;  %v1363_v11 = vlaneseq }
 0x26b   : > { %v1163_v14 = vmax.f32 %v1160_v13, 0.0  ;;  %vm1365_vm15 = vcmp.lt.s32.totalorder %v1363_v11, 60  ;;  %vm12554_vm1 = vcmp.ge.s32.totalorder %v1363_v11, 60  ;;  %vm12559_vm2 = vcmp.lt.s32.totalorder %v1363_v11, 120 }
 0x26c   : > { %vm1377_vm3 = vmand %vm12554_vm1, %vm12559_vm2  ;;  %vm12652_vm5 = vcmp.ge.s32.totalorder %v1363_v11, 120  ;;  %vm12657_vm6 = vcmp.lt.s32.totalorder %v1363_v11, 180  ;;  %vm12670_vm7 = vcmp.ge.s32.totalorder %v1363_v11, 52  ;;  %vm12675_vm9 = vcmp.lt.s32.totalorder %v1363_v11, 112 }
 0x26d   : > { %1165 = vst.msk [vmem:[#allocation4] sm:$0xff] %vm1164_vm14, %v1163_v14  ;;  %vm1390_vm10 = vmand %vm12652_vm5, %vm12657_vm6  ;;  %vm12722_vm13 = vcmp.ge.s32.totalorder %v1363_v11, 112  ;;  %vm12765_vm1 = vcmp.lt.s32.totalorder %v1363_v11, 104  ;;  %vm1408_vm2 = vcmask 916480   ;;  %vm1451_vm5 = vcmask 785408  }
 0x26e   : > { %v1148_v15 = vpop.f32.mrf.mxu3  ;;  %vm1400_vm11 = vmand %vm12670_vm7, %vm12675_vm9  ;;  %vm12984_vm6 = vcmp.ge.s32.totalorder %v1363_v11, 104  ;;  %vm12989_vm7 = vcmp.lt.s32.totalorder %v1363_v11, 164 }
 0x26f   : > { %v1161_v16 = vpop.f32.mrf.mxu0  ;;  %vm1435_vm9 = vmand %vm12984_vm6, %vm12989_vm7 }
 0x274   : > { %v1210_v17 = vld [vmem:[#allocation4] sm:$0xff] }
 0x275   : > { %1212 = vrot.lane.b32.xlu2 %v1210_v17, %s17175_s4  ;;  %1206 = vrot.lane.b32.xlu1 %v1210_v17, %s11666_s1  ;;  %1167 = vst.msk [vmem:[#allocation5] sm:$0xff] %vm1164_vm14, %v1210_v17 }
 0x276   : > { %1200 = vrot.lane.b32.xlu0 %v1210_v17, %s11667_s20 }
 0x27c   : > { %v1217_v40 = vld [vmem:[#allocation5] sm:$0xff] }
 0x27d   : > { %1188 = vrot.lane.b32.xlu2 %v1210_v17, %s11668_s21  ;;  %1176 = vrot.lane.b32.xlu1 %v1210_v17, %s17176_s24 }
 0x27e   : > { %1194 = vrot.lane.b32.xlu0 %v1210_v17, %s11669_s25 }
 0x285   : > { %1182 = vrot.lane.b32.xlu2 %v1210_v17, %s11670_s3  ;;  %1234 = vperm.xlu1 %11579, %v1231_v18  }
 0x286   : > { %1170 = vrot.lane.b32.xlu0 %v1210_v17, %s17177_s29 }
 0x2cf   : > { %v1213_v19 = vpop.permute.xlu2 %1212 }
 0x2d0   : > { %1215 = vst.msk [vmem:[#allocation5 + $0x40] sm:$0xff] %vm1164_vm14, %v1213_v19 }
 0x2d7   : > { %v1189_v20 = vpop.permute.xlu2 %1188  ;;  %v1225_v21 = vld [vmem:[#allocation5 + $0x40] sm:$0xff] }
 0x2d8   : > { %1191 = vst.msk [vmem:[#allocation5 + $0x20] sm:$0xff] %vm1164_vm14, %v1189_v20  ;;  %v1230_v22 = vpack.c.bf16 %v1225_v21, %v1225_v21 }
 0x2da   : > { %v1241_v23 = vsel %vm624_vm0, %v1230_v22, 0  ;;  %v7774_v22 = vld [vmem:[%s17139_s12 + $0x70] sm:$0xf] }
 0x2db   : > { %1246 = vmatpush.bf16.msra.mxu1 %v1241_v23  ;;  %v10889_v23 = vld [vmem:[%s17139_s12 + $0x74] sm:$0xf0] }
 0x2df   : > { %v1183_v24 = vpop.permute.xlu2 %1182  ;;  %v1221_v34 = vld [vmem:[#allocation5 + $0x20] sm:$0xff] }
 0x2e0   : > { %1185 = vst.msk [vmem:[#allocation5 + $0x18] sm:$0xff] %vm1164_vm14, %v1183_v24  ;;  %v7775_v24 = vor.u32 %v10889_v23, %v7774_v22 }
 0x2e2   : > { %5461 = vmatpush.bf16.msrb.mxu0 %v7775_v24  ;;  %v7734_v24 = vld [vmem:[%s17139_s12 + $0x20] sm:$0xf] }
 0x2e7   : > { %v1207_v26 = vpop.permute.xlu1 %1206  ;;  %v1220_v38 = vld [vmem:[#allocation5 + $0x18] sm:$0xff] }
 0x2e8   : > { %1209 = vst.msk [vmem:[#allocation5 + $0x38] sm:$0xff] %vm1164_vm14, %v1207_v26  ;;  %v1201_v27 = vpop.permute.xlu0 %1200  ;;  %v7838_v26 = vld [vmem:[%s17139_s12 + $0xf0] sm:$0xf] }
 0x2e9   : > { %1203 = vst.msk [vmem:[#allocation5 + $0x30] sm:$0xff] %vm1164_vm14, %v1201_v27  ;;  %v10905_v27 = vld [vmem:[%s17139_s12 + $0xf4] sm:$0xf0] }
 0x2ef   : > { %v1177_v28 = vpop.permute.xlu1 %1176  ;;  %v1224_v29 = vld [vmem:[#allocation5 + $0x38] sm:$0xff] }
 0x2f0   : > { %v1195_v30 = vpop.permute.xlu0 %1194  ;;  %1179 = vst.msk [vmem:[#allocation5 + $0x10] sm:$0xff] %vm1164_vm14, %v1177_v28  ;;  %v1223_v31 = vld [vmem:[#allocation5 + $0x30] sm:$0xff] }
 0x2f1   : > { %1197 = vst.msk [vmem:[#allocation5 + $0x28] sm:$0xff] %vm1164_vm14, %v1195_v30  ;;  %v1229_v32 = vpack.c.bf16 %v1224_v29, %v1223_v31  ;;  %v7902_v28 = vld [vmem:[%s17139_s12 + $0x170] sm:$0xf]  ;;  %v7839_v29 = vor.u32 %v10905_v27, %v7838_v26  ;;  %v10921_v30 = vld [vmem:[%s17139_s12 + $0x174] sm:$0xf0] }
 0x2f2   : > { %v7966_v31 = vld [vmem:[%s17139_s12 + $0x1f0] sm:$0xf]  ;;  %v10879_v26 = vld [vmem:[%s17139_s12 + $0x24] sm:$0xf0] }
 0x2f3   : > { %1247 = vmatpush.bf16.msra.mxu1 %v1229_v32  ;;  %v10937_v32 = vld [vmem:[%s17139_s12 + $0x1f4] sm:$0xf0]  ;;  %v7735_v27 = vor.u32 %v10879_v26, %v7734_v24  ;;  %v8014_v24 = vld [vmem:[%s17139_s12 + $0x250] sm:$0xf] }
 0x2f4   : > { %v10949_v26 = vld [vmem:[%s17139_s12 + $0x254] sm:$0xf0] }
 0x2f7   : > { %v1219_v37 = vld [vmem:[#allocation5 + $0x10] sm:$0xff]  ;;  %v1235_v44 = vpop.permute.xlu1 %1234 }
 0x2f8   : > { %v1171_v33 = vpop.permute.xlu0 %1170  ;;  %v1222_v35 = vld [vmem:[#allocation5 + $0x28] sm:$0xff]  ;;  %v1227_v39 = vpack.c.bf16 %v1220_v38, %v1219_v37 }
 0x2f9   : > { %1173 = vst.msk [vmem:[#allocation5 + $0x8] sm:$0xff] %vm1164_vm14, %v1171_v33  ;;  %v1228_v36 = vpack.c.bf16 %v1222_v35, %v1221_v34  ;;  %v7903_v33 = vor.u32 %v10921_v30, %v7902_v28  ;;  %v7967_v34 = vor.u32 %v10937_v32, %v7966_v31  ;;  %v10887_v37 = vld [vmem:[%s17139_s12 + $0x64] sm:$0xf0]  ;;  %v7798_v28 = vld [vmem:[%s17139_s12 + $0xa0] sm:$0xf] }
 0x2fa   : > { %v7862_v30 = vld [vmem:[%s17139_s12 + $0x120] sm:$0xf]  ;;  %v10911_v32 = vld [vmem:[%s17139_s12 + $0x124] sm:$0xf0] }
 0x2fb   : > { %1248 = vmatpush.bf16.msra.mxu1 %v1228_v36  ;;  %5487 = vmatpush.bf16.msra.mxu3 %v7903_v33  ;;  %v7766_v36 = vld [vmem:[%s17139_s12 + $0x60] sm:$0xf] }
 0x2fc   : > { %v7767_v38 = vor.u32 %v10887_v37, %v7766_v36  ;;  %v7926_v33 = vld [vmem:[%s17139_s12 + $0x1a0] sm:$0xf]  ;;  %v7726_v37 = vld [vmem:[%s17139_s12 + $0x10] sm:$0xf] }
 0x2fe   : > { %5462 = vmatpush.bf16.msrb.mxu0 %v7767_v38  ;;  %v10877_v38 = vld [vmem:[%s17139_s12 + $0x14] sm:$0xf0] }
 0x2ff   : > { %1249 = vmatpush.bf16.msra.mxu1 %v1227_v39  ;;  %v7830_v39 = vld [vmem:[%s17139_s12 + $0xe0] sm:$0xf] }
 0x300   : > { %v1218_v41 = vld [vmem:[#allocation5 + $0x8] sm:$0xff] }
 0x301   : > { %v1226_v42 = vpack.c.bf16 %v1218_v41, %v1217_v40  ;;  %v10903_v40 = vld [vmem:[%s17139_s12 + $0xe4] sm:$0xf0]  ;;  %v7894_v41 = vld [vmem:[%s17139_s12 + $0x160] sm:$0xf] }
 0x303   : > { %1250 = vmatpush.bf16.msra.mxu1 %v1226_v42  ;;  %v7831_v42 = vor.u32 %v10903_v40, %v7830_v39  ;;  %v7790_v39 = vld [vmem:[%s17139_s12 + $0x90] sm:$0xf]  ;;  %v7727_v40 = vor.u32 %v10877_v38, %v7726_v37  ;;  %v10947_v38 = vld [vmem:[%s17139_s12 + $0x244] sm:$0xf0] }
 0x306   : > { %7710 = vmatmul.msk.bf16.vlgmr.msra.gmra.mxu1 %vm900_vm12, %v1216_v43  ;;  %v10919_v43 = vld [vmem:[%s17139_s12 + $0x164] sm:$0xf0] }
 0x307   : > { %5474 = vmatpush.bf16.msrb.mxu1 %v7839_v29  ;;  %v10895_v29 = vld [vmem:[%s17139_s12 + $0xa4] sm:$0xf0] }
 0x308   : > { %v7799_v31 = vor.u32 %v10895_v29, %v7798_v28  ;;  %v8015_v28 = vor.u32 %v10949_v26, %v8014_v24  ;;  %v10965_v29 = vld [vmem:[%s17139_s12 + $0x2d4] sm:$0xf0]  ;;  %v10939_v24 = vld [vmem:[%s17139_s12 + $0x204] sm:$0xf0]  ;;  %v8038_v26 = vld [vmem:[%s17139_s12 + $0x280] sm:$0xf] }
 0x30b   : > { %5475 = vmatpush.bf16.msrb.mxu1 %v7831_v42  ;;  %v7854_v42 = vld [vmem:[%s17139_s12 + $0x110] sm:$0xf] }
 0x383   : > { %v1252_v45 = vpop.f32.mrf.mxu1 }
 0x384   : > { %v1253_v46 = vadd.f32 %v1252_v45, %v1235_v44  ;;  %v7958_v44 = vld [vmem:[%s17139_s12 + $0x1e0] sm:$0xf]  ;;  %v10935_v45 = vld [vmem:[%s17139_s12 + $0x1e4] sm:$0xf0] }
 0x386   : > { %v1256_v47 = vmax.f32 %v1253_v46, 0.0  ;;  %v7895_v46 = vor.u32 %v10919_v43, %v7894_v41  ;;  %v10893_v41 = vld [vmem:[%s17139_s12 + $0x94] sm:$0xf0] }
 0x387   : > { %v10909_v43 = vld [vmem:[%s17139_s12 + $0x114] sm:$0xf0] }
 0x388   : > { %1257 = vst.msk [vmem:[#allocation6] sm:$0xff] %vm1164_vm14, %v1256_v47  ;;  %v7959_v47 = vor.u32 %v10935_v45, %v7958_v44  ;;  %5488 = vmatpush.bf16.msra.mxu3 %v7895_v46  ;;  %v7791_v44 = vor.u32 %v10893_v41, %v7790_v39  ;;  %v7855_v45 = vor.u32 %v10909_v43, %v7854_v42  ;;  %v7918_v46 = vld [vmem:[%s17139_s12 + $0x190] sm:$0xf]  ;;  %v8070_v39 = vld [vmem:[%s17139_s12 + $0x2c0] sm:$0xf] }
 0x389   : > { %v8134_v41 = vld [vmem:[%s17139_s12 + $0x340] sm:$0xf]  ;;  %v10979_v42 = vld [vmem:[%s17139_s12 + $0x344] sm:$0xf0] }
 0x38a   : > { %v8198_v43 = vld [vmem:[%s17139_s12 + $0x3c0] sm:$0xf] }
 0x38b   : > { %v1254_v48 = vpop.f32.mrf.mxu1 }
 0x38c   : > { %v7758_v48 = vld [vmem:[%s17139_s12 + $0x50] sm:$0xf] }
 0x38f   : > { %v1258_v49 = vld [vmem:[#allocation6] sm:$0xff] }
 0x390   : > { %1259 = vst.msk [vmem:[#allocation7] sm:$0xff] %vm1164_vm14, %v1258_v49  ;;  %1304 = vrot.lane.b32.xlu2 %v1258_v49, %s17175_s4  ;;  %1298 = vrot.lane.b32.xlu1 %v1258_v49, %s11666_s1  ;;  %s11680_s1 = smov 20  }
 0x391   : > { %1292 = vrot.lane.b32.xlu0 %v1258_v49, %s11667_s20  ;;  %s11681_s20 = smov 80  }
 0x397   : > { %v1310_v7 = vld [vmem:[#allocation7] sm:$0xff] }
 0x398   : > { %1280 = vrot.lane.b32.xlu2 %v1258_v49, %s11668_s21  ;;  %1268 = vrot.lane.b32.xlu1 %v1258_v49, %s17176_s24  ;;  %s11671_s24 = smov 96   ;;  %s11684_s21 = smov 4  }
 0x399   : > { %1286 = vrot.lane.b32.xlu0 %v1258_v49, %s11669_s25  ;;  %s11672_s25 = smov 60  }
 0x3a0   : > { %1274 = vrot.lane.b32.xlu2 %v1258_v49, %s11670_s3  ;;  %1328 = vperm.xlu1 %11579, %v1324_v50   ;;  %s11673_s3 = smov 120   ;;  %v7822_v50 = vld [vmem:[%s17139_s12 + $0xd0] sm:$0xf] }
 0x3a1   : > { %1262 = vrot.lane.b32.xlu0 %v1258_v49, %s17177_s29  ;;  %v10885_v49 = vld [vmem:[%s17139_s12 + $0x54] sm:$0xf0] }
 0x3a8   : > { %1333 = vperm.xlu2 %11580, %v1325_v56   ;;  %v7950_v56 = vld [vmem:[%s17139_s12 + $0x1d0] sm:$0xf] }
 0x3ea   : > { %v1305_v51 = vpop.permute.xlu2 %1304 }
 0x3eb   : > { %1307 = vst.msk [vmem:[#allocation7 + $0x40] sm:$0xff] %vm1164_vm14, %v1305_v51  ;;  %v7759_v51 = vor.u32 %v10885_v49, %v7758_v48 }
 0x3ed   : > { %5463 = vmatpush.bf16.msrb.mxu0 %v7759_v51  ;;  %v10875_v51 = vld [vmem:[%s17139_s12 + $0x4] sm:$0xf0] }
 0x3f2   : > { %v1281_v52 = vpop.permute.xlu2 %1280  ;;  %v1318_v25 = vld [vmem:[#allocation7 + $0x40] sm:$0xff] }
 0x3f3   : > { %1283 = vst.msk [vmem:[#allocation7 + $0x20] sm:$0xff] %vm1164_vm14, %v1281_v52  ;;  %v1323_v53 = vpack.c.bf16 %v1318_v25, %v1318_v25  ;;  %v10901_v52 = vld [vmem:[%s17139_s12 + $0xd4] sm:$0xf0]  ;;  %v7886_v25 = vld [vmem:[%s17139_s12 + $0x150] sm:$0xf] }
 0x3f5   : > { %v1345_v54 = vsel %vm624_vm0, %v1323_v53, 0  ;;  %v10917_v53 = vld [vmem:[%s17139_s12 + $0x154] sm:$0xf0] }
 0x3f6   : > { %1350 = vmatpush.bf16.msra.mxu2 %v1345_v54  ;;  %v7823_v54 = vor.u32 %v10901_v52, %v7822_v50  ;;  %v7718_v50 = vld [vmem:[%s17139_s12] sm:$0xf] }
 0x3f7   : > { %v7719_v52 = vor.u32 %v10875_v51, %v7718_v50  ;;  %v7998_v50 = vld [vmem:[%s17139_s12 + $0x230] sm:$0xf]  ;;  %v10945_v51 = vld [vmem:[%s17139_s12 + $0x234] sm:$0xf0] }
 0x3f8   : > { %5476 = vmatpush.bf16.msrb.mxu1 %v7823_v54 }
 0x3fa   : > { %v1275_v55 = vpop.permute.xlu2 %1274  ;;  %v1314_v1 = vld [vmem:[#allocation7 + $0x20] sm:$0xff] }
 0x3fb   : > { %1277 = vst.msk [vmem:[#allocation7 + $0x18] sm:$0xff] %vm1164_vm14, %v1275_v55  ;;  %v7887_v55 = vor.u32 %v10917_v53, %v7886_v25  ;;  %v7782_v25 = vld [vmem:[%s17139_s12 + $0x80] sm:$0xf] }
 0x3fc   : > { %v7846_v53 = vld [vmem:[%s17139_s12 + $0x100] sm:$0xf] }
 0x3fd   : > { %5489 = vmatpush.bf16.msra.mxu3 %v7887_v55  ;;  %v10907_v55 = vld [vmem:[%s17139_s12 + $0x104] sm:$0xf0] }
 0x402   : > { %v1299_v57 = vpop.permute.xlu1 %1298  ;;  %v1313_v5 = vld [vmem:[#allocation7 + $0x18] sm:$0xff]  ;;  %v1334_v16 = vpop.permute.xlu2 %1333 }
 0x403   : > { %1301 = vst.msk [vmem:[#allocation7 + $0x38] sm:$0xff] %vm1164_vm14, %v1299_v57  ;;  %v1293_v58 = vpop.permute.xlu0 %1292  ;;  %v10933_v57 = vld [vmem:[%s17139_s12 + $0x1d4] sm:$0xf0] }
 0x404   : > { %1295 = vst.msk [vmem:[#allocation7 + $0x30] sm:$0xff] %vm1164_vm14, %v1293_v58  ;;  %v7951_v58 = vor.u32 %v10933_v57, %v7950_v56  ;;  %v7910_v56 = vld [vmem:[%s17139_s12 + $0x180] sm:$0xf]  ;;  %v10923_v57 = vld [vmem:[%s17139_s12 + $0x184] sm:$0xf0] }
 0x40a   : > { %v1269_v59 = vpop.permute.xlu1 %1268  ;;  %v1317_v60 = vld [vmem:[#allocation7 + $0x38] sm:$0xff] }
 0x40b   : > { %v1287_v61 = vpop.permute.xlu0 %1286  ;;  %1271 = vst.msk [vmem:[#allocation7 + $0x10] sm:$0xff] %vm1164_vm14, %v1269_v59  ;;  %v1316_v62 = vld [vmem:[#allocation7 + $0x30] sm:$0xff] }
 0x40c   : > { %1289 = vst.msk [vmem:[#allocation7 + $0x28] sm:$0xff] %vm1164_vm14, %v1287_v61  ;;  %v1322_v63 = vpack.c.bf16 %v1317_v60, %v1316_v62  ;;  %v7750_v60 = vld [vmem:[%s17139_s12 + $0x40] sm:$0xf]  ;;  %v10883_v61 = vld [vmem:[%s17139_s12 + $0x44] sm:$0xf0] }
 0x40d   : > { %v7751_v62 = vor.u32 %v10883_v61, %v7750_v60  ;;  %v8030_v60 = vld [vmem:[%s17139_s12 + $0x270] sm:$0xf]  ;;  %v10953_v61 = vld [vmem:[%s17139_s12 + $0x274] sm:$0xf0] }
 0x40e   : > { %1351 = vmatpush.bf16.msra.mxu2 %v1322_v63  ;;  %v7814_v63 = vld [vmem:[%s17139_s12 + $0xc0] sm:$0xf] }
 0x40f   : > { %5464 = vmatpush.bf16.msrb.mxu0 %v7751_v62  ;;  %v8094_v62 = vld [vmem:[%s17139_s12 + $0x2f0] sm:$0xf] }
 0x412   : > { %v1312_v4 = vld [vmem:[#allocation7 + $0x10] sm:$0xff]  ;;  %v1329_v12 = vpop.permute.xlu1 %1328 }
 0x413   : > { %v1263_v0 = vpop.permute.xlu0 %1262  ;;  %v1315_v2 = vld [vmem:[#allocation7 + $0x28] sm:$0xff]  ;;  %v1320_v6 = vpack.c.bf16 %v1313_v5, %v1312_v4  ;;  %v7942_v4 = vld [vmem:[%s17139_s12 + $0x1c0] sm:$0xf]  ;;  %v10931_v5 = vld [vmem:[%s17139_s12 + $0x1c4] sm:$0xf0] }
 0x414   : > { %1265 = vst.msk [vmem:[#allocation7 + $0x8] sm:$0xff] %vm1164_vm14, %v1263_v0  ;;  %v1321_v3 = vpack.c.bf16 %v1315_v2, %v1314_v1  ;;  %v10899_v0 = vld [vmem:[%s17139_s12 + $0xc4] sm:$0xf0]  ;;  %v7878_v1 = vld [vmem:[%s17139_s12 + $0x140] sm:$0xf]  ;;  %vm12727_vm14 = vcmp.lt.s32.totalorder %v1363_v11, 172 }
 0x415   : > { %v7815_v2 = vor.u32 %v10899_v0, %v7814_v63  ;;  %v8031_v63 = vor.u32 %v10953_v61, %v8030_v60  ;;  %v10969_v0 = vld [vmem:[%s17139_s12 + $0x2f4] sm:$0xf0]  ;;  %v10943_v60 = vld [vmem:[%s17139_s12 + $0x224] sm:$0xf0]  ;;  %v8054_v61 = vld [vmem:[%s17139_s12 + $0x2a0] sm:$0xf] }
 0x416   : > { %1352 = vmatpush.bf16.msra.mxu2 %v1321_v3  ;;  %v10915_v3 = vld [vmem:[%s17139_s12 + $0x144] sm:$0xf0] }
 0x417   : > { %5477 = vmatpush.bf16.msrb.mxu1 %v7815_v2  ;;  %v10985_v2 = vld [vmem:[%s17139_s12 + $0x374] sm:$0xf0] }
 0x41a   : > { %1353 = vmatpush.bf16.msra.mxu2 %v1320_v6  ;;  %v7879_v6 = vor.u32 %v10915_v3, %v7878_v1  ;;  %v8158_v1 = vld [vmem:[%s17139_s12 + $0x370] sm:$0xf]  ;;  %v8095_v3 = vor.u32 %v10969_v0, %v8094_v62  ;;  %v8118_v0 = vld [vmem:[%s17139_s12 + $0x320] sm:$0xf] }
 0x41b   : > { %v1311_v8 = vld [vmem:[#allocation7 + $0x8] sm:$0xff] }
 0x41c   : > { %v1319_v9 = vpack.c.bf16 %v1311_v8, %v1310_v7  ;;  %v7943_v7 = vor.u32 %v10931_v5, %v7942_v4  ;;  %v7742_v8 = vld [vmem:[%s17139_s12 + $0x30] sm:$0xf]  ;;  %5490 = vmatpush.bf16.msra.mxu3 %v7879_v6  ;;  %v8159_v4 = vor.u32 %v10985_v2, %v8158_v1  ;;  %v11001_v6 = vld [vmem:[%s17139_s12 + $0x3f4] sm:$0xf0]  ;;  %v10975_v1 = vld [vmem:[%s17139_s12 + $0x324] sm:$0xf0] }
 0x41d   : > { %v8222_v5 = vld [vmem:[%s17139_s12 + $0x3f0] sm:$0xf]  ;;  %v8182_v2 = vld [vmem:[%s17139_s12 + $0x3a0] sm:$0xf] }
 0x41e   : > { %1354 = vmatpush.bf16.msra.mxu2 %v1319_v9  ;;  %v10881_v9 = vld [vmem:[%s17139_s12 + $0x34] sm:$0xf0] }
 0x421   : > { %7715 = vmatmul.msk.bf16.vlgmr.msra.gmra.mxu2 %vm900_vm12, %v10753_v10  ;;  %v7806_v10 = vld [vmem:[%s17139_s12 + $0xb0] sm:$0xf] }
 0x422   : > { %5500 = vmatpush.bf16.msrb.mxu2 %v7967_v34  ;;  %v10927_v34 = vld [vmem:[%s17139_s12 + $0x1a4] sm:$0xf0] }
 0x423   : > { %v7927_v36 = vor.u32 %v10927_v34, %v7926_v33  ;;  %v8206_v34 = vld [vmem:[%s17139_s12 + $0x3d0] sm:$0xf] }
 0x426   : > { %5501 = vmatpush.bf16.msrb.mxu2 %v7959_v47  ;;  %v10925_v47 = vld [vmem:[%s17139_s12 + $0x194] sm:$0xf0] }
 0x427   : > { %v7919_v48 = vor.u32 %v10925_v47, %v7918_v46 }
 0x42a   : > { %5502 = vmatpush.bf16.msrb.mxu2 %v7951_v58  ;;  %v7847_v58 = vor.u32 %v10907_v55, %v7846_v53  ;;  %v7999_v53 = vor.u32 %v10945_v51, %v7998_v50  ;;  %v8190_v55 = vld [vmem:[%s17139_s12 + $0x3b0] sm:$0xf]  ;;  %v8278_v50 = vld [vmem:[%s17139_s12 + $0x460] sm:$0xf]  ;;  %v11015_v51 = vld [vmem:[%s17139_s12 + $0x464] sm:$0xf0] }
 0x42e   : > { %5503 = vmatpush.bf16.msrb.mxu2 %v7943_v7  ;;  %v8022_v7 = vld [vmem:[%s17139_s12 + $0x260] sm:$0xf] }
 0x4a4   : > { %v1356_v13 = vpop.f32.mrf.mxu2 }
 0x4a5   : > { %v1357_v14 = vadd.f32 %v1356_v13, %v1329_v12  ;;  %v7743_v12 = vor.u32 %v10881_v9, %v7742_v8  ;;  %v10897_v13 = vld [vmem:[%s17139_s12 + $0xb4] sm:$0xf0]  ;;  %v8223_v8 = vor.u32 %v11001_v6, %v8222_v5  ;;  %v10951_v9 = vld [vmem:[%s17139_s12 + $0x264] sm:$0xf0] }
 0x4a7   : > { %v12056_v15 = vmax.f32 %v1357_v14, 0.0  ;;  %v7870_v14 = vld [vmem:[%s17139_s12 + $0x130] sm:$0xf]  ;;  %5465 = vmatpush.bf16.msrb.mxu0 %v7743_v12  ;;  %v10967_v12 = vld [vmem:[%s17139_s12 + $0x2e4] sm:$0xf0] }
 0x4a9   : > { %1369 = vst [vmem:[#allocation1] sm:$0xff] %v12056_v15 }
 0x4aa   : > { %1367 = vst.msk [vmem:[#allocation8] sm:$0x1] %vm1365_vm15, %v12056_v15  ;;  %vm12741_vm15 = vcmp.ge.s32.totalorder %v1363_v11, 44 }
 0x4ab   : > { %5466 = vmatpush.bf16.msrb.mxu0 %v7735_v27  ;;  %v8078_v27 = vld [vmem:[%s17139_s12 + $0x2d0] sm:$0xf] }
 0x4ac   : > { %v1358_v17 = vpop.f32.mrf.mxu2 }
 0x4ad   : > { %v1359_v18 = vadd.f32 %v1358_v17, %v1334_v16  ;;  %v10913_v16 = vld [vmem:[%s17139_s12 + $0x134] sm:$0xf0]  ;;  %v7807_v17 = vor.u32 %v10897_v13, %v7806_v10  ;;  %v8086_v10 = vld [vmem:[%s17139_s12 + $0x2e0] sm:$0xf] }
 0x4af   : > { %v12061_v19 = vmax.f32 %v1359_v18, 0.0  ;;  %v7871_v18 = vor.u32 %v10913_v16, %v7870_v14  ;;  %5478 = vmatpush.bf16.msrb.mxu1 %v7807_v17  ;;  %5467 = vmatpush.bf16.msrb.mxu0 %v7727_v40  ;;  %v8023_v14 = vor.u32 %v10951_v9, %v8022_v7  ;;  %v8087_v16 = vor.u32 %v10967_v12, %v8086_v10  ;;  %v8150_v17 = vld [vmem:[%s17139_s12 + $0x360] sm:$0xf]  ;;  %v10963_v40 = vld [vmem:[%s17139_s12 + $0x2c4] sm:$0xf0] }
 0x4b0   : > { %v1371_v20 = vld [vmem:[#allocation1 + $0x1] ss:$9 sm:$0xff]  ;;  %v8071_v47 = vor.u32 %v10963_v40, %v8070_v39  ;;  %v8119_v7 = vor.u32 %v10975_v1, %v8118_v0  ;;  %v10941_v10 = vld [vmem:[%s17139_s12 + $0x214] sm:$0xf0] }
 0x4b1   : > { %1379 = vst [vmem:[#allocation1] sm:$0xff] %v12056_v15  ;;  %1448 = vrot.lane.b32.xlu0 %v12061_v19, %s11671_s24  ;;  %1372 = vrot.lane.b32.xlu1 %v1371_v20, %s11672_s25  ;;  %v7934_v20 = vld [vmem:[%s17139_s12 + $0x1b0] sm:$0xf]  ;;  %s11678_s25 = smov 28  }
 0x4b2   : > { %5491 = vmatpush.bf16.msra.mxu3 %v7871_v18  ;;  %v10983_v18 = vld [vmem:[%s17139_s12 + $0x364] sm:$0xf0]  ;;  %v7982_v9 = vld [vmem:[%s17139_s12 + $0x210] sm:$0xf] }
 0x4b3   : > { %5479 = vmatpush.bf16.msrb.mxu1 %v7799_v31  ;;  %5468 = vmatpush.bf16.msrb.mxu0 %v7719_v52  ;;  %v10981_v31 = vld [vmem:[%s17139_s12 + $0x354] sm:$0xf0]  ;;  %v8062_v52 = vld [vmem:[%s17139_s12 + $0x2b0] sm:$0xf] }
 0x4b4   : > { %v8046_v12 = vld [vmem:[%s17139_s12 + $0x290] sm:$0xf] }
 0x4b7   : > { %5480 = vmatpush.bf16.msrb.mxu1 %v7791_v44  ;;  %5513 = vmatpush.bf16.msra.mxu0 %v8031_v63  ;;  %v10959_v63 = vld [vmem:[%s17139_s12 + $0x2a4] sm:$0xf0] }
 0x4b8   : > { %v1381_v21 = vld [vmem:[#allocation1 + $0x2] ss:$9 sm:$0xff]  ;;  %v8055_v6 = vor.u32 %v10959_v63, %v8054_v61 }
 0x4b9   : > { %1392 = vst [vmem:[#allocation1] sm:$0xff] %v12056_v15  ;;  %1382 = vrot.lane.b32.xlu0 %v1381_v21, %s11673_s3  ;;  %v10929_v21 = vld [vmem:[%s17139_s12 + $0x1b4] sm:$0xf0] }
 0x4ba   : > { %v7935_v22 = vor.u32 %v10929_v21, %v7934_v20  ;;  %v8151_v20 = vor.u32 %v10983_v18, %v8150_v17  ;;  %v8214_v21 = vld [vmem:[%s17139_s12 + $0x3e0] sm:$0xf]  ;;  %v10973_v17 = vld [vmem:[%s17139_s12 + $0x314] sm:$0xf0]  ;;  %v8174_v18 = vld [vmem:[%s17139_s12 + $0x390] sm:$0xf] }
 0x4bb   : > { %5514 = vmatpush.bf16.msra.mxu0 %v8023_v14  ;;  %v8110_v14 = vld [vmem:[%s17139_s12 + $0x310] sm:$0xf] }
 0x4bc   : > { %5504 = vmatpush.bf16.msrb.mxu2 %v7935_v22  ;;  %v10999_v22 = vld [vmem:[%s17139_s12 + $0x3e4] sm:$0xf0] }
 0x4bf   : > { %5515 = vmatpush.bf16.msra.mxu0 %v8015_v28  ;;  %v10955_v28 = vld [vmem:[%s17139_s12 + $0x284] sm:$0xf0] }
 0x4c0   : > { %v1394_v35 = vld [vmem:[#allocation1 + $0x3] ss:$9 sm:$0xff]  ;;  %5505 = vmatpush.bf16.msrb.mxu2 %v7927_v36 }
 0x4c1   : > { %1402 = vst [vmem:[#allocation1] sm:$0xff] %v12056_v15  ;;  %1395 = vrot.lane.b32.xlu0 %v1394_v35, %s11674_s5  ;;  %s11675_s5 = smov 112   ;;  %v7863_v35 = vor.u32 %v10911_v32, %v7862_v30  ;;  %v8142_v30 = vld [vmem:[%s17139_s12 + $0x350] sm:$0xf]  ;;  %v8079_v32 = vor.u32 %v10965_v29, %v8078_v27  ;;  %v8006_v36 = vld [vmem:[%s17139_s12 + $0x240] sm:$0xf] }
 0x4c2   : > { %v8143_v33 = vor.u32 %v10981_v31, %v8142_v30  ;;  %v8007_v44 = vor.u32 %v10947_v38, %v8006_v36  ;;  %v8102_v29 = vld [vmem:[%s17139_s12 + $0x300] sm:$0xf]  ;;  %v10971_v30 = vld [vmem:[%s17139_s12 + $0x304] sm:$0xf0] }
 0x4c3   : > { %5492 = vmatpush.bf16.msra.mxu3 %v7863_v35  ;;  %v10997_v35 = vld [vmem:[%s17139_s12 + $0x3d4] sm:$0xf0]  ;;  %v8166_v31 = vld [vmem:[%s17139_s12 + $0x380] sm:$0xf]  ;;  %v8103_v36 = vor.u32 %v10971_v30, %v8102_v29  ;;  %v11027_v30 = vld [vmem:[%s17139_s12 + $0x4c4] sm:$0xf0] }
 0x4c4   : > { %5506 = vmatpush.bf16.msrb.mxu2 %v7919_v48  ;;  %v8207_v37 = vor.u32 %v10997_v35, %v8206_v34  ;;  %v8135_v48 = vor.u32 %v10979_v42, %v8134_v41  ;;  %5516 = vmatpush.bf16.msra.mxu0 %v8007_v44  ;;  %v8039_v35 = vor.u32 %v10955_v28, %v8038_v26  ;;  %v8286_v42 = vld [vmem:[%s17139_s12 + $0x470] sm:$0xf]  ;;  %v11011_v26 = vld [vmem:[%s17139_s12 + $0x444] sm:$0xf0]  ;;  %v8326_v29 = vld [vmem:[%s17139_s12 + $0x4c0] sm:$0xf] }
 0x4c5   : > { %v8350_v44 = vld [vmem:[%s17139_s12 + $0x4f0] sm:$0xf] }
 0x4c7   : > { %5493 = vmatpush.bf16.msra.mxu3 %v7855_v45  ;;  %v10995_v45 = vld [vmem:[%s17139_s12 + $0x3c4] sm:$0xf0] }
 0x4c8   : > { %v1404_v59 = vld [vmem:[#allocation1 + $0x4] ss:$9 sm:$0xff]  ;;  %5517 = vmatpush.bf16.msra.mxu0 %v7999_v53 }
 0x4c9   : > { %1405 = vrot.lane.b32.xlu2 %v1404_v59, %s11675_s5  ;;  %1415 = vst [vmem:[#allocation1] sm:$0xff] %v12056_v15  ;;  %s11676_s5 = smov 44   ;;  %v7911_v59 = vor.u32 %v10923_v57, %v7910_v56  ;;  %v10993_v56 = vld [vmem:[%s17139_s12 + $0x3b4] sm:$0xf0] }
 0x4ca   : > { %v8191_v62 = vor.u32 %v10993_v56, %v8190_v55  ;;  %v8406_v55 = vld [vmem:[%s17139_s12 + $0x560] sm:$0xf]  ;;  %v11047_v56 = vld [vmem:[%s17139_s12 + $0x564] sm:$0xf0] }
 0x4cb   : > { %5494 = vmatpush.bf16.msra.mxu3 %v7847_v58  ;;  %5507 = vmatpush.bf16.msrb.mxu2 %v7911_v59  ;;  %v7990_v59 = vld [vmem:[%s17139_s12 + $0x220] sm:$0xf] }
 0x4cf   : > { %5539 = vmatpush.bf16.msrb.mxu3 %v8159_v4  ;;  %5552 = vmatpush.bf16.msra.mxu2 %v8223_v8  ;;  %v7991_v4 = vor.u32 %v10943_v60, %v7990_v59 }
 0x4d0   : > { %v1417_v23 = vld [vmem:[#allocation1 + $0x5] ss:$9 sm:$0xff] }
 0x4d1   : > { %1418 = vrot.lane.b32.xlu2 %v1417_v23, %s11676_s5  ;;  %1425 = vst [vmem:[#allocation1] sm:$0xff] %v12056_v15  ;;  %s17179_s5 = smov 104   ;;  %v8215_v23 = vor.u32 %v10999_v22, %v8214_v21  ;;  %5518 = vmatpush.bf16.msra.mxu0 %v7991_v4  ;;  %v8111_v22 = vor.u32 %v10973_v17, %v8110_v14  ;;  %v8398_v14 = vld [vmem:[%s17139_s12 + $0x550] sm:$0xf] }
 0x4d2   : > { %v8366_v17 = vld [vmem:[%s17139_s12 + $0x510] sm:$0xf] }
 0x4d3   : > { %5540 = vmatpush.bf16.msrb.mxu3 %v8151_v20  ;;  %5553 = vmatpush.bf16.msra.mxu2 %v8215_v23  ;;  %v10989_v20 = vld [vmem:[%s17139_s12 + $0x394] sm:$0xf0]  ;;  %v7974_v23 = vld [vmem:[%s17139_s12 + $0x200] sm:$0xf] }
 0x4d4   : > { %v8175_v27 = vor.u32 %v10989_v20, %v8174_v18  ;;  %v11045_v18 = vld [vmem:[%s17139_s12 + $0x554] sm:$0xf0]  ;;  %v8462_v20 = vld [vmem:[%s17139_s12 + $0x5d0] sm:$0xf] }
 0x4d7   : > { %5541 = vmatpush.bf16.msrb.mxu3 %v8143_v33  ;;  %5554 = vmatpush.bf16.msra.mxu2 %v8207_v37  ;;  %v7975_v33 = vor.u32 %v10939_v24, %v7974_v23  ;;  %v8262_v24 = vld [vmem:[%s17139_s12 + $0x440] sm:$0xf] }
 0x4d8   : > { %v1427_v49 = vld [vmem:[#allocation1 + $0x6] ss:$9 sm:$0xff] }
 0x4d9   : > { %1428 = vrot.lane.b32.xlu1 %v1427_v49, %s17179_s5  ;;  %1437 = vst [vmem:[#allocation1] sm:$0xff] %v12056_v15  ;;  %v10891_v15 = vld [vmem:[%s17139_s12 + $0x84] sm:$0xf0]  ;;  %v8199_v49 = vor.u32 %v10995_v45, %v8198_v43  ;;  %s11507_s5 = smul.u32 39, %s11834_s26  ;;  %v11017_v43 = vld [vmem:[%s17139_s12 + $0x474] sm:$0xf0] }
 0x4da   : > { %v7783_v54 = vor.u32 %v10891_v15, %v7782_v25  ;;  %v10961_v25 = vld [vmem:[%s17139_s12 + $0x2b4] sm:$0xf0]  ;;  %v8126_v15 = vld [vmem:[%s17139_s12 + $0x330] sm:$0xf]  ;;  %v8287_v53 = vor.u32 %v11017_v43, %v8286_v42 }
 0x4db   : > { %5542 = vmatpush.bf16.msrb.mxu3 %v8135_v48  ;;  %v8063_v57 = vor.u32 %v10961_v25, %v8062_v52  ;;  %5555 = vmatpush.bf16.msra.mxu2 %v8199_v49  ;;  %v11033_v45 = vld [vmem:[%s17139_s12 + $0x4f4] sm:$0xf0]  ;;  %v8342_v52 = vld [vmem:[%s17139_s12 + $0x4e0] sm:$0xf]  ;;  %v11031_v25 = vld [vmem:[%s17139_s12 + $0x4e4] sm:$0xf0] }
 0x4dc   : > { %5481 = vmatpush.bf16.msrb.mxu1 %v7783_v54  ;;  %v10977_v54 = vld [vmem:[%s17139_s12 + $0x334] sm:$0xf0]  ;;  %v8318_v43 = vld [vmem:[%s17139_s12 + $0x4b0] sm:$0xf] }
 0x4dd   : > { %v8127_v58 = vor.u32 %v10977_v54, %v8126_v15  ;;  %v11065_v48 = vld [vmem:[%s17139_s12 + $0x5f4] sm:$0xf0]  ;;  %v8351_v54 = vor.u32 %v11033_v45, %v8350_v44  ;;  %v8382_v45 = vld [vmem:[%s17139_s12 + $0x530] sm:$0xf] }
 0x4de   : > { %v11025_v44 = vld [vmem:[%s17139_s12 + $0x4b4] sm:$0xf0] }
 0x4df   : > { %5543 = vmatpush.bf16.msrb.mxu3 %v8127_v58  ;;  %5556 = vmatpush.bf16.msra.mxu2 %v8191_v62  ;;  %v11063_v58 = vld [vmem:[%s17139_s12 + $0x5e4] sm:$0xf0] }
 0x4e0   : > { %v1439_v13 = vld [vmem:[#allocation1 + $0x7] ss:$9 sm:$0xff]  ;;  %5526 = vmatpush.bf16.msra.mxu1 %v8095_v3 }
 0x4e1   : > { %1440 = vrot.lane.b32.xlu1 %v1439_v13, %s11677_s6  ;;  %1458 = vst [vmem:[#allocation1] sm:$0xff] %v12061_v19  ;;  %v10991_v3 = vld [vmem:[%s17139_s12 + $0x3a4] sm:$0xf0]  ;;  %s11679_s6 = smov 88   ;;  %v10957_v13 = vld [vmem:[%s17139_s12 + $0x294] sm:$0xf0] }
 0x4e2   : > { %v8183_v8 = vor.u32 %v10991_v3, %v8182_v2  ;;  %v8047_v21 = vor.u32 %v10957_v13, %v8046_v12  ;;  %v8270_v3 = vld [vmem:[%s17139_s12 + $0x450] sm:$0xf]  ;;  %v11029_v13 = vld [vmem:[%s17139_s12 + $0x4d4] sm:$0xf0] }
 0x4e3   : > { %5544 = vmatpush.bf16.msrb.mxu3 %v8119_v7  ;;  %v8343_v7 = vor.u32 %v11031_v25, %v8342_v52  ;;  %v8310_v52 = vld [vmem:[%s17139_s12 + $0x4a0] sm:$0xf]  ;;  %v11023_v25 = vld [vmem:[%s17139_s12 + $0x4a4] sm:$0xf0] }
 0x4e4   : > { %5527 = vmatpush.bf16.msra.mxu1 %v8087_v16  ;;  %v7983_v16 = vor.u32 %v10941_v10, %v7982_v9  ;;  %5557 = vmatpush.bf16.msra.mxu2 %v8183_v8  ;;  %v11013_v8 = vld [vmem:[%s17139_s12 + $0x454] sm:$0xf0]  ;;  %v8334_v9 = vld [vmem:[%s17139_s12 + $0x4d0] sm:$0xf]  ;;  %v8407_v10 = vor.u32 %v11047_v56, %v8406_v55  ;;  %v11039_v55 = vld [vmem:[%s17139_s12 + $0x524] sm:$0xf0] }
 0x4e5   : > { %v8335_v23 = vor.u32 %v11029_v13, %v8334_v9  ;;  %v12691_v9 = vld [vmem:[%s17139_s12 + $0x414] sm:$0xf0] }
 0x4e6   : > { %5519 = vmatpush.bf16.msra.mxu0 %v7983_v16  ;;  %v8311_v16 = vor.u32 %v11023_v25, %v8310_v52  ;;  %v8542_v52 = vld [vmem:[%s17139_s12 + $0x670] sm:$0xf]  ;;  %v11081_v25 = vld [vmem:[%s17139_s12 + $0x674] sm:$0xf0] }
 0x4e7   : > { %5545 = vmatpush.bf16.msrb.mxu3 %v8111_v22  ;;  %v8271_v22 = vor.u32 %v11013_v8, %v8270_v3  ;;  %v12686_v8 = vld [vmem:[%s17139_s12 + $0x410] sm:$0xf]  ;;  %v11113_v56 = vld [vmem:[%s17139_s12 + $0x774] sm:$0xf0] }
 0x4e8   : > { %v1460_v46 = vld [vmem:[#allocation1 + $0x1] ss:$9 sm:$0xff]  ;;  %5528 = vmatpush.bf16.msra.mxu1 %v8079_v32  ;;  %5558 = vmatpush.bf16.msra.mxu2 %v8175_v27  ;;  %v8399_v27 = vor.u32 %v11045_v18, %v8398_v14  ;;  %v11037_v18 = vld [vmem:[%s17139_s12 + $0x514] sm:$0xf0] }
 0x4e9   : > { %1461 = vrot.lane.b32.xlu0 %v1460_v46, %s11678_s25  ;;  %1468 = vst [vmem:[#allocation1] sm:$0xff] %v12061_v19  ;;  %v10987_v32 = vld [vmem:[%s17139_s12 + $0x384] sm:$0xf0]  ;;  %s17180_s25 = sld [smem:[#allocation16_spill]]  ;;  %v11049_v46 = vld [vmem:[%s17139_s12 + $0x574] sm:$0xf0] }
 0x4ea   : > { %v8167_v37 = vor.u32 %v10987_v32, %v8166_v31  ;;  %5520 = vmatpush.bf16.msra.mxu0 %v7975_v33  ;;  %v8390_v31 = vld [vmem:[%s17139_s12 + $0x540] sm:$0xf]  ;;  %v11043_v32 = vld [vmem:[%s17139_s12 + $0x544] sm:$0xf0] }
 0x4eb   : > { %5546 = vmatpush.bf16.msrb.mxu3 %v8103_v36  ;;  %v8454_v33 = vld [vmem:[%s17139_s12 + $0x5c0] sm:$0xf] }
 0x4ec   : > { %5529 = vmatpush.bf16.msra.mxu1 %v8071_v47  ;;  %5559 = vmatpush.bf16.msra.mxu2 %v8167_v37  ;;  %v8478_v47 = vld [vmem:[%s17139_s12 + $0x5f0] sm:$0xf]  ;;  %v8263_v37 = vor.u32 %v11011_v26, %v8262_v24 }
 0x4ed   : > { %v8479_v63 = vor.u32 %v11065_v48, %v8478_v47  ;;  %v11057_v47 = vld [vmem:[%s17139_s12 + $0x5b4] sm:$0xf0]  ;;  %v12634_v48 = vld [vmem:[%s17139_s12 + $0x420] sm:$0xf] }
 0x4ef   : > { %s12465_s3 = scalar_lea.vmem %s17180_s25, %s11507_s5 }
 0x4f0   : > { %v1470_v5 = vld [vmem:[#allocation1 + $0x2] ss:$9 sm:$0xff]  ;;  %5530 = vmatpush.bf16.msra.mxu1 %v8063_v57 }
 0x4f1   : > { %1471 = vrot.lane.b32.xlu2 %v1470_v5, %s11679_s6  ;;  %1481 = vst [vmem:[#allocation1] sm:$0xff] %v12061_v19  ;;  %s11682_s6 = smov 12   ;;  %v1536_v40 = vld [vmem:[%s12465_s3] sm:$0xff]  ;;  %v1537_v49 = vld [vmem:[%s12465_s3 + $0x8] sm:$0xff] }
 0x4f2   : > { %v8470_v57 = vld [vmem:[%s17139_s12 + $0x5e0] sm:$0xf] }
 0x4f3   : > { %v8471_v12 = vor.u32 %v11063_v58, %v8470_v57  ;;  %v8438_v58 = vld [vmem:[%s17139_s12 + $0x5a0] sm:$0xf] }
 0x4f4   : > { %5531 = vmatpush.bf16.msra.mxu1 %v8055_v6  ;;  %v8279_v6 = vor.u32 %v11015_v51, %v8278_v50  ;;  %v8319_v50 = vor.u32 %v11025_v44, %v8318_v43  ;;  %v11007_v51 = vld [vmem:[%s17139_s12 + $0x424] sm:$0xf0] }
 0x4f5   : > { %v8247_v14 = vor.u32 %v11007_v51, %v12634_v48  ;;  %v8367_v48 = vor.u32 %v11037_v18, %v8366_v17  ;;  %v11051_v51 = vld [vmem:[%s17139_s12 + $0x584] sm:$0xf0]  ;;  %v8598_v17 = vld [vmem:[%s17139_s12 + $0x6e0] sm:$0xf] }
 0x4f6   : > { %v11095_v18 = vld [vmem:[%s17139_s12 + $0x6e4] sm:$0xf0] }
 0x4f7   : > { %v8599_v26 = vor.u32 %v11095_v18, %v8598_v17 }
 0x4f8   : > { %v1483_v34 = vld [vmem:[#allocation1 + $0x3] ss:$9 sm:$0xff]  ;;  %5532 = vmatpush.bf16.msra.mxu1 %v8047_v21 }
 0x4f9   : > { %1484 = vrot.lane.b32.xlu2 %v1483_v34, %s11680_s1  ;;  %1491 = vst [vmem:[#allocation1] sm:$0xff] %v12061_v19  ;;  %v11061_v21 = vld [vmem:[%s17139_s12 + $0x5d4] sm:$0xf0]  ;;  %v11059_v34 = vld [vmem:[%s17139_s12 + $0x5c4] sm:$0xf0] }
 0x4fa   : > { %v8463_v28 = vor.u32 %v11061_v21, %v8462_v20  ;;  %v8455_v42 = vor.u32 %v11059_v34, %v8454_v33  ;;  %v8430_v20 = vld [vmem:[%s17139_s12 + $0x590] sm:$0xf]  ;;  %v11053_v21 = vld [vmem:[%s17139_s12 + $0x594] sm:$0xf0] }
 0x4fc   : > { %5533 = vmatpush.bf16.msra.mxu1 %v8039_v35 }
 0x500   : > { %v1493_v38 = vld [vmem:[#allocation1 + $0x4] ss:$9 sm:$0xff] }
 0x501   : > { %1494 = vrot.lane.b32.xlu1 %v1493_v38, %s11681_s20  ;;  %1504 = vst [vmem:[#allocation1] sm:$0xff] %v12061_v19  ;;  %v8327_v38 = vor.u32 %v11027_v30, %v8326_v29  ;;  %s579_s20 = sand.u32 1, %s11645_s28  }
 0x502   : > { %s580_s24 = scalar_lea.vmem [#allocation9], %s579_s20  ;;  %s7531_s26 = scalar_lea.sflag [#allocation10], %s579_s20 }
 0x503   : > { %s7541_s25 = sshll.u32 %s580_s24, 4  ;;  %s7542_s25 = int_to_ptr.vmem [resolvable:$true] %s7541_s25 }
 0x508   : > { %v1506_v39 = vld [vmem:[#allocation1 + $0x5] ss:$9 sm:$0xff] }
 0x509   : > { %1507 = vrot.lane.b32.xlu1 %v1506_v39, %s11682_s6  ;;  %1514 = vst [vmem:[#allocation1] sm:$0xff] %v12061_v19  ;;  %v8254_v39 = vld [vmem:[%s17139_s12 + $0x430] sm:$0xf] }
 0x510   : > { %v1516_v41 = vld [vmem:[#allocation1 + $0x6] ss:$9 sm:$0xff] }
 0x511   : > { %1517 = vrot.lane.b32.xlu0 %v1516_v41, %s11683_s7  ;;  %1526 = vst [vmem:[#allocation1] sm:$0xff] %v12061_v19  ;;  %v8414_v19 = vld [vmem:[%s17139_s12 + $0x570] sm:$0xf]  ;;  %v8391_v41 = vor.u32 %v11043_v32, %v8390_v31 }
 0x512   : > { %2301 = vst [vmem:[#allocation1] ss:$9 sm:$0xff] %v1536_v40  ;;  %v8415_v62 = vor.u32 %v11049_v46, %v8414_v19  ;;  %v11009_v40 = vld [vmem:[%s17139_s12 + $0x434] sm:$0xf0]  ;;  %v8446_v46 = vld [vmem:[%s17139_s12 + $0x5b0] sm:$0xf] }
 0x513   : > { %v11041_v19 = vld [vmem:[%s17139_s12 + $0x534] sm:$0xf0] }
 0x518   : > { %v1528_v15 = vld [vmem:[#allocation1 + $0x7] ss:$9 sm:$0xff] }
 0x519   : > { %1529 = vrot.lane.b32.xlu2 %v1528_v15, %s11684_s21  ;;  %v12518_v59 = vld [vmem:[#allocation1] sm:$0xff]  ;;  %v12520_v60 = vld [vmem:[#allocation1 + $0x9] sm:$0xff]  ;;  %v12522_v61 = vld [vmem:[#allocation1 + $0x12] sm:$0xff]  ;;  %v8383_v15 = vor.u32 %v11041_v19, %v8382_v45  ;;  %v8239_v45 = vor.u32 %v12691_v9, %v12686_v8  ;;  %s7539_s21 = scalar_lea.hbm %s17145_s18, %s11802_s0  ;;  %s11611_s0 = scalar_lea.hbm %s17145_s18, 2 }
 0x51a   : > { %5469 = vmatmul.bf16.vlgmr.msrb.gmra.mxu0 %v12518_v59  ;;  %5482 = vmatmul.bf16.vlgmr.msrb.gmra.mxu1 %v12520_v60  ;;  %v12526_v0 = vld [vmem:[#allocation1 + $0x1b] sm:$0xff]  ;;  %v12528_v1 = vld [vmem:[#allocation1 + $0x24] sm:$0xff]  ;;  %v12537_v4 = vld [vmem:[#allocation1 + $0x2d] sm:$0xff]  ;;  %s7543_s7 = sshll.u32 %s7539_s21, 4  ;;  %s7544_s7 = int_to_ptr.hbm [resolvable:$true] %s7543_s7 }
 0x51b   : > { %v12530_v2 = vld [vmem:[#allocation1 + $0x36] sm:$0xff]  ;;  %5495 = vmatmul.bf16.vlgmr.msra.gmra.mxu3 %v12522_v61  ;;  %5508 = vmatmul.bf16.vlgmr.msrb.gmra.mxu2 %v12526_v0  ;;  %v12539_v5 = vld [vmem:[#allocation1 + $0x3f] sm:$0xff]  ;;  %s11605_s22 = sshra.s32 %s7544_s7, 4  ;;  %s11606_s22 = int_to_ptr.hbm [resolvable:$true] %s11605_s22 }
 0x51c   : > { %5565 = vmatpush.bf16.msrb.mxu0 %v8287_v53  ;;  %5578 = vmatpush.bf16.msrb.mxu1 %v8351_v54  ;;  %2311 = vst [vmem:[#allocation1] ss:$9 sm:$0xff] %v1537_v49  ;;  %v8255_v49 = vor.u32 %v11009_v40, %v8254_v39  ;;  %v8447_v53 = vor.u32 %v11057_v47, %v8446_v46  ;;  %v8374_v54 = vld [vmem:[%s17139_s12 + $0x520] sm:$0xf]  ;;  %v11019_v39 = vld [vmem:[%s17139_s12 + $0x484] sm:$0xf0]  ;;  %p11612_p0 = scmp.lt.s32.totalorder %s11606_s22, %s17145_s18 }
 0x51d   : > { %5591 = vmatpush.bf16.msra.mxu3 %v8415_v62  ;;  %5604 = vmatpush.bf16.msrb.mxu2 %v8479_v63  ;;  %v11055_v62 = vld [vmem:[%s17139_s12 + $0x5a4] sm:$0xf0]  ;;  %v8358_v46 = vld [vmem:[%s17139_s12 + $0x500] sm:$0xf]  ;;  %v11129_v8 = vld [vmem:[%s17139_s12 + $0x7f4] sm:$0xf0] }
 0x51e   : > { %v8439_v24 = vor.u32 %v11055_v62, %v8438_v58  ;;  %v11035_v47 = vld [vmem:[%s17139_s12 + $0x504] sm:$0xf0]  ;;  %v11109_v40 = vld [vmem:[%s17139_s12 + $0x754] sm:$0xf0]  ;;  %s11607_s19 = scalar_lea.hbm %s11606_s22, 1 }
 0x51f   : > { %v8359_v63 = vor.u32 %v11035_v47, %v8358_v46  ;;  %v8518_v47 = vld [vmem:[%s17139_s12 + $0x640] sm:$0xf]  ;;  %p11608_p11 = scmp.ne.s32.totalorder %s11606_s22, %s11607_s19  ;;  %p11613_p1 = scmp.lt.s32.totalorder %s11611_s0, %s11607_s19 }
 0x520   : > { %5566 = vmatpush.bf16.msrb.mxu0 %v8279_v6  ;;  %5579 = vmatpush.bf16.msrb.mxu1 %v8343_v7 }
 0x521   : > { %5592 = vmatpush.bf16.msra.mxu3 %v8407_v10  ;;  %5605 = vmatpush.bf16.msrb.mxu2 %v8471_v12  ;;  %v8302_v10 = vld [vmem:[%s17139_s12 + $0x490] sm:$0xf]  ;;  %v11021_v12 = vld [vmem:[%s17139_s12 + $0x494] sm:$0xf0]  ;;  %p11609_p12 = pnand %p11608_p11, %p11819_p5  ;;  %p11614_p2 = por %p11613_p1, %p11612_p0 }
 0x522   : > { %v8303_v19 = vor.u32 %v11021_v12, %v8302_v10  ;;  %v8534_v12 = vld [vmem:[%s17139_s12 + $0x660] sm:$0xf] }
 0x523   : > { %v12600_v35 = vpop.permute.xlu0 %1448  ;;  %v1373_v36 = vpop.permute.xlu1 %1372  ;;  %v12733_v29 = vld [vmem:[#allocation1 + $0x12] sm:$0xff]  ;;  %v12736_v31 = vld [vmem:[#allocation1 + $0x9] sm:$0xff]  ;;  %v12738_v32 = vld [vmem:[#allocation1 + $0x1b] sm:$0xff]  ;;  %p11610_p13 = pneg %p11609_p12 }
 0x524   : > { %5567 = vmatpush.bf16.msrb.mxu0 %v8271_v22  ;;  %5580 = vmatpush.bf16.msrb.mxu1 %v8335_v23  ;;  %1378 = vst.msk [vmem:[#allocation8] sm:$0x1] %vm1377_vm3, %v1373_v36  ;;  %v12679_v6 = vpop.permute.xlu2 %1405  ;;  %v1538_v22 = vld [vmem:[%s12465_s3 + $0x10] sm:$0xff]  ;;  %v8375_v23 = vor.u32 %v11039_v55, %v8374_v54  ;;  %v12745_v34 = vld [vmem:[#allocation1 + $0x24] sm:$0xff]  ;;  %v8230_v36 = vld [vmem:[%s17139_s12 + $0x400] sm:$0xf] }
 0x525   : > { %5593 = vmatpush.bf16.msra.mxu3 %v8399_v27  ;;  %5606 = vmatpush.bf16.msrb.mxu2 %v8463_v28  ;;  %v12731_v28 = vld [vmem:[#allocation1] sm:$0xff]  ;;  %v1407_v44 = vrot.slane %v12679_v6, 7  ;;  %vm1413_vm3 = vmand %vm12722_vm13, %vm12727_vm14  ;;  %v11097_v54 = vld [vmem:[%s17139_s12 + $0x6f4] sm:$0xf0]  ;;  %vm13064_vm13 = vcmp.ge.s32.totalorder %v1363_v11, 96  ;;  %vm13069_vm14 = vcmp.lt.s32.totalorder %v1363_v11, 156  ;;  %p11615_p3 = pnand %p11614_p2, %p11610_p13 }
 0x526   : > { %v12773_v43 = vld [vmem:[#allocation1 + $0x3f] sm:$0xff]  ;;  %v8670_v55 = vld [vmem:[%s17139_s12 + $0x770] sm:$0xf] }
 0x527   : > { %v1409_v57 = vsel %vm1408_vm2, %v1407_v44, %v12679_v6  ;;  %v8543_v6 = vor.u32 %v11081_v25, %v8542_v52  ;;  %v8526_v27 = vld [vmem:[%s17139_s12 + $0x650] sm:$0xf]  ;;  %v11091_v52 = vld [vmem:[%s17139_s12 + $0x6c4] sm:$0xf0]  ;;  %v8646_v25 = vld [vmem:[%s17139_s12 + $0x740] sm:$0xf] }
 0x528   : > { %5568 = vmatpush.bf16.msrb.mxu0 %v8263_v37  ;;  %5581 = vmatpush.bf16.msrb.mxu1 %v8327_v38  ;;  %v11003_v37 = vld [vmem:[%s17139_s12 + $0x404] sm:$0xf0]  ;;  %v8294_v38 = vld [vmem:[%s17139_s12 + $0x480] sm:$0xf]  ;;  %v8718_v44 = vld [vmem:[%s17139_s12 + $0x7d0] sm:$0xf] }
 0x529   : > { %5594 = vmatpush.bf16.msra.mxu3 %v8391_v41  ;;  %5607 = vmatpush.bf16.msrb.mxu2 %v8455_v42  ;;  %v12769_v41 = vld [vmem:[#allocation1 + $0x36] sm:$0xff]  ;;  %v12771_v42 = vld [vmem:[#allocation1 + $0x2d] sm:$0xff]  ;;  %v8231_v58 = vor.u32 %v11003_v37, %v8230_v36  ;;  %v8295_v62 = vor.u32 %v11019_v39, %v8294_v38  ;;  %vm13129_vm2 = vcmp.lt.s32.totalorder %v1363_v11, 88 }
 0x52a   : > { %5521 = vmatmul.bf16.vlgmr.msra.gmra.mxu0 %v12528_v1  ;;  %5534 = vmatmul.bf16.vlgmr.msra.gmra.mxu1 %v12537_v4  ;;  %2321 = vst [vmem:[#allocation1] ss:$9 sm:$0xff] %v1538_v22  ;;  %v8726_v22 = vld [vmem:[%s17139_s12 + $0x7e0] sm:$0xf]  ;;  %v8590_v37 = vld [vmem:[%s17139_s12 + $0x6d0] sm:$0xf] }
 0x52b   : > { %5547 = vmatmul.bf16.vlgmr.msrb.gmra.mxu3 %v12530_v2  ;;  %v1383_v7 = vpop.permute.xlu0 %1382  ;;  %5560 = vmatmul.bf16.vlgmr.msra.gmra.mxu2 %v12539_v5  ;;  %v11093_v38 = vld [vmem:[%s17139_s12 + $0x6d4] sm:$0xf0]  ;;  %v8654_v39 = vld [vmem:[%s17139_s12 + $0x750] sm:$0xf] }
 0x52c   : > { %5569 = vmatpush.bf16.msrb.mxu0 %v8255_v49  ;;  %5582 = vmatpush.bf16.msrb.mxu1 %v8319_v50  ;;  %v1384_v13 = vrot.slane %v1383_v7, 7  ;;  %v8431_v49 = vor.u32 %v11053_v21, %v8430_v20  ;;  %v8422_v50 = vld [vmem:[%s17139_s12 + $0x580] sm:$0xf]  ;;  %v1419_v9 = vpop.permute.xlu2 %1418  ;;  %v11111_v21 = vld [vmem:[%s17139_s12 + $0x764] sm:$0xf0]  ;;  %v8591_v46 = vor.u32 %v11093_v38, %v8590_v37 }
 0x52d   : > { %5595 = vmatpush.bf16.msra.mxu3 %v8383_v15  ;;  %5608 = vmatpush.bf16.msrb.mxu2 %v8447_v53  ;;  %v8606_v15 = vld [vmem:[%s17139_s12 + $0x6f0] sm:$0xf]  ;;  %v8423_v3 = vor.u32 %v11051_v51, %v8422_v50  ;;  %v8662_v20 = vld [vmem:[%s17139_s12 + $0x760] sm:$0xf]  ;;  %v11087_v37 = vld [vmem:[%s17139_s12 + $0x6a4] sm:$0xf0] }
 0x52e   : > { %v1386_v30 = vsel %vm1385_vm4, %v1384_v13, %v1383_v7  ;;  %vm1423_vm4 = vmand %vm12741_vm15, %vm12765_vm1  ;;  %v8734_v7 = vld [vmem:[%s17139_s12 + $0x7f0] sm:$0xf]  ;;  %v8607_v10 = vor.u32 %v11097_v54, %v8606_v15  ;;  %v11079_v13 = vld [vmem:[%s17139_s12 + $0x664] sm:$0xf0]  ;;  %v8663_v33 = vor.u32 %v11111_v21, %v8662_v20  ;;  %vm13124_vm1 = vcmp.ge.s32.totalorder %v1363_v11, 28 }
 0x52f   : > { %1391 = vst.msk [vmem:[#allocation8] sm:$0x3] %vm1390_vm10, %v1386_v30  ;;  %v11077_v30 = vld [vmem:[%s17139_s12 + $0x654] sm:$0xf0]  ;;  %v8582_v51 = vld [vmem:[%s17139_s12 + $0x6c0] sm:$0xf]  ;;  %vm1456_vm15 = vmand %vm13064_vm13, %vm13069_vm14 }
 0x530   : > { %5570 = vmatpush.bf16.msrb.mxu0 %v8247_v14  ;;  %5583 = vmatpush.bf16.msrb.mxu1 %v8311_v16  ;;  %v8671_v14 = vor.u32 %v11113_v56, %v8670_v55  ;;  %v8735_v16 = vor.u32 %v11129_v8, %v8734_v7  ;;  %v11107_v15 = vld [vmem:[%s17139_s12 + $0x744] sm:$0xf0]  ;;  %v8510_v55 = vld [vmem:[%s17139_s12 + $0x630] sm:$0xf]  ;;  %v11073_v56 = vld [vmem:[%s17139_s12 + $0x634] sm:$0xf0]  ;;  %v8583_v8 = vor.u32 %v11091_v52, %v8582_v51 }
 0x531   : > { %5596 = vmatpush.bf16.msra.mxu3 %v8375_v23  ;;  %5609 = vmatpush.bf16.msrb.mxu2 %v8439_v24  ;;  %v11127_v23 = vld [vmem:[%s17139_s12 + $0x7e4] sm:$0xf0]  ;;  %v8535_v24 = vor.u32 %v11079_v13, %v8534_v12  ;;  %v8647_v12 = vor.u32 %v11107_v15, %v8646_v25  ;;  %v12946_v17 = vld [vmem:[#allocation1 + $0x1b] sm:$0xff]  ;;  %v12952_v21 = vld [vmem:[#allocation1 + $0x2d] sm:$0xff]  ;;  %vm13020_vm10 = vcmp.ge.s32.totalorder %v1363_v11, 36  ;;  %vm13380_vm13 = vcmp.ge.s32.totalorder %v1363_v11, 80 }
 0x532   : > { %v8727_v36 = vor.u32 %v11127_v23, %v8726_v22  ;;  %v11123_v54 = vld [vmem:[%s17139_s12 + $0x7c4] sm:$0xf0]  ;;  %v12950_v20 = vld [vmem:[#allocation1 + $0x36] sm:$0xff]  ;;  %v8502_v22 = vld [vmem:[%s17139_s12 + $0x620] sm:$0xf]  ;;  %v8511_v23 = vor.u32 %v11073_v56, %v8510_v55  ;;  %v1450_v56 = vrot.slane %v12600_v35, 7 }
 0x533   : > { %v1396_v53 = vpop.permute.xlu0 %1395  ;;  %v12948_v18 = vld [vmem:[#allocation1 + $0x24] sm:$0xff]  ;;  %v8630_v38 = vld [vmem:[%s17139_s12 + $0x720] sm:$0xf]  ;;  %v11085_v51 = vld [vmem:[%s17139_s12 + $0x694] sm:$0xf0]  ;;  %vm13385_vm14 = vcmp.lt.s32.totalorder %v1363_v11, 140 }
 0x534   : > { %5571 = vmatpush.bf16.msrb.mxu0 %v8239_v45  ;;  %5584 = vmatpush.bf16.msrb.mxu1 %v8303_v19  ;;  %1401 = vst.msk [vmem:[#allocation8 + $0x1] sm:$0x1] %vm1400_vm11, %v1396_v53  ;;  %v11125_v45 = vld [vmem:[%s17139_s12 + $0x7d4] sm:$0xf0]  ;;  %v8527_v19 = vor.u32 %v11077_v30, %v8526_v27  ;;  %v8710_v53 = vld [vmem:[%s17139_s12 + $0x7c0] sm:$0xf]  ;;  %vm1466_vm6 = vmand %vm13124_vm1, %vm13129_vm2 }
 0x535   : > { %5597 = vmatpush.bf16.msra.mxu3 %v8367_v48  ;;  %5610 = vmatpush.bf16.msrb.mxu2 %v8431_v49  ;;  %1414 = vst.msk [vmem:[#allocation8 + $0x1] sm:$0x3] %vm1413_vm3, %v1409_v57  ;;  %v11075_v48 = vld [vmem:[%s17139_s12 + $0x644] sm:$0xf0]  ;;  %v8655_v49 = vor.u32 %v11109_v40, %v8654_v39  ;;  %v8719_v50 = vor.u32 %v11125_v45, %v8718_v44  ;;  %v8574_v57 = vld [vmem:[%s17139_s12 + $0x6b0] sm:$0xf] }
 0x536   : > { %1424 = vst.msk [vmem:[#allocation8 + $0x2] sm:$0x1] %vm1423_vm4, %v1419_v9  ;;  %v8519_v7 = vor.u32 %v11075_v48, %v8518_v47  ;;  %v8638_v9 = vld [vmem:[%s17139_s12 + $0x730] sm:$0xf]  ;;  %v8711_v13 = vor.u32 %v11123_v54, %v8710_v53  ;;  %v8566_v27 = vld [vmem:[%s17139_s12 + $0x6a0] sm:$0xf] }
 0x537   : > { %v12963_v30 = vld [vmem:[#allocation1 + $0x3f] sm:$0xff]  ;;  %v11103_v39 = vld [vmem:[%s17139_s12 + $0x724] sm:$0xf0]  ;;  %v8494_v45 = vld [vmem:[%s17139_s12 + $0x610] sm:$0xf]  ;;  %v8567_v48 = vor.u32 %v11087_v37, %v8566_v27  ;;  %vm13025_vm11 = vcmp.lt.s32.totalorder %v1363_v11, 96 }
 0x538   : > { %5572 = vmatpush.bf16.msrb.mxu0 %v8231_v58  ;;  %5585 = vmatpush.bf16.msrb.mxu1 %v8295_v62  ;;  %v11089_v58 = vld [vmem:[%s17139_s12 + $0x6b4] sm:$0xf0]  ;;  %v8694_v40 = vld [vmem:[%s17139_s12 + $0x7a0] sm:$0xf]  ;;  %v11119_v44 = vld [vmem:[%s17139_s12 + $0x7a4] sm:$0xf0]  ;;  %v8631_v25 = vor.u32 %v11103_v39, %v8630_v38 }
 0x539   : > { %5598 = vmatpush.bf16.msra.mxu3 %v8359_v63  ;;  %5611 = vmatpush.bf16.msrb.mxu2 %v8423_v3  ;;  %v1539_v62 = vld [vmem:[%s12465_s3 + $0x18] sm:$0xff]  ;;  %v8702_v3 = vld [vmem:[%s17139_s12 + $0x7b0] sm:$0xf]  ;;  %v8695_v15 = vor.u32 %v11119_v44, %v8694_v40  ;;  %vm13148_vm3 = vcmp.ge.s32.totalorder %v1363_v11, 88  ;;  %vm13153_vm4 = vcmp.lt.s32.totalorder %v1363_v11, 148  ;;  %vm13428_vm1 = vcmp.ge.s32.totalorder %v1363_v11, 12 }
 0x53a   : > { %v11105_v63 = vld [vmem:[%s17139_s12 + $0x734] sm:$0xf0]  ;;  %v8622_v53 = vld [vmem:[%s17139_s12 + $0x710] sm:$0xf]  ;;  %vm1479_vm7 = vmand %vm13148_vm3, %vm13153_vm4  ;;  %vm13433_vm2 = vcmp.lt.s32.totalorder %v1363_v11, 72  ;;  %vm13519_vm4 = vcmp.ge.s32.totalorder %v1363_v11, 72 }
 0x53b   : > { %5573 = vmatmul.bf16.vlgmr.msrb.gmra.mxu0 %v12731_v28  ;;  %5586 = vmatmul.bf16.vlgmr.msrb.gmra.mxu1 %v12736_v31  ;;  %v11101_v54 = vld [vmem:[%s17139_s12 + $0x714] sm:$0xf0]  ;;  %v8686_v55 = vld [vmem:[%s17139_s12 + $0x790] sm:$0xf]  ;;  %vm1512_vm3 = vmand %vm13428_vm1, %vm13433_vm2 }
 0x53c   : > { %5617 = vmatpush.bf16.msra.mxu0 %v8543_v6  ;;  %5630 = vmatpush.bf16.msra.mxu1 %v8607_v10  ;;  %v11121_v6 = vld [vmem:[%s17139_s12 + $0x7b4] sm:$0xf0]  ;;  %v12940_v10 = vld [vmem:[#allocation1] sm:$0xff]  ;;  %v8798_v38 = vld [vmem:[%s17139_s12 + $0x870] sm:$0xf] }
 0x53d   : > { %5643 = vmatpush.bf16.msrb.mxu3 %v8671_v14  ;;  %5656 = vmatpush.bf16.msra.mxu2 %v8735_v16  ;;  %v12942_v14 = vld [vmem:[#allocation1 + $0x12] sm:$0xff]  ;;  %v12944_v16 = vld [vmem:[#allocation1 + $0x9] sm:$0xff] }
 0x53e   : > { %5599 = vmatmul.bf16.vlgmr.msra.gmra.mxu3 %v12733_v29  ;;  %5612 = vmatmul.bf16.vlgmr.msrb.gmra.mxu2 %v12738_v32  ;;  %2331 = vst [vmem:[#allocation1] ss:$9 sm:$0xff] %v1539_v62  ;;  %v11145_v39 = vld [vmem:[%s17139_s12 + $0x874] sm:$0xf0]  ;;  %v8862_v40 = vld [vmem:[%s17139_s12 + $0x8f0] sm:$0xf] }
 0x53f   : > { %v11161_v44 = vld [vmem:[%s17139_s12 + $0x8f4] sm:$0xf0] }
 0x540   : > { %5618 = vmatpush.bf16.msra.mxu0 %v8535_v24  ;;  %5631 = vmatpush.bf16.msra.mxu1 %v8599_v26  ;;  %v8575_v24 = vor.u32 %v11089_v58, %v8574_v57  ;;  %v11071_v26 = vld [vmem:[%s17139_s12 + $0x624] sm:$0xf0]  ;;  %v11117_v58 = vld [vmem:[%s17139_s12 + $0x794] sm:$0xf0] }
 0x541   : > { %5644 = vmatpush.bf16.msrb.mxu3 %v8663_v33  ;;  %5657 = vmatpush.bf16.msra.mxu2 %v8727_v36  ;;  %v8639_v33 = vor.u32 %v11105_v63, %v8638_v9  ;;  %v8703_v36 = vor.u32 %v11121_v6, %v8702_v3  ;;  %v8503_v47 = vor.u32 %v11071_v26, %v8502_v22  ;;  %v11067_v9 = vld [vmem:[%s17139_s12 + $0x604] sm:$0xf0]  ;;  %v8550_v63 = vld [vmem:[%s17139_s12 + $0x680] sm:$0xf] }
 0x542   : > { %v11083_v3 = vld [vmem:[%s17139_s12 + $0x684] sm:$0xf0]  ;;  %v8614_v22 = vld [vmem:[%s17139_s12 + $0x700] sm:$0xf]  ;;  %v8623_v26 = vor.u32 %v11101_v54, %v8622_v53  ;;  %v8687_v27 = vor.u32 %v11117_v58, %v8686_v55  ;;  %v1452_v53 = vsel %vm1451_vm5, %v1450_v56, %v12600_v35  ;;  %v8799_v54 = vor.u32 %v11145_v39, %v8798_v38  ;;  %v11157_v38 = vld [vmem:[%s17139_s12 + $0x8d4] sm:$0xf0] }
 0x543   : > { %v8863_v55 = vor.u32 %v11161_v44, %v8862_v40  ;;  %v11159_v58 = vld [vmem:[%s17139_s12 + $0x8e4] sm:$0xf0]  ;;  %v8918_v35 = vld [vmem:[%s17139_s12 + $0x960] sm:$0xf]  ;;  %vm1474_vm5 = vcmask 719872  }
 0x544   : > { %5619 = vmatpush.bf16.msra.mxu0 %v8527_v19  ;;  %5632 = vmatpush.bf16.msra.mxu1 %v8591_v46  ;;  %v11177_v19 = vld [vmem:[%s17139_s12 + $0x974] sm:$0xf0]  ;;  %v8910_v39 = vld [vmem:[%s17139_s12 + $0x950] sm:$0xf] }
 0x545   : > { %5645 = vmatpush.bf16.msrb.mxu3 %v8655_v49  ;;  %5658 = vmatpush.bf16.msra.mxu2 %v8719_v50  ;;  %v11069_v49 = vld [vmem:[%s17139_s12 + $0x614] sm:$0xf0]  ;;  %v8558_v50 = vld [vmem:[%s17139_s12 + $0x690] sm:$0xf] }
 0x546   : > { %v11173_v40 = vld [vmem:[%s17139_s12 + $0x954] sm:$0xf0]  ;;  %v8974_v44 = vld [vmem:[%s17139_s12 + $0x9d0] sm:$0xf] }
 0x547   : > { %v13249_v62 = vld [vmem:[#allocation1 + $0x1b] sm:$0xff] }
 0x548   : > { %5620 = vmatpush.bf16.msra.mxu0 %v8519_v7  ;;  %5633 = vmatpush.bf16.msra.mxu1 %v8583_v8  ;;  %v8486_v8 = vld [vmem:[%s17139_s12 + $0x600] sm:$0xf]  ;;  %v11175_v7 = vld [vmem:[%s17139_s12 + $0x964] sm:$0xf0] }
 0x549   : > { %5646 = vmatpush.bf16.msrb.mxu3 %v8647_v12  ;;  %5659 = vmatpush.bf16.msra.mxu2 %v8711_v13  ;;  %v8495_v12 = vor.u32 %v11069_v49, %v8494_v45  ;;  %v8559_v13 = vor.u32 %v11085_v51, %v8558_v50  ;;  %v8926_v45 = vld [vmem:[%s17139_s12 + $0x970] sm:$0xf]  ;;  %v8487_v46 = vor.u32 %v11067_v9, %v8486_v8  ;;  %v11193_v49 = vld [vmem:[%s17139_s12 + $0x9f4] sm:$0xf0] }
 0x54a   : > { %v8927_v9 = vor.u32 %v11177_v19, %v8926_v45  ;;  %v11189_v45 = vld [vmem:[%s17139_s12 + $0x9d4] sm:$0xf0] }
 0x54b   : > { %v1429_v52 = vpop.permute.xlu1 %1428  ;;  %v1472_v8 = vpop.permute.xlu2 %1471  ;;  %v8975_v56 = vor.u32 %v11189_v45, %v8974_v44  ;;  %v11185_v44 = vld [vmem:[%s17139_s12 + $0x9b4] sm:$0xf0] }
 0x54c   : > { %5621 = vmatpush.bf16.msra.mxu0 %v8511_v23  ;;  %5634 = vmatpush.bf16.msra.mxu1 %v8575_v24  ;;  %v1430_v57 = vrot.slane %v1429_v52, 7  ;;  %v11099_v23 = vld [vmem:[%s17139_s12 + $0x704] sm:$0xf0]  ;;  %v8678_v24 = vld [vmem:[%s17139_s12 + $0x780] sm:$0xf] }
 0x54d   : > { %5647 = vmatpush.bf16.msrb.mxu3 %v8639_v33  ;;  %5660 = vmatpush.bf16.msra.mxu2 %v8703_v36  ;;  %v11115_v33 = vld [vmem:[%s17139_s12 + $0x784] sm:$0xf0]  ;;  %v8615_v51 = vor.u32 %v11099_v23, %v8614_v22  ;;  %v8782_v22 = vld [vmem:[%s17139_s12 + $0x850] sm:$0xf]  ;;  %v1473_v23 = vrot.slane %v1472_v8, 7  ;;  %v8919_v36 = vor.u32 %v11175_v7, %v8918_v35  ;;  %v8911_v35 = vor.u32 %v11173_v40, %v8910_v39 }
 0x54e   : > { %v1431_v6 = vsel %vm785_vm8, %v1430_v57, %v1429_v52  ;;  %vm1445_vm8 = vmand %vm13020_vm10, %vm13025_vm11  ;;  %v8679_v52 = vor.u32 %v11115_v33, %v8678_v24  ;;  %v8854_v57 = vld [vmem:[%s17139_s12 + $0x8e0] sm:$0xf]  ;;  %v8846_v33 = vld [vmem:[%s17139_s12 + $0x8d0] sm:$0xf]  ;;  %vm13197_vm10 = vcmp.lt.s32.totalorder %v1363_v11, 80 }
 0x54f   : > { %1436 = vst.msk [vmem:[#allocation8 + $0x2] sm:$0x3] %vm1435_vm9, %v1431_v6  ;;  %v11191_v6 = vld [vmem:[%s17139_s12 + $0x9e4] sm:$0xf0]  ;;  %vm13192_vm9 = vcmp.ge.s32.totalorder %v1363_v11, 20 }
 0x550   : > { %5622 = vmatpush.bf16.msra.mxu0 %v8503_v47  ;;  %5635 = vmatpush.bf16.msra.mxu1 %v8567_v48  ;;  %v8551_v47 = vor.u32 %v11083_v3, %v8550_v63  ;;  %v8990_v48 = vld [vmem:[%s17139_s12 + $0x9f0] sm:$0xf]  ;;  %v8982_v3 = vld [vmem:[%s17139_s12 + $0x9e0] sm:$0xf]  ;;  %vm1489_vm11 = vmand %vm13192_vm9, %vm13197_vm10 }
 0x551   : > { %5648 = vmatpush.bf16.msrb.mxu3 %v8631_v25  ;;  %5661 = vmatpush.bf16.msra.mxu2 %v8695_v15  ;;  %v8790_v25 = vld [vmem:[%s17139_s12 + $0x860] sm:$0xf]  ;;  %v11143_v15 = vld [vmem:[%s17139_s12 + $0x864] sm:$0xf0]  ;;  %v8991_v63 = vor.u32 %v11193_v49, %v8990_v48  ;;  %v8983_v37 = vor.u32 %v11191_v6, %v8982_v3  ;;  %v13253_v3 = vld [vmem:[#allocation1 + $0x36] sm:$0xff] }
 0x552   : > { %v8791_v24 = vor.u32 %v11143_v15, %v8790_v25  ;;  %v8774_v48 = vld [vmem:[%s17139_s12 + $0x840] sm:$0xf]  ;;  %v11139_v49 = vld [vmem:[%s17139_s12 + $0x844] sm:$0xf0]  ;;  %v1475_v25 = vsel %vm1474_vm5, %v1473_v23, %v1472_v8  ;;  %v13255_v6 = vld [vmem:[#allocation1 + $0x2d] sm:$0xff]  ;;  %vm13524_vm5 = vcmp.lt.s32.totalorder %v1363_v11, 132 }
 0x553   : > { %v1441_v50 = vpop.permute.xlu1 %1440  ;;  %v13234_v8 = vld [vmem:[#allocation1] sm:$0xff]  ;;  %v8775_v23 = vor.u32 %v11139_v49, %v8774_v48  ;;  %v11169_v39 = vld [vmem:[%s17139_s12 + $0x934] sm:$0xf0]  ;;  %v8958_v40 = vld [vmem:[%s17139_s12 + $0x9b0] sm:$0xf] }
 0x554   : > { %5623 = vmatpush.bf16.msra.mxu0 %v8495_v12  ;;  %5636 = vmatpush.bf16.msra.mxu1 %v8559_v13  ;;  %1446 = vst.msk [vmem:[#allocation8 + $0x3] sm:$0x1] %vm1445_vm8, %v1441_v50  ;;  %v8838_v50 = vld [vmem:[%s17139_s12 + $0x8c0] sm:$0xf]  ;;  %v13251_v7 = vld [vmem:[#allocation1 + $0x24] sm:$0xff]  ;;  %v1485_v13 = vpop.permute.xlu2 %1484  ;;  %v8959_v49 = vor.u32 %v11185_v44, %v8958_v40  ;;  %vm1497_vm8 = vcmask 654336   ;;  %vm1524_vm9 = vmand %vm13519_vm4, %vm13524_vm5 }
 0x555   : > { %5649 = vmatpush.bf16.msrb.mxu3 %v8623_v26  ;;  %5662 = vmatpush.bf16.msra.mxu2 %v8687_v27  ;;  %1457 = vst.msk [vmem:[#allocation8 + $0x3] sm:$0x3] %vm1456_vm15, %v1452_v53  ;;  %v8855_v26 = vor.u32 %v11159_v58, %v8854_v57  ;;  %v11141_v27 = vld [vmem:[%s17139_s12 + $0x854] sm:$0xf0]  ;;  %v8847_v53 = vor.u32 %v11157_v38, %v8846_v33  ;;  %v8966_v57 = vld [vmem:[%s17139_s12 + $0x9c0] sm:$0xf]  ;;  %vm1502_vm15 = vmand %vm13380_vm13, %vm13385_vm14 }
 0x556   : > { %v8783_v15 = vor.u32 %v11141_v27, %v8782_v22  ;;  %v11187_v58 = vld [vmem:[%s17139_s12 + $0x9c4] sm:$0xf0]  ;;  %v13257_v12 = vld [vmem:[#allocation1 + $0x3f] sm:$0xff]  ;;  %v8766_v22 = vld [vmem:[%s17139_s12 + $0x830] sm:$0xf] }
 0x557   : > { %v8830_v27 = vld [vmem:[%s17139_s12 + $0x8b0] sm:$0xf]  ;;  %v11147_v40 = vld [vmem:[%s17139_s12 + $0x884] sm:$0xf0] }
 0x558   : > { %5624 = vmatpush.bf16.msra.mxu0 %v8487_v46  ;;  %5637 = vmatpush.bf16.msra.mxu1 %v8551_v47  ;;  %v8894_v38 = vld [vmem:[%s17139_s12 + $0x930] sm:$0xf]  ;;  %v8758_v46 = vld [vmem:[%s17139_s12 + $0x820] sm:$0xf] }
 0x559   : > { %5650 = vmatpush.bf16.msrb.mxu3 %v8615_v51  ;;  %5663 = vmatpush.bf16.msra.mxu2 %v8679_v52  ;;  %v11155_v51 = vld [vmem:[%s17139_s12 + $0x8c4] sm:$0xf0]  ;;  %v1540_v52 = vld [vmem:[%s12465_s3 + $0x20] sm:$0x7f]  ;;  %v8895_v48 = vor.u32 %v11169_v39, %v8894_v38 }
 0x55a   : > { %v11131_v38 = vld [vmem:[%s17139_s12 + $0x804] sm:$0xf0]  ;;  %v8806_v39 = vld [vmem:[%s17139_s12 + $0x880] sm:$0xf] }
 0x55b   : > { %5625 = vmatmul.bf16.vlgmr.msra.gmra.mxu0 %v12745_v34  ;;  %5638 = vmatmul.bf16.vlgmr.msra.gmra.mxu1 %v12771_v42  ;;  %v1462_v47 = vpop.permute.xlu0 %1461 }
 0x55c   : > { %5669 = vmatpush.bf16.msrb.mxu0 %v8799_v54  ;;  %5682 = vmatpush.bf16.msrb.mxu1 %v8863_v55  ;;  %1467 = vst.msk [vmem:[#allocation8 + $0x4] sm:$0x1] %vm1466_vm6, %v1462_v47  ;;  %v8902_v54 = vld [vmem:[%s17139_s12 + $0x940] sm:$0xf]  ;;  %v11171_v55 = vld [vmem:[%s17139_s12 + $0x944] sm:$0xf0] }
 0x55d   : > { %5695 = vmatpush.bf16.msra.mxu3 %v8927_v9  ;;  %5708 = vmatpush.bf16.msrb.mxu2 %v8991_v63  ;;  %v13236_v9 = vld [vmem:[#allocation1 + $0x12] sm:$0xff]  ;;  %v13238_v63 = vld [vmem:[#allocation1 + $0x9] sm:$0xff]  ;;  %1480 = vst.msk [vmem:[#allocation8 + $0x4] sm:$0x3] %vm1479_vm7, %v1475_v25  ;;  %v8903_v33 = vor.u32 %v11171_v55, %v8902_v54  ;;  %vm13532_vm6 = vcmp.ge.s32.totalorder %v1363_v11, 4  ;;  %vm13537_vm7 = vcmp.lt.s32.totalorder %v1363_v11, 64 }
 0x55e   : > { %5651 = vmatmul.bf16.vlgmr.msrb.gmra.mxu3 %v12769_v41  ;;  %5664 = vmatmul.bf16.vlgmr.msra.gmra.mxu2 %v12773_v43  ;;  %1490 = vst.msk [vmem:[#allocation8 + $0x5] sm:$0x1] %vm1489_vm11, %v1485_v13  ;;  %v11135_v47 = vld [vmem:[%s17139_s12 + $0x824] sm:$0xf0]  ;;  %v8814_v13 = vld [vmem:[%s17139_s12 + $0x890] sm:$0xf]  ;;  %vm1534_vm10 = vmand %vm13532_vm6, %vm13537_vm7 }
 0x55f   : > { %2341 = vst [vmem:[#allocation1] ss:$9 sm:$0xff] %v1540_v52  ;;  %v8886_v52 = vld [vmem:[%s17139_s12 + $0x920] sm:$0xf]  ;;  %v11167_v25 = vld [vmem:[%s17139_s12 + $0x924] sm:$0xf0]  ;;  %v8759_v54 = vor.u32 %v11135_v47, %v8758_v46 }
 0x560   : > { %5670 = vmatpush.bf16.msrb.mxu0 %v8791_v24  ;;  %5683 = vmatpush.bf16.msrb.mxu1 %v8855_v26  ;;  %v8839_v24 = vor.u32 %v11155_v51, %v8838_v50  ;;  %v11137_v26 = vld [vmem:[%s17139_s12 + $0x834] sm:$0xf0]  ;;  %v8822_v50 = vld [vmem:[%s17139_s12 + $0x8a0] sm:$0xf]  ;;  %v11151_v51 = vld [vmem:[%s17139_s12 + $0x8a4] sm:$0xf0] }
 0x561   : > { %5696 = vmatpush.bf16.msra.mxu3 %v8919_v36  ;;  %5709 = vmatpush.bf16.msrb.mxu2 %v8983_v37  ;;  %v8967_v36 = vor.u32 %v11187_v58, %v8966_v57  ;;  %v11153_v37 = vld [vmem:[%s17139_s12 + $0x8b4] sm:$0xf0]  ;;  %v8767_v45 = vor.u32 %v11137_v26, %v8766_v22  ;;  %v8823_v55 = vor.u32 %v11151_v51, %v8822_v50  ;;  %v8750_v57 = vld [vmem:[%s17139_s12 + $0x810] sm:$0xf]  ;;  %v11163_v46 = vld [vmem:[%s17139_s12 + $0x904] sm:$0xf0] }
 0x562   : > { %v8831_v19 = vor.u32 %v11153_v37, %v8830_v27  ;;  %v11133_v58 = vld [vmem:[%s17139_s12 + $0x814] sm:$0xf0]  ;;  %v8942_v26 = vld [vmem:[%s17139_s12 + $0x990] sm:$0xf]  ;;  %v8934_v47 = vld [vmem:[%s17139_s12 + $0x980] sm:$0xf] }
 0x563   : > { %v11149_v22 = vld [vmem:[%s17139_s12 + $0x894] sm:$0xf0]  ;;  %v9118_v51 = vld [vmem:[%s17139_s12 + $0xaf0] sm:$0xf]  ;;  %v11215_v11 = vld [vmem:[%s17139_s12 + $0xaa4] sm:$0xf0] }
 0x564   : > { %5671 = vmatpush.bf16.msrb.mxu0 %v8783_v15  ;;  %5684 = vmatpush.bf16.msrb.mxu1 %v8847_v53  ;;  %v8950_v15 = vld [vmem:[%s17139_s12 + $0x9a0] sm:$0xf]  ;;  %v11183_v53 = vld [vmem:[%s17139_s12 + $0x9a4] sm:$0xf0]  ;;  %v11181_v27 = vld [vmem:[%s17139_s12 + $0x994] sm:$0xf0]  ;;  %v8815_v37 = vor.u32 %v11149_v22, %v8814_v13 }
 0x565   : > { %5697 = vmatpush.bf16.msra.mxu3 %v8911_v35  ;;  %5710 = vmatpush.bf16.msrb.mxu2 %v8975_v56  ;;  %v8887_v35 = vor.u32 %v11167_v25, %v8886_v52  ;;  %v8951_v56 = vor.u32 %v11183_v53, %v8950_v15  ;;  %v11209_v50 = vld [vmem:[%s17139_s12 + $0xa74] sm:$0xf0]  ;;  %v9182_v25 = vld [vmem:[%s17139_s12 + $0xb70] sm:$0xf]  ;;  %v8807_v53 = vor.u32 %v11147_v40, %v8806_v39  ;;  %v9174_v39 = vld [vmem:[%s17139_s12 + $0xb60] sm:$0xf] }
 0x566   : > { %v11225_v52 = vld [vmem:[%s17139_s12 + $0xaf4] sm:$0xf0]  ;;  %v11239_v40 = vld [vmem:[%s17139_s12 + $0xb64] sm:$0xf0]  ;;  %vm7512_vm11 = vcmask 57344  }
 0x568   : > { %5672 = vmatpush.bf16.msrb.mxu0 %v8775_v23  ;;  %5685 = vmatpush.bf16.msrb.mxu1 %v8839_v24  ;;  %v8878_v23 = vld [vmem:[%s17139_s12 + $0x910] sm:$0xf]  ;;  %v11165_v24 = vld [vmem:[%s17139_s12 + $0x914] sm:$0xf0] }
 0x569   : > { %5698 = vmatpush.bf16.msra.mxu3 %v8903_v33  ;;  %5711 = vmatpush.bf16.msrb.mxu2 %v8967_v36  ;;  %v8742_v33 = vld [vmem:[%s17139_s12 + $0x800] sm:$0xf]  ;;  %v8751_v36 = vor.u32 %v11133_v58, %v8750_v57  ;;  %v8879_v44 = vor.u32 %v11165_v24, %v8878_v23  ;;  %v9246_v57 = vld [vmem:[%s17139_s12 + $0xbf0] sm:$0xf]  ;;  %v11257_v58 = vld [vmem:[%s17139_s12 + $0xbf4] sm:$0xf0]  ;;  %v9119_v23 = vor.u32 %v11225_v52, %v9118_v51 }
 0x56a   : > { %v8743_v15 = vor.u32 %v11131_v38, %v8742_v33  ;;  %v9046_v24 = vld [vmem:[%s17139_s12 + $0xa60] sm:$0xf]  ;;  %v11223_v38 = vld [vmem:[%s17139_s12 + $0xae4] sm:$0xf0]  ;;  %v9102_v51 = vld [vmem:[%s17139_s12 + $0xad0] sm:$0xf] }
 0x56b   : > { %v11233_v52 = vld [vmem:[%s17139_s12 + $0xb34] sm:$0xf0] }
 0x56c   : > { %5673 = vmatpush.bf16.msrb.mxu0 %v8767_v45  ;;  %5686 = vmatpush.bf16.msrb.mxu1 %v8831_v19  ;;  %v8943_v45 = vor.u32 %v11181_v27, %v8942_v26  ;;  %v8870_v19 = vld [vmem:[%s17139_s12 + $0x900] sm:$0xf]  ;;  %v11207_v26 = vld [vmem:[%s17139_s12 + $0xa64] sm:$0xf0] }
 0x56d   : > { %5699 = vmatpush.bf16.msra.mxu3 %v8895_v48  ;;  %5712 = vmatpush.bf16.msrb.mxu2 %v8959_v49  ;;  %v11179_v48 = vld [vmem:[%s17139_s12 + $0x984] sm:$0xf0]  ;;  %v9054_v49 = vld [vmem:[%s17139_s12 + $0xa70] sm:$0xf]  ;;  %v9110_v27 = vld [vmem:[%s17139_s12 + $0xae0] sm:$0xf] }
 0x56e   : > { %v9055_v22 = vor.u32 %v11209_v50, %v9054_v49  ;;  %v9111_v49 = vor.u32 %v11223_v38, %v9110_v27  ;;  %v11205_v50 = vld [vmem:[%s17139_s12 + $0xa54] sm:$0xf0]  ;;  %v11235_v38 = vld [vmem:[%s17139_s12 + $0xb44] sm:$0xf0] }
 0x570   : > { %5674 = vmatpush.bf16.msrb.mxu0 %v8759_v54  ;;  %5687 = vmatpush.bf16.msrb.mxu1 %v8823_v55  ;;  %v8871_v54 = vor.u32 %v11163_v46, %v8870_v19  ;;  %v11241_v55 = vld [vmem:[%s17139_s12 + $0xb74] sm:$0xf0]  ;;  %v11255_v19 = vld [vmem:[%s17139_s12 + $0xbe4] sm:$0xf0]  ;;  %v9047_v46 = vor.u32 %v11207_v26, %v9046_v24  ;;  %v9094_v24 = vld [vmem:[%s17139_s12 + $0xac0] sm:$0xf] }
 0x571   : > { %5700 = vmatpush.bf16.msra.mxu3 %v8887_v35  ;;  %5713 = vmatpush.bf16.msrb.mxu2 %v8951_v56  ;;  %v8935_v35 = vor.u32 %v11179_v48, %v8934_v47  ;;  %v9183_v33 = vor.u32 %v11241_v55, %v9182_v25  ;;  %v9038_v47 = vld [vmem:[%s17139_s12 + $0xa50] sm:$0xf] }
 0x572   : > { %v9166_v55 = vld [vmem:[%s17139_s12 + $0xb50] sm:$0xf]  ;;  %v9039_v56 = vor.u32 %v11205_v50, %v9038_v47  ;;  %v11217_v50 = vld [vmem:[%s17139_s12 + $0xab4] sm:$0xf0] }
 0x573   : > { %v9214_v25 = vld [vmem:[%s17139_s12 + $0xbb0] sm:$0xf] }
 0x574   : > { %5675 = vmatpush.bf16.msrb.mxu0 %v8751_v36  ;;  %5688 = vmatpush.bf16.msrb.mxu1 %v8815_v37  ;;  %v9247_v36 = vor.u32 %v11257_v58, %v9246_v57  ;;  %v1495_v37 = vpop.permute.xlu1 %1494  ;;  %v11237_v57 = vld [vmem:[%s17139_s12 + $0xb54] sm:$0xf0]  ;;  %v9230_v58 = vld [vmem:[%s17139_s12 + $0xbd0] sm:$0xf] }
 0x575   : > { %5701 = vmatpush.bf16.msra.mxu3 %v8879_v44  ;;  %5714 = vmatpush.bf16.msrb.mxu2 %v8943_v45  ;;  %v1496_v44 = vrot.slane %v1495_v37, 7  ;;  %v9238_v45 = vld [vmem:[%s17139_s12 + $0xbe0] sm:$0xf]  ;;  %v9167_v26 = vor.u32 %v11237_v57, %v9166_v55 }
 0x576   : > { %v9014_v55 = vld [vmem:[%s17139_s12 + $0xa20] sm:$0xf] }
 0x577   : > { %v1498_v48 = vsel %vm1497_vm8, %v1496_v44, %v1495_v37  ;;  %v9158_v37 = vld [vmem:[%s17139_s12 + $0xb40] sm:$0xf] }
 0x578   : > { %5676 = vmatpush.bf16.msrb.mxu0 %v8743_v15  ;;  %5689 = vmatpush.bf16.msrb.mxu1 %v8807_v53  ;;  %v9175_v15 = vor.u32 %v11239_v40, %v9174_v39  ;;  %v9239_v53 = vor.u32 %v11255_v19, %v9238_v45  ;;  %1503 = vst.msk [vmem:[#allocation8 + $0x5] sm:$0x3] %vm1502_vm15, %v1498_v48  ;;  %v9222_v39 = vld [vmem:[%s17139_s12 + $0xbc0] sm:$0xf]  ;;  %v11251_v40 = vld [vmem:[%s17139_s12 + $0xbc4] sm:$0xf0] }
 0x579   : > { %5702 = vmatpush.bf16.msra.mxu3 %v8871_v54  ;;  %5715 = vmatpush.bf16.msrb.mxu2 %v8935_v35  ;;  %v11221_v54 = vld [vmem:[%s17139_s12 + $0xad4] sm:$0xf0]  ;;  %v9022_v19 = vld [vmem:[%s17139_s12 + $0xa30] sm:$0xf]  ;;  %v9159_v47 = vor.u32 %v11235_v38, %v9158_v37  ;;  %v9223_v48 = vor.u32 %v11251_v40, %v9222_v39  ;;  %v9206_v37 = vld [vmem:[%s17139_s12 + $0xba0] sm:$0xf] }
 0x57a   : > { %v11253_v35 = vld [vmem:[%s17139_s12 + $0xbd4] sm:$0xf0]  ;;  %v9103_v13 = vor.u32 %v11221_v54, %v9102_v51  ;;  %v9150_v51 = vld [vmem:[%s17139_s12 + $0xb30] sm:$0xf]  ;;  %v11247_v38 = vld [vmem:[%s17139_s12 + $0xba4] sm:$0xf0] }
 0x57b   : > { %5677 = vmatmul.bf16.vlgmr.msrb.gmra.mxu0 %v12940_v10  ;;  %5690 = vmatmul.bf16.vlgmr.msrb.gmra.mxu1 %v12944_v16  ;;  %v9231_v27 = vor.u32 %v11253_v35, %v9230_v58  ;;  %v9006_v39 = vld [vmem:[%s17139_s12 + $0xa10] sm:$0xf]  ;;  %v11211_v35 = vld [vmem:[%s17139_s12 + $0xa84] sm:$0xf0] }
 0x57c   : > { %5721 = vmatpush.bf16.msra.mxu0 %v9055_v22  ;;  %5734 = vmatpush.bf16.msra.mxu1 %v9119_v23  ;;  %v9030_v22 = vld [vmem:[%s17139_s12 + $0xa40] sm:$0xf]  ;;  %v11203_v23 = vld [vmem:[%s17139_s12 + $0xa44] sm:$0xf0] }
 0x57d   : > { %5747 = vmatpush.bf16.msrb.mxu3 %v9183_v33  ;;  %5760 = vmatpush.bf16.msra.mxu2 %v9247_v36  ;;  %v1508_v33 = vpop.permute.xlu1 %1507  ;;  %v11219_v36 = vld [vmem:[%s17139_s12 + $0xac4] sm:$0xf0]  ;;  %v9031_v44 = vor.u32 %v11203_v23, %v9030_v22  ;;  %v9078_v22 = vld [vmem:[%s17139_s12 + $0xaa0] sm:$0xf]  ;;  %v9151_v23 = vor.u32 %v11233_v52, %v9150_v51  ;;  %v9134_v51 = vld [vmem:[%s17139_s12 + $0xb10] sm:$0xf] }
 0x57e   : > { %5703 = vmatmul.bf16.vlgmr.msra.gmra.mxu3 %v12942_v14  ;;  %5716 = vmatmul.bf16.vlgmr.msrb.gmra.mxu2 %v12946_v17  ;;  %1513 = vst.msk [vmem:[#allocation8 + $0x6] sm:$0x1] %vm1512_vm3, %v1508_v33  ;;  %v9095_v45 = vor.u32 %v11219_v36, %v9094_v24  ;;  %v11231_v33 = vld [vmem:[%s17139_s12 + $0xb24] sm:$0xf0]  ;;  %v11229_v52 = vld [vmem:[%s17139_s12 + $0xb14] sm:$0xf0] }
 0x580   : > { %5722 = vmatpush.bf16.msra.mxu0 %v9047_v46  ;;  %5735 = vmatpush.bf16.msra.mxu1 %v9111_v49  ;;  %v11201_v46 = vld [vmem:[%s17139_s12 + $0xa34] sm:$0xf0]  ;;  %v9086_v49 = vld [vmem:[%s17139_s12 + $0xab0] sm:$0xf] }
 0x581   : > { %5748 = vmatpush.bf16.msrb.mxu3 %v9175_v15  ;;  %5761 = vmatpush.bf16.msra.mxu2 %v9239_v53  ;;  %v11249_v15 = vld [vmem:[%s17139_s12 + $0xbb4] sm:$0xf0]  ;;  %v9023_v57 = vor.u32 %v11201_v46, %v9022_v19  ;;  %v9087_v58 = vor.u32 %v11217_v50, %v9086_v49  ;;  %v9070_v46 = vld [vmem:[%s17139_s12 + $0xa90] sm:$0xf]  ;;  %v9207_v50 = vor.u32 %v11247_v38, %v9206_v37  ;;  %v8998_v53 = vld [vmem:[%s17139_s12 + $0xa00] sm:$0xf] }
 0x582   : > { %v9215_v24 = vor.u32 %v11249_v15, %v9214_v25  ;;  %v11197_v19 = vld [vmem:[%s17139_s12 + $0xa14] sm:$0xf0]  ;;  %v9198_v25 = vld [vmem:[%s17139_s12 + $0xb90] sm:$0xf] }
 0x583   : > { %v11245_v15 = vld [vmem:[%s17139_s12 + $0xb94] sm:$0xf0]  ;;  %v9007_v54 = vor.u32 %v11197_v19, %v9006_v39  ;;  %v9438_v37 = vld [vmem:[%s17139_s12 + $0xd70] sm:$0xf] }
 0x584   : > { %5723 = vmatpush.bf16.msra.mxu0 %v9039_v56  ;;  %5736 = vmatpush.bf16.msra.mxu1 %v9103_v13  ;;  %v11199_v13 = vld [vmem:[%s17139_s12 + $0xa24] sm:$0xf0]  ;;  %v9135_v56 = vor.u32 %v11229_v52, %v9134_v51 }
 0x585   : > { %5749 = vmatpush.bf16.msrb.mxu3 %v9167_v26  ;;  %5762 = vmatpush.bf16.msra.mxu2 %v9231_v27  ;;  %v1518_v26 = vpop.permute.xlu0 %1517  ;;  %v9142_v27 = vld [vmem:[%s17139_s12 + $0xb20] sm:$0xf] }
 0x586   : > { %v1519_v36 = vrot.slane %v1518_v26, 7  ;;  %v9143_v49 = vor.u32 %v11231_v33, %v9142_v27  ;;  %v11273_v27 = vld [vmem:[%s17139_s12 + $0xc74] sm:$0xf0]  ;;  %v9374_v33 = vld [vmem:[%s17139_s12 + $0xcf0] sm:$0xf] }
 0x588   : > { %5724 = vmatpush.bf16.msra.mxu0 %v9031_v44  ;;  %5737 = vmatpush.bf16.msra.mxu1 %v9095_v45  ;;  %v1520_v40 = vsel %vm900_vm12, %v1519_v36, %v1518_v26  ;;  %v9015_v44 = vor.u32 %v11199_v13, %v9014_v55  ;;  %v9079_v45 = vor.u32 %v11215_v11, %v9078_v22  ;;  %v9126_v22 = vld [vmem:[%s17139_s12 + $0xb00] sm:$0xf]  ;;  %v11243_v26 = vld [vmem:[%s17139_s12 + $0xb84] sm:$0xf0]  ;;  %v9310_v11 = vld [vmem:[%s17139_s12 + $0xc70] sm:$0xf] }
 0x589   : > { %5750 = vmatpush.bf16.msrb.mxu3 %v9159_v47  ;;  %5763 = vmatpush.bf16.msra.mxu2 %v9223_v48  ;;  %v11213_v47 = vld [vmem:[%s17139_s12 + $0xa94] sm:$0xf0]  ;;  %v1530_v48 = vpop.permute.xlu2 %1529  ;;  %1525 = vst.msk [vmem:[#allocation8 + $0x6] sm:$0x3] %vm1524_vm9, %v1520_v40  ;;  %v9199_v13 = vor.u32 %v11245_v15, %v9198_v25  ;;  %v9366_v25 = vld [vmem:[%s17139_s12 + $0xce0] sm:$0xf] }
 0x58a   : > { %1535 = vst.msk [vmem:[#allocation8 + $0x7] sm:$0x1] %vm1534_vm10, %v1530_v48  ;;  %v9071_v55 = vor.u32 %v11213_v47, %v9070_v46  ;;  %v11289_v36 = vld [vmem:[%s17139_s12 + $0xcf4] sm:$0xf0]  ;;  %v9311_v47 = vor.u32 %v11273_v27, %v9310_v11  ;;  %v11287_v15 = vld [vmem:[%s17139_s12 + $0xce4] sm:$0xf0] }
 0x58b   : > { %v11305_v40 = vld [vmem:[%s17139_s12 + $0xd74] sm:$0xf0]  ;;  %v9375_v48 = vor.u32 %v11289_v36, %v9374_v33  ;;  %v9422_v11 = vld [vmem:[%s17139_s12 + $0xd50] sm:$0xf]  ;;  %vm5452_vm12 = vcmask 326656  }
 0x58c   : > { %5725 = vmatpush.bf16.msra.mxu0 %v9023_v57  ;;  %5738 = vmatpush.bf16.msra.mxu1 %v9087_v58  ;;  %v11195_v57 = vld [vmem:[%s17139_s12 + $0xa04] sm:$0xf0]  ;;  %v9062_v58 = vld [vmem:[%s17139_s12 + $0xa80] sm:$0xf]  ;;  %v9439_v51 = vor.u32 %v11305_v40, %v9438_v37  ;;  %v11301_v27 = vld [vmem:[%s17139_s12 + $0xd54] sm:$0xf0] }
 0x58d   : > { %5751 = vmatpush.bf16.msrb.mxu3 %v9151_v23  ;;  %5764 = vmatpush.bf16.msra.mxu2 %v9215_v24  ;;  %v11227_v23 = vld [vmem:[%s17139_s12 + $0xb04] sm:$0xf0]  ;;  %v9190_v24 = vld [vmem:[%s17139_s12 + $0xb80] sm:$0xf]  ;;  %v8999_v38 = vor.u32 %v11195_v57, %v8998_v53  ;;  %v9063_v39 = vor.u32 %v11211_v35, %v9062_v58  ;;  %v9367_v35 = vor.u32 %v11287_v15, %v9366_v25  ;;  %v9486_v33 = vld [vmem:[%s17139_s12 + $0xdd0] sm:$0xf] }
 0x58e   : > { %v9127_v19 = vor.u32 %v11227_v23, %v9126_v22  ;;  %v9191_v46 = vor.u32 %v11243_v26, %v9190_v24  ;;  %v9430_v53 = vld [vmem:[%s17139_s12 + $0xd60] sm:$0xf]  ;;  %v11319_v57 = vld [vmem:[%s17139_s12 + $0xde4] sm:$0xf0]  ;;  %v9358_v24 = vld [vmem:[%s17139_s12 + $0xcd0] sm:$0xf] }
 0x58f   : > { %v11285_v26 = vld [vmem:[%s17139_s12 + $0xcd4] sm:$0xf0]  ;;  %v11315_v25 = vld [vmem:[%s17139_s12 + $0xdc4] sm:$0xf0] }
 0x590   : > { %5726 = vmatpush.bf16.msra.mxu0 %v9015_v44  ;;  %5739 = vmatpush.bf16.msra.mxu1 %v9079_v45  ;;  %v9502_v44 = vld [vmem:[%s17139_s12 + $0xdf0] sm:$0xf]  ;;  %v11321_v45 = vld [vmem:[%s17139_s12 + $0xdf4] sm:$0xf0]  ;;  %v9359_v40 = vor.u32 %v11285_v26, %v9358_v24 }
 0x591   : > { %5752 = vmatpush.bf16.msrb.mxu3 %v9143_v49  ;;  %5765 = vmatpush.bf16.msra.mxu2 %v9207_v50  ;;  %v9302_v49 = vld [vmem:[%s17139_s12 + $0xc60] sm:$0xf]  ;;  %v11271_v50 = vld [vmem:[%s17139_s12 + $0xc64] sm:$0xf0]  ;;  %v9503_v52 = vor.u32 %v11321_v45, %v9502_v44  ;;  %v11317_v36 = vld [vmem:[%s17139_s12 + $0xdd4] sm:$0xf0] }
 0x592   : > { %v9303_v58 = vor.u32 %v11271_v50, %v9302_v49  ;;  %v9286_v45 = vld [vmem:[%s17139_s12 + $0xc40] sm:$0xf]  ;;  %v11283_v49 = vld [vmem:[%s17139_s12 + $0xcc4] sm:$0xf0]  ;;  %v9470_v24 = vld [vmem:[%s17139_s12 + $0xdb0] sm:$0xf] }
 0x593   : > { %v9414_v50 = vld [vmem:[%s17139_s12 + $0xd40] sm:$0xf]  ;;  %v11313_v26 = vld [vmem:[%s17139_s12 + $0xdb4] sm:$0xf0] }
 0x594   : > { %5727 = vmatpush.bf16.msra.mxu0 %v9007_v54  ;;  %5740 = vmatpush.bf16.msra.mxu1 %v9071_v55  ;;  %v11303_v54 = vld [vmem:[%s17139_s12 + $0xd64] sm:$0xf0]  ;;  %v9494_v55 = vld [vmem:[%s17139_s12 + $0xde0] sm:$0xf] }
 0x595   : > { %5753 = vmatpush.bf16.msrb.mxu3 %v9135_v56  ;;  %5766 = vmatpush.bf16.msra.mxu2 %v9199_v13  ;;  %v9294_v56 = vld [vmem:[%s17139_s12 + $0xc50] sm:$0xf]  ;;  %v11269_v13 = vld [vmem:[%s17139_s12 + $0xc54] sm:$0xf0]  ;;  %v9431_v22 = vor.u32 %v11303_v54, %v9430_v53  ;;  %v9495_v23 = vor.u32 %v11319_v57, %v9494_v55 }
 0x596   : > { %v9278_v54 = vld [vmem:[%s17139_s12 + $0xc30] sm:$0xf]  ;;  %v11265_v55 = vld [vmem:[%s17139_s12 + $0xc34] sm:$0xf0] }
 0x597   : > { %v5470_v37 = vpop.f32.mrf.mxu0 }
 0x598   : > { %5728 = vmatpush.bf16.msra.mxu0 %v8999_v38  ;;  %5741 = vmatpush.bf16.msra.mxu1 %v9063_v39  ;;  %v5483_v38 = vpop.f32.mrf.mxu1  ;;  %v9295_v39 = vor.u32 %v11269_v13, %v9294_v56  ;;  %v11281_v56 = vld [vmem:[%s17139_s12 + $0xcb4] sm:$0xf0]  ;;  %v9406_v13 = vld [vmem:[%s17139_s12 + $0xd30] sm:$0xf] }
 0x599   : > { %5754 = vmatpush.bf16.msrb.mxu3 %v9127_v19  ;;  %5767 = vmatpush.bf16.msra.mxu2 %v9191_v46  ;;  %v5484_v44 = vadd.f32 %v5483_v38, %v5470_v37  ;;  %v11267_v19 = vld [vmem:[%s17139_s12 + $0xc44] sm:$0xf0]  ;;  %v9423_v46 = vor.u32 %v11301_v27, %v9422_v11  ;;  %v9279_v37 = vor.u32 %v11265_v55, %v9278_v54 }
 0x59a   : > { %v9287_v15 = vor.u32 %v11267_v19, %v9286_v45  ;;  %v9471_v19 = vor.u32 %v11313_v26, %v9470_v24 }
 0x59b   : > { %5729 = vmatmul.bf16.vlgmr.msra.gmra.mxu0 %v12948_v18  ;;  %5742 = vmatmul.bf16.vlgmr.msra.gmra.mxu1 %v12952_v21 }
 0x59c   : > { %5773 = vmatpush.bf16.msrb.mxu0 %v9311_v47  ;;  %5786 = vmatpush.bf16.msrb.mxu1 %v9375_v48  ;;  %v9487_v47 = vor.u32 %v11317_v36, %v9486_v33  ;;  %v9350_v48 = vld [vmem:[%s17139_s12 + $0xcc0] sm:$0xf] }
 0x59d   : > { %5799 = vmatpush.bf16.msra.mxu3 %v9439_v51  ;;  %5812 = vmatpush.bf16.msrb.mxu2 %v9503_v52  ;;  %v11299_v51 = vld [vmem:[%s17139_s12 + $0xd44] sm:$0xf0]  ;;  %v9478_v52 = vld [vmem:[%s17139_s12 + $0xdc0] sm:$0xf]  ;;  %v9351_v53 = vor.u32 %v11283_v49, %v9350_v48 }
 0x59e   : > { %5755 = vmatmul.bf16.vlgmr.msrb.gmra.mxu3 %v12950_v20  ;;  %5768 = vmatmul.bf16.vlgmr.msra.gmra.mxu2 %v12963_v30  ;;  %v9415_v57 = vor.u32 %v11299_v51, %v9414_v50  ;;  %v5509_v11 = vpop.f32.mrf.mxu2  ;;  %v9398_v48 = vld [vmem:[%s17139_s12 + $0xd20] sm:$0xf]  ;;  %v11295_v49 = vld [vmem:[%s17139_s12 + $0xd24] sm:$0xf0] }
 0x59f   : > { %v5472_v33 = vpop.f32.mrf.mxu0  ;;  %v9462_v50 = vld [vmem:[%s17139_s12 + $0xda0] sm:$0xf]  ;;  %v11311_v51 = vld [vmem:[%s17139_s12 + $0xda4] sm:$0xf0]  ;;  %v9399_v54 = vor.u32 %v11295_v49, %v9398_v48 }
 0x5a0   : > { %5774 = vmatpush.bf16.msrb.mxu0 %v9303_v58  ;;  %5787 = vmatpush.bf16.msrb.mxu1 %v9367_v35  ;;  %v9479_v58 = vor.u32 %v11315_v25, %v9478_v52  ;;  %v9342_v35 = vld [vmem:[%s17139_s12 + $0xcb0] sm:$0xf]  ;;  %v5485_v36 = vpop.f32.mrf.mxu1  ;;  %v9463_v55 = vor.u32 %v11311_v51, %v9462_v50  ;;  %v11307_v49 = vld [vmem:[%s17139_s12 + $0xd84] sm:$0xf0]  ;;  %v11337_v51 = vld [vmem:[%s17139_s12 + $0xe74] sm:$0xf0] }
 0x5a1   : > { %5800 = vmatpush.bf16.msra.mxu3 %v9431_v22  ;;  %5813 = vmatpush.bf16.msrb.mxu2 %v9495_v23  ;;  %v5496_v22 = vpop.f32.mrf.mxu3  ;;  %v11297_v23 = vld [vmem:[%s17139_s12 + $0xd34] sm:$0xf0]  ;;  %v9343_v38 = vor.u32 %v11281_v56, %v9342_v35  ;;  %v9390_v35 = vld [vmem:[%s17139_s12 + $0xd10] sm:$0xf] }
 0x5a2   : > { %v5497_v27 = vadd.f32 %v5496_v22, %v5484_v44  ;;  %v9407_v45 = vor.u32 %v11297_v23, %v9406_v13  ;;  %v9334_v44 = vld [vmem:[%s17139_s12 + $0xca0] sm:$0xf]  ;;  %v11293_v13 = vld [vmem:[%s17139_s12 + $0xd14] sm:$0xf0]  ;;  %v9454_v22 = vld [vmem:[%s17139_s12 + $0xd90] sm:$0xf] }
 0x5a3   : > { %v11309_v23 = vld [vmem:[%s17139_s12 + $0xd94] sm:$0xf0]  ;;  %v9566_v50 = vld [vmem:[%s17139_s12 + $0xe70] sm:$0xf] }
 0x5a4   : > { %5775 = vmatpush.bf16.msrb.mxu0 %v9295_v39  ;;  %5788 = vmatpush.bf16.msrb.mxu1 %v9359_v40  ;;  %v9270_v39 = vld [vmem:[%s17139_s12 + $0xc20] sm:$0xf]  ;;  %v11263_v40 = vld [vmem:[%s17139_s12 + $0xc24] sm:$0xf0] }
 0x5a5   : > { %5801 = vmatpush.bf16.msra.mxu3 %v9423_v46  ;;  %5814 = vmatpush.bf16.msrb.mxu2 %v9487_v47  ;;  %v5510_v46 = vadd.f32 %v5509_v11, %v5497_v27  ;;  %v11279_v47 = vld [vmem:[%s17139_s12 + $0xca4] sm:$0xf0]  ;;  %v9271_v52 = vor.u32 %v11263_v40, %v9270_v39  ;;  %v9254_v27 = vld [vmem:[%s17139_s12 + $0xc00] sm:$0xf] }
 0x5a6   : > { %v9335_v25 = vor.u32 %v11279_v47, %v9334_v44  ;;  %v5511_v24 = vpop.f32.mrf.mxu2  ;;  %v9318_v39 = vld [vmem:[%s17139_s12 + $0xc80] sm:$0xf]  ;;  %v11275_v40 = vld [vmem:[%s17139_s12 + $0xc84] sm:$0xf0] }
 0x5a7   : > { %v5522_v26 = vpop.f32.mrf.mxu0  ;;  %v11291_v44 = vld [vmem:[%s17139_s12 + $0xd04] sm:$0xf0]  ;;  %v9446_v47 = vld [vmem:[%s17139_s12 + $0xd80] sm:$0xf] }
 0x5a8   : > { %5776 = vmatpush.bf16.msrb.mxu0 %v9287_v15  ;;  %5789 = vmatpush.bf16.msrb.mxu1 %v9351_v53  ;;  %v9262_v15 = vld [vmem:[%s17139_s12 + $0xc10] sm:$0xf]  ;;  %v11261_v53 = vld [vmem:[%s17139_s12 + $0xc14] sm:$0xf0]  ;;  %v5535_v11 = vpop.f32.mrf.mxu1 }
 0x5a9   : > { %5802 = vmatpush.bf16.msra.mxu3 %v9415_v57  ;;  %5815 = vmatpush.bf16.msrb.mxu2 %v9479_v58  ;;  %v9326_v57 = vld [vmem:[%s17139_s12 + $0xc90] sm:$0xf]  ;;  %v11277_v58 = vld [vmem:[%s17139_s12 + $0xc94] sm:$0xf0]  ;;  %v5498_v56 = vpop.f32.mrf.mxu3  ;;  %v9263_v33 = vor.u32 %v11261_v53, %v9262_v15 }
 0x5aa   : > { %v9327_v36 = vor.u32 %v11277_v58, %v9326_v57  ;;  %v9694_v15 = vld [vmem:[%s17139_s12 + $0xf70] sm:$0xf]  ;;  %v11385_v58 = vld [vmem:[%s17139_s12 + $0xff4] sm:$0xf0]  ;;  %v9447_v56 = vor.u32 %v11307_v49, %v9446_v47 }
 0x5ab   : > { %v9758_v57 = vld [vmem:[%s17139_s12 + $0xff0] sm:$0xf] }
 0x5ac   : > { %5777 = vmatpush.bf16.msrb.mxu0 %v9279_v37  ;;  %5790 = vmatpush.bf16.msrb.mxu1 %v9343_v38  ;;  %v5523_v37 = vadd.f32 %v5522_v26, %v5510_v46  ;;  %v11259_v38 = vld [vmem:[%s17139_s12 + $0xc04] sm:$0xf0]  ;;  %v9382_v46 = vld [vmem:[%s17139_s12 + $0xd00] sm:$0xf] }
 0x5ad   : > { %5803 = vmatpush.bf16.msra.mxu3 %v9407_v45  ;;  %5816 = vmatpush.bf16.msrb.mxu2 %v9471_v19  ;;  %v9391_v45 = vor.u32 %v11293_v13, %v9390_v35  ;;  %v9455_v19 = vor.u32 %v11309_v23, %v9454_v22  ;;  %v9255_v53 = vor.u32 %v11259_v38, %v9254_v27  ;;  %v9558_v26 = vld [vmem:[%s17139_s12 + $0xe60] sm:$0xf] }
 0x5ae   : > { %v5536_v48 = vadd.f32 %v5535_v11, %v5523_v37  ;;  %v9383_v35 = vor.u32 %v11291_v44, %v9382_v46  ;;  %v9567_v13 = vor.u32 %v11337_v51, %v9566_v50  ;;  %v5561_v24 = vpop.f32.mrf.mxu2  ;;  %v11335_v11 = vld [vmem:[%s17139_s12 + $0xe64] sm:$0xf0]  ;;  %v9622_v38 = vld [vmem:[%s17139_s12 + $0xee0] sm:$0xf]  ;;  %v9550_v50 = vld [vmem:[%s17139_s12 + $0xe50] sm:$0xf] }
 0x5af   : > { %v5524_v37 = vpop.f32.mrf.mxu0  ;;  %v9750_v46 = vld [vmem:[%s17139_s12 + $0xfe0] sm:$0xf]  ;;  %v11383_v44 = vld [vmem:[%s17139_s12 + $0xfe4] sm:$0xf0]  ;;  %v11333_v51 = vld [vmem:[%s17139_s12 + $0xe54] sm:$0xf0] }
 0x5b0   : > { %5778 = vmatpush.bf16.msrb.mxu0 %v9271_v52  ;;  %5791 = vmatpush.bf16.msrb.mxu1 %v9335_v25  ;;  %v9630_v52 = vld [vmem:[%s17139_s12 + $0xef0] sm:$0xf]  ;;  %v11353_v25 = vld [vmem:[%s17139_s12 + $0xef4] sm:$0xf0]  ;;  %v11363_v37 = vld [vmem:[%s17139_s12 + $0xf44] sm:$0xf0] }
 0x5b1   : > { %5804 = vmatpush.bf16.msra.mxu3 %v9399_v54  ;;  %5817 = vmatpush.bf16.msrb.mxu2 %v9463_v55  ;;  %v9319_v54 = vor.u32 %v11275_v40, %v9318_v39  ;;  %v11369_v55 = vld [vmem:[%s17139_s12 + $0xf74] sm:$0xf0]  ;;  %v9631_v22 = vor.u32 %v11353_v25, %v9630_v52  ;;  %v5548_v23 = vpop.f32.mrf.mxu3  ;;  %v11351_v39 = vld [vmem:[%s17139_s12 + $0xee4] sm:$0xf0]  ;;  %v9686_v40 = vld [vmem:[%s17139_s12 + $0xf60] sm:$0xf]  ;;  %v9751_v25 = vor.u32 %v11383_v44, %v9750_v46 }
 0x5b2   : > { %v9695_v27 = vor.u32 %v11369_v55, %v9694_v15  ;;  %v9623_v49 = vor.u32 %v11351_v39, %v9622_v38  ;;  %v9614_v15 = vld [vmem:[%s17139_s12 + $0xed0] sm:$0xf]  ;;  %v11365_v55 = vld [vmem:[%s17139_s12 + $0xf54] sm:$0xf0]  ;;  %v9734_v38 = vld [vmem:[%s17139_s12 + $0xfc0] sm:$0xf] }
 0x5b3   : > { %v11379_v39 = vld [vmem:[%s17139_s12 + $0xfc4] sm:$0xf0] }
 0x5b4   : > { %5779 = vmatpush.bf16.msrb.mxu0 %v9263_v33  ;;  %5792 = vmatpush.bf16.msrb.mxu1 %v9327_v36  ;;  %v9759_v33 = vor.u32 %v11385_v58, %v9758_v57  ;;  %v5549_v36 = vadd.f32 %v5548_v23, %v5536_v48  ;;  %v9559_v48 = vor.u32 %v11335_v11, %v9558_v26  ;;  %v9742_v57 = vld [vmem:[%s17139_s12 + $0xfd0] sm:$0xf]  ;;  %v11381_v58 = vld [vmem:[%s17139_s12 + $0xfd4] sm:$0xf0]  ;;  %v9542_v23 = vld [vmem:[%s17139_s12 + $0xe40] sm:$0xf] }
 0x5b5   : > { %5805 = vmatpush.bf16.msra.mxu3 %v9391_v45  ;;  %5818 = vmatpush.bf16.msrb.mxu2 %v9455_v19  ;;  %v5537_v45 = vpop.f32.mrf.mxu1  ;;  %v11367_v19 = vld [vmem:[%s17139_s12 + $0xf64] sm:$0xf0]  ;;  %v9743_v11 = vor.u32 %v11381_v58, %v9742_v57 }
 0x5b6   : > { %v5562_v47 = vadd.f32 %v5561_v24, %v5549_v36  ;;  %v9687_v52 = vor.u32 %v11367_v19, %v9686_v40  ;;  %v11331_v24 = vld [vmem:[%s17139_s12 + $0xe44] sm:$0xf0]  ;;  %v9670_v36 = vld [vmem:[%s17139_s12 + $0xf40] sm:$0xf] }
 0x5b7   : > { %v9543_v19 = vor.u32 %v11331_v24, %v9542_v23  ;;  %v9590_v24 = vld [vmem:[%s17139_s12 + $0xea0] sm:$0xf] }
 0x5b8   : > { %5780 = vmatpush.bf16.msrb.mxu0 %v9255_v53  ;;  %5793 = vmatpush.bf16.msrb.mxu1 %v9319_v54  ;;  %v11349_v53 = vld [vmem:[%s17139_s12 + $0xed4] sm:$0xf0]  ;;  %v9678_v54 = vld [vmem:[%s17139_s12 + $0xf50] sm:$0xf]  ;;  %v5574_v40 = vpop.f32.mrf.mxu0 }
 0x5b9   : > { %5806 = vmatpush.bf16.msra.mxu3 %v9383_v35  ;;  %5819 = vmatpush.bf16.msrb.mxu2 %v9447_v56  ;;  %v9551_v35 = vor.u32 %v11333_v51, %v9550_v50  ;;  %v9615_v56 = vor.u32 %v11349_v53, %v9614_v15  ;;  %v9679_v26 = vor.u32 %v11365_v55, %v9678_v54  ;;  %v11361_v53 = vld [vmem:[%s17139_s12 + $0xf34] sm:$0xf0]  ;;  %v9726_v54 = vld [vmem:[%s17139_s12 + $0xfb0] sm:$0xf] }
 0x5ba   : > { %v5575_v45 = vadd.f32 %v5574_v40, %v5562_v47  ;;  %v9671_v50 = vor.u32 %v11363_v37, %v9670_v36  ;;  %v9735_v51 = vor.u32 %v11379_v39, %v9734_v38  ;;  %v11345_v47 = vld [vmem:[%s17139_s12 + $0xeb4] sm:$0xf0]  ;;  %v11359_v36 = vld [vmem:[%s17139_s12 + $0xf24] sm:$0xf0]  ;;  %v9718_v37 = vld [vmem:[%s17139_s12 + $0xfa0] sm:$0xf] }
 0x5bb   : > { %5781 = vmatmul.bf16.vlgmr.msrb.gmra.mxu0 %v13234_v8  ;;  %5794 = vmatmul.bf16.vlgmr.msrb.gmra.mxu1 %v13238_v63  ;;  %v11377_v55 = vld [vmem:[%s17139_s12 + $0xfb4] sm:$0xf0]  ;;  %v11375_v38 = vld [vmem:[%s17139_s12 + $0xfa4] sm:$0xf0] }
 0x5bc   : > { %5825 = vmatpush.bf16.msra.mxu0 %v9567_v13  ;;  %5838 = vmatpush.bf16.msra.mxu1 %v9631_v22  ;;  %v5550_v13 = vpop.f32.mrf.mxu3  ;;  %v5563_v22 = vpop.f32.mrf.mxu2 }
 0x5bd   : > { %5851 = vmatpush.bf16.msrb.mxu3 %v9695_v27  ;;  %5864 = vmatpush.bf16.msra.mxu2 %v9759_v33  ;;  %v9606_v27 = vld [vmem:[%s17139_s12 + $0xec0] sm:$0xf]  ;;  %v11347_v33 = vld [vmem:[%s17139_s12 + $0xec4] sm:$0xf0]  ;;  %v5587_v44 = vpop.f32.mrf.mxu1  ;;  %v9727_v22 = vor.u32 %v11377_v55, %v9726_v54 }
 0x5be   : > { %5807 = vmatmul.bf16.vlgmr.msra.gmra.mxu3 %v13236_v9  ;;  %5820 = vmatmul.bf16.vlgmr.msrb.gmra.mxu2 %v13249_v62  ;;  %v9607_v46 = vor.u32 %v11347_v33, %v9606_v27  ;;  %v5588_v15 = vadd.f32 %v5587_v44, %v5575_v45  ;;  %v11325_v44 = vld [vmem:[%s17139_s12 + $0xe14] sm:$0xf0]  ;;  %v9510_v54 = vld [vmem:[%s17139_s12 + $0xe00] sm:$0xf] }
 0x5c0   : > { %5826 = vmatpush.bf16.msra.mxu0 %v9559_v48  ;;  %5839 = vmatpush.bf16.msra.mxu1 %v9623_v49  ;;  %v9534_v48 = vld [vmem:[%s17139_s12 + $0xe30] sm:$0xf]  ;;  %v11329_v49 = vld [vmem:[%s17139_s12 + $0xe34] sm:$0xf0]  ;;  %v5576_v39 = vpop.f32.mrf.mxu0 }
 0x5c1   : > { %5852 = vmatpush.bf16.msrb.mxu3 %v9687_v52  ;;  %5865 = vmatpush.bf16.msra.mxu2 %v9751_v25  ;;  %v9598_v52 = vld [vmem:[%s17139_s12 + $0xeb0] sm:$0xf]  ;;  %v9535_v57 = vor.u32 %v11329_v49, %v9534_v48  ;;  %v11417_v39 = vld [vmem:[%s17139_s12 + $0x10f4] sm:$0xf0] }
 0x5c2   : > { %v9662_v25 = vld [vmem:[%s17139_s12 + $0xf30] sm:$0xf]  ;;  %v9599_v58 = vor.u32 %v11345_v47, %v9598_v52  ;;  %v11341_v52 = vld [vmem:[%s17139_s12 + $0xe94] sm:$0xf0] }
 0x5c3   : > { %v9663_v13 = vor.u32 %v11361_v53, %v9662_v25  ;;  %v9646_v47 = vld [vmem:[%s17139_s12 + $0xf10] sm:$0xf]  ;;  %v11357_v25 = vld [vmem:[%s17139_s12 + $0xf14] sm:$0xf0] }
 0x5c4   : > { %5827 = vmatpush.bf16.msra.mxu0 %v9551_v35  ;;  %5840 = vmatpush.bf16.msra.mxu1 %v9615_v56  ;;  %v9526_v35 = vld [vmem:[%s17139_s12 + $0xe20] sm:$0xf]  ;;  %v11327_v56 = vld [vmem:[%s17139_s12 + $0xe24] sm:$0xf0]  ;;  %v5600_v23 = vpop.f32.mrf.mxu3  ;;  %v5613_v33 = vpop.f32.mrf.mxu2  ;;  %v11373_v53 = vld [vmem:[%s17139_s12 + $0xf94] sm:$0xf0] }
 0x5c5   : > { %5853 = vmatpush.bf16.msrb.mxu3 %v9679_v26  ;;  %5866 = vmatpush.bf16.msra.mxu2 %v9743_v11  ;;  %v11343_v26 = vld [vmem:[%s17139_s12 + $0xea4] sm:$0xf0]  ;;  %v9654_v11 = vld [vmem:[%s17139_s12 + $0xf20] sm:$0xf]  ;;  %v5601_v27 = vadd.f32 %v5600_v23, %v5588_v15  ;;  %v9527_v45 = vor.u32 %v11327_v56, %v9526_v35  ;;  %v5589_v48 = vpop.f32.mrf.mxu1  ;;  %v9710_v15 = vld [vmem:[%s17139_s12 + $0xf90] sm:$0xf] }
 0x5c6   : > { %v9655_v49 = vor.u32 %v11359_v36, %v9654_v11  ;;  %v9574_v35 = vld [vmem:[%s17139_s12 + $0xe80] sm:$0xf]  ;;  %v11339_v56 = vld [vmem:[%s17139_s12 + $0xe84] sm:$0xf0]  ;;  %v11401_v36 = vld [vmem:[%s17139_s12 + $0x1074] sm:$0xf0] }
 0x5c7   : > { %v13973_v40 = vadd.f32 %v5613_v33, %v5601_v27  ;;  %v9638_v23 = vld [vmem:[%s17139_s12 + $0xf00] sm:$0xf]  ;;  %v11371_v27 = vld [vmem:[%s17139_s12 + $0xf84] sm:$0xf0]  ;;  %v9822_v33 = vld [vmem:[%s17139_s12 + $0x1070] sm:$0xf] }
 0x5c8   : > { %5828 = vmatpush.bf16.msra.mxu0 %v9543_v19  ;;  %5841 = vmatpush.bf16.msra.mxu1 %v9607_v46  ;;  %v9591_v19 = vor.u32 %v11343_v26, %v9590_v24  ;;  %v9518_v46 = vld [vmem:[%s17139_s12 + $0xe10] sm:$0xf]  ;;  %v11355_v24 = vld [vmem:[%s17139_s12 + $0xf04] sm:$0xf0]  ;;  %v9702_v26 = vld [vmem:[%s17139_s12 + $0xf80] sm:$0xf] }
 0x5c9   : > { %5854 = vmatpush.bf16.msrb.mxu3 %v9671_v50  ;;  %5867 = vmatpush.bf16.msra.mxu2 %v9735_v51  ;;  %v9719_v50 = vor.u32 %v11375_v38, %v9718_v37  ;;  %v9582_v51 = vld [vmem:[%s17139_s12 + $0xe90] sm:$0xf]  ;;  %v9519_v55 = vor.u32 %v11325_v44, %v9518_v46  ;;  %v9575_v46 = vor.u32 %v11339_v56, %v9574_v35  ;;  %v11433_v44 = vld [vmem:[%s17139_s12 + $0x1174] sm:$0xf0]  ;;  %v11431_v35 = vld [vmem:[%s17139_s12 + $0x1164] sm:$0xf0] }
 0x5ca   : > { %v9886_v38 = vld [vmem:[%s17139_s12 + $0x10f0] sm:$0xf]  ;;  %v10006_v56 = vld [vmem:[%s17139_s12 + $0x11e0] sm:$0xf] }
 0x5cb   : > { %v10014_v48 = vld [vmem:[%s17139_s12 + $0x11f0] sm:$0xf] }
 0x5cc   : > { %5829 = vmatpush.bf16.msra.mxu0 %v9535_v57  ;;  %5842 = vmatpush.bf16.msra.mxu1 %v9599_v58  ;;  %v9583_v57 = vor.u32 %v11341_v52, %v9582_v51  ;;  %v11323_v58 = vld [vmem:[%s17139_s12 + $0xe04] sm:$0xf0]  ;;  %v5602_v11 = vpop.f32.mrf.mxu3  ;;  %v5615_v37 = vpop.f32.mrf.mxu2  ;;  %v9703_v51 = vor.u32 %v11371_v27, %v9702_v26  ;;  %v9823_v52 = vor.u32 %v11401_v36, %v9822_v33  ;;  %v11397_v26 = vld [vmem:[%s17139_s12 + $0x1054] sm:$0xf0]  ;;  %v9870_v33 = vld [vmem:[%s17139_s12 + $0x10d0] sm:$0xf] }
 0x5cd   : > { %5855 = vmatpush.bf16.msrb.mxu3 %v9663_v13  ;;  %5868 = vmatpush.bf16.msra.mxu2 %v9727_v22  ;;  %v9647_v13 = vor.u32 %v11357_v25, %v9646_v47  ;;  %v9711_v22 = vor.u32 %v11373_v53, %v9710_v15  ;;  %v9887_v47 = vor.u32 %v11417_v39, %v9886_v38  ;;  %v9814_v25 = vld [vmem:[%s17139_s12 + $0x1060] sm:$0xf]  ;;  %v11399_v15 = vld [vmem:[%s17139_s12 + $0x1064] sm:$0xf0]  ;;  %v11413_v36 = vld [vmem:[%s17139_s12 + $0x10d4] sm:$0xf0] }
 0x5ce   : > { %v9934_v37 = vld [vmem:[%s17139_s12 + $0x1150] sm:$0xf]  ;;  %v11429_v38 = vld [vmem:[%s17139_s12 + $0x1154] sm:$0xf0] }
 0x5cf   : > { %v9998_v39 = vld [vmem:[%s17139_s12 + $0x11d0] sm:$0xf] }
 0x5d0   : > { %5830 = vmatpush.bf16.msra.mxu0 %v9527_v45  ;;  %5843 = vmatpush.bf16.msra.mxu1 %v9591_v19  ;;  %v9950_v45 = vld [vmem:[%s17139_s12 + $0x1170] sm:$0xf]  ;;  %v9511_v19 = vor.u32 %v11323_v58, %v9510_v54  ;;  %v9942_v58 = vld [vmem:[%s17139_s12 + $0x1160] sm:$0xf] }
 0x5d1   : > { %5856 = vmatpush.bf16.msrb.mxu3 %v9655_v49  ;;  %5869 = vmatpush.bf16.msra.mxu2 %v9719_v50  ;;  %v11449_v49 = vld [vmem:[%s17139_s12 + $0x11f4] sm:$0xf0]  ;;  %v9639_v50 = vor.u32 %v11355_v24, %v9638_v23  ;;  %v9951_v53 = vor.u32 %v11433_v44, %v9950_v45  ;;  %v9806_v24 = vld [vmem:[%s17139_s12 + $0x1050] sm:$0xf]  ;;  %v9943_v11 = vor.u32 %v11431_v35, %v9942_v58  ;;  %v9798_v44 = vld [vmem:[%s17139_s12 + $0x1040] sm:$0xf] }
 0x5d2   : > { %v10015_v54 = vor.u32 %v11449_v49, %v10014_v48  ;;  %v11445_v45 = vld [vmem:[%s17139_s12 + $0x11d4] sm:$0xf0]  ;;  %v11395_v48 = vld [vmem:[%s17139_s12 + $0x1044] sm:$0xf0]  ;;  %v9935_v49 = vor.u32 %v11429_v38, %v9934_v37 }
 0x5d4   : > { %5831 = vmatpush.bf16.msra.mxu0 %v9519_v55  ;;  %5844 = vmatpush.bf16.msra.mxu1 %v9583_v57  ;;  %v9878_v55 = vld [vmem:[%s17139_s12 + $0x10e0] sm:$0xf]  ;;  %v11415_v57 = vld [vmem:[%s17139_s12 + $0x10e4] sm:$0xf0] }
 0x5d5   : > { %5857 = vmatpush.bf16.msrb.mxu3 %v9647_v13  ;;  %5870 = vmatpush.bf16.msra.mxu2 %v9711_v22  ;;  %v11447_v13 = vld [vmem:[%s17139_s12 + $0x11e4] sm:$0xf0]  ;;  %v9815_v22 = vor.u32 %v11399_v15, %v9814_v25  ;;  %v9879_v23 = vor.u32 %v11415_v57, %v9878_v55  ;;  %v9990_v15 = vld [vmem:[%s17139_s12 + $0x11c0] sm:$0xf]  ;;  %v9799_v57 = vor.u32 %v11395_v48, %v9798_v44 }
 0x5d6   : > { %v10007_v27 = vor.u32 %v11447_v13, %v10006_v56  ;;  %v11427_v25 = vld [vmem:[%s17139_s12 + $0x1144] sm:$0xf0]  ;;  %v9790_v56 = vld [vmem:[%s17139_s12 + $0x1030] sm:$0xf]  ;;  %v11393_v13 = vld [vmem:[%s17139_s12 + $0x1034] sm:$0xf0] }
 0x5d7   : > { %v9791_v37 = vor.u32 %v11393_v13, %v9790_v56  ;;  %v9846_v48 = vld [vmem:[%s17139_s12 + $0x10a0] sm:$0xf] }
 0x5d8   : > { %5832 = vmatpush.bf16.msra.mxu0 %v9511_v19  ;;  %5845 = vmatpush.bf16.msra.mxu1 %v9575_v46  ;;  %v9807_v19 = vor.u32 %v11397_v26, %v9806_v24  ;;  %v9871_v46 = vor.u32 %v11413_v36, %v9870_v33  ;;  %v5639_v35 = vpop.f32.mrf.mxu1  ;;  %v9854_v24 = vld [vmem:[%s17139_s12 + $0x10b0] sm:$0xf]  ;;  %v11441_v36 = vld [vmem:[%s17139_s12 + $0x11b4] sm:$0xf0] }
 0x5d9   : > { %5858 = vmatpush.bf16.msrb.mxu3 %v9639_v50  ;;  %5871 = vmatpush.bf16.msra.mxu2 %v9703_v51  ;;  %v9999_v50 = vor.u32 %v11445_v45, %v9998_v39  ;;  %v9862_v51 = vld [vmem:[%s17139_s12 + $0x10c0] sm:$0xf]  ;;  %v9918_v26 = vld [vmem:[%s17139_s12 + $0x1130] sm:$0xf]  ;;  %v11391_v45 = vld [vmem:[%s17139_s12 + $0x1024] sm:$0xf0] }
 0x5da   : > { %v9982_v33 = vld [vmem:[%s17139_s12 + $0x11b0] sm:$0xf]  ;;  %v9782_v39 = vld [vmem:[%s17139_s12 + $0x1020] sm:$0xf] }
 0x5db   : > { %5833 = vmatmul.bf16.vlgmr.msra.gmra.mxu0 %v13251_v7  ;;  %5846 = vmatmul.bf16.vlgmr.msra.gmra.mxu1 %v13255_v6 }
 0x5dc   : > { %5877 = vmatpush.bf16.msrb.mxu0 %v9823_v52  ;;  %5890 = vmatpush.bf16.msrb.mxu1 %v9887_v47  ;;  %v11411_v52 = vld [vmem:[%s17139_s12 + $0x10c4] sm:$0xf0]  ;;  %v9926_v47 = vld [vmem:[%s17139_s12 + $0x1140] sm:$0xf] }
 0x5dd   : > { %5903 = vmatpush.bf16.msra.mxu3 %v9951_v53  ;;  %5916 = vmatpush.bf16.msrb.mxu2 %v10015_v54  ;;  %v11443_v53 = vld [vmem:[%s17139_s12 + $0x11c4] sm:$0xf0]  ;;  %v5626_v54 = vpop.f32.mrf.mxu0  ;;  %v9863_v58 = vor.u32 %v11411_v52, %v9862_v51 }
 0x5de   : > { %5859 = vmatmul.bf16.vlgmr.msrb.gmra.mxu3 %v13253_v3  ;;  %5872 = vmatmul.bf16.vlgmr.msra.gmra.mxu2 %v13257_v12  ;;  %v5627_v55 = vadd.f32 %v5626_v54, %v13973_v40  ;;  %v11409_v40 = vld [vmem:[%s17139_s12 + $0x10b4] sm:$0xf0] }
 0x5df   : > { %v9855_v38 = vor.u32 %v11409_v40, %v9854_v24  ;;  %v11405_v24 = vld [vmem:[%s17139_s12 + $0x1094] sm:$0xf0]  ;;  %v9902_v40 = vld [vmem:[%s17139_s12 + $0x1110] sm:$0xf] }
 0x5e0   : > { %5878 = vmatpush.bf16.msrb.mxu0 %v9815_v22  ;;  %5891 = vmatpush.bf16.msrb.mxu1 %v9879_v23  ;;  %v9927_v22 = vor.u32 %v11427_v25, %v9926_v47  ;;  %v9991_v23 = vor.u32 %v11443_v53, %v9990_v15  ;;  %v11423_v47 = vld [vmem:[%s17139_s12 + $0x1124] sm:$0xf0]  ;;  %v9974_v25 = vld [vmem:[%s17139_s12 + $0x11a0] sm:$0xf]  ;;  %v5641_v56 = vpop.f32.mrf.mxu1 }
 0x5e1   : > { %5904 = vmatpush.bf16.msra.mxu3 %v9943_v11  ;;  %5917 = vmatpush.bf16.msrb.mxu2 %v10007_v27  ;;  %v5640_v11 = vadd.f32 %v5639_v35, %v5627_v55  ;;  %v11425_v27 = vld [vmem:[%s17139_s12 + $0x1134] sm:$0xf0]  ;;  %v5652_v44 = vpop.f32.mrf.mxu3  ;;  %v5665_v52 = vpop.f32.mrf.mxu2  ;;  %v11439_v15 = vld [vmem:[%s17139_s12 + $0x11a4] sm:$0xf0]  ;;  %v9783_v55 = vor.u32 %v11391_v45, %v9782_v39  ;;  %v9830_v39 = vld [vmem:[%s17139_s12 + $0x1080] sm:$0xf] }
 0x5e2   : > { %v11389_v35 = vld [vmem:[%s17139_s12 + $0x1014] sm:$0xf0]  ;;  %v11403_v45 = vld [vmem:[%s17139_s12 + $0x1084] sm:$0xf0]  ;;  %v10904_v56 = vld [vmem:[%s17139_s12 + $0xf4] sm:$0xf] }
 0x5e3   : > { %v5653_v51 = vadd.f32 %v5652_v44, %v5640_v11  ;;  %v9966_v11 = vld [vmem:[%s17139_s12 + $0x1190] sm:$0xf]  ;;  %v9894_v44 = vld [vmem:[%s17139_s12 + $0x1100] sm:$0xf] }
 0x5e4   : > { %5879 = vmatpush.bf16.msrb.mxu0 %v9807_v19  ;;  %5892 = vmatpush.bf16.msrb.mxu1 %v9871_v46  ;;  %v9919_v19 = vor.u32 %v11425_v27, %v9918_v26  ;;  %v9983_v46 = vor.u32 %v11441_v36, %v9982_v33  ;;  %v11421_v26 = vld [vmem:[%s17139_s12 + $0x1114] sm:$0xf0]  ;;  %v9766_v33 = vld [vmem:[%s17139_s12 + $0x1000] sm:$0xf] }
 0x5e5   : > { %5905 = vmatpush.bf16.msra.mxu3 %v9935_v49  ;;  %5918 = vmatpush.bf16.msrb.mxu2 %v9999_v50  ;;  %v11407_v49 = vld [vmem:[%s17139_s12 + $0x10a4] sm:$0xf0]  ;;  %v9910_v50 = vld [vmem:[%s17139_s12 + $0x1120] sm:$0xf]  ;;  %v5628_v53 = vpop.f32.mrf.mxu0  ;;  %v14172_v54 = vadd.f32 %v5665_v52, %v5653_v51  ;;  %v11437_v27 = vld [vmem:[%s17139_s12 + $0x1194] sm:$0xf0] }
 0x5e6   : > { %v9911_v13 = vor.u32 %v11423_v47, %v9910_v50  ;;  %v11435_v51 = vld [vmem:[%s17139_s12 + $0x1184] sm:$0xf0]  ;;  %v10078_v52 = vld [vmem:[%s17139_s12 + $0x1270] sm:$0xf]  ;;  %v11465_v47 = vld [vmem:[%s17139_s12 + $0x1274] sm:$0xf0] }
 0x5e7   : > { %v11481_v53 = vld [vmem:[%s17139_s12 + $0x12f4] sm:$0xf0] }
 0x5e8   : > { %5880 = vmatpush.bf16.msrb.mxu0 %v9799_v57  ;;  %5893 = vmatpush.bf16.msrb.mxu1 %v9863_v58  ;;  %v9847_v57 = vor.u32 %v11407_v49, %v9846_v48  ;;  %v9774_v58 = vld [vmem:[%s17139_s12 + $0x1010] sm:$0xf]  ;;  %v11419_v48 = vld [vmem:[%s17139_s12 + $0x1104] sm:$0xf0]  ;;  %v9958_v49 = vld [vmem:[%s17139_s12 + $0x1180] sm:$0xf] }
 0x5e9   : > { %5906 = vmatpush.bf16.msra.mxu3 %v9927_v22  ;;  %5919 = vmatpush.bf16.msrb.mxu2 %v9991_v23  ;;  %v9975_v22 = vor.u32 %v11439_v15, %v9974_v25  ;;  %v9838_v23 = vld [vmem:[%s17139_s12 + $0x1090] sm:$0xf]  ;;  %v9775_v36 = vor.u32 %v11389_v35, %v9774_v58  ;;  %v5654_v50 = vpop.f32.mrf.mxu3  ;;  %v5667_v25 = vpop.f32.mrf.mxu2  ;;  %v9831_v58 = vor.u32 %v11403_v45, %v9830_v39  ;;  %v7776_v35 = vld [vmem:[%s17139_s12 + $0x78] sm:$0xf0]  ;;  %v7768_v39 = vld [vmem:[%s17139_s12 + $0x68] sm:$0xf0] }
 0x5ea   : > { %v10142_v15 = vld [vmem:[%s17139_s12 + $0x12f0] sm:$0xf]  ;;  %v10902_v45 = vld [vmem:[%s17139_s12 + $0xe4] sm:$0xf] }
 0x5ec   : > { %5881 = vmatpush.bf16.msrb.mxu0 %v9791_v37  ;;  %5894 = vmatpush.bf16.msrb.mxu1 %v9855_v38  ;;  %v9839_v37 = vor.u32 %v11405_v24, %v9838_v23  ;;  %v11387_v38 = vld [vmem:[%s17139_s12 + $0x1004] sm:$0xf0]  ;;  %v9959_v23 = vor.u32 %v11435_v51, %v9958_v49  ;;  %v10079_v24 = vor.u32 %v11465_v47, %v10078_v52  ;;  %v2345_v49 = vld [vmem:[#allocation1 + $0x1b] sm:$0xff]  ;;  %v10062_v52 = vld [vmem:[%s17139_s12 + $0x1250] sm:$0xf] }
 0x5ed   : > { %5907 = vmatpush.bf16.msra.mxu3 %v9919_v19  ;;  %5920 = vmatpush.bf16.msrb.mxu2 %v9983_v46  ;;  %v9903_v19 = vor.u32 %v11421_v26, %v9902_v40  ;;  %v9967_v46 = vor.u32 %v11437_v27, %v9966_v11  ;;  %v10143_v40 = vor.u32 %v11481_v53, %v10142_v15  ;;  %v10070_v26 = vld [vmem:[%s17139_s12 + $0x1260] sm:$0xf]  ;;  %v11463_v11 = vld [vmem:[%s17139_s12 + $0x1264] sm:$0xf0]  ;;  %v11461_v47 = vld [vmem:[%s17139_s12 + $0x1254] sm:$0xf0] }
 0x5ee   : > { %v10071_v50 = vor.u32 %v11463_v11, %v10070_v26  ;;  %v10126_v53 = vld [vmem:[%s17139_s12 + $0x12d0] sm:$0xf]  ;;  %v10118_v11 = vld [vmem:[%s17139_s12 + $0x12c0] sm:$0xf] }
 0x5f0   : > { %5882 = vmatpush.bf16.msrb.mxu0 %v9783_v55  ;;  %5895 = vmatpush.bf16.msrb.mxu1 %v9847_v57  ;;  %v10888_v55 = vld [vmem:[%s17139_s12 + $0x74] sm:$0xf]  ;;  %v9767_v57 = vor.u32 %v11387_v38, %v9766_v33  ;;  %v10886_v38 = vld [vmem:[%s17139_s12 + $0x64] sm:$0xf] }
 0x5f1   : > { %5908 = vmatpush.bf16.msra.mxu3 %v9911_v13  ;;  %5921 = vmatpush.bf16.msrb.mxu2 %v9975_v22  ;;  %v7840_v13 = vld [vmem:[%s17139_s12 + $0xf8] sm:$0xf0]  ;;  %v9895_v22 = vor.u32 %v11419_v48, %v9894_v44  ;;  %v7779_v27 = vor.u32 %v10888_v55, %v7776_v35  ;;  %v2344_v44 = vld [vmem:[#allocation1 + $0x12] sm:$0xff]  ;;  %v2343_v48 = vld [vmem:[#allocation1 + $0x9] sm:$0xff]  ;;  %v7771_v25 = vor.u32 %v10886_v38, %v7768_v39 }
 0x5f2   : > { %v7843_v33 = vor.u32 %v10904_v56, %v7840_v13  ;;  %v11477_v55 = vld [vmem:[%s17139_s12 + $0x12d4] sm:$0xf0]  ;;  %v10900_v35 = vld [vmem:[%s17139_s12 + $0xd4] sm:$0xf]  ;;  %v7824_v56 = vld [vmem:[%s17139_s12 + $0xd8] sm:$0xf0]  ;;  %v10063_v13 = vor.u32 %v11461_v47, %v10062_v52 }
 0x5f3   : > { %v7827_v26 = vor.u32 %v10900_v35, %v7824_v56  ;;  %v7816_v38 = vld [vmem:[%s17139_s12 + $0xc8] sm:$0xf0]  ;;  %v10110_v52 = vld [vmem:[%s17139_s12 + $0x12b0] sm:$0xf]  ;;  %v10880_v47 = vld [vmem:[%s17139_s12 + $0x34] sm:$0xf] }
 0x5f4   : > { %5883 = vmatpush.bf16.msrb.mxu0 %v9775_v36  ;;  %5896 = vmatpush.bf16.msrb.mxu1 %v9839_v37  ;;  %v10134_v36 = vld [vmem:[%s17139_s12 + $0x12e0] sm:$0xf]  ;;  %v11479_v37 = vld [vmem:[%s17139_s12 + $0x12e4] sm:$0xf0] }
 0x5f5   : > { %5909 = vmatpush.bf16.msra.mxu3 %v9903_v19  ;;  %5922 = vmatpush.bf16.msrb.mxu2 %v9967_v46  ;;  %v7832_v19 = vld [vmem:[%s17139_s12 + $0xe8] sm:$0xf0]  ;;  %v2342_v46 = vld [vmem:[#allocation1] sm:$0xff]  ;;  %v10135_v51 = vor.u32 %v11479_v37, %v10134_v36  ;;  %v11455_v56 = vld [vmem:[%s17139_s12 + $0x1224] sm:$0xf0] }
 0x5f6   : > { %v7835_v15 = vor.u32 %v10902_v45, %v7832_v19  ;;  %v7752_v36 = vld [vmem:[%s17139_s12 + $0x48] sm:$0xf0]  ;;  %v10898_v37 = vld [vmem:[%s17139_s12 + $0xc4] sm:$0xf]  ;;  %v10038_v35 = vld [vmem:[%s17139_s12 + $0x1220] sm:$0xf] }
 0x5f8   : > { %5884 = vmatpush.bf16.msrb.mxu0 %v9767_v57  ;;  %5897 = vmatpush.bf16.msrb.mxu1 %v9831_v58  ;;  %v10884_v57 = vld [vmem:[%s17139_s12 + $0x54] sm:$0xf]  ;;  %v7760_v58 = vld [vmem:[%s17139_s12 + $0x58] sm:$0xf0]  ;;  %v5678_v39 = vpop.f32.mrf.mxu0 }
 0x5f9   : > { %5910 = vmatpush.bf16.msra.mxu3 %v9895_v22  ;;  %5923 = vmatpush.bf16.msrb.mxu2 %v9959_v23  ;;  %v10127_v22 = vor.u32 %v11477_v55, %v10126_v53  ;;  %v10054_v23 = vld [vmem:[%s17139_s12 + $0x1240] sm:$0xf]  ;;  %v5679_v45 = vadd.f32 %v5678_v39, %v14172_v54  ;;  %v11473_v54 = vld [vmem:[%s17139_s12 + $0x12b4] sm:$0xf0]  ;;  %v10896_v53 = vld [vmem:[%s17139_s12 + $0xb4] sm:$0xf] }
 0x5fa   : > { %v7808_v55 = vld [vmem:[%s17139_s12 + $0xb8] sm:$0xf0] }
 0x5fb   : > { %5885 = vmatmul.bf16.vlgmr.msrb.gmra.mxu0 %v2342_v46  ;;  %5898 = vmatmul.bf16.vlgmr.msrb.gmra.mxu1 %v2343_v48  ;;  %v10046_v48 = vld [vmem:[%s17139_s12 + $0x1230] sm:$0xf] }
 0x5fc   : > { %5929 = vmatpush.bf16.msra.mxu0 %v10079_v24  ;;  %5942 = vmatpush.bf16.msra.mxu1 %v10143_v40  ;;  %v11459_v24 = vld [vmem:[%s17139_s12 + $0x1244] sm:$0xf0]  ;;  %v7763_v40 = vor.u32 %v10884_v57, %v7760_v58  ;;  %v10111_v58 = vor.u32 %v11473_v54, %v10110_v52  ;;  %v10094_v52 = vld [vmem:[%s17139_s12 + $0x1290] sm:$0xf]  ;;  %v11469_v54 = vld [vmem:[%s17139_s12 + $0x1294] sm:$0xf0] }
 0x5fd   : > { %5968 = vmatpush.bf16.msra.mxu2 %v7779_v27  ;;  %5981 = vmatpush.bf16.msrb.mxu3 %v7843_v33  ;;  %v11475_v27 = vld [vmem:[%s17139_s12 + $0x12c4] sm:$0xf0]  ;;  %v10882_v33 = vld [vmem:[%s17139_s12 + $0x44] sm:$0xf]  ;;  %v10055_v19 = vor.u32 %v11459_v24, %v10054_v23  ;;  %v10102_v24 = vld [vmem:[%s17139_s12 + $0x12a0] sm:$0xf] }
 0x5fe   : > { %5911 = vmatmul.bf16.vlgmr.msra.gmra.mxu3 %v2344_v44  ;;  %5924 = vmatmul.bf16.vlgmr.msrb.gmra.mxu2 %v2345_v49  ;;  %v10119_v46 = vor.u32 %v11475_v27, %v10118_v11  ;;  %v5691_v44 = vpop.f32.mrf.mxu1  ;;  %v11457_v49 = vld [vmem:[%s17139_s12 + $0x1234] sm:$0xf0] }
 0x5ff   : > { %v10047_v57 = vor.u32 %v11457_v49, %v10046_v48  ;;  %v2299_v48 = vld [vmem:[%s17139_s12 + $0x1320] sm:$0xff] }
 0x600   : > { %5930 = vmatpush.bf16.msra.mxu0 %v10071_v50  ;;  %5943 = vmatpush.bf16.msra.mxu1 %v10135_v51  ;;  %v7755_v50 = vor.u32 %v10882_v33, %v7752_v36  ;;  %v7819_v51 = vor.u32 %v10898_v37, %v7816_v38  ;;  %v7736_v33 = vld [vmem:[%s17139_s12 + $0x28] sm:$0xf0]  ;;  %v10894_v36 = vld [vmem:[%s17139_s12 + $0xa4] sm:$0xf]  ;;  %v5680_v38 = vpop.f32.mrf.mxu0 }
 0x601   : > { %5969 = vmatpush.bf16.msra.mxu2 %v7771_v25  ;;  %5982 = vmatpush.bf16.msrb.mxu3 %v7835_v15  ;;  %v5692_v25 = vadd.f32 %v5691_v44, %v5679_v45  ;;  %v7744_v15 = vld [vmem:[%s17139_s12 + $0x38] sm:$0xf0]  ;;  %v5704_v23 = vpop.f32.mrf.mxu3  ;;  %v5717_v27 = vpop.f32.mrf.mxu2  ;;  %v7800_v37 = vld [vmem:[%s17139_s12 + $0xa8] sm:$0xf0]  ;;  %v10039_v45 = vor.u32 %v11455_v56, %v10038_v35  ;;  %v11453_v44 = vld [vmem:[%s17139_s12 + $0x1214] sm:$0xf0] }
 0x602   : > { %v10022_v35 = vld [vmem:[%s17139_s12 + $0x1200] sm:$0xf]  ;;  %v11451_v56 = vld [vmem:[%s17139_s12 + $0x1204] sm:$0xf0]  ;;  %v10936_v38 = vld [vmem:[%s17139_s12 + $0x1f4] sm:$0xf] }
 0x603   : > { %v5705_v11 = vadd.f32 %v5704_v23, %v5692_v25  ;;  %v7728_v25 = vld [vmem:[%s17139_s12 + $0x18] sm:$0xf0]  ;;  %v10086_v23 = vld [vmem:[%s17139_s12 + $0x1280] sm:$0xf] }
 0x604   : > { %5931 = vmatpush.bf16.msra.mxu0 %v10063_v13  ;;  %5944 = vmatpush.bf16.msra.mxu1 %v10127_v22  ;;  %v7747_v13 = vor.u32 %v10880_v47, %v7744_v15  ;;  %v7811_v22 = vor.u32 %v10896_v53, %v7808_v55  ;;  %v10876_v47 = vld [vmem:[%s17139_s12 + $0x14] sm:$0xf]  ;;  %v7792_v53 = vld [vmem:[%s17139_s12 + $0x98] sm:$0xf0]  ;;  %v4224_v55 = vunpack.c.l.b16 %v2299_v48 }
 0x605   : > { %5970 = vmatpush.bf16.msra.mxu2 %v7763_v40  ;;  %5983 = vmatpush.bf16.msrb.mxu3 %v7827_v26  ;;  %v11471_v40 = vld [vmem:[%s17139_s12 + $0x12a4] sm:$0xf0]  ;;  %v10878_v26 = vld [vmem:[%s17139_s12 + $0x24] sm:$0xf]  ;;  %v14367_v39 = vadd.f32 %v5717_v27, %v5705_v11  ;;  %v10892_v15 = vld [vmem:[%s17139_s12 + $0x94] sm:$0xf] }
 0x606   : > { %v5693_v49 = vpop.f32.mrf.mxu1  ;;  %v7720_v11 = vld [vmem:[%s17139_s12 + $0x8] sm:$0xf0]  ;;  %v10890_v27 = vld [vmem:[%s17139_s12 + $0x84] sm:$0xf]  ;;  %v8032_v48 = vld [vmem:[%s17139_s12 + $0x278] sm:$0xf0] }
 0x607   : > { %v10968_v49 = vld [vmem:[%s17139_s12 + $0x2f4] sm:$0xf] }
 0x608   : > { %5932 = vmatpush.bf16.msra.mxu0 %v10055_v19  ;;  %5945 = vmatpush.bf16.msra.mxu1 %v10119_v46  ;;  %v10103_v19 = vor.u32 %v11471_v40, %v10102_v24  ;;  %v10030_v46 = vld [vmem:[%s17139_s12 + $0x1210] sm:$0xf]  ;;  %v11467_v24 = vld [vmem:[%s17139_s12 + $0x1284] sm:$0xf0]  ;;  %v10874_v40 = vld [vmem:[%s17139_s12 + $0x4] sm:$0xf] }
 0x609   : > { %5971 = vmatpush.bf16.msra.mxu2 %v7755_v50  ;;  %5984 = vmatpush.bf16.msrb.mxu3 %v7819_v51  ;;  %v7739_v50 = vor.u32 %v10878_v26, %v7736_v33  ;;  %v7803_v51 = vor.u32 %v10894_v36, %v7800_v37  ;;  %v5706_v26 = vpop.f32.mrf.mxu3  ;;  %v7784_v33 = vld [vmem:[%s17139_s12 + $0x88] sm:$0xf0]  ;;  %v5719_v36 = vpop.f32.mrf.mxu2  ;;  %v4838_v37 = vpack.c.b16 %v4224_v55, %v4224_v55 }
 0x60c   : > { %5933 = vmatpush.bf16.msra.mxu0 %v10047_v57  ;;  %5946 = vmatpush.bf16.msra.mxu1 %v10111_v58  ;;  %v10031_v57 = vor.u32 %v11453_v44, %v10030_v46  ;;  %v10095_v58 = vor.u32 %v11469_v54, %v10094_v52  ;;  %v10023_v46 = vor.u32 %v11451_v56, %v10022_v35  ;;  %v10950_v35 = vld [vmem:[%s17139_s12 + $0x264] sm:$0xf]  ;;  %v8024_v56 = vld [vmem:[%s17139_s12 + $0x268] sm:$0xf0] }
 0x60d   : > { %5972 = vmatpush.bf16.msra.mxu2 %v7747_v13  ;;  %5985 = vmatpush.bf16.msrb.mxu3 %v7811_v22  ;;  %v7731_v13 = vor.u32 %v10876_v47, %v7728_v25  ;;  %v7795_v22 = vor.u32 %v10892_v15, %v7792_v53  ;;  %v10087_v44 = vor.u32 %v11467_v24, %v10086_v23  ;;  %v10158_v47 = vld [vmem:[%s17139_s12 + $0x1310] sm:$0xf]  ;;  %v11485_v25 = vld [vmem:[%s17139_s12 + $0x1314] sm:$0xf0]  ;;  %v10934_v15 = vld [vmem:[%s17139_s12 + $0x1e4] sm:$0xf] }
 0x60e   : > { %v7787_v52 = vor.u32 %v10890_v27, %v7784_v33  ;;  %v5456_v53 = vsel %vm624_vm0, %v4838_v37, 0  ;;  %v2346_v23 = vld [vmem:[#allocation1 + $0x24] sm:$0xff]  ;;  %v2347_v24 = vld [vmem:[#allocation1 + $0x2d] sm:$0xff]  ;;  %v8027_v33 = vor.u32 %v10950_v35, %v8024_v56 }
 0x60f   : > { %v11483_v27 = vld [vmem:[%s17139_s12 + $0x1304] sm:$0xf0]  ;;  %v10932_v37 = vld [vmem:[%s17139_s12 + $0x1d4] sm:$0xf]  ;;  %v7896_v35 = vld [vmem:[%s17139_s12 + $0x168] sm:$0xf0] }
 0x610   : > { %5934 = vmatpush.bf16.msra.mxu0 %v10039_v45  ;;  %5947 = vmatpush.bf16.msra.mxu1 %v10103_v19  ;;  %v7968_v45 = vld [vmem:[%s17139_s12 + $0x1f8] sm:$0xf0]  ;;  %v10952_v19 = vld [vmem:[%s17139_s12 + $0x274] sm:$0xf] }
 0x611   : > { %5973 = vmatpush.bf16.msra.mxu2 %v7739_v50  ;;  %5986 = vmatpush.bf16.msrb.mxu3 %v7803_v51  ;;  %v8096_v50 = vld [vmem:[%s17139_s12 + $0x2f8] sm:$0xf0]  ;;  %v7723_v51 = vor.u32 %v10874_v40, %v7720_v11  ;;  %v7971_v54 = vor.u32 %v10936_v38, %v7968_v45  ;;  %v8035_v55 = vor.u32 %v10952_v19, %v8032_v48  ;;  %v10150_v11 = vld [vmem:[%s17139_s12 + $0x1300] sm:$0xf]  ;;  %v10948_v45 = vld [vmem:[%s17139_s12 + $0x254] sm:$0xf] }
 0x612   : > { %v10159_v40 = vor.u32 %v11485_v25, %v10158_v47  ;;  %v7952_v38 = vld [vmem:[%s17139_s12 + $0x1d8] sm:$0xf0]  ;;  %v10920_v48 = vld [vmem:[%s17139_s12 + $0x174] sm:$0xf]  ;;  %v10946_v47 = vld [vmem:[%s17139_s12 + $0x244] sm:$0xf] }
 0x613   : > { %v8016_v19 = vld [vmem:[%s17139_s12 + $0x258] sm:$0xf0] }
 0x614   : > { %5935 = vmatpush.bf16.msra.mxu0 %v10031_v57  ;;  %5948 = vmatpush.bf16.msra.mxu1 %v10095_v58  ;;  %v8099_v57 = vor.u32 %v10968_v49, %v8096_v50  ;;  %v7960_v58 = vld [vmem:[%s17139_s12 + $0x1e8] sm:$0xf0]  ;;  %v10151_v49 = vor.u32 %v11483_v27, %v10150_v11  ;;  %v7955_v50 = vor.u32 %v10932_v37, %v7952_v38  ;;  %v10944_v11 = vld [vmem:[%s17139_s12 + $0x234] sm:$0xf]  ;;  %v8064_v37 = vld [vmem:[%s17139_s12 + $0x2b8] sm:$0xf0] }
 0x615   : > { %5974 = vmatpush.bf16.msra.mxu2 %v7731_v13  ;;  %5987 = vmatpush.bf16.msrb.mxu3 %v7795_v22  ;;  %v10966_v13 = vld [vmem:[%s17139_s12 + $0x2e4] sm:$0xf]  ;;  %v8088_v22 = vld [vmem:[%s17139_s12 + $0x2e8] sm:$0xf0]  ;;  %v7963_v26 = vor.u32 %v10934_v15, %v7960_v58  ;;  %v10916_v38 = vld [vmem:[%s17139_s12 + $0x154] sm:$0xf] }
 0x616   : > { %v8091_v36 = vor.u32 %v10966_v13, %v8088_v22  ;;  %v8008_v15 = vld [vmem:[%s17139_s12 + $0x248] sm:$0xf0]  ;;  %v10918_v58 = vld [vmem:[%s17139_s12 + $0x164] sm:$0xf] }
 0x617   : > { %v7899_v27 = vor.u32 %v10918_v58, %v7896_v35 }
 0x618   : > { %5936 = vmatpush.bf16.msra.mxu0 %v10023_v46  ;;  %5949 = vmatpush.bf16.msra.mxu1 %v10087_v44  ;;  %v10964_v46 = vld [vmem:[%s17139_s12 + $0x2d4] sm:$0xf]  ;;  %v8080_v44 = vld [vmem:[%s17139_s12 + $0x2d8] sm:$0xf0]  ;;  %v5743_v22 = vpop.f32.mrf.mxu1 }
 0x619   : > { %5975 = vmatpush.bf16.msra.mxu2 %v7723_v51  ;;  %5988 = vmatpush.bf16.msrb.mxu3 %v7787_v52  ;;  %v8019_v51 = vor.u32 %v10948_v45, %v8016_v19  ;;  %v8083_v52 = vor.u32 %v10964_v46, %v8080_v44  ;;  %v7888_v45 = vld [vmem:[%s17139_s12 + $0x158] sm:$0xf0] }
 0x61b   : > { %5937 = vmatmul.bf16.vlgmr.msra.gmra.mxu0 %v2346_v23  ;;  %5950 = vmatmul.bf16.vlgmr.msra.gmra.mxu1 %v2347_v24  ;;  %v8011_v23 = vor.u32 %v10946_v47, %v8008_v15  ;;  %v10958_v47 = vld [vmem:[%s17139_s12 + $0x2a4] sm:$0xf] }
 0x61c   : > { %5960 = vmatpush.bf16.msrb.mxu0 %v5456_v53  ;;  %6007 = vmatpush.bf16.msrb.mxu1 %v7971_v54  ;;  %v7944_v54 = vld [vmem:[%s17139_s12 + $0x1c8] sm:$0xf0]  ;;  %v10962_v53 = vld [vmem:[%s17139_s12 + $0x2c4] sm:$0xf] }
 0x61d   : > { %6020 = vmatpush.bf16.msrb.mxu2 %v8035_v55  ;;  %6033 = vmatpush.bf16.msra.mxu3 %v8099_v57  ;;  %v8072_v55 = vld [vmem:[%s17139_s12 + $0x2c8] sm:$0xf0]  ;;  %v5730_v57 = vpop.f32.mrf.mxu0  ;;  %v10914_v15 = vld [vmem:[%s17139_s12 + $0x144] sm:$0xf] }
 0x61e   : > { %5976 = vmatmul.bf16.vlgmr.msra.gmra.mxu2 %v12518_v59  ;;  %5989 = vmatmul.bf16.vlgmr.msrb.gmra.mxu3 %v12520_v60  ;;  %v7904_v59 = vld [vmem:[%s17139_s12 + $0x178] sm:$0xf0]  ;;  %v10930_v60 = vld [vmem:[%s17139_s12 + $0x1c4] sm:$0xf]  ;;  %v5731_v56 = vadd.f32 %v5730_v57, %v14367_v39  ;;  %v8075_v24 = vor.u32 %v10962_v53, %v8072_v55  ;;  %v7880_v53 = vld [vmem:[%s17139_s12 + $0x148] sm:$0xf0] }
 0x61f   : > { %v7907_v25 = vor.u32 %v10920_v48, %v7904_v59  ;;  %v7947_v13 = vor.u32 %v10930_v60, %v7944_v54  ;;  %v10926_v59 = vld [vmem:[%s17139_s12 + $0x1a4] sm:$0xf]  ;;  %v7992_v54 = vld [vmem:[%s17139_s12 + $0x228] sm:$0xf0]  ;;  %v2348_v57 = vld [vmem:[#allocation1 + $0x36] sm:$0xff] }
 0x620   : > { %5961 = vmatpush.bf16.msrb.mxu0 %v10159_v40  ;;  %6008 = vmatpush.bf16.msrb.mxu1 %v7963_v26  ;;  %v10928_v40 = vld [vmem:[%s17139_s12 + $0x1b4] sm:$0xf]  ;;  %v7936_v26 = vld [vmem:[%s17139_s12 + $0x1b8] sm:$0xf0]  ;;  %v5744_v39 = vadd.f32 %v5743_v22, %v5731_v56  ;;  %v5745_v56 = vpop.f32.mrf.mxu1 }
 0x621   : > { %6021 = vmatpush.bf16.msrb.mxu2 %v8027_v33  ;;  %6034 = vmatpush.bf16.msra.mxu3 %v8091_v36  ;;  %v8000_v33 = vld [vmem:[%s17139_s12 + $0x238] sm:$0xf0]  ;;  %v10960_v36 = vld [vmem:[%s17139_s12 + $0x2b4] sm:$0xf]  ;;  %v7939_v19 = vor.u32 %v10928_v40, %v7936_v26  ;;  %v5756_v48 = vpop.f32.mrf.mxu3  ;;  %v5769_v60 = vpop.f32.mrf.mxu2  ;;  %v7883_v26 = vor.u32 %v10914_v15, %v7880_v53 }
 0x622   : > { %v8003_v46 = vor.u32 %v10944_v11, %v8000_v33  ;;  %v8067_v44 = vor.u32 %v10960_v36, %v8064_v37  ;;  %v10940_v40 = vld [vmem:[%s17139_s12 + $0x214] sm:$0xf]  ;;  %v7984_v11 = vld [vmem:[%s17139_s12 + $0x218] sm:$0xf0] }
 0x623   : > { %v10912_v33 = vld [vmem:[%s17139_s12 + $0x134] sm:$0xf]  ;;  %v7872_v36 = vld [vmem:[%s17139_s12 + $0x138] sm:$0xf0] }
 0x624   : > { %5962 = vmatpush.bf16.msrb.mxu0 %v10151_v49  ;;  %6009 = vmatpush.bf16.msrb.mxu1 %v7955_v50  ;;  %v7928_v49 = vld [vmem:[%s17139_s12 + $0x1a8] sm:$0xf0]  ;;  %v10942_v50 = vld [vmem:[%s17139_s12 + $0x224] sm:$0xf]  ;;  %v11016_v15 = vld [vmem:[%s17139_s12 + $0x474] sm:$0xf] }
 0x625   : > { %6022 = vmatpush.bf16.msrb.mxu2 %v8019_v51  ;;  %6035 = vmatpush.bf16.msra.mxu3 %v8083_v52  ;;  %v5757_v51 = vadd.f32 %v5756_v48, %v5744_v39  ;;  %v7891_v52 = vor.u32 %v10916_v38, %v7888_v45  ;;  %v5732_v55 = vpop.f32.mrf.mxu0  ;;  %v7931_v35 = vor.u32 %v10926_v59, %v7928_v49  ;;  %v10956_v39 = vld [vmem:[%s17139_s12 + $0x294] sm:$0xf]  ;;  %v10922_v38 = vld [vmem:[%s17139_s12 + $0x184] sm:$0xf]  ;;  %v7912_v45 = vld [vmem:[%s17139_s12 + $0x188] sm:$0xf0] }
 0x626   : > { %v7976_v48 = vld [vmem:[%s17139_s12 + $0x208] sm:$0xf0]  ;;  %v10954_v59 = vld [vmem:[%s17139_s12 + $0x284] sm:$0xf]  ;;  %v7915_v53 = vor.u32 %v10922_v38, %v7912_v45  ;;  %v8288_v55 = vld [vmem:[%s17139_s12 + $0x478] sm:$0xf0] }
 0x627   : > { %v14568_v58 = vadd.f32 %v5769_v60, %v5757_v51  ;;  %v8040_v51 = vld [vmem:[%s17139_s12 + $0x288] sm:$0xf0] }
 0x628   : > { %5994 = vmatpush.bf16.msra.mxu0 %v7907_v25  ;;  %6010 = vmatpush.bf16.msrb.mxu1 %v7947_v13  ;;  %v8056_v25 = vld [vmem:[%s17139_s12 + $0x2a8] sm:$0xf0]  ;;  %v7995_v13 = vor.u32 %v10942_v50, %v7992_v54  ;;  %v7875_v50 = vor.u32 %v10912_v33, %v7872_v36  ;;  %v11014_v33 = vld [vmem:[%s17139_s12 + $0x464] sm:$0xf] }
 0x629   : > { %6023 = vmatpush.bf16.msrb.mxu2 %v8011_v23  ;;  %6036 = vmatpush.bf16.msra.mxu3 %v8075_v24  ;;  %v8059_v22 = vor.u32 %v10958_v47, %v8056_v25  ;;  %v10924_v23 = vld [vmem:[%s17139_s12 + $0x194] sm:$0xf]  ;;  %v7920_v24 = vld [vmem:[%s17139_s12 + $0x198] sm:$0xf0]  ;;  %v5758_v49 = vpop.f32.mrf.mxu3  ;;  %v7864_v60 = vld [vmem:[%s17139_s12 + $0x128] sm:$0xf0]  ;;  %v5771_v54 = vpop.f32.mrf.mxu2 }
 0x62a   : > { %v7923_v37 = vor.u32 %v10924_v23, %v7920_v24  ;;  %v11000_v47 = vld [vmem:[%s17139_s12 + $0x3f4] sm:$0xf]  ;;  %v8224_v25 = vld [vmem:[%s17139_s12 + $0x3f8] sm:$0xf0]  ;;  %v8280_v36 = vld [vmem:[%s17139_s12 + $0x468] sm:$0xf0] }
 0x62b   : > { %10164 = vmatmul.msk.bf16.vlgmr.msrb.gmra.mxu0 %vm5452_vm12, %v2348_v57  ;;  %v11032_v57 = vld [vmem:[%s17139_s12 + $0x4f4] sm:$0xf]  ;;  %v8227_v23 = vor.u32 %v11000_v47, %v8224_v25  ;;  %v8344_v38 = vld [vmem:[%s17139_s12 + $0x4e8] sm:$0xf0]  ;;  %v8336_v54 = vld [vmem:[%s17139_s12 + $0x4d8] sm:$0xf0] }
 0x62c   : > { %5995 = vmatpush.bf16.msra.mxu0 %v7899_v27  ;;  %6011 = vmatpush.bf16.msrb.mxu1 %v7939_v19  ;;  %v8048_v27 = vld [vmem:[%s17139_s12 + $0x298] sm:$0xf0]  ;;  %v7987_v19 = vor.u32 %v10940_v40, %v7984_v11  ;;  %v10908_v24 = vld [vmem:[%s17139_s12 + $0x114] sm:$0xf] }
 0x62d   : > { %6024 = vmatpush.bf16.msrb.mxu2 %v8003_v46  ;;  %6037 = vmatpush.bf16.msra.mxu3 %v8067_v44  ;;  %v8051_v46 = vor.u32 %v10956_v39, %v8048_v27  ;;  %v10938_v44 = vld [vmem:[%s17139_s12 + $0x204] sm:$0xf]  ;;  %v7856_v40 = vld [vmem:[%s17139_s12 + $0x118] sm:$0xf0]  ;;  %v8216_v27 = vld [vmem:[%s17139_s12 + $0x3e8] sm:$0xf0] }
 0x62e   : > { %v7979_v56 = vor.u32 %v10938_v44, %v7976_v48  ;;  %v10998_v39 = vld [vmem:[%s17139_s12 + $0x3e4] sm:$0xf]  ;;  %v7859_v45 = vor.u32 %v10908_v24, %v7856_v40  ;;  %v7848_v44 = vld [vmem:[%s17139_s12 + $0x108] sm:$0xf0]  ;;  %v8283_v48 = vor.u32 %v11014_v33, %v8280_v36  ;;  %v10996_v49 = vld [vmem:[%s17139_s12 + $0x3d4] sm:$0xf] }
 0x62f   : > { %v10984_v47 = vld [vmem:[%s17139_s12 + $0x374] sm:$0xf]  ;;  %v8160_v25 = vld [vmem:[%s17139_s12 + $0x378] sm:$0xf0]  ;;  %v10982_v24 = vld [vmem:[%s17139_s12 + $0x364] sm:$0xf] }
 0x630   : > { %5996 = vmatpush.bf16.msra.mxu0 %v7891_v52  ;;  %6012 = vmatpush.bf16.msrb.mxu1 %v7931_v35  ;;  %v10910_v52 = vld [vmem:[%s17139_s12 + $0x124] sm:$0xf]  ;;  %v8352_v35 = vld [vmem:[%s17139_s12 + $0x4f8] sm:$0xf0]  ;;  %v8152_v40 = vld [vmem:[%s17139_s12 + $0x368] sm:$0xf0] }
 0x631   : > { %6025 = vmatpush.bf16.msrb.mxu2 %v7995_v13  ;;  %6038 = vmatpush.bf16.msra.mxu3 %v8059_v22  ;;  %v8043_v13 = vor.u32 %v10954_v59, %v8040_v51  ;;  %v7867_v22 = vor.u32 %v10910_v52, %v7864_v60  ;;  %v8355_v11 = vor.u32 %v11032_v57, %v8352_v35  ;;  %v11012_v51 = vld [vmem:[%s17139_s12 + $0x454] sm:$0xf]  ;;  %v8272_v52 = vld [vmem:[%s17139_s12 + $0x458] sm:$0xf0]  ;;  %v8200_v57 = vld [vmem:[%s17139_s12 + $0x3c8] sm:$0xf0] }
 0x632   : > { %v11028_v60 = vld [vmem:[%s17139_s12 + $0x4d4] sm:$0xf]  ;;  %v8163_v35 = vor.u32 %v10984_v47, %v8160_v25 }
 0x633   : > { %v10992_v36 = vld [vmem:[%s17139_s12 + $0x3b4] sm:$0xf] }
 0x634   : > { %5997 = vmatpush.bf16.msra.mxu0 %v7883_v26  ;;  %6013 = vmatpush.bf16.msrb.mxu1 %v7923_v37  ;;  %v8291_v26 = vor.u32 %v11016_v15, %v8288_v55  ;;  %v11030_v37 = vld [vmem:[%s17139_s12 + $0x4e4] sm:$0xf]  ;;  %v8275_v55 = vor.u32 %v11012_v51, %v8272_v52 }
 0x635   : > { %6026 = vmatpush.bf16.msrb.mxu2 %v7987_v19  ;;  %6039 = vmatpush.bf16.msra.mxu3 %v8051_v46  ;;  %v8219_v19 = vor.u32 %v10998_v39, %v8216_v27  ;;  %v10906_v46 = vld [vmem:[%s17139_s12 + $0x104] sm:$0xf]  ;;  %v8347_v59 = vor.u32 %v11030_v37, %v8344_v38  ;;  %v8192_v37 = vld [vmem:[%s17139_s12 + $0x3b8] sm:$0xf0]  ;;  %v11008_v38 = vld [vmem:[%s17139_s12 + $0x434] sm:$0xf] }
 0x636   : > { %v7851_v15 = vor.u32 %v10906_v46, %v7848_v44  ;;  %v11024_v46 = vld [vmem:[%s17139_s12 + $0x4b4] sm:$0xf]  ;;  %v8320_v44 = vld [vmem:[%s17139_s12 + $0x4b8] sm:$0xf0] }
 0x637   : > { %v8323_v51 = vor.u32 %v11024_v46, %v8320_v44  ;;  %v11002_v44 = vld [vmem:[%s17139_s12 + $0x404] sm:$0xf] }
 0x638   : > { %5998 = vmatpush.bf16.msra.mxu0 %v7875_v50  ;;  %6014 = vmatpush.bf16.msrb.mxu1 %v7915_v53  ;;  %v8208_v50 = vld [vmem:[%s17139_s12 + $0x3d8] sm:$0xf0]  ;;  %v5795_v39 = vpop.f32.mrf.mxu1 }
 0x639   : > { %6027 = vmatpush.bf16.msrb.mxu2 %v7979_v56  ;;  %6040 = vmatpush.bf16.msra.mxu3 %v8043_v13  ;;  %v8211_v53 = vor.u32 %v10996_v49, %v8208_v50  ;;  %v8264_v56 = vld [vmem:[%s17139_s12 + $0x448] sm:$0xf0]  ;;  %v11026_v13 = vld [vmem:[%s17139_s12 + $0x4c4] sm:$0xf]  ;;  %v8195_v49 = vor.u32 %v10992_v36, %v8192_v37  ;;  %v10976_v36 = vld [vmem:[%s17139_s12 + $0x334] sm:$0xf] }
 0x63a   : > { %v8128_v37 = vld [vmem:[%s17139_s12 + $0x338] sm:$0xf0] }
 0x63b   : > { %6015 = vmatmul.bf16.vlgmr.msrb.gmra.mxu1 %v12526_v0  ;;  %v11010_v0 = vld [vmem:[%s17139_s12 + $0x444] sm:$0xf] }
 0x63c   : > { %5999 = vmatpush.bf16.msra.mxu0 %v7867_v22  ;;  %6059 = vmatpush.bf16.msra.mxu1 %v8227_v23  ;;  %v8328_v22 = vld [vmem:[%s17139_s12 + $0x4c8] sm:$0xf0]  ;;  %v5782_v23 = vpop.f32.mrf.mxu0  ;;  %v8267_v27 = vor.u32 %v11010_v0, %v8264_v56 }
 0x63d   : > { %6072 = vmatpush.bf16.msra.mxu2 %v8291_v26  ;;  %6085 = vmatpush.bf16.msrb.mxu3 %v8355_v11  ;;  %v5783_v26 = vadd.f32 %v5782_v23, %v14568_v58  ;;  %v8331_v33 = vor.u32 %v11026_v13, %v8328_v22  ;;  %v8136_v0 = vld [vmem:[%s17139_s12 + $0x348] sm:$0xf0] }
 0x63e   : > { %6028 = vmatmul.bf16.vlgmr.msrb.gmra.mxu2 %v12528_v1  ;;  %6041 = vmatmul.bf16.vlgmr.msra.gmra.mxu3 %v12537_v4  ;;  %v8339_v1 = vor.u32 %v11028_v60, %v8336_v54  ;;  %v10994_v4 = vld [vmem:[%s17139_s12 + $0x3c4] sm:$0xf] }
 0x63f   : > { %v8203_v11 = vor.u32 %v10994_v4, %v8200_v57  ;;  %v5796_v58 = vadd.f32 %v5795_v39, %v5783_v26  ;;  %v10990_v60 = vld [vmem:[%s17139_s12 + $0x3a4] sm:$0xf]  ;;  %v11004_v26 = vld [vmem:[%s17139_s12 + $0x414] sm:$0xf]  ;;  %v8240_v39 = vld [vmem:[%s17139_s12 + $0x418] sm:$0xf0] }
 0x640   : > { %6000 = vmatpush.bf16.msra.mxu0 %v7859_v45  ;;  %6060 = vmatpush.bf16.msra.mxu1 %v8219_v19  ;;  %v8155_v45 = vor.u32 %v10982_v24, %v8152_v40  ;;  %v8256_v19 = vld [vmem:[%s17139_s12 + $0x438] sm:$0xf0]  ;;  %v11006_v54 = vld [vmem:[%s17139_s12 + $0x424] sm:$0xf]  ;;  %v5797_v13 = vpop.f32.mrf.mxu1  ;;  %v10988_v24 = vld [vmem:[%s17139_s12 + $0x394] sm:$0xf] }
 0x641   : > { %6073 = vmatpush.bf16.msra.mxu2 %v8283_v48  ;;  %6086 = vmatpush.bf16.msrb.mxu3 %v8347_v59  ;;  %v10980_v48 = vld [vmem:[%s17139_s12 + $0x354] sm:$0xf]  ;;  %v8144_v59 = vld [vmem:[%s17139_s12 + $0x358] sm:$0xf0]  ;;  %v8259_v50 = vor.u32 %v11008_v38, %v8256_v19  ;;  %v5808_v52 = vpop.f32.mrf.mxu3  ;;  %v10978_v57 = vld [vmem:[%s17139_s12 + $0x344] sm:$0xf]  ;;  %v8243_v19 = vor.u32 %v11004_v26, %v8240_v39 }
 0x642   : > { %v5809_v47 = vadd.f32 %v5808_v52, %v5796_v58  ;;  %v8147_v25 = vor.u32 %v10980_v48, %v8144_v59  ;;  %v8176_v40 = vld [vmem:[%s17139_s12 + $0x398] sm:$0xf0]  ;;  %v10986_v58 = vld [vmem:[%s17139_s12 + $0x384] sm:$0xf]  ;;  %v8232_v48 = vld [vmem:[%s17139_s12 + $0x408] sm:$0xf0] }
 0x643   : > { %v8179_v38 = vor.u32 %v10988_v24, %v8176_v40  ;;  %v11018_v59 = vld [vmem:[%s17139_s12 + $0x484] sm:$0xf]  ;;  %v10972_v13 = vld [vmem:[%s17139_s12 + $0x314] sm:$0xf]  ;;  %v8472_v26 = vld [vmem:[%s17139_s12 + $0x5e8] sm:$0xf0] }
 0x644   : > { %6001 = vmatpush.bf16.msra.mxu0 %v7851_v15  ;;  %6061 = vmatpush.bf16.msra.mxu1 %v8211_v53  ;;  %v5821_v15 = vpop.f32.mrf.mxu2  ;;  %v8248_v53 = vld [vmem:[%s17139_s12 + $0x428] sm:$0xf0]  ;;  %v5784_v4 = vpop.f32.mrf.mxu0  ;;  %v10974_v52 = vld [vmem:[%s17139_s12 + $0x324] sm:$0xf] }
 0x645   : > { %6074 = vmatpush.bf16.msra.mxu2 %v8275_v55  ;;  %6087 = vmatpush.bf16.msrb.mxu3 %v8339_v1  ;;  %v11022_v55 = vld [vmem:[%s17139_s12 + $0x4a4] sm:$0xf]  ;;  %v8312_v1 = vld [vmem:[%s17139_s12 + $0x4a8] sm:$0xf0]  ;;  %v8251_v22 = vor.u32 %v11006_v54, %v8248_v53  ;;  %v11064_v54 = vld [vmem:[%s17139_s12 + $0x5f4] sm:$0xf]  ;;  %v8235_v4 = vor.u32 %v11002_v44, %v8232_v48 }
 0x646   : > { %v8315_v23 = vor.u32 %v11022_v55, %v8312_v1  ;;  %v8544_v53 = vld [vmem:[%s17139_s12 + $0x678] sm:$0xf0]  ;;  %v11096_v55 = vld [vmem:[%s17139_s12 + $0x6f4] sm:$0xf]  ;;  %v11062_v40 = vld [vmem:[%s17139_s12 + $0x5e4] sm:$0xf] }
 0x647   : > { %6002 = vmatmul.bf16.vlgmr.msra.gmra.mxu0 %v12522_v61  ;;  %v8184_v61 = vld [vmem:[%s17139_s12 + $0x3a8] sm:$0xf0]  ;;  %v8608_v1 = vld [vmem:[%s17139_s12 + $0x6f8] sm:$0xf0]  ;;  %v11076_v48 = vld [vmem:[%s17139_s12 + $0x654] sm:$0xf] }
 0x648   : > { %6046 = vmatpush.bf16.msrb.mxu0 %v8163_v35  ;;  %6062 = vmatpush.bf16.msra.mxu1 %v8203_v11  ;;  %v14768_v35 = vadd.f32 %v5821_v15, %v5809_v47  ;;  %v8187_v56 = vor.u32 %v10990_v60, %v8184_v61  ;;  %v8139_v11 = vor.u32 %v10978_v57, %v8136_v0  ;;  %v8120_v60 = vld [vmem:[%s17139_s12 + $0x328] sm:$0xf0]  ;;  %v8480_v47 = vld [vmem:[%s17139_s12 + $0x5f8] sm:$0xf0] }
 0x649   : > { %6075 = vmatpush.bf16.msra.mxu2 %v8267_v27  ;;  %6088 = vmatpush.bf16.msrb.mxu3 %v8331_v33  ;;  %v11020_v27 = vld [vmem:[%s17139_s12 + $0x494] sm:$0xf]  ;;  %v8304_v33 = vld [vmem:[%s17139_s12 + $0x498] sm:$0xf0]  ;;  %v8123_v0 = vor.u32 %v10974_v52, %v8120_v60  ;;  %v8611_v24 = vor.u32 %v11096_v55, %v8608_v1  ;;  %v8536_v39 = vld [vmem:[%s17139_s12 + $0x668] sm:$0xf0] }
 0x64a   : > { %v8307_v46 = vor.u32 %v11020_v27, %v8304_v33  ;;  %v11094_v27 = vld [vmem:[%s17139_s12 + $0x6e4] sm:$0xf]  ;;  %v8600_v33 = vld [vmem:[%s17139_s12 + $0x6e8] sm:$0xf0]  ;;  %v8464_v44 = vld [vmem:[%s17139_s12 + $0x5d8] sm:$0xf0] }
 0x64b   : > { %v8584_v55 = vld [vmem:[%s17139_s12 + $0x6c8] sm:$0xf0] }
 0x64c   : > { %6047 = vmatpush.bf16.msrb.mxu0 %v8155_v45  ;;  %6063 = vmatpush.bf16.msra.mxu1 %v8195_v49  ;;  %v8168_v45 = vld [vmem:[%s17139_s12 + $0x388] sm:$0xf0]  ;;  %v5810_v49 = vpop.f32.mrf.mxu3  ;;  %v5823_v61 = vpop.f32.mrf.mxu2 }
 0x64d   : > { %6076 = vmatpush.bf16.msra.mxu2 %v8259_v50  ;;  %6089 = vmatpush.bf16.msrb.mxu3 %v8323_v51  ;;  %v8131_v50 = vor.u32 %v10976_v36, %v8128_v37  ;;  %v8296_v51 = vld [vmem:[%s17139_s12 + $0x488] sm:$0xf0]  ;;  %v8171_v15 = vor.u32 %v10986_v58, %v8168_v45  ;;  %v8475_v37 = vor.u32 %v11062_v40, %v8472_v26  ;;  %v11092_v49 = vld [vmem:[%s17139_s12 + $0x6d4] sm:$0xf]  ;;  %v8448_v40 = vld [vmem:[%s17139_s12 + $0x5b8] sm:$0xf0] }
 0x64e   : > { %v8299_v57 = vor.u32 %v11018_v59, %v8296_v51  ;;  %v8104_v58 = vld [vmem:[%s17139_s12 + $0x308] sm:$0xf0]  ;;  %v8528_v59 = vld [vmem:[%s17139_s12 + $0x658] sm:$0xf0]  ;;  %v11048_v51 = vld [vmem:[%s17139_s12 + $0x574] sm:$0xf] }
 0x64f   : > { %v8531_v61 = vor.u32 %v11076_v48, %v8528_v59  ;;  %v11072_v26 = vld [vmem:[%s17139_s12 + $0x634] sm:$0xf] }
 0x650   : > { %6048 = vmatpush.bf16.msrb.mxu0 %v8147_v25  ;;  %6064 = vmatpush.bf16.msra.mxu1 %v8187_v56  ;;  %v11080_v25 = vld [vmem:[%s17139_s12 + $0x674] sm:$0xf]  ;;  %v8483_v56 = vor.u32 %v11064_v54, %v8480_v47  ;;  %v8456_v47 = vld [vmem:[%s17139_s12 + $0x5c8] sm:$0xf0] }
 0x651   : > { %6077 = vmatpush.bf16.msra.mxu2 %v8251_v22  ;;  %6090 = vmatpush.bf16.msrb.mxu3 %v8315_v23  ;;  %v8112_v22 = vld [vmem:[%s17139_s12 + $0x318] sm:$0xf0]  ;;  %v8547_v23 = vor.u32 %v11080_v25, %v8544_v53  ;;  %v11090_v53 = vld [vmem:[%s17139_s12 + $0x6c4] sm:$0xf] }
 0x652   : > { %v8115_v36 = vor.u32 %v10972_v13, %v8112_v22 }
 0x654   : > { %6049 = vmatpush.bf16.msrb.mxu0 %v8139_v11  ;;  %6065 = vmatpush.bf16.msra.mxu1 %v8179_v38  ;;  %v11078_v11 = vld [vmem:[%s17139_s12 + $0x664] sm:$0xf] }
 0x655   : > { %6078 = vmatpush.bf16.msra.mxu2 %v8243_v19  ;;  %6091 = vmatpush.bf16.msrb.mxu3 %v8307_v46  ;;  %v10970_v38 = vld [vmem:[%s17139_s12 + $0x304] sm:$0xf]  ;;  %v8539_v45 = vor.u32 %v11078_v11, %v8536_v39  ;;  %v8603_v19 = vor.u32 %v11094_v27, %v8600_v33  ;;  %v11060_v46 = vld [vmem:[%s17139_s12 + $0x5d4] sm:$0xf]  ;;  %v8512_v39 = vld [vmem:[%s17139_s12 + $0x638] sm:$0xf0] }
 0x656   : > { %v8107_v52 = vor.u32 %v10970_v38, %v8104_v58  ;;  %v8467_v60 = vor.u32 %v11060_v46, %v8464_v44  ;;  %v11088_v27 = vld [vmem:[%s17139_s12 + $0x6b4] sm:$0xf]  ;;  %v8576_v33 = vld [vmem:[%s17139_s12 + $0x6b8] sm:$0xf0]  ;;  %v8515_v58 = vor.u32 %v11072_v26, %v8512_v39  ;;  %v11054_v46 = vld [vmem:[%s17139_s12 + $0x5a4] sm:$0xf] }
 0x657   : > { %v11070_v44 = vld [vmem:[%s17139_s12 + $0x624] sm:$0xf] }
 0x658   : > { %6050 = vmatpush.bf16.msrb.mxu0 %v8131_v50  ;;  %6066 = vmatpush.bf16.msra.mxu1 %v8171_v15  ;;  %v8592_v50 = vld [vmem:[%s17139_s12 + $0x6d8] sm:$0xf0]  ;;  %v8520_v15 = vld [vmem:[%s17139_s12 + $0x648] sm:$0xf0]  ;;  %v5834_v1 = vpop.f32.mrf.mxu0  ;;  %v5847_v13 = vpop.f32.mrf.mxu1  ;;  %v11082_v39 = vld [vmem:[%s17139_s12 + $0x684] sm:$0xf] }
 0x659   : > { %6079 = vmatpush.bf16.msra.mxu2 %v8235_v4  ;;  %6092 = vmatpush.bf16.msrb.mxu3 %v8299_v57  ;;  %v8595_v54 = vor.u32 %v11092_v49, %v8592_v50  ;;  %v11046_v4 = vld [vmem:[%s17139_s12 + $0x564] sm:$0xf]  ;;  %v8408_v57 = vld [vmem:[%s17139_s12 + $0x568] sm:$0xf0] }
 0x65a   : > { %v8411_v11 = vor.u32 %v11046_v4, %v8408_v57  ;;  %v8504_v50 = vld [vmem:[%s17139_s12 + $0x628] sm:$0xf0]  ;;  %v8496_v4 = vld [vmem:[%s17139_s12 + $0x618] sm:$0xf0]  ;;  %v11084_v57 = vld [vmem:[%s17139_s12 + $0x694] sm:$0xf] }
 0x65b   : > { %6067 = vmatmul.bf16.vlgmr.msra.gmra.mxu1 %v12539_v5  ;;  %v11074_v5 = vld [vmem:[%s17139_s12 + $0x644] sm:$0xf] }
 0x65c   : > { %6051 = vmatpush.bf16.msrb.mxu0 %v8123_v0  ;;  %6111 = vmatpush.bf16.msrb.mxu1 %v8483_v56  ;;  %v5835_v0 = vadd.f32 %v5834_v1, %v14768_v35  ;;  %v8523_v22 = vor.u32 %v11074_v5, %v8520_v15  ;;  %v8507_v5 = vor.u32 %v11070_v44, %v8504_v50  ;;  %v11052_v15 = vld [vmem:[%s17139_s12 + $0x594] sm:$0xf]  ;;  %v8800_v44 = vld [vmem:[%s17139_s12 + $0x878] sm:$0xf0] }
 0x65d   : > { %6124 = vmatpush.bf16.msrb.mxu2 %v8547_v23  ;;  %6137 = vmatpush.bf16.msra.mxu3 %v8611_v24  ;;  %v8587_v23 = vor.u32 %v11090_v53, %v8584_v55  ;;  %v11056_v24 = vld [vmem:[%s17139_s12 + $0x5b4] sm:$0xf]  ;;  %v8432_v53 = vld [vmem:[%s17139_s12 + $0x598] sm:$0xf0] }
 0x65e   : > { %6080 = vmatmul.bf16.vlgmr.msra.gmra.mxu2 %v12731_v28  ;;  %6093 = vmatmul.bf16.vlgmr.msrb.gmra.mxu3 %v12736_v31  ;;  %v8416_v28 = vld [vmem:[%s17139_s12 + $0x578] sm:$0xf0]  ;;  %v11058_v31 = vld [vmem:[%s17139_s12 + $0x5c4] sm:$0xf]  ;;  %v5848_v35 = vadd.f32 %v5847_v13, %v5835_v0  ;;  %v8451_v38 = vor.u32 %v11056_v24, %v8448_v40  ;;  %v11068_v55 = vld [vmem:[%s17139_s12 + $0x614] sm:$0xf] }
 0x65f   : > { %v8419_v25 = vor.u32 %v11048_v51, %v8416_v28  ;;  %v8459_v56 = vor.u32 %v11058_v31, %v8456_v47  ;;  %v11086_v51 = vld [vmem:[%s17139_s12 + $0x6a4] sm:$0xf]  ;;  %v8568_v28 = vld [vmem:[%s17139_s12 + $0x6a8] sm:$0xf0]  ;;  %v8560_v0 = vld [vmem:[%s17139_s12 + $0x698] sm:$0xf0]  ;;  %v8499_v40 = vor.u32 %v11068_v55, %v8496_v4 }
 0x660   : > { %6052 = vmatpush.bf16.msrb.mxu0 %v8115_v36  ;;  %6112 = vmatpush.bf16.msrb.mxu1 %v8475_v37  ;;  %v11044_v36 = vld [vmem:[%s17139_s12 + $0x554] sm:$0xf]  ;;  %v8400_v37 = vld [vmem:[%s17139_s12 + $0x558] sm:$0xf0]  ;;  %v5849_v47 = vpop.f32.mrf.mxu1  ;;  %v8424_v24 = vld [vmem:[%s17139_s12 + $0x588] sm:$0xf0]  ;;  %v8563_v26 = vor.u32 %v11084_v57, %v8560_v0 }
 0x661   : > { %6125 = vmatpush.bf16.msrb.mxu2 %v8539_v45  ;;  %6138 = vmatpush.bf16.msra.mxu3 %v8603_v19  ;;  %v8579_v45 = vor.u32 %v11088_v27, %v8576_v33  ;;  %v5860_v19 = vpop.f32.mrf.mxu3  ;;  %v8403_v59 = vor.u32 %v11044_v36, %v8400_v37  ;;  %v5873_v49 = vpop.f32.mrf.mxu2  ;;  %v8384_v13 = vld [vmem:[%s17139_s12 + $0x538] sm:$0xf0]  ;;  %v8552_v36 = vld [vmem:[%s17139_s12 + $0x688] sm:$0xf0]  ;;  %v11038_v37 = vld [vmem:[%s17139_s12 + $0x524] sm:$0xf] }
 0x662   : > { %v5861_v48 = vadd.f32 %v5860_v19, %v5848_v35  ;;  %v11066_v35 = vld [vmem:[%s17139_s12 + $0x604] sm:$0xf]  ;;  %v8736_v19 = vld [vmem:[%s17139_s12 + $0x7f8] sm:$0xf0]  ;;  %v8555_v50 = vor.u32 %v11082_v39, %v8552_v36  ;;  %v8856_v55 = vld [vmem:[%s17139_s12 + $0x8e8] sm:$0xf0] }
 0x663   : > { %v11126_v47 = vld [vmem:[%s17139_s12 + $0x7e4] sm:$0xf]  ;;  %v8360_v0 = vld [vmem:[%s17139_s12 + $0x508] sm:$0xf0]  ;;  %v8672_v39 = vld [vmem:[%s17139_s12 + $0x778] sm:$0xf0] }
 0x664   : > { %6053 = vmatpush.bf16.msrb.mxu0 %v8107_v52  ;;  %6113 = vmatpush.bf16.msrb.mxu1 %v8467_v60  ;;  %v11042_v52 = vld [vmem:[%s17139_s12 + $0x544] sm:$0xf]  ;;  %v8392_v60 = vld [vmem:[%s17139_s12 + $0x548] sm:$0xf0] }
 0x665   : > { %6126 = vmatpush.bf16.msrb.mxu2 %v8531_v61  ;;  %6139 = vmatpush.bf16.msra.mxu3 %v8595_v54  ;;  %v5836_v61 = vpop.f32.mrf.mxu0  ;;  %v14967_v54 = vadd.f32 %v5873_v49, %v5861_v48  ;;  %v8395_v1 = vor.u32 %v11042_v52, %v8392_v60  ;;  %v11160_v48 = vld [vmem:[%s17139_s12 + $0x8f4] sm:$0xf]  ;;  %v8368_v60 = vld [vmem:[%s17139_s12 + $0x518] sm:$0xf0]  ;;  %v11034_v57 = vld [vmem:[%s17139_s12 + $0x504] sm:$0xf] }
 0x666   : > { %v11036_v52 = vld [vmem:[%s17139_s12 + $0x514] sm:$0xf] }
 0x667   : > { %6054 = vmatmul.bf16.vlgmr.msrb.gmra.mxu0 %v12530_v2  ;;  %v8440_v2 = vld [vmem:[%s17139_s12 + $0x5a8] sm:$0xf0] }
 0x668   : > { %6098 = vmatpush.bf16.msra.mxu0 %v8419_v25  ;;  %6114 = vmatpush.bf16.msrb.mxu1 %v8459_v56  ;;  %v8443_v31 = vor.u32 %v11054_v46, %v8440_v2  ;;  %v8571_v25 = vor.u32 %v11086_v51, %v8568_v28  ;;  %v11040_v56 = vld [vmem:[%s17139_s12 + $0x534] sm:$0xf] }
 0x669   : > { %6127 = vmatpush.bf16.msrb.mxu2 %v8523_v22  ;;  %6140 = vmatpush.bf16.msra.mxu3 %v8587_v23  ;;  %v8435_v22 = vor.u32 %v11052_v15, %v8432_v53  ;;  %v11050_v23 = vld [vmem:[%s17139_s12 + $0x584] sm:$0xf]  ;;  %v5862_v27 = vpop.f32.mrf.mxu3  ;;  %v8387_v33 = vor.u32 %v11040_v56, %v8384_v13  ;;  %v11144_v46 = vld [vmem:[%s17139_s12 + $0x874] sm:$0xf]  ;;  %v8792_v15 = vld [vmem:[%s17139_s12 + $0x868] sm:$0xf0] }
 0x66a   : > { %v8427_v2 = vor.u32 %v11050_v23, %v8424_v24  ;;  %v8803_v61 = vor.u32 %v11144_v46, %v8800_v44  ;;  %v11158_v53 = vld [vmem:[%s17139_s12 + $0x8e4] sm:$0xf]  ;;  %v8720_v23 = vld [vmem:[%s17139_s12 + $0x7d8] sm:$0xf0]  ;;  %v11140_v24 = vld [vmem:[%s17139_s12 + $0x854] sm:$0xf]  ;;  %v8363_v27 = vor.u32 %v11034_v57, %v8360_v0 }
 0x66b   : > { %v8859_v13 = vor.u32 %v11158_v53, %v8856_v55  ;;  %v8664_v44 = vld [vmem:[%s17139_s12 + $0x768] sm:$0xf0]  ;;  %v11118_v57 = vld [vmem:[%s17139_s12 + $0x7a4] sm:$0xf] }
 0x66c   : > { %6099 = vmatpush.bf16.msra.mxu0 %v8411_v11  ;;  %6115 = vmatpush.bf16.msrb.mxu1 %v8451_v38  ;;  %v8488_v11 = vld [vmem:[%s17139_s12 + $0x608] sm:$0xf0]  ;;  %v11134_v0 = vld [vmem:[%s17139_s12 + $0x824] sm:$0xf] }
 0x66d   : > { %6128 = vmatpush.bf16.msrb.mxu2 %v8515_v58  ;;  %6141 = vmatpush.bf16.msra.mxu3 %v8579_v45  ;;  %v8376_v38 = vld [vmem:[%s17139_s12 + $0x528] sm:$0xf0]  ;;  %v5875_v58 = vpop.f32.mrf.mxu2  ;;  %v11128_v45 = vld [vmem:[%s17139_s12 + $0x7f4] sm:$0xf]  ;;  %v8491_v49 = vor.u32 %v11066_v35, %v8488_v11  ;;  %v8848_v35 = vld [vmem:[%s17139_s12 + $0x8d8] sm:$0xf0] }
 0x66e   : > { %v8379_v51 = vor.u32 %v11038_v37, %v8376_v38  ;;  %v8739_v28 = vor.u32 %v11128_v45, %v8736_v19  ;;  %v11112_v11 = vld [vmem:[%s17139_s12 + $0x774] sm:$0xf]  ;;  %v8712_v37 = vld [vmem:[%s17139_s12 + $0x7c8] sm:$0xf0]  ;;  %v11154_v45 = vld [vmem:[%s17139_s12 + $0x8c4] sm:$0xf] }
 0x66f   : > { %v8675_v38 = vor.u32 %v11112_v11, %v8672_v39  ;;  %v8776_v58 = vld [vmem:[%s17139_s12 + $0x848] sm:$0xf0] }
 0x670   : > { %6100 = vmatpush.bf16.msra.mxu0 %v8403_v59  ;;  %6116 = vmatpush.bf16.msrb.mxu1 %v8443_v31  ;;  %v8864_v59 = vld [vmem:[%s17139_s12 + $0x8f8] sm:$0xf0]  ;;  %v8840_v19 = vld [vmem:[%s17139_s12 + $0x8c8] sm:$0xf0] }
 0x671   : > { %6129 = vmatpush.bf16.msrb.mxu2 %v8507_v5  ;;  %6142 = vmatpush.bf16.msra.mxu3 %v8571_v25  ;;  %v8867_v31 = vor.u32 %v11160_v48, %v8864_v59  ;;  %v8728_v5 = vld [vmem:[%s17139_s12 + $0x7e8] sm:$0xf0]  ;;  %v11142_v25 = vld [vmem:[%s17139_s12 + $0x864] sm:$0xf] }
 0x672   : > { %v8731_v4 = vor.u32 %v11126_v47, %v8728_v5  ;;  %v8795_v56 = vor.u32 %v11142_v25, %v8792_v15  ;;  %v11152_v47 = vld [vmem:[%s17139_s12 + $0x8b4] sm:$0xf]  ;;  %v8832_v5 = vld [vmem:[%s17139_s12 + $0x8b8] sm:$0xf0]  ;;  %v8648_v11 = vld [vmem:[%s17139_s12 + $0x748] sm:$0xf0] }
 0x673   : > { %v11108_v25 = vld [vmem:[%s17139_s12 + $0x754] sm:$0xf]  ;;  %v8656_v15 = vld [vmem:[%s17139_s12 + $0x758] sm:$0xf0] }
 0x674   : > { %6101 = vmatpush.bf16.msra.mxu0 %v8395_v1  ;;  %6117 = vmatpush.bf16.msrb.mxu1 %v8435_v22  ;;  %v8371_v1 = vor.u32 %v11036_v52, %v8368_v60  ;;  %v11124_v22 = vld [vmem:[%s17139_s12 + $0x7d4] sm:$0xf]  ;;  %v8704_v52 = vld [vmem:[%s17139_s12 + $0x7b8] sm:$0xf0] }
 0x675   : > { %6130 = vmatpush.bf16.msrb.mxu2 %v8499_v40  ;;  %6143 = vmatpush.bf16.msra.mxu3 %v8563_v26  ;;  %v8784_v40 = vld [vmem:[%s17139_s12 + $0x858] sm:$0xf0]  ;;  %v11156_v26 = vld [vmem:[%s17139_s12 + $0x8d4] sm:$0xf] }
 0x676   : > { %v8787_v36 = vor.u32 %v11140_v24, %v8784_v40  ;;  %v11136_v60 = vld [vmem:[%s17139_s12 + $0x834] sm:$0xf]  ;;  %v11150_v24 = vld [vmem:[%s17139_s12 + $0x8a4] sm:$0xf]  ;;  %v8824_v40 = vld [vmem:[%s17139_s12 + $0x8a8] sm:$0xf0] }
 0x678   : > { %6102 = vmatpush.bf16.msra.mxu0 %v8387_v33  ;;  %6118 = vmatpush.bf16.msrb.mxu1 %v8427_v2  ;;  %v8723_v33 = vor.u32 %v11124_v22, %v8720_v23  ;;  %v5886_v46 = vpop.f32.mrf.mxu0  ;;  %v11110_v2 = vld [vmem:[%s17139_s12 + $0x764] sm:$0xf]  ;;  %v8760_v23 = vld [vmem:[%s17139_s12 + $0x828] sm:$0xf0] }
 0x679   : > { %6131 = vmatpush.bf16.msrb.mxu2 %v8491_v49  ;;  %6144 = vmatpush.bf16.msra.mxu3 %v8555_v50  ;;  %v5887_v48 = vadd.f32 %v5886_v46, %v14967_v54  ;;  %v5899_v49 = vpop.f32.mrf.mxu1  ;;  %v11104_v46 = vld [vmem:[%s17139_s12 + $0x734] sm:$0xf] }
 0x67b   : > { %6119 = vmatmul.bf16.vlgmr.msrb.gmra.mxu1 %v12738_v32  ;;  %v11138_v32 = vld [vmem:[%s17139_s12 + $0x844] sm:$0xf]  ;;  %v5900_v54 = vadd.f32 %v5899_v49, %v5887_v48 }
 0x67c   : > { %6103 = vmatpush.bf16.msra.mxu0 %v8379_v51  ;;  %6163 = vmatpush.bf16.msra.mxu1 %v8739_v28  ;;  %v8779_v50 = vor.u32 %v11138_v32, %v8776_v58  ;;  %v8843_v51 = vor.u32 %v11154_v45, %v8840_v19  ;;  %v11120_v28 = vld [vmem:[%s17139_s12 + $0x7b4] sm:$0xf]  ;;  %v8752_v58 = vld [vmem:[%s17139_s12 + $0x818] sm:$0xf0]  ;;  %v11114_v48 = vld [vmem:[%s17139_s12 + $0x784] sm:$0xf] }
 0x67d   : > { %6176 = vmatpush.bf16.msra.mxu2 %v8803_v61  ;;  %6189 = vmatpush.bf16.msrb.mxu3 %v8867_v31  ;;  %v8667_v61 = vor.u32 %v11110_v2, %v8664_v44  ;;  %v8768_v31 = vld [vmem:[%s17139_s12 + $0x838] sm:$0xf0]  ;;  %v8707_v53 = vor.u32 %v11120_v28, %v8704_v52  ;;  %v11132_v32 = vld [vmem:[%s17139_s12 + $0x814] sm:$0xf]  ;;  %v8744_v28 = vld [vmem:[%s17139_s12 + $0x808] sm:$0xf0] }
 0x67e   : > { %6132 = vmatmul.bf16.vlgmr.msrb.gmra.mxu2 %v12745_v34  ;;  %6145 = vmatmul.bf16.vlgmr.msra.gmra.mxu3 %v12771_v42  ;;  %v8851_v34 = vor.u32 %v11156_v26, %v8848_v35  ;;  %v11122_v42 = vld [vmem:[%s17139_s12 + $0x7c4] sm:$0xf]  ;;  %v8771_v55 = vor.u32 %v11136_v60, %v8768_v31  ;;  %v11148_v45 = vld [vmem:[%s17139_s12 + $0x894] sm:$0xf]  ;;  %v8816_v19 = vld [vmem:[%s17139_s12 + $0x898] sm:$0xf0]  ;;  %v8755_v49 = vor.u32 %v11132_v32, %v8752_v58 }
 0x67f   : > { %v8715_v59 = vor.u32 %v11122_v42, %v8712_v37  ;;  %v11106_v35 = vld [vmem:[%s17139_s12 + $0x744] sm:$0xf]  ;;  %v11116_v42 = vld [vmem:[%s17139_s12 + $0x794] sm:$0xf]  ;;  %v8688_v37 = vld [vmem:[%s17139_s12 + $0x798] sm:$0xf0] }
 0x680   : > { %6104 = vmatpush.bf16.msra.mxu0 %v8371_v1  ;;  %6164 = vmatpush.bf16.msra.mxu1 %v8731_v4  ;;  %v8835_v1 = vor.u32 %v11152_v47, %v8832_v5  ;;  %v5888_v26 = vpop.f32.mrf.mxu0  ;;  %v8640_v2 = vld [vmem:[%s17139_s12 + $0x738] sm:$0xf0]  ;;  %v8691_v44 = vor.u32 %v11116_v42, %v8688_v37  ;;  %v11146_v52 = vld [vmem:[%s17139_s12 + $0x884] sm:$0xf]  ;;  %v8632_v47 = vld [vmem:[%s17139_s12 + $0x728] sm:$0xf0] }
 0x681   : > { %6177 = vmatpush.bf16.msra.mxu2 %v8795_v56  ;;  %6190 = vmatpush.bf16.msrb.mxu3 %v8859_v13  ;;  %v5912_v4 = vpop.f32.mrf.mxu3  ;;  %v8659_v13 = vor.u32 %v11108_v25, %v8656_v15  ;;  %v5925_v22 = vpop.f32.mrf.mxu2  ;;  %v11102_v31 = vld [vmem:[%s17139_s12 + $0x724] sm:$0xf]  ;;  %v11192_v25 = vld [vmem:[%s17139_s12 + $0x9f4] sm:$0xf]  ;;  %v8992_v15 = vld [vmem:[%s17139_s12 + $0x9f8] sm:$0xf0] }
 0x682   : > { %v5913_v56 = vadd.f32 %v5912_v4, %v5900_v54  ;;  %v8643_v54 = vor.u32 %v11104_v46, %v8640_v2  ;;  %v11224_v4 = vld [vmem:[%s17139_s12 + $0xaf4] sm:$0xf]  ;;  %v11190_v26 = vld [vmem:[%s17139_s12 + $0x9e4] sm:$0xf]  ;;  %v8616_v32 = vld [vmem:[%s17139_s12 + $0x708] sm:$0xf0] }
 0x683   : > { %v11098_v37 = vld [vmem:[%s17139_s12 + $0x704] sm:$0xf]  ;;  %v11204_v46 = vld [vmem:[%s17139_s12 + $0xa54] sm:$0xf]  ;;  %v9040_v2 = vld [vmem:[%s17139_s12 + $0xa58] sm:$0xf0] }
 0x684   : > { %6105 = vmatpush.bf16.msra.mxu0 %v8363_v27  ;;  %6165 = vmatpush.bf16.msra.mxu1 %v8723_v33  ;;  %v15166_v39 = vadd.f32 %v5925_v22, %v5913_v56  ;;  %v5901_v33 = vpop.f32.mrf.mxu1  ;;  %v8635_v56 = vor.u32 %v11102_v31, %v8632_v47  ;;  %v11100_v22 = vld [vmem:[%s17139_s12 + $0x714] sm:$0xf]  ;;  %v9096_v31 = vld [vmem:[%s17139_s12 + $0xac8] sm:$0xf0] }
 0x685   : > { %6178 = vmatpush.bf16.msra.mxu2 %v8787_v36  ;;  %6191 = vmatpush.bf16.msrb.mxu3 %v8851_v34  ;;  %v8763_v36 = vor.u32 %v11134_v0, %v8760_v23  ;;  %v8827_v34 = vor.u32 %v11150_v24, %v8824_v40  ;;  %v8624_v23 = vld [vmem:[%s17139_s12 + $0x718] sm:$0xf0]  ;;  %v11222_v33 = vld [vmem:[%s17139_s12 + $0xae4] sm:$0xf] }
 0x687   : > { %6106 = vmatmul.bf16.vlgmr.msra.gmra.mxu0 %v12733_v29  ;;  %v8696_v29 = vld [vmem:[%s17139_s12 + $0x7a8] sm:$0xf0] }
 0x688   : > { %6150 = vmatpush.bf16.msrb.mxu0 %v8675_v38  ;;  %6166 = vmatpush.bf16.msra.mxu1 %v8715_v59  ;;  %v8699_v27 = vor.u32 %v11118_v57, %v8696_v29  ;;  %v8651_v38 = vor.u32 %v11106_v35, %v8648_v11  ;;  %v8680_v59 = vld [vmem:[%s17139_s12 + $0x788] sm:$0xf0]  ;;  %v9120_v57 = vld [vmem:[%s17139_s12 + $0xaf8] sm:$0xf0]  ;;  %v11206_v11 = vld [vmem:[%s17139_s12 + $0xa64] sm:$0xf] }
 0x689   : > { %6179 = vmatpush.bf16.msra.mxu2 %v8779_v50  ;;  %6192 = vmatpush.bf16.msrb.mxu3 %v8843_v51  ;;  %v8819_v50 = vor.u32 %v11148_v45, %v8816_v19  ;;  %v11130_v51 = vld [vmem:[%s17139_s12 + $0x804] sm:$0xf]  ;;  %v5914_v60 = vpop.f32.mrf.mxu3  ;;  %v5927_v5 = vpop.f32.mrf.mxu2  ;;  %v9123_v40 = vor.u32 %v11224_v4, %v9120_v57  ;;  %v8984_v35 = vld [vmem:[%s17139_s12 + $0x9e8] sm:$0xf0]  ;;  %v11188_v45 = vld [vmem:[%s17139_s12 + $0x9d4] sm:$0xf] }
 0x68a   : > { %v8747_v29 = vor.u32 %v11130_v51, %v8744_v28  ;;  %v8987_v42 = vor.u32 %v11190_v26, %v8984_v35  ;;  %v8976_v19 = vld [vmem:[%s17139_s12 + $0x9d8] sm:$0xf0]  ;;  %v9043_v51 = vor.u32 %v11204_v46, %v9040_v2  ;;  %v11174_v5 = vld [vmem:[%s17139_s12 + $0x964] sm:$0xf]  ;;  %v11184_v57 = vld [vmem:[%s17139_s12 + $0x9b4] sm:$0xf] }
 0x68b   : > { %v8904_v46 = vld [vmem:[%s17139_s12 + $0x948] sm:$0xf0] }
 0x68c   : > { %6151 = vmatpush.bf16.msrb.mxu0 %v8667_v61  ;;  %6167 = vmatpush.bf16.msra.mxu1 %v8707_v53  ;;  %v8808_v61 = vld [vmem:[%s17139_s12 + $0x888] sm:$0xf0]  ;;  %v11208_v53 = vld [vmem:[%s17139_s12 + $0xa74] sm:$0xf] }
 0x68d   : > { %6180 = vmatpush.bf16.msra.mxu2 %v8771_v55  ;;  %6193 = vmatpush.bf16.msrb.mxu3 %v8835_v1  ;;  %v8683_v55 = vor.u32 %v11114_v48, %v8680_v59  ;;  %v9056_v1 = vld [vmem:[%s17139_s12 + $0xa78] sm:$0xf0]  ;;  %v8811_v0 = vor.u32 %v11146_v52, %v8808_v61  ;;  %v11176_v59 = vld [vmem:[%s17139_s12 + $0x974] sm:$0xf]  ;;  %v8968_v52 = vld [vmem:[%s17139_s12 + $0x9c8] sm:$0xf0] }
 0x68e   : > { %v9059_v24 = vor.u32 %v11208_v53, %v9056_v1  ;;  %v9104_v48 = vld [vmem:[%s17139_s12 + $0xad8] sm:$0xf0]  ;;  %v11218_v61 = vld [vmem:[%s17139_s12 + $0xac4] sm:$0xf] }
 0x68f   : > { %v9099_v4 = vor.u32 %v11218_v61, %v9096_v31  ;;  %v11178_v61 = vld [vmem:[%s17139_s12 + $0x984] sm:$0xf]  ;;  %v8936_v31 = vld [vmem:[%s17139_s12 + $0x988] sm:$0xf0] }
 0x690   : > { %6152 = vmatpush.bf16.msrb.mxu0 %v8659_v13  ;;  %6168 = vmatpush.bf16.msra.mxu1 %v8699_v27  ;;  %v8995_v13 = vor.u32 %v11192_v25, %v8992_v15  ;;  %v9048_v27 = vld [vmem:[%s17139_s12 + $0xa68] sm:$0xf0] }
 0x691   : > { %6181 = vmatpush.bf16.msra.mxu2 %v8763_v36  ;;  %6194 = vmatpush.bf16.msrb.mxu3 %v8827_v34  ;;  %v9112_v36 = vld [vmem:[%s17139_s12 + $0xae8] sm:$0xf0]  ;;  %v8627_v34 = vor.u32 %v11100_v22, %v8624_v23  ;;  %v11216_v22 = vld [vmem:[%s17139_s12 + $0xab4] sm:$0xf]  ;;  %v9088_v23 = vld [vmem:[%s17139_s12 + $0xab8] sm:$0xf0] }
 0x692   : > { %v9115_v58 = vor.u32 %v11222_v33, %v9112_v36  ;;  %v8920_v25 = vld [vmem:[%s17139_s12 + $0x968] sm:$0xf0]  ;;  %v11182_v33 = vld [vmem:[%s17139_s12 + $0x9a4] sm:$0xf] }
 0x693   : > { %v11198_v36 = vld [vmem:[%s17139_s12 + $0xa24] sm:$0xf] }
 0x694   : > { %6153 = vmatpush.bf16.msrb.mxu0 %v8651_v38  ;;  %6169 = vmatpush.bf16.msra.mxu1 %v8691_v44  ;;  %v9051_v38 = vor.u32 %v11206_v11, %v9048_v27  ;;  %v11220_v44 = vld [vmem:[%s17139_s12 + $0xad4] sm:$0xf]  ;;  %v9091_v11 = vor.u32 %v11216_v22, %v9088_v23 }
 0x695   : > { %6182 = vmatpush.bf16.msra.mxu2 %v8755_v49  ;;  %6195 = vmatpush.bf16.msrb.mxu3 %v8819_v50  ;;  %v8619_v49 = vor.u32 %v11098_v37, %v8616_v32  ;;  %v8979_v50 = vor.u32 %v11188_v45, %v8976_v19  ;;  %v9107_v28 = vor.u32 %v11220_v44, %v9104_v48  ;;  %v9016_v37 = vld [vmem:[%s17139_s12 + $0xa28] sm:$0xf0]  ;;  %v11214_v32 = vld [vmem:[%s17139_s12 + $0xaa4] sm:$0xf]  ;;  %v11272_v22 = vld [vmem:[%s17139_s12 + $0xc74] sm:$0xf] }
 0x696   : > { %v11170_v19 = vld [vmem:[%s17139_s12 + $0x944] sm:$0xf]  ;;  %v9019_v48 = vor.u32 %v11198_v36, %v9016_v37 }
 0x698   : > { %6154 = vmatpush.bf16.msrb.mxu0 %v8643_v54  ;;  %6170 = vmatpush.bf16.msra.mxu1 %v8683_v55  ;;  %v9032_v54 = vld [vmem:[%s17139_s12 + $0xa48] sm:$0xf0]  ;;  %v5938_v47 = vpop.f32.mrf.mxu0  ;;  %v5951_v55 = vpop.f32.mrf.mxu1 }
 0x699   : > { %6183 = vmatpush.bf16.msra.mxu2 %v8747_v29  ;;  %6196 = vmatpush.bf16.msrb.mxu3 %v8811_v0  ;;  %v5939_v15 = vadd.f32 %v5938_v47, %v15166_v39  ;;  %v8960_v29 = vld [vmem:[%s17139_s12 + $0x9b8] sm:$0xf0]  ;;  %v11200_v0 = vld [vmem:[%s17139_s12 + $0xa34] sm:$0xf] }
 0x69a   : > { %v8963_v26 = vor.u32 %v11184_v57, %v8960_v29  ;;  %v11166_v57 = vld [vmem:[%s17139_s12 + $0x924] sm:$0xf]  ;;  %v8888_v29 = vld [vmem:[%s17139_s12 + $0x928] sm:$0xf0] }
 0x69b   : > { %6171 = vmatmul.bf16.vlgmr.msra.gmra.mxu1 %v12773_v43  ;;  %v11202_v43 = vld [vmem:[%s17139_s12 + $0xa44] sm:$0xf]  ;;  %v15325_v39 = vadd.f32 %v5951_v55, %v5939_v15 }
 0x69c   : > { %6155 = vmatpush.bf16.msrb.mxu0 %v8635_v56  ;;  %6215 = vmatpush.bf16.msrb.mxu1 %v8995_v13  ;;  %v9035_v1 = vor.u32 %v11202_v43, %v9032_v54  ;;  %v8923_v56 = vor.u32 %v11174_v5, %v8920_v25  ;;  %v9024_v13 = vld [vmem:[%s17139_s12 + $0xa38] sm:$0xf0]  ;;  %v11168_v43 = vld [vmem:[%s17139_s12 + $0x934] sm:$0xf]  ;;  %v11194_v15 = vld [vmem:[%s17139_s12 + $0xa04] sm:$0xf] }
 0x69d   : > { %6228 = vmatpush.bf16.msrb.mxu2 %v9059_v24  ;;  %6241 = vmatpush.bf16.msra.mxu3 %v9123_v40  ;;  %v11172_v24 = vld [vmem:[%s17139_s12 + $0x954] sm:$0xf]  ;;  %v8912_v40 = vld [vmem:[%s17139_s12 + $0x958] sm:$0xf0]  ;;  %v9027_v35 = vor.u32 %v11200_v0, %v9024_v13  ;;  %v11210_v55 = vld [vmem:[%s17139_s12 + $0xa84] sm:$0xf] }
 0x69e   : > { %6184 = vmatmul.bf16.vlgmr.msra.gmra.mxu2 %v12940_v10  ;;  %6197 = vmatmul.bf16.vlgmr.msrb.gmra.mxu3 %v12944_v16  ;;  %v8928_v10 = vld [vmem:[%s17139_s12 + $0x978] sm:$0xf0]  ;;  %v11186_v16 = vld [vmem:[%s17139_s12 + $0x9c4] sm:$0xf] }
 0x69f   : > { %v8931_v60 = vor.u32 %v11176_v59, %v8928_v10  ;;  %v8971_v53 = vor.u32 %v11186_v16, %v8968_v52  ;;  %v11180_v10 = vld [vmem:[%s17139_s12 + $0x994] sm:$0xf]  ;;  %v9072_v52 = vld [vmem:[%s17139_s12 + $0xa98] sm:$0xf0] }
 0x6a0   : > { %6156 = vmatpush.bf16.msrb.mxu0 %v8627_v34  ;;  %6216 = vmatpush.bf16.msrb.mxu1 %v8987_v42  ;;  %v8915_v42 = vor.u32 %v11172_v24, %v8912_v40  ;;  %v5940_v45 = vpop.f32.mrf.mxu0  ;;  %v5953_v44 = vpop.f32.mrf.mxu1  ;;  %v11212_v16 = vld [vmem:[%s17139_s12 + $0xa94] sm:$0xf]  ;;  %v9248_v13 = vld [vmem:[%s17139_s12 + $0xbf8] sm:$0xf0]  ;;  %v8939_v24 = vor.u32 %v11178_v61, %v8936_v31 }
 0x6a1   : > { %6229 = vmatpush.bf16.msrb.mxu2 %v9051_v38  ;;  %6242 = vmatpush.bf16.msra.mxu3 %v9115_v58  ;;  %v5977_v27 = vpop.f32.mrf.mxu2  ;;  %v5990_v34 = vpop.f32.mrf.mxu3  ;;  %v9080_v38 = vld [vmem:[%s17139_s12 + $0xaa8] sm:$0xf0]  ;;  %v9075_v5 = vor.u32 %v11212_v16, %v9072_v52  ;;  %v9312_v40 = vld [vmem:[%s17139_s12 + $0xc78] sm:$0xf0]  ;;  %v11270_v45 = vld [vmem:[%s17139_s12 + $0xc64] sm:$0xf] }
 0x6a2   : > { %v15361_v58 = vadd.f32 %v5990_v34, %v5977_v27  ;;  %v9083_v59 = vor.u32 %v11214_v32, %v9080_v38  ;;  %v11164_v34 = vld [vmem:[%s17139_s12 + $0x914] sm:$0xf]  ;;  %v9315_v37 = vor.u32 %v11272_v22, %v9312_v40  ;;  %v9240_v38 = vld [vmem:[%s17139_s12 + $0xbe8] sm:$0xf0]  ;;  %v9296_v52 = vld [vmem:[%s17139_s12 + $0xc58] sm:$0xf0] }
 0x6a3   : > { %v11268_v16 = vld [vmem:[%s17139_s12 + $0xc54] sm:$0xf]  ;;  %v9184_v31 = vld [vmem:[%s17139_s12 + $0xb78] sm:$0xf0] }
 0x6a4   : > { %6157 = vmatpush.bf16.msrb.mxu0 %v8619_v49  ;;  %6217 = vmatpush.bf16.msrb.mxu1 %v8979_v50  ;;  %v8944_v49 = vld [vmem:[%s17139_s12 + $0x998] sm:$0xf0]  ;;  %v11196_v50 = vld [vmem:[%s17139_s12 + $0xa14] sm:$0xf] }
 0x6a5   : > { %6230 = vmatpush.bf16.msrb.mxu2 %v9043_v51  ;;  %6243 = vmatpush.bf16.msra.mxu3 %v9107_v28  ;;  %v8907_v51 = vor.u32 %v11170_v19, %v8904_v46  ;;  %v9008_v28 = vld [vmem:[%s17139_s12 + $0xa18] sm:$0xf0]  ;;  %v8947_v54 = vor.u32 %v11180_v10, %v8944_v49  ;;  %v9304_v19 = vld [vmem:[%s17139_s12 + $0xc68] sm:$0xf0]  ;;  %v11286_v46 = vld [vmem:[%s17139_s12 + $0xce4] sm:$0xf] }
 0x6a6   : > { %v9011_v47 = vor.u32 %v11196_v50, %v9008_v28  ;;  %v8872_v10 = vld [vmem:[%s17139_s12 + $0x908] sm:$0xf0]  ;;  %v9307_v49 = vor.u32 %v11270_v45, %v9304_v19  ;;  %v9232_v28 = vld [vmem:[%s17139_s12 + $0xbd8] sm:$0xf0]  ;;  %v11240_v61 = vld [vmem:[%s17139_s12 + $0xb74] sm:$0xf] }
 0x6a7   : > { %6158 = vmatmul.bf16.vlgmr.msrb.gmra.mxu0 %v12769_v41  ;;  %v8952_v41 = vld [vmem:[%s17139_s12 + $0x9a8] sm:$0xf0]  ;;  %v11264_v40 = vld [vmem:[%s17139_s12 + $0xc34] sm:$0xf] }
 0x6a8   : > { %6202 = vmatpush.bf16.msra.mxu0 %v8931_v60  ;;  %6218 = vmatpush.bf16.msrb.mxu1 %v8971_v53  ;;  %v8955_v2 = vor.u32 %v11182_v33, %v8952_v41  ;;  %v8896_v60 = vld [vmem:[%s17139_s12 + $0x938] sm:$0xf0]  ;;  %v9000_v53 = vld [vmem:[%s17139_s12 + $0xa08] sm:$0xf0]  ;;  %v5964_v23 = vpop.f32.mrf.mxu0  ;;  %v8891_v41 = vor.u32 %v11166_v57, %v8888_v29  ;;  %v11238_v57 = vld [vmem:[%s17139_s12 + $0xb64] sm:$0xf] }
 0x6a9   : > { %6231 = vmatpush.bf16.msrb.mxu2 %v9035_v1  ;;  %6244 = vmatpush.bf16.msra.mxu3 %v9099_v4  ;;  %v5979_v25 = vpop.f32.mrf.mxu2  ;;  %v8899_v1 = vor.u32 %v11168_v43, %v8896_v60  ;;  %v9064_v4 = vld [vmem:[%s17139_s12 + $0xa88] sm:$0xf0]  ;;  %v5992_v0 = vpop.f32.mrf.mxu3  ;;  %v9003_v27 = vor.u32 %v11194_v15, %v9000_v53  ;;  %v11284_v43 = vld [vmem:[%s17139_s12 + $0xcd4] sm:$0xf]  ;;  %v9360_v60 = vld [vmem:[%s17139_s12 + $0xcd8] sm:$0xf0]  ;;  %v9187_v53 = vor.u32 %v11240_v61, %v9184_v31 }
 0x6aa   : > { %v9067_v33 = vor.u32 %v11210_v55, %v9064_v4  ;;  %v9363_v25 = vor.u32 %v11284_v43, %v9360_v60  ;;  %v9224_v15 = vld [vmem:[%s17139_s12 + $0xbc8] sm:$0xf0]  ;;  %v9200_v43 = vld [vmem:[%s17139_s12 + $0xb98] sm:$0xf0]  ;;  %v11260_v60 = vld [vmem:[%s17139_s12 + $0xc14] sm:$0xf] }
 0x6ab   : > { %v9288_v55 = vld [vmem:[%s17139_s12 + $0xc48] sm:$0xf0]  ;;  %v11276_v61 = vld [vmem:[%s17139_s12 + $0xc94] sm:$0xf]  ;;  %v9328_v31 = vld [vmem:[%s17139_s12 + $0xc98] sm:$0xf0] }
 0x6ac   : > { %6203 = vmatpush.bf16.msra.mxu0 %v8923_v56  ;;  %6219 = vmatpush.bf16.msrb.mxu1 %v8963_v26  ;;  %v11256_v56 = vld [vmem:[%s17139_s12 + $0xbf4] sm:$0xf]  ;;  %v9352_v4 = vld [vmem:[%s17139_s12 + $0xcc8] sm:$0xf0] }
 0x6ad   : > { %6232 = vmatpush.bf16.msrb.mxu2 %v9027_v35  ;;  %6245 = vmatpush.bf16.msra.mxu3 %v9091_v11  ;;  %v11288_v26 = vld [vmem:[%s17139_s12 + $0xcf4] sm:$0xf]  ;;  %v9376_v35 = vld [vmem:[%s17139_s12 + $0xcf8] sm:$0xf0]  ;;  %v15436_v11 = vadd.f32 %v5964_v23, %v15325_v39  ;;  %v9251_v36 = vor.u32 %v11256_v56, %v9248_v13  ;;  %v11254_v39 = vld [vmem:[%s17139_s12 + $0xbe4] sm:$0xf] }
 0x6ae   : > { %v9379_v32 = vor.u32 %v11288_v26, %v9376_v35  ;;  %v9176_v29 = vld [vmem:[%s17139_s12 + $0xb68] sm:$0xf0]  ;;  %v11248_v23 = vld [vmem:[%s17139_s12 + $0xbb4] sm:$0xf]  ;;  %v9280_v35 = vld [vmem:[%s17139_s12 + $0xc38] sm:$0xf0] }
 0x6af   : > { %v9179_v26 = vor.u32 %v11238_v57, %v9176_v29  ;;  %v11274_v57 = vld [vmem:[%s17139_s12 + $0xc84] sm:$0xf] }
 0x6b0   : > { %6204 = vmatpush.bf16.msra.mxu0 %v8915_v42  ;;  %6220 = vmatpush.bf16.msrb.mxu1 %v8955_v2  ;;  %v8880_v42 = vld [vmem:[%s17139_s12 + $0x918] sm:$0xf0]  ;;  %v9368_v2 = vld [vmem:[%s17139_s12 + $0xce8] sm:$0xf0] }
 0x6b1   : > { %6233 = vmatpush.bf16.msrb.mxu2 %v9019_v48  ;;  %6246 = vmatpush.bf16.msra.mxu3 %v9083_v59  ;;  %v8883_v44 = vor.u32 %v11164_v34, %v8880_v42  ;;  %v9243_v48 = vor.u32 %v11254_v39, %v9240_v38  ;;  %v11162_v59 = vld [vmem:[%s17139_s12 + $0x904] sm:$0xf]  ;;  %v9371_v50 = vor.u32 %v11286_v46, %v9368_v2  ;;  %v9272_v46 = vld [vmem:[%s17139_s12 + $0xc28] sm:$0xf0] }
 0x6b2   : > { %v9283_v42 = vor.u32 %v11264_v40, %v9280_v35  ;;  %v11262_v39 = vld [vmem:[%s17139_s12 + $0xc24] sm:$0xf]  ;;  %v11320_v40 = vld [vmem:[%s17139_s12 + $0xdf4] sm:$0xf] }
 0x6b3   : > { %v11278_v2 = vld [vmem:[%s17139_s12 + $0xca4] sm:$0xf]  ;;  %v11336_v35 = vld [vmem:[%s17139_s12 + $0xe74] sm:$0xf] }
 0x6b4   : > { %6205 = vmatpush.bf16.msra.mxu0 %v8907_v51  ;;  %6221 = vmatpush.bf16.msrb.mxu1 %v8947_v54  ;;  %v11252_v51 = vld [vmem:[%s17139_s12 + $0xbd4] sm:$0xf]  ;;  %v5966_v54 = vpop.f32.mrf.mxu0 }
 0x6b5   : > { %6234 = vmatpush.bf16.msrb.mxu2 %v9011_v47  ;;  %6247 = vmatpush.bf16.msra.mxu3 %v9075_v5  ;;  %v8875_v47 = vor.u32 %v11162_v59, %v8872_v10  ;;  %v9235_v5 = vor.u32 %v11252_v51, %v9232_v28  ;;  %v9160_v59 = vld [vmem:[%s17139_s12 + $0xb48] sm:$0xf0]  ;;  %v9275_v28 = vor.u32 %v11262_v39, %v9272_v46  ;;  %v11228_v39 = vld [vmem:[%s17139_s12 + $0xb14] sm:$0xf]  ;;  %v11318_v46 = vld [vmem:[%s17139_s12 + $0xde4] sm:$0xf] }
 0x6b8   : > { %6206 = vmatpush.bf16.msra.mxu0 %v8899_v1  ;;  %6222 = vmatpush.bf16.msrb.mxu1 %v8939_v24  ;;  %v11282_v1 = vld [vmem:[%s17139_s12 + $0xcc4] sm:$0xf]  ;;  %v6016_v56 = vpop.f32.mrf.mxu1  ;;  %v9216_v24 = vld [vmem:[%s17139_s12 + $0xbb8] sm:$0xf0] }
 0x6b9   : > { %6235 = vmatpush.bf16.msrb.mxu2 %v9003_v27  ;;  %6248 = vmatpush.bf16.msra.mxu3 %v9067_v33  ;;  %v9355_v22 = vor.u32 %v11282_v1, %v9352_v4  ;;  %v11280_v27 = vld [vmem:[%s17139_s12 + $0xcb4] sm:$0xf]  ;;  %v9344_v33 = vld [vmem:[%s17139_s12 + $0xcb8] sm:$0xf0]  ;;  %v9219_v34 = vor.u32 %v11248_v23, %v9216_v24  ;;  %v11258_v1 = vld [vmem:[%s17139_s12 + $0xc04] sm:$0xf] }
 0x6ba   : > { %v9256_v4 = vld [vmem:[%s17139_s12 + $0xc08] sm:$0xf0] }
 0x6bb   : > { %6223 = vmatmul.bf16.vlgmr.msrb.gmra.mxu1 %v12946_v17  ;;  %v11266_v17 = vld [vmem:[%s17139_s12 + $0xc44] sm:$0xf]  ;;  %v9144_v23 = vld [vmem:[%s17139_s12 + $0xb28] sm:$0xf0] }
 0x6bc   : > { %6207 = vmatpush.bf16.msra.mxu0 %v8891_v41  ;;  %6267 = vmatpush.bf16.msra.mxu1 %v9251_v36  ;;  %v9291_v13 = vor.u32 %v11266_v17, %v9288_v55  ;;  %v11236_v41 = vld [vmem:[%s17139_s12 + $0xb54] sm:$0xf]  ;;  %v9168_v36 = vld [vmem:[%s17139_s12 + $0xb58] sm:$0xf0]  ;;  %v9331_v55 = vor.u32 %v11276_v61, %v9328_v31 }
 0x6bd   : > { %6280 = vmatpush.bf16.msra.mxu2 %v9315_v37  ;;  %6293 = vmatpush.bf16.msrb.mxu3 %v9379_v32  ;;  %v9347_v37 = vor.u32 %v11280_v27, %v9344_v33  ;;  %v11246_v32 = vld [vmem:[%s17139_s12 + $0xba4] sm:$0xf]  ;;  %v9171_v19 = vor.u32 %v11236_v41, %v9168_v36  ;;  %v9568_v33 = vld [vmem:[%s17139_s12 + $0xe78] sm:$0xf0]  ;;  %v11352_v41 = vld [vmem:[%s17139_s12 + $0xef4] sm:$0xf] }
 0x6be   : > { %6236 = vmatmul.bf16.vlgmr.msrb.gmra.mxu2 %v12948_v18  ;;  %6249 = vmatmul.bf16.vlgmr.msra.gmra.mxu3 %v12952_v21  ;;  %v9299_v18 = vor.u32 %v11268_v16, %v9296_v52  ;;  %v11250_v21 = vld [vmem:[%s17139_s12 + $0xbc4] sm:$0xf]  ;;  %v11244_v52 = vld [vmem:[%s17139_s12 + $0xb94] sm:$0xf]  ;;  %v9632_v36 = vld [vmem:[%s17139_s12 + $0xef8] sm:$0xf0] }
 0x6bf   : > { %v9227_v0 = vor.u32 %v11250_v21, %v9224_v15  ;;  %v11242_v21 = vld [vmem:[%s17139_s12 + $0xb84] sm:$0xf]  ;;  %v9192_v15 = vld [vmem:[%s17139_s12 + $0xb88] sm:$0xf0]  ;;  %v11348_v61 = vld [vmem:[%s17139_s12 + $0xed4] sm:$0xf] }
 0x6c0   : > { %6208 = vmatpush.bf16.msra.mxu0 %v8883_v44  ;;  %6268 = vmatpush.bf16.msra.mxu1 %v9243_v48  ;;  %v9336_v44 = vld [vmem:[%s17139_s12 + $0xca8] sm:$0xf0]  ;;  %v11234_v48 = vld [vmem:[%s17139_s12 + $0xb44] sm:$0xf]  ;;  %v9195_v27 = vor.u32 %v11242_v21, %v9192_v15  ;;  %v9616_v31 = vld [vmem:[%s17139_s12 + $0xed8] sm:$0xf0] }
 0x6c1   : > { %6281 = vmatpush.bf16.msra.mxu2 %v9307_v49  ;;  %6294 = vmatpush.bf16.msrb.mxu3 %v9371_v50  ;;  %v6029_v38 = vpop.f32.mrf.mxu2  ;;  %v6042_v45 = vpop.f32.mrf.mxu3  ;;  %v9339_v16 = vor.u32 %v11278_v2, %v9336_v44  ;;  %v9163_v54 = vor.u32 %v11234_v48, %v9160_v59  ;;  %v9496_v2 = vld [vmem:[%s17139_s12 + $0xde8] sm:$0xf0]  ;;  %v11334_v44 = vld [vmem:[%s17139_s12 + $0xe64] sm:$0xf]  ;;  %v9619_v21 = vor.u32 %v11348_v61, %v9616_v31  ;;  %v11296_v31 = vld [vmem:[%s17139_s12 + $0xd34] sm:$0xf] }
 0x6c2   : > { %v6018_v50 = vpop.f32.mrf.mxu1  ;;  %v9560_v48 = vld [vmem:[%s17139_s12 + $0xe68] sm:$0xf0]  ;;  %v11350_v59 = vld [vmem:[%s17139_s12 + $0xee4] sm:$0xf] }
 0x6c3   : > { %v9499_v50 = vor.u32 %v11318_v46, %v9496_v2  ;;  %v9480_v15 = vld [vmem:[%s17139_s12 + $0xdc8] sm:$0xf0]  ;;  %v11342_v46 = vld [vmem:[%s17139_s12 + $0xea4] sm:$0xf] }
 0x6c4   : > { %6209 = vmatpush.bf16.msra.mxu0 %v8875_v47  ;;  %6269 = vmatpush.bf16.msra.mxu1 %v9235_v5  ;;  %v6003_v10 = vpop.f32.mrf.mxu0  ;;  %v11232_v5 = vld [vmem:[%s17139_s12 + $0xb34] sm:$0xf]  ;;  %v9592_v2 = vld [vmem:[%s17139_s12 + $0xea8] sm:$0xf0] }
 0x6c5   : > { %6282 = vmatpush.bf16.msra.mxu2 %v9299_v18  ;;  %6295 = vmatpush.bf16.msrb.mxu3 %v9363_v25  ;;  %v6004_v51 = vadd.f32 %v6003_v10, %v15361_v58  ;;  %v9264_v58 = vld [vmem:[%s17139_s12 + $0xc18] sm:$0xf0]  ;;  %v9203_v25 = vor.u32 %v11244_v52, %v9200_v43  ;;  %v9624_v10 = vld [vmem:[%s17139_s12 + $0xee8] sm:$0xf0]  ;;  %v11316_v43 = vld [vmem:[%s17139_s12 + $0xdd4] sm:$0xf] }
 0x6c6   : > { %v9152_v18 = vld [vmem:[%s17139_s12 + $0xb38] sm:$0xf0]  ;;  %v9627_v52 = vor.u32 %v11350_v59, %v9624_v10 }
 0x6c7   : > { %6210 = vmatmul.bf16.vlgmr.msra.gmra.mxu0 %v12942_v14  ;;  %v9208_v14 = vld [vmem:[%s17139_s12 + $0xba8] sm:$0xf0]  ;;  %v6017_v47 = vadd.f32 %v6016_v56, %v6004_v51  ;;  %v9155_v56 = vor.u32 %v11232_v5, %v9152_v18  ;;  %v11226_v51 = vld [vmem:[%s17139_s12 + $0xb04] sm:$0xf] }
 0x6c8   : > { %6254 = vmatpush.bf16.msrb.mxu0 %v9187_v53  ;;  %6270 = vmatpush.bf16.msra.mxu1 %v9227_v0  ;;  %v9211_v49 = vor.u32 %v11246_v32, %v9208_v14  ;;  %v9267_v53 = vor.u32 %v11260_v60, %v9264_v58  ;;  %v9488_v60 = vld [vmem:[%s17139_s12 + $0xdd8] sm:$0xf0] }
 0x6c9   : > { %6283 = vmatpush.bf16.msra.mxu2 %v9291_v13  ;;  %6296 = vmatpush.bf16.msrb.mxu3 %v9355_v22  ;;  %v6030_v17 = vadd.f32 %v6029_v38, %v6017_v47  ;;  %v6031_v29 = vpop.f32.mrf.mxu2  ;;  %v6044_v0 = vpop.f32.mrf.mxu3  ;;  %v9320_v13 = vld [vmem:[%s17139_s12 + $0xc88] sm:$0xf0]  ;;  %v11230_v22 = vld [vmem:[%s17139_s12 + $0xb24] sm:$0xf]  ;;  %v9136_v38 = vld [vmem:[%s17139_s12 + $0xb18] sm:$0xf0]  ;;  %v9491_v18 = vor.u32 %v11316_v43, %v9488_v60 }
 0x6ca   : > { %v9147_v32 = vor.u32 %v11230_v22, %v9144_v23  ;;  %v9552_v58 = vld [vmem:[%s17139_s12 + $0xe58] sm:$0xf0]  ;;  %v11304_v47 = vld [vmem:[%s17139_s12 + $0xd74] sm:$0xf] }
 0x6cb   : > { %v15617_v24 = vadd.f32 %v6042_v45, %v6030_v17  ;;  %v9571_v45 = vor.u32 %v11336_v35, %v9568_v33  ;;  %v11312_v22 = vld [vmem:[%s17139_s12 + $0xdb4] sm:$0xf]  ;;  %v9472_v23 = vld [vmem:[%s17139_s12 + $0xdb8] sm:$0xf0] }
 0x6cc   : > { %6255 = vmatpush.bf16.msrb.mxu0 %v9179_v26  ;;  %6271 = vmatpush.bf16.msra.mxu1 %v9219_v34  ;;  %v9504_v26 = vld [vmem:[%s17139_s12 + $0xdf8] sm:$0xf0]  ;;  %v6005_v34 = vpop.f32.mrf.mxu0  ;;  %v11324_v43 = vld [vmem:[%s17139_s12 + $0xe14] sm:$0xf] }
 0x6cd   : > { %6284 = vmatpush.bf16.msra.mxu2 %v9283_v42  ;;  %6297 = vmatpush.bf16.msrb.mxu3 %v9347_v37  ;;  %v9259_v42 = vor.u32 %v11258_v1, %v9256_v4  ;;  %v9323_v37 = vor.u32 %v11274_v57, %v9320_v13  ;;  %v9507_v14 = vor.u32 %v11320_v40, %v9504_v26  ;;  %v9608_v1 = vld [vmem:[%s17139_s12 + $0xec8] sm:$0xf0]  ;;  %v11302_v4 = vld [vmem:[%s17139_s12 + $0xd64] sm:$0xf]  ;;  %v11328_v40 = vld [vmem:[%s17139_s12 + $0xe34] sm:$0xf] }
 0x6ce   : > { %v9432_v57 = vld [vmem:[%s17139_s12 + $0xd68] sm:$0xf0]  ;;  %v9536_v35 = vld [vmem:[%s17139_s12 + $0xe38] sm:$0xf0]  ;;  %v9475_v34 = vor.u32 %v11312_v22, %v9472_v23  ;;  %v11400_v22 = vld [vmem:[%s17139_s12 + $0x1074] sm:$0xf] }
 0x6cf   : > { %v9435_v26 = vor.u32 %v11302_v4, %v9432_v57  ;;  %v9600_v33 = vld [vmem:[%s17139_s12 + $0xeb8] sm:$0xf0]  ;;  %v9576_v4 = vld [vmem:[%s17139_s12 + $0xe88] sm:$0xf0]  ;;  %v11294_v57 = vld [vmem:[%s17139_s12 + $0xd24] sm:$0xf] }
 0x6d0   : > { %6256 = vmatpush.bf16.msrb.mxu0 %v9171_v19  ;;  %6272 = vmatpush.bf16.msra.mxu1 %v9211_v49  ;;  %v9635_v19 = vor.u32 %v11352_v41, %v9632_v36  ;;  %v9139_v49 = vor.u32 %v11228_v39, %v9136_v38  ;;  %v11300_v41 = vld [vmem:[%s17139_s12 + $0xd54] sm:$0xf]  ;;  %v9424_v36 = vld [vmem:[%s17139_s12 + $0xd58] sm:$0xf0]  ;;  %v11326_v39 = vld [vmem:[%s17139_s12 + $0xe24] sm:$0xf] }
 0x6d1   : > { %6285 = vmatpush.bf16.msra.mxu2 %v9275_v28  ;;  %6298 = vmatpush.bf16.msrb.mxu3 %v9339_v16  ;;  %v9128_v28 = vld [vmem:[%s17139_s12 + $0xb08] sm:$0xf0]  ;;  %v9563_v16 = vor.u32 %v11334_v44, %v9560_v48  ;;  %v11298_v44 = vld [vmem:[%s17139_s12 + $0xd44] sm:$0xf] }
 0x6d2   : > { %v9131_v5 = vor.u32 %v11226_v51, %v9128_v28  ;;  %v9416_v48 = vld [vmem:[%s17139_s12 + $0xd48] sm:$0xf0]  ;;  %v9595_v28 = vor.u32 %v11342_v46, %v9592_v2 }
 0x6d3   : > { %v9419_v60 = vor.u32 %v11298_v44, %v9416_v48  ;;  %v9880_v46 = vld [vmem:[%s17139_s12 + $0x10e8] sm:$0xf0]  ;;  %v11290_v48 = vld [vmem:[%s17139_s12 + $0xd04] sm:$0xf] }
 0x6d4   : > { %6257 = vmatpush.bf16.msrb.mxu0 %v9163_v54  ;;  %6273 = vmatpush.bf16.msra.mxu1 %v9203_v25  ;;  %v11332_v54 = vld [vmem:[%s17139_s12 + $0xe54] sm:$0xf] }
 0x6d5   : > { %6286 = vmatpush.bf16.msra.mxu2 %v9267_v53  ;;  %6299 = vmatpush.bf16.msrb.mxu3 %v9331_v55  ;;  %v9555_v25 = vor.u32 %v11332_v54, %v9552_v58  ;;  %v9544_v53 = vld [vmem:[%s17139_s12 + $0xe48] sm:$0xf0]  ;;  %v11346_v55 = vld [vmem:[%s17139_s12 + $0xec4] sm:$0xf]  ;;  %v11340_v54 = vld [vmem:[%s17139_s12 + $0xe94] sm:$0xf] }
 0x6d6   : > { %v9611_v13 = vor.u32 %v11346_v55, %v9608_v1  ;;  %v9584_v58 = vld [vmem:[%s17139_s12 + $0xe98] sm:$0xf0] }
 0x6d8   : > { %6258 = vmatpush.bf16.msrb.mxu0 %v9155_v56  ;;  %6274 = vmatpush.bf16.msra.mxu1 %v9195_v27  ;;  %v6068_v0 = vpop.f32.mrf.mxu1  ;;  %v11344_v27 = vld [vmem:[%s17139_s12 + $0xeb4] sm:$0xf] }
 0x6d9   : > { %6287 = vmatpush.bf16.msra.mxu2 %v9259_v42  ;;  %6300 = vmatpush.bf16.msrb.mxu3 %v9323_v37  ;;  %v9539_v42 = vor.u32 %v11328_v40, %v9536_v35  ;;  %v9603_v37 = vor.u32 %v11344_v27, %v9600_v33  ;;  %v9824_v40 = vld [vmem:[%s17139_s12 + $0x1078] sm:$0xf0] }
 0x6da   : > { %v9888_v35 = vld [vmem:[%s17139_s12 + $0x10f8] sm:$0xf0] }
 0x6db   : > { %6275 = vmatmul.bf16.vlgmr.msra.gmra.mxu1 %v12963_v30  ;;  %v11330_v30 = vld [vmem:[%s17139_s12 + $0xe44] sm:$0xf] }
 0x6dc   : > { %6259 = vmatpush.bf16.msrb.mxu0 %v9147_v32  ;;  %6319 = vmatpush.bf16.msrb.mxu1 %v9507_v14  ;;  %v9547_v56 = vor.u32 %v11330_v30, %v9544_v53  ;;  %v11310_v14 = vld [vmem:[%s17139_s12 + $0xda4] sm:$0xf] }
 0x6dd   : > { %6332 = vmatpush.bf16.msrb.mxu2 %v9571_v45  ;;  %6345 = vmatpush.bf16.msra.mxu3 %v9635_v19  ;;  %v9427_v45 = vor.u32 %v11300_v41, %v9424_v36  ;;  %v9528_v19 = vld [vmem:[%s17139_s12 + $0xe28] sm:$0xf0]  ;;  %v11322_v30 = vld [vmem:[%s17139_s12 + $0xe04] sm:$0xf] }
 0x6de   : > { %6288 = vmatmul.bf16.vlgmr.msra.gmra.mxu2 %v13234_v8  ;;  %6301 = vmatmul.bf16.vlgmr.msrb.gmra.mxu3 %v13238_v63  ;;  %v9440_v8 = vld [vmem:[%s17139_s12 + $0xd78] sm:$0xf0]  ;;  %v11314_v63 = vld [vmem:[%s17139_s12 + $0xdc4] sm:$0xf]  ;;  %v9531_v51 = vor.u32 %v11326_v39, %v9528_v19  ;;  %v9752_v39 = vld [vmem:[%s17139_s12 + $0xfe8] sm:$0xf0] }
 0x6df   : > { %v9443_v17 = vor.u32 %v11304_v47, %v9440_v8  ;;  %v9483_v29 = vor.u32 %v11314_v63, %v9480_v15  ;;  %v9408_v47 = vld [vmem:[%s17139_s12 + $0xd38] sm:$0xf0]  ;;  %v9587_v63 = vor.u32 %v11340_v54, %v9584_v58  ;;  %v11338_v53 = vld [vmem:[%s17139_s12 + $0xe84] sm:$0xf] }
 0x6e0   : > { %6260 = vmatpush.bf16.msrb.mxu0 %v9139_v49  ;;  %6320 = vmatpush.bf16.msrb.mxu1 %v9499_v50  ;;  %v6070_v49 = vpop.f32.mrf.mxu1  ;;  %v9411_v1 = vor.u32 %v11296_v31, %v9408_v47  ;;  %v9579_v41 = vor.u32 %v11338_v53, %v9576_v4  ;;  %v11414_v19 = vld [vmem:[%s17139_s12 + $0x10e4] sm:$0xf]  ;;  %v9736_v31 = vld [vmem:[%s17139_s12 + $0xfc8] sm:$0xf0]  ;;  %v11376_v53 = vld [vmem:[%s17139_s12 + $0xfb4] sm:$0xf] }
 0x6e1   : > { %6333 = vmatpush.bf16.msrb.mxu2 %v9563_v16  ;;  %6346 = vmatpush.bf16.msra.mxu3 %v9627_v52  ;;  %v6081_v32 = vpop.f32.mrf.mxu2  ;;  %v6094_v38 = vpop.f32.mrf.mxu3  ;;  %v11308_v16 = vld [vmem:[%s17139_s12 + $0xd94] sm:$0xf]  ;;  %v9456_v52 = vld [vmem:[%s17139_s12 + $0xd98] sm:$0xf0]  ;;  %v9883_v49 = vor.u32 %v11414_v19, %v9880_v46 }
 0x6e2   : > { %v9459_v8 = vor.u32 %v11308_v16, %v9456_v52  ;;  %v9808_v16 = vld [vmem:[%s17139_s12 + $0x1058] sm:$0xf0]  ;;  %v11412_v52 = vld [vmem:[%s17139_s12 + $0x10d4] sm:$0xf] }
 0x6e4   : > { %6261 = vmatpush.bf16.msrb.mxu0 %v9131_v5  ;;  %6321 = vmatpush.bf16.msrb.mxu1 %v9491_v18  ;;  %v6055_v59 = vpop.f32.mrf.mxu0  ;;  %v11306_v5 = vld [vmem:[%s17139_s12 + $0xd84] sm:$0xf]  ;;  %v9448_v18 = vld [vmem:[%s17139_s12 + $0xd88] sm:$0xf0] }
 0x6e5   : > { %6334 = vmatpush.bf16.msrb.mxu2 %v9555_v25  ;;  %6347 = vmatpush.bf16.msra.mxu3 %v9619_v21  ;;  %v6056_v50 = vadd.f32 %v6055_v59, %v15617_v24  ;;  %v9520_v24 = vld [vmem:[%s17139_s12 + $0xe18] sm:$0xf0]  ;;  %v9451_v23 = vor.u32 %v11306_v5, %v9448_v18  ;;  %v9384_v59 = vld [vmem:[%s17139_s12 + $0xd08] sm:$0xf0]  ;;  %v11410_v5 = vld [vmem:[%s17139_s12 + $0x10c4] sm:$0xf] }
 0x6e6   : > { %v9523_v21 = vor.u32 %v11324_v43, %v9520_v24  ;;  %v9872_v43 = vld [vmem:[%s17139_s12 + $0x10d8] sm:$0xf0]  ;;  %v9387_v54 = vor.u32 %v11290_v48, %v9384_v59  ;;  %v9864_v18 = vld [vmem:[%s17139_s12 + $0x10c8] sm:$0xf0]  ;;  %v11388_v48 = vld [vmem:[%s17139_s12 + $0x1014] sm:$0xf] }
 0x6e7   : > { %6262 = vmatmul.bf16.vlgmr.msrb.gmra.mxu0 %v12950_v20  ;;  %v9464_v20 = vld [vmem:[%s17139_s12 + $0xda8] sm:$0xf0]  ;;  %v6069_v61 = vadd.f32 %v6068_v0, %v6056_v50  ;;  %v11380_v50 = vld [vmem:[%s17139_s12 + $0xfd4] sm:$0xf]  ;;  %v9696_v24 = vld [vmem:[%s17139_s12 + $0xf78] sm:$0xf0] }
 0x6e8   : > { %6306 = vmatpush.bf16.msra.mxu0 %v9443_v17  ;;  %6322 = vmatpush.bf16.msrb.mxu1 %v9483_v29  ;;  %v9467_v10 = vor.u32 %v11310_v14, %v9464_v20  ;;  %v9512_v17 = vld [vmem:[%s17139_s12 + $0xe08] sm:$0xf0]  ;;  %v11382_v20 = vld [vmem:[%s17139_s12 + $0xfe4] sm:$0xf] }
 0x6e9   : > { %6335 = vmatpush.bf16.msrb.mxu2 %v9547_v56  ;;  %6348 = vmatpush.bf16.msra.mxu3 %v9611_v13  ;;  %v6082_v25 = vadd.f32 %v6081_v32, %v6069_v61  ;;  %v6083_v15 = vpop.f32.mrf.mxu2  ;;  %v6096_v55 = vpop.f32.mrf.mxu3  ;;  %v9400_v29 = vld [vmem:[%s17139_s12 + $0xd28] sm:$0xf0]  ;;  %v11384_v56 = vld [vmem:[%s17139_s12 + $0xff4] sm:$0xf]  ;;  %v9760_v13 = vld [vmem:[%s17139_s12 + $0xff8] sm:$0xf0]  ;;  %v9515_v33 = vor.u32 %v11322_v30, %v9512_v17  ;;  %v9827_v32 = vor.u32 %v11400_v22, %v9824_v40 }
 0x6ea   : > { %v9403_v36 = vor.u32 %v11294_v57, %v9400_v29  ;;  %v9755_v44 = vor.u32 %v11382_v20, %v9752_v39  ;;  %v9867_v17 = vor.u32 %v11410_v5, %v9864_v18  ;;  %v9728_v55 = vld [vmem:[%s17139_s12 + $0xfb8] sm:$0xf0]  ;;  %v11408_v29 = vld [vmem:[%s17139_s12 + $0x10b4] sm:$0xf]  ;;  %v9656_v5 = vld [vmem:[%s17139_s12 + $0xf28] sm:$0xf0] }
 0x6eb   : > { %v15816_v0 = vadd.f32 %v6094_v38, %v6082_v25  ;;  %v11398_v38 = vld [vmem:[%s17139_s12 + $0x1064] sm:$0xf]  ;;  %v9792_v57 = vld [vmem:[%s17139_s12 + $0x1038] sm:$0xf0] }
 0x6ec   : > { %6307 = vmatpush.bf16.msra.mxu0 %v9435_v26  ;;  %6323 = vmatpush.bf16.msrb.mxu1 %v9475_v34  ;;  %v11416_v26 = vld [vmem:[%s17139_s12 + $0x10f4] sm:$0xf]  ;;  %v6057_v27 = vpop.f32.mrf.mxu0  ;;  %v9763_v34 = vor.u32 %v11384_v56, %v9760_v13  ;;  %v11366_v25 = vld [vmem:[%s17139_s12 + $0xf64] sm:$0xf]  ;;  %v9856_v56 = vld [vmem:[%s17139_s12 + $0x10b8] sm:$0xf0] }
 0x6ed   : > { %6336 = vmatpush.bf16.msrb.mxu2 %v9539_v42  ;;  %6349 = vmatpush.bf16.msra.mxu3 %v9603_v37  ;;  %v11292_v42 = vld [vmem:[%s17139_s12 + $0xd14] sm:$0xf]  ;;  %v9392_v37 = vld [vmem:[%s17139_s12 + $0xd18] sm:$0xf0]  ;;  %v9891_v14 = vor.u32 %v11416_v26, %v9888_v35  ;;  %v9859_v26 = vor.u32 %v11408_v29, %v9856_v56  ;;  %v11374_v35 = vld [vmem:[%s17139_s12 + $0xfa4] sm:$0xf] }
 0x6ee   : > { %v9395_v2 = vor.u32 %v11292_v42, %v9392_v37  ;;  %v11364_v13 = vld [vmem:[%s17139_s12 + $0xf54] sm:$0xf]  ;;  %v9680_v22 = vld [vmem:[%s17139_s12 + $0xf58] sm:$0xf0]  ;;  %v11390_v27 = vld [vmem:[%s17139_s12 + $0x1024] sm:$0xf] }
 0x6ef   : > { %v11406_v42 = vld [vmem:[%s17139_s12 + $0x10a4] sm:$0xf]  ;;  %v9848_v37 = vld [vmem:[%s17139_s12 + $0x10a8] sm:$0xf0]  ;;  %v11356_v56 = vld [vmem:[%s17139_s12 + $0xf14] sm:$0xf] }
 0x6f0   : > { %6308 = vmatpush.bf16.msra.mxu0 %v9427_v45  ;;  %6324 = vmatpush.bf16.msrb.mxu1 %v9467_v10  ;;  %v9816_v45 = vld [vmem:[%s17139_s12 + $0x1068] sm:$0xf0]  ;;  %v9851_v46 = vor.u32 %v11406_v42, %v9848_v37 }
 0x6f1   : > { %6337 = vmatpush.bf16.msrb.mxu2 %v9531_v51  ;;  %6350 = vmatpush.bf16.msra.mxu3 %v9595_v28  ;;  %v9819_v10 = vor.u32 %v11398_v38, %v9816_v45  ;;  %v9744_v51 = vld [vmem:[%s17139_s12 + $0xfd8] sm:$0xf0]  ;;  %v11396_v28 = vld [vmem:[%s17139_s12 + $0x1054] sm:$0xf]  ;;  %v9640_v42 = vld [vmem:[%s17139_s12 + $0xf08] sm:$0xf0] }
 0x6f2   : > { %v9747_v58 = vor.u32 %v11380_v50, %v9744_v51  ;;  %v9811_v61 = vor.u32 %v11396_v28, %v9808_v16  ;;  %v11360_v51 = vld [vmem:[%s17139_s12 + $0xf34] sm:$0xf]  ;;  %v9664_v28 = vld [vmem:[%s17139_s12 + $0xf38] sm:$0xf0] }
 0x6f4   : > { %6309 = vmatpush.bf16.msra.mxu0 %v9419_v60  ;;  %6325 = vmatpush.bf16.msrb.mxu1 %v9459_v8  ;;  %v11368_v60 = vld [vmem:[%s17139_s12 + $0xf74] sm:$0xf]  ;;  %v9800_v8 = vld [vmem:[%s17139_s12 + $0x1048] sm:$0xf0] }
 0x6f5   : > { %6338 = vmatpush.bf16.msrb.mxu2 %v9523_v21  ;;  %6351 = vmatpush.bf16.msra.mxu3 %v9587_v63  ;;  %v9699_v47 = vor.u32 %v11368_v60, %v9696_v24  ;;  %v9688_v21 = vld [vmem:[%s17139_s12 + $0xf68] sm:$0xf0] }
 0x6f6   : > { %v9691_v4 = vor.u32 %v11366_v25, %v9688_v21  ;;  %v11448_v25 = vld [vmem:[%s17139_s12 + $0x11f4] sm:$0xf]  ;;  %v10016_v21 = vld [vmem:[%s17139_s12 + $0x11f8] sm:$0xf0] }
 0x6f7   : > { %v10019_v29 = vor.u32 %v11448_v25, %v10016_v21  ;;  %v10112_v25 = vld [vmem:[%s17139_s12 + $0x12b8] sm:$0xf0]  ;;  %v11428_v21 = vld [vmem:[%s17139_s12 + $0x1154] sm:$0xf] }
 0x6f8   : > { %6310 = vmatpush.bf16.msra.mxu0 %v9411_v1  ;;  %6326 = vmatpush.bf16.msrb.mxu1 %v9451_v23  ;;  %v6120_v15 = vpop.f32.mrf.mxu1  ;;  %v11392_v1 = vld [vmem:[%s17139_s12 + $0x1034] sm:$0xf]  ;;  %v9731_v23 = vor.u32 %v11376_v53, %v9728_v55  ;;  %v10144_v53 = vld [vmem:[%s17139_s12 + $0x12f8] sm:$0xf0] }
 0x6f9   : > { %6339 = vmatpush.bf16.msrb.mxu2 %v9515_v33  ;;  %6352 = vmatpush.bf16.msra.mxu3 %v9579_v41  ;;  %v9795_v40 = vor.u32 %v11392_v1, %v9792_v57 }
 0x6fb   : > { %6327 = vmatmul.bf16.vlgmr.msrb.gmra.mxu1 %v13249_v62  ;;  %v11394_v62 = vld [vmem:[%s17139_s12 + $0x1044] sm:$0xf] }
 0x6fc   : > { %6311 = vmatpush.bf16.msra.mxu0 %v9403_v36  ;;  %6371 = vmatpush.bf16.msra.mxu1 %v9763_v34  ;;  %v9803_v30 = vor.u32 %v11394_v62, %v9800_v8  ;;  %v9683_v36 = vor.u32 %v11364_v13, %v9680_v22  ;;  %v9784_v34 = vld [vmem:[%s17139_s12 + $0x1028] sm:$0xf0]  ;;  %v9667_v62 = vor.u32 %v11360_v51, %v9664_v28  ;;  %v11358_v8 = vld [vmem:[%s17139_s12 + $0xf24] sm:$0xf]  ;;  %v9648_v13 = vld [vmem:[%s17139_s12 + $0xf18] sm:$0xf0] }
 0x6fd   : > { %6384 = vmatpush.bf16.msra.mxu2 %v9827_v32  ;;  %6397 = vmatpush.bf16.msrb.mxu3 %v9891_v14  ;;  %v11362_v32 = vld [vmem:[%s17139_s12 + $0xf44] sm:$0xf]  ;;  %v9672_v14 = vld [vmem:[%s17139_s12 + $0xf48] sm:$0xf0]  ;;  %v9787_v19 = vor.u32 %v11390_v27, %v9784_v34  ;;  %v9659_v57 = vor.u32 %v11358_v8, %v9656_v5  ;;  %v10048_v8 = vld [vmem:[%s17139_s12 + $0x1238] sm:$0xf0] }
 0x6fe   : > { %6340 = vmatmul.bf16.vlgmr.msrb.gmra.mxu2 %v13251_v7  ;;  %6353 = vmatmul.bf16.vlgmr.msra.gmra.mxu3 %v13255_v6  ;;  %v9875_v7 = vor.u32 %v11412_v52, %v9872_v43  ;;  %v11378_v6 = vld [vmem:[%s17139_s12 + $0xfc4] sm:$0xf]  ;;  %v9675_v59 = vor.u32 %v11362_v32, %v9672_v14  ;;  %v9704_v43 = vld [vmem:[%s17139_s12 + $0xf88] sm:$0xf0]  ;;  %v11444_v14 = vld [vmem:[%s17139_s12 + $0x11d4] sm:$0xf] }
 0x6ff   : > { %v9739_v63 = vor.u32 %v11378_v6, %v9736_v31  ;;  %v11370_v52 = vld [vmem:[%s17139_s12 + $0xf84] sm:$0xf]  ;;  %v9992_v51 = vld [vmem:[%s17139_s12 + $0x11c8] sm:$0xf0]  ;;  %v11472_v5 = vld [vmem:[%s17139_s12 + $0x12b4] sm:$0xf] }
 0x700   : > { %6312 = vmatpush.bf16.msra.mxu0 %v9395_v2  ;;  %6372 = vmatpush.bf16.msra.mxu1 %v9755_v44  ;;  %v6122_v38 = vpop.f32.mrf.mxu1  ;;  %v11372_v2 = vld [vmem:[%s17139_s12 + $0xf94] sm:$0xf]  ;;  %v9712_v44 = vld [vmem:[%s17139_s12 + $0xf98] sm:$0xf0]  ;;  %v11478_v27 = vld [vmem:[%s17139_s12 + $0x12e4] sm:$0xf] }
 0x701   : > { %6385 = vmatpush.bf16.msra.mxu2 %v9819_v10  ;;  %6398 = vmatpush.bf16.msrb.mxu3 %v9883_v49  ;;  %v6133_v33 = vpop.f32.mrf.mxu2  ;;  %v6146_v41 = vpop.f32.mrf.mxu3  ;;  %v11404_v10 = vld [vmem:[%s17139_s12 + $0x1094] sm:$0xf]  ;;  %v9840_v49 = vld [vmem:[%s17139_s12 + $0x1098] sm:$0xf0]  ;;  %v9715_v16 = vor.u32 %v11372_v2, %v9712_v44  ;;  %v11354_v34 = vld [vmem:[%s17139_s12 + $0xf04] sm:$0xf] }
 0x702   : > { %v11583_v38 = vld [vmem:[#allocation1] sm:$0xff]  ;;  %v11584_v2 = vld [vmem:[#allocation1 + $0x9] sm:$0xff]  ;;  %v11432_v44 = vld [vmem:[%s17139_s12 + $0x1174] sm:$0xf] }
 0x704   : > { %6313 = vmatpush.bf16.msra.mxu0 %v9387_v54  ;;  %6373 = vmatpush.bf16.msra.mxu1 %v9747_v58  ;;  %v6107_v20 = vpop.f32.mrf.mxu0  ;;  %v9843_v54 = vor.u32 %v11404_v10, %v9840_v49  ;;  %v11386_v58 = vld [vmem:[%s17139_s12 + $0x1004] sm:$0xf] }
 0x705   : > { %6386 = vmatpush.bf16.msra.mxu2 %v9811_v61  ;;  %6399 = vmatpush.bf16.msrb.mxu3 %v9875_v7  ;;  %v6108_v45 = vadd.f32 %v6107_v20, %v15816_v0  ;;  %v9776_v0 = vld [vmem:[%s17139_s12 + $0x1018] sm:$0xf0]  ;;  %v9768_v61 = vld [vmem:[%s17139_s12 + $0x1008] sm:$0xf0]  ;;  %v11402_v7 = vld [vmem:[%s17139_s12 + $0x1084] sm:$0xf] }
 0x706   : > { %v9779_v24 = vor.u32 %v11388_v48, %v9776_v0  ;;  %v9771_v1 = vor.u32 %v11386_v58, %v9768_v61  ;;  %v10000_v20 = vld [vmem:[%s17139_s12 + $0x11d8] sm:$0xf0] }
 0x707   : > { %6314 = vmatmul.bf16.vlgmr.msra.gmra.mxu0 %v13236_v9  ;;  %v9720_v9 = vld [vmem:[%s17139_s12 + $0xfa8] sm:$0xf0]  ;;  %v6121_v50 = vadd.f32 %v6120_v15, %v6108_v45  ;;  %v9707_v15 = vor.u32 %v11370_v52, %v9704_v43  ;;  %v10064_v45 = vld [vmem:[%s17139_s12 + $0x1258] sm:$0xf0]  ;;  %v10003_v0 = vor.u32 %v11444_v14, %v10000_v20  ;;  %v11474_v52 = vld [vmem:[%s17139_s12 + $0x12c4] sm:$0xf] }
 0x708   : > { %6358 = vmatpush.bf16.msrb.mxu0 %v9699_v47  ;;  %6374 = vmatpush.bf16.msra.mxu1 %v9739_v63  ;;  %v9723_v39 = vor.u32 %v11374_v35, %v9720_v9  ;;  %v9832_v47 = vld [vmem:[%s17139_s12 + $0x1088] sm:$0xf0]  ;;  %v11464_v63 = vld [vmem:[%s17139_s12 + $0x1274] sm:$0xf]  ;;  %v11462_v35 = vld [vmem:[%s17139_s12 + $0x1264] sm:$0xf] }
 0x709   : > { %6387 = vmatpush.bf16.msra.mxu2 %v9803_v30  ;;  %6400 = vmatpush.bf16.msrb.mxu3 %v9867_v17  ;;  %v6134_v60 = vadd.f32 %v6133_v33, %v6121_v50  ;;  %v6135_v6 = vpop.f32.mrf.mxu2  ;;  %v6148_v31 = vpop.f32.mrf.mxu3  ;;  %v10080_v30 = vld [vmem:[%s17139_s12 + $0x1278] sm:$0xf0]  ;;  %v11480_v17 = vld [vmem:[%s17139_s12 + $0x12f4] sm:$0xf]  ;;  %v10072_v9 = vld [vmem:[%s17139_s12 + $0x1268] sm:$0xf0] }
 0x70a   : > { %v10083_v22 = vor.u32 %v11464_v63, %v10080_v30  ;;  %v10136_v33 = vld [vmem:[%s17139_s12 + $0x12e8] sm:$0xf0]  ;;  %v10075_v37 = vor.u32 %v11462_v35, %v10072_v9  ;;  %v9952_v48 = vld [vmem:[%s17139_s12 + $0x1178] sm:$0xf0]  ;;  %v11442_v50 = vld [vmem:[%s17139_s12 + $0x11c4] sm:$0xf] }
 0x70b   : > { %v16015_v18 = vadd.f32 %v6146_v41, %v6134_v60  ;;  %v9651_v41 = vor.u32 %v11356_v56, %v9648_v13  ;;  %v10139_v32 = vor.u32 %v11478_v27, %v10136_v33  ;;  %v9955_v28 = vor.u32 %v11432_v44, %v9952_v48  ;;  %v10120_v43 = vld [vmem:[%s17139_s12 + $0x12c8] sm:$0xf0]  ;;  %v11430_v60 = vld [vmem:[%s17139_s12 + $0x1164] sm:$0xf]  ;;  %v11440_v6 = vld [vmem:[%s17139_s12 + $0x11b4] sm:$0xf] }
 0x70c   : > { %6359 = vmatpush.bf16.msrb.mxu0 %v9691_v4  ;;  %6375 = vmatpush.bf16.msra.mxu1 %v9731_v23  ;;  %v6109_v55 = vpop.f32.mrf.mxu0  ;;  %v9835_v4 = vor.u32 %v11402_v7, %v9832_v47  ;;  %v10147_v23 = vor.u32 %v11480_v17, %v10144_v53  ;;  %v10123_v7 = vor.u32 %v11474_v52, %v10120_v43  ;;  %v9984_v31 = vld [vmem:[%s17139_s12 + $0x11b8] sm:$0xf0]  ;;  %v11470_v56 = vld [vmem:[%s17139_s12 + $0x12a4] sm:$0xf]  ;;  %v10104_v13 = vld [vmem:[%s17139_s12 + $0x12a8] sm:$0xf0] }
 0x70d   : > { %6388 = vmatpush.bf16.msra.mxu2 %v9795_v40  ;;  %6401 = vmatpush.bf16.msrb.mxu3 %v9859_v26  ;;  %v11446_v40 = vld [vmem:[%s17139_s12 + $0x11e4] sm:$0xf]  ;;  %v10008_v26 = vld [vmem:[%s17139_s12 + $0x11e8] sm:$0xf0]  ;;  %v9936_v63 = vld [vmem:[%s17139_s12 + $0x1158] sm:$0xf0]  ;;  %v10115_v17 = vor.u32 %v11472_v5, %v10112_v25  ;;  %v10107_v33 = vor.u32 %v11470_v56, %v10104_v13 }
 0x70e   : > { %v11438_v55 = vld [vmem:[%s17139_s12 + $0x11a4] sm:$0xf]  ;;  %v11424_v20 = vld [vmem:[%s17139_s12 + $0x1134] sm:$0xf]  ;;  %v10224_v52 = vld [vmem:[%s17138_s11 + $0x70] sm:$0xf] }
 0x70f   : > { %v10769_v43 = vld [vmem:[%s17138_s11 + $0x74] sm:$0xf0]  ;;  %v9904_v5 = vld [vmem:[%s17139_s12 + $0x1118] sm:$0xf0]  ;;  %v9896_v56 = vld [vmem:[%s17139_s12 + $0x1108] sm:$0xf0] }
 0x710   : > { %6360 = vmatpush.bf16.msrb.mxu0 %v9683_v36  ;;  %6376 = vmatpush.bf16.msra.mxu1 %v9723_v39  ;;  %v10011_v36 = vor.u32 %v11446_v40, %v10008_v26  ;;  %v11460_v39 = vld [vmem:[%s17139_s12 + $0x1254] sm:$0xf] }
 0x711   : > { %6389 = vmatpush.bf16.msra.mxu2 %v9787_v19  ;;  %6402 = vmatpush.bf16.msrb.mxu3 %v9851_v46  ;;  %v11476_v19 = vld [vmem:[%s17139_s12 + $0x12d4] sm:$0xf]  ;;  %v10128_v46 = vld [vmem:[%s17139_s12 + $0x12d8] sm:$0xf0]  ;;  %v10067_v10 = vor.u32 %v11460_v39, %v10064_v45  ;;  %v11434_v45 = vld [vmem:[%s17139_s12 + $0x1184] sm:$0xf] }
 0x712   : > { %v10131_v49 = vor.u32 %v11476_v19, %v10128_v46  ;;  %v9920_v39 = vld [vmem:[%s17139_s12 + $0x1138] sm:$0xf0]  ;;  %v9960_v19 = vld [vmem:[%s17139_s12 + $0x1188] sm:$0xf0] }
 0x714   : > { %6361 = vmatpush.bf16.msrb.mxu0 %v9675_v59  ;;  %6377 = vmatpush.bf16.msra.mxu1 %v9715_v16  ;;  %v9643_v59 = vor.u32 %v11354_v34, %v9640_v42  ;;  %v10056_v16 = vld [vmem:[%s17139_s12 + $0x1248] sm:$0xf0]  ;;  %v11452_v34 = vld [vmem:[%s17139_s12 + $0x1214] sm:$0xf] }
 0x715   : > { %6390 = vmatpush.bf16.msra.mxu2 %v9779_v24  ;;  %6403 = vmatpush.bf16.msrb.mxu3 %v9843_v54  ;;  %v9944_v24 = vld [vmem:[%s17139_s12 + $0x1168] sm:$0xf0]  ;;  %v9995_v54 = vor.u32 %v11442_v50, %v9992_v51  ;;  %v9923_v50 = vor.u32 %v11424_v20, %v9920_v39  ;;  %v10763_v20 = vld [vmem:[%s17138_s11 + $0x44] sm:$0xf0]  ;;  %v10328_v39 = vld [vmem:[%s17138_s11 + $0x140] sm:$0xf] }
 0x716   : > { %v9947_v47 = vor.u32 %v11430_v60, %v9944_v24  ;;  %v10088_v51 = vld [vmem:[%s17139_s12 + $0x1288] sm:$0xf0]  ;;  %v10352_v60 = vld [vmem:[%s17138_s11 + $0x170] sm:$0xf]  ;;  %v9963_v24 = vor.u32 %v11434_v45, %v9960_v19  ;;  %v10392_v45 = vld [vmem:[%s17138_s11 + $0x1c0] sm:$0xf] }
 0x717   : > { %v10811_v19 = vld [vmem:[%s17138_s11 + $0x1c4] sm:$0xf0] }
 0x718   : > { %6362 = vmatpush.bf16.msrb.mxu0 %v9667_v62  ;;  %6378 = vmatpush.bf16.msra.mxu1 %v9707_v15  ;;  %v6172_v58 = vpop.f32.mrf.mxu1  ;;  %v11456_v62 = vld [vmem:[%s17139_s12 + $0x1234] sm:$0xf]  ;;  %v9987_v15 = vor.u32 %v11440_v6, %v9984_v31 }
 0x719   : > { %6391 = vmatpush.bf16.msra.mxu2 %v9771_v1  ;;  %6404 = vmatpush.bf16.msrb.mxu3 %v9835_v4  ;;  %v10051_v30 = vor.u32 %v11456_v62, %v10048_v8  ;;  %v11454_v1 = vld [vmem:[%s17139_s12 + $0x1224] sm:$0xf]  ;;  %v11420_v8 = vld [vmem:[%s17139_s12 + $0x1114] sm:$0xf] }
 0x71b   : > { %6379 = vmatmul.bf16.vlgmr.msra.gmra.mxu1 %v13257_v12  ;;  %v11458_v12 = vld [vmem:[%s17139_s12 + $0x1244] sm:$0xf] }
 0x71c   : > { %6363 = vmatpush.bf16.msrb.mxu0 %v9659_v57  ;;  %6423 = vmatpush.bf16.msrb.mxu1 %v10019_v29  ;;  %v10059_v61 = vor.u32 %v11458_v12, %v10056_v16  ;;  %v9939_v57 = vor.u32 %v11428_v21, %v9936_v63  ;;  %v10040_v29 = vld [vmem:[%s17139_s12 + $0x1228] sm:$0xf0]  ;;  %v11422_v12 = vld [vmem:[%s17139_s12 + $0x1124] sm:$0xf]  ;;  %v10216_v63 = vld [vmem:[%s17138_s11 + $0x60] sm:$0xf] }
 0x71d   : > { %6436 = vmatpush.bf16.msrb.mxu2 %v10083_v22  ;;  %6449 = vmatpush.bf16.msra.mxu3 %v10147_v23  ;;  %v11426_v22 = vld [vmem:[%s17139_s12 + $0x1144] sm:$0xf]  ;;  %v9928_v23 = vld [vmem:[%s17139_s12 + $0x1148] sm:$0xf0]  ;;  %v10043_v27 = vor.u32 %v11454_v1, %v10040_v29 }
 0x71e   : > { %6392 = vmatmul.bf16.vlgmr.msra.gmra.mxu2 %v11583_v38  ;;  %6405 = vmatmul.bf16.vlgmr.msrb.gmra.mxu3 %v11584_v2  ;;  %v9931_v42 = vor.u32 %v11426_v22, %v9928_v23  ;;  %v11418_v29 = vld [vmem:[%s17139_s12 + $0x1104] sm:$0xf]  ;;  %v10208_v23 = vld [vmem:[%s17138_s11 + $0x50] sm:$0xf] }
 0x720   : > { %6364 = vmatpush.bf16.msrb.mxu0 %v9651_v41  ;;  %6424 = vmatpush.bf16.msrb.mxu1 %v10011_v36  ;;  %v6174_v35 = vpop.f32.mrf.mxu1  ;;  %v11436_v41 = vld [vmem:[%s17139_s12 + $0x1194] sm:$0xf]  ;;  %v9968_v36 = vld [vmem:[%s17139_s12 + $0x1198] sm:$0xf0] }
 0x721   : > { %6437 = vmatpush.bf16.msrb.mxu2 %v10075_v37  ;;  %6450 = vmatpush.bf16.msra.mxu3 %v10139_v32  ;;  %v6185_v53 = vpop.f32.mrf.mxu2  ;;  %v6198_v4 = vpop.f32.mrf.mxu3  ;;  %v11468_v37 = vld [vmem:[%s17139_s12 + $0x1294] sm:$0xf]  ;;  %v10096_v32 = vld [vmem:[%s17139_s12 + $0x1298] sm:$0xf0]  ;;  %v9971_v38 = vor.u32 %v11436_v41, %v9968_v36  ;;  %v10797_v35 = vld [vmem:[%s17138_s11 + $0x154] sm:$0xf0] }
 0x722   : > { %v10099_v2 = vor.u32 %v11468_v37, %v10096_v32  ;;  %v11587_v41 = vld [vmem:[#allocation1 + $0x2d] sm:$0xff] }
 0x724   : > { %6365 = vmatpush.bf16.msrb.mxu0 %v9643_v59  ;;  %6425 = vmatpush.bf16.msrb.mxu1 %v10003_v0  ;;  %v6159_v40 = vpop.f32.mrf.mxu0  ;;  %v11450_v59 = vld [vmem:[%s17139_s12 + $0x1204] sm:$0xf]  ;;  %v10024_v0 = vld [vmem:[%s17139_s12 + $0x1208] sm:$0xf0] }
 0x725   : > { %6438 = vmatpush.bf16.msrb.mxu2 %v10067_v10  ;;  %6451 = vmatpush.bf16.msra.mxu3 %v10131_v49  ;;  %v6160_v9 = vadd.f32 %v6159_v40, %v16015_v18  ;;  %v10032_v18 = vld [vmem:[%s17139_s12 + $0x1218] sm:$0xf0]  ;;  %v11466_v10 = vld [vmem:[%s17139_s12 + $0x1284] sm:$0xf]  ;;  %v10027_v6 = vor.u32 %v11450_v59, %v10024_v0  ;;  %v10765_v40 = vld [vmem:[%s17138_s11 + $0x54] sm:$0xf0] }
 0x726   : > { %v10035_v46 = vor.u32 %v11452_v34, %v10032_v18  ;;  %v10091_v31 = vor.u32 %v11466_v10, %v10088_v51  ;;  %v11588_v34 = vld [vmem:[#allocation1 + $0x1b] sm:$0xff]  ;;  %v10209_v18 = vor.u32 %v10765_v40, %v10208_v23  ;;  %v10393_v10 = vor.u32 %v10811_v19, %v10392_v45  ;;  %v10320_v51 = vld [vmem:[%s17138_s11 + $0x130] sm:$0xf]  ;;  %v10803_v19 = vld [vmem:[%s17138_s11 + $0x184] sm:$0xf0] }
 0x727   : > { %6366 = vmatmul.bf16.vlgmr.msrb.gmra.mxu0 %v13253_v3  ;;  %v9976_v3 = vld [vmem:[%s17139_s12 + $0x11a8] sm:$0xf0]  ;;  %v6173_v14 = vadd.f32 %v6172_v58, %v6160_v9  ;;  %v10416_v58 = vld [vmem:[%s17138_s11 + $0x1f0] sm:$0xf]  ;;  %v10789_v40 = vld [vmem:[%s17138_s11 + $0x114] sm:$0xf0] }
 0x728   : > { %6410 = vmatpush.bf16.msra.mxu0 %v9955_v28  ;;  %6426 = vmatpush.bf16.msrb.mxu1 %v9995_v54  ;;  %v9979_v26 = vor.u32 %v11438_v55, %v9976_v3  ;;  %v9912_v28 = vld [vmem:[%s17139_s12 + $0x1128] sm:$0xf0]  ;;  %v10801_v54 = vld [vmem:[%s17138_s11 + $0x174] sm:$0xf0]  ;;  %v10815_v55 = vld [vmem:[%s17138_s11 + $0x1e4] sm:$0xf0] }
 0x729   : > { %6439 = vmatpush.bf16.msrb.mxu2 %v10059_v61  ;;  %6452 = vmatpush.bf16.msra.mxu3 %v10123_v7  ;;  %v6187_v44 = vpop.f32.mrf.mxu2  ;;  %v6186_v48 = vadd.f32 %v6185_v53, %v6173_v14  ;;  %v6200_v49 = vpop.f32.mrf.mxu3  ;;  %v10817_v61 = vld [vmem:[%s17138_s11 + $0x1f4] sm:$0xf0]  ;;  %v9915_v62 = vor.u32 %v11422_v12, %v9912_v28  ;;  %v10353_v25 = vor.u32 %v10801_v54, %v10352_v60  ;;  %v10408_v53 = vld [vmem:[%s17138_s11 + $0x1e0] sm:$0xf]  ;;  %v10400_v9 = vld [vmem:[%s17138_s11 + $0x1d0] sm:$0xf] }
 0x72a   : > { %v10417_v21 = vor.u32 %v10817_v61, %v10416_v58  ;;  %v11585_v3 = vld [vmem:[%s17139_s12 + $0x1320] sm:$0xff]  ;;  %v10409_v22 = vor.u32 %v10815_v55, %v10408_v53  ;;  %v10160_v44 = vld [vmem:[%s17139_s12 + $0x1318] sm:$0xf0]  ;;  %v10192_v49 = vld [vmem:[%s17138_s11 + $0x30] sm:$0xf] }
 0x72b   : > { %v16212_v16 = vadd.f32 %v6198_v4, %v6186_v48  ;;  %v4225_v1 = vunpack.c.h.b16 %v11585_v3  ;;  %v9907_v4 = vor.u32 %v11420_v8, %v9904_v5  ;;  %v10200_v14 = vld [vmem:[%s17138_s11 + $0x40] sm:$0xf]  ;;  %v10793_v28 = vld [vmem:[%s17138_s11 + $0x134] sm:$0xf0]  ;;  %v10152_v54 = vld [vmem:[%s17139_s12 + $0x1308] sm:$0xf0] }
 0x72c   : > { %6411 = vmatpush.bf16.msra.mxu0 %v9947_v47  ;;  %6427 = vmatpush.bf16.msrb.mxu1 %v9987_v15  ;;  %v6161_v7 = vpop.f32.mrf.mxu0  ;;  %v10225_v47 = vor.u32 %v10769_v43, %v10224_v52  ;;  %v10767_v15 = vld [vmem:[%s17138_s11 + $0x64] sm:$0xf0]  ;;  %v10201_v48 = vor.u32 %v10763_v20, %v10200_v14  ;;  %v10384_v52 = vld [vmem:[%s17138_s11 + $0x1b0] sm:$0xf]  ;;  %v10809_v43 = vld [vmem:[%s17138_s11 + $0x1b4] sm:$0xf0] }
 0x72d   : > { %6440 = vmatpush.bf16.msrb.mxu2 %v10051_v30  ;;  %6453 = vmatpush.bf16.msra.mxu3 %v10115_v17  ;;  %v10344_v30 = vld [vmem:[%s17138_s11 + $0x160] sm:$0xf]  ;;  %v10799_v17 = vld [vmem:[%s17138_s11 + $0x164] sm:$0xf0]  ;;  %v4839_v36 = vpack.c.b16 %v4225_v1, %v4225_v1  ;;  %v11589_v60 = vld [vmem:[#allocation1 + $0x12] sm:$0xff] }
 0x72e   : > { %v10345_v13 = vor.u32 %v10799_v17, %v10344_v30  ;;  %v10288_v61 = vld [vmem:[%s17138_s11 + $0xf0] sm:$0xf]  ;;  %v10785_v7 = vld [vmem:[%s17138_s11 + $0xf4] sm:$0xf0]  ;;  %v10312_v8 = vld [vmem:[%s17138_s11 + $0x120] sm:$0xf] }
 0x72f   : > { %v10807_v30 = vld [vmem:[%s17138_s11 + $0x1a4] sm:$0xf0]  ;;  %v10289_v17 = vor.u32 %v10785_v7, %v10288_v61  ;;  %v10280_v3 = vld [vmem:[%s17138_s11 + $0xe0] sm:$0xf]  ;;  %v10304_v23 = vld [vmem:[%s17138_s11 + $0x110] sm:$0xf] }
 0x730   : > { %6412 = vmatpush.bf16.msra.mxu0 %v9939_v57  ;;  %6428 = vmatpush.bf16.msrb.mxu1 %v9979_v26  ;;  %v10217_v57 = vor.u32 %v10767_v15, %v10216_v63  ;;  %v10336_v26 = vld [vmem:[%s17138_s11 + $0x150] sm:$0xf]  ;;  %v10791_v63 = vld [vmem:[%s17138_s11 + $0x124] sm:$0xf0]  ;;  %v10376_v15 = vld [vmem:[%s17138_s11 + $0x1a0] sm:$0xf] }
 0x731   : > { %6441 = vmatpush.bf16.msrb.mxu2 %v10043_v27  ;;  %6454 = vmatpush.bf16.msra.mxu3 %v10107_v33  ;;  %v10813_v27 = vld [vmem:[%s17138_s11 + $0x1d4] sm:$0xf0]  ;;  %v11586_v33 = vld [vmem:[#allocation1 + $0x24] sm:$0xff]  ;;  %v10337_v37 = vor.u32 %v10797_v35, %v10336_v26  ;;  %v10296_v14 = vld [vmem:[%s17138_s11 + $0x100] sm:$0xf] }
 0x732   : > { %v10401_v32 = vor.u32 %v10813_v27, %v10400_v9  ;;  %v10783_v1 = vld [vmem:[%s17138_s11 + $0xe4] sm:$0xf0]  ;;  %v10805_v26 = vld [vmem:[%s17138_s11 + $0x194] sm:$0xf0]  ;;  %v10272_v27 = vld [vmem:[%s17138_s11 + $0xd0] sm:$0xf] }
 0x733   : > { %v10281_v9 = vor.u32 %v10783_v1, %v10280_v3  ;;  %v10787_v20 = vld [vmem:[%s17138_s11 + $0x104] sm:$0xf0]  ;;  %v10472_v7 = vld [vmem:[%s17138_s11 + $0x260] sm:$0xf]  ;;  %v10464_v3 = vld [vmem:[%s17138_s11 + $0x250] sm:$0xf] }
 0x734   : > { %6413 = vmatpush.bf16.msra.mxu0 %v9931_v42  ;;  %6429 = vmatpush.bf16.msrb.mxu1 %v9971_v38  ;;  %v9899_v42 = vor.u32 %v11418_v29, %v9896_v56  ;;  %v10795_v38 = vld [vmem:[%s17138_s11 + $0x144] sm:$0xf0]  ;;  %v10313_v29 = vor.u32 %v10791_v63, %v10312_v8  ;;  %v10377_v56 = vor.u32 %v10807_v30, %v10376_v15  ;;  %v10256_v63 = vld [vmem:[%s17138_s11 + $0xb0] sm:$0xf]  ;;  %v10777_v15 = vld [vmem:[%s17138_s11 + $0xb4] sm:$0xf0] }
 0x735   : > { %6442 = vmatpush.bf16.msrb.mxu2 %v10035_v46  ;;  %6455 = vmatpush.bf16.msra.mxu3 %v10099_v2  ;;  %v5459_v46 = vsel %vm624_vm0, %v4839_v36, 0  ;;  %v11484_v2 = vld [vmem:[%s17139_s12 + $0x1314] sm:$0xf]  ;;  %v10329_v0 = vor.u32 %v10795_v38, %v10328_v39  ;;  %v10168_v36 = vld [vmem:[%s17138_s11] sm:$0xf]  ;;  %vm7075_vm0 = vcmask 523264  }
 0x736   : > { %v10163_v12 = vor.u32 %v11484_v2, %v10160_v44  ;;  %v10360_v39 = vld [vmem:[%s17138_s11 + $0x180] sm:$0xf]  ;;  %v10833_v2 = vld [vmem:[%s17138_s11 + $0x274] sm:$0xf0]  ;;  %v10863_v8 = vld [vmem:[%s17138_s11 + $0x364] sm:$0xf0] }
 0x737   : > { %v10829_v1 = vld [vmem:[%s17138_s11 + $0x254] sm:$0xf0] }
 0x738   : > { %6414 = vmatpush.bf16.msra.mxu0 %v9923_v50  ;;  %6430 = vmatpush.bf16.msrb.mxu1 %v9963_v24  ;;  %v6224_v59 = vpop.f32.mrf.mxu1  ;;  %v10761_v50 = vld [vmem:[%s17138_s11 + $0x34] sm:$0xf0]  ;;  %v11482_v24 = vld [vmem:[%s17139_s12 + $0x1304] sm:$0xf] }
 0x739   : > { %6443 = vmatpush.bf16.msrb.mxu2 %v10027_v6  ;;  %6456 = vmatpush.bf16.msra.mxu3 %v10091_v31  ;;  %v10193_v58 = vor.u32 %v10761_v50, %v10192_v49  ;;  %v10321_v6 = vor.u32 %v10793_v28, %v10320_v51  ;;  %v10385_v31 = vor.u32 %v10809_v43, %v10384_v52  ;;  %v10873_v50 = vld [vmem:[%s17138_s11 + $0x3b4] sm:$0xf0]  ;;  %v10264_v51 = vld [vmem:[%s17138_s11 + $0xc0] sm:$0xf] }
 0x73a   : > { %v10297_v52 = vor.u32 %v10787_v20, %v10296_v14  ;;  %v10361_v43 = vor.u32 %v10803_v19, %v10360_v39  ;;  %v10773_v14 = vld [vmem:[%s17138_s11 + $0x94] sm:$0xf0]  ;;  %v10784_v20 = vld [vmem:[%s17138_s11 + $0xf4] sm:$0xf]  ;;  %v10290_v39 = vld [vmem:[%s17138_s11 + $0xf8] sm:$0xf0] }
 0x73b   : > { %6431 = vmatmul.bf16.vlgmr.msrb.gmra.mxu1 %v11588_v34  ;;  %v10755_v34 = vld [vmem:[%s17138_s11 + $0x4] sm:$0xf0]  ;;  %v10448_v19 = vld [vmem:[%s17138_s11 + $0x230] sm:$0xf] }
 0x73c   : > { %6415 = vmatpush.bf16.msra.mxu0 %v9915_v62  ;;  %7079 = vmatpush.bf16.msra.mxu1 %v10225_v47  ;;  %v10184_v62 = vld [vmem:[%s17138_s11 + $0x20] sm:$0xf]  ;;  %v10759_v47 = vld [vmem:[%s17138_s11 + $0x24] sm:$0xf0]  ;;  %v10169_v49 = vor.u32 %v10755_v34, %v10168_v36 }
 0x73d   : > { %7105 = vmatpush.bf16.msra.mxu2 %v10353_v25  ;;  %7118 = vmatpush.bf16.msrb.mxu3 %v10417_v21  ;;  %v10155_v21 = vor.u32 %v11482_v24, %v10152_v54  ;;  %v10185_v55 = vor.u32 %v10759_v47, %v10184_v62  ;;  %v10600_v47 = vld [vmem:[%s17138_s11 + $0x360] sm:$0xf]  ;;  %v10859_v34 = vld [vmem:[%s17138_s11 + $0x344] sm:$0xf0] }
 0x73e   : > { %6444 = vmatmul.bf16.vlgmr.msrb.gmra.mxu2 %v11586_v33  ;;  %6457 = vmatmul.bf16.vlgmr.msra.gmra.mxu3 %v11587_v41  ;;  %v10781_v41 = vld [vmem:[%s17138_s11 + $0xd4] sm:$0xf0]  ;;  %v10584_v36 = vld [vmem:[%s17138_s11 + $0x340] sm:$0xf] }
 0x740   : > { %6416 = vmatpush.bf16.msra.mxu0 %v9907_v4  ;;  %7080 = vmatpush.bf16.msra.mxu1 %v10217_v57  ;;  %v6226_v4 = vpop.f32.mrf.mxu1 }
 0x741   : > { %7106 = vmatpush.bf16.msra.mxu2 %v10345_v13  ;;  %7119 = vmatpush.bf16.msrb.mxu3 %v10409_v22  ;;  %v6237_v5 = vpop.f32.mrf.mxu2  ;;  %v6250_v25 = vpop.f32.mrf.mxu3  ;;  %v10176_v13 = vld [vmem:[%s17138_s11 + $0x10] sm:$0xf]  ;;  %v10757_v22 = vld [vmem:[%s17138_s11 + $0x14] sm:$0xf0] }
 0x742   : > { %v10177_v33 = vor.u32 %v10757_v22, %v10176_v13  ;;  %v10861_v13 = vld [vmem:[%s17138_s11 + $0x354] sm:$0xf0]  ;;  %v10624_v22 = vld [vmem:[%s17138_s11 + $0x390] sm:$0xf] }
 0x744   : > { %6417 = vmatpush.bf16.msra.mxu0 %v9899_v42  ;;  %7081 = vmatpush.bf16.msra.mxu1 %v10209_v18  ;;  %v6211_v53 = vpop.f32.mrf.mxu0  ;;  %v16393_v42 = vld [vmem:[#allocation8] sm:$0xff] }
 0x745   : > { %7107 = vmatpush.bf16.msra.mxu2 %v10337_v37  ;;  %7120 = vmatpush.bf16.msrb.mxu3 %v10401_v32  ;;  %v6212_v57 = vadd.f32 %v6211_v53, %v16212_v16  ;;  %v10368_v16 = vld [vmem:[%s17138_s11 + $0x190] sm:$0xf]  ;;  %v10305_v37 = vor.u32 %v10789_v40, %v10304_v23  ;;  %v1666_v61 = vperm.slane %v16393_v42, 3  ;;  %v10869_v23 = vld [vmem:[%s17138_s11 + $0x394] sm:$0xf0] }
 0x746   : > { %v10369_v32 = vor.u32 %v10805_v26, %v10368_v16  ;;  %v10248_v40 = vld [vmem:[%s17138_s11 + $0xa0] sm:$0xf]  ;;  %v10775_v16 = vld [vmem:[%s17138_s11 + $0xa4] sm:$0xf0]  ;;  %v10465_v26 = vor.u32 %v10829_v1, %v10464_v3 }
 0x747   : > { %6418 = vmatmul.bf16.vlgmr.msra.gmra.mxu0 %v11589_v60  ;;  %v6225_v35 = vadd.f32 %v6224_v59, %v6212_v57  ;;  %v10608_v59 = vld [vmem:[%s17138_s11 + $0x370] sm:$0xf]  ;;  %v1663_v60 = vperm.slane %v16393_v42, 0  ;;  %v16471_v4 = vpack.c.bf16 %v1666_v61, %v1666_v61  ;;  %v1670_v61 = vperm.slane %v16393_v42, 7 }
 0x748   : > { %6467 = vmatpush.bf16.msrb.mxu0 %v5459_v46  ;;  %7082 = vmatpush.bf16.msra.mxu1 %v10201_v48  ;;  %v10480_v46 = vld [vmem:[%s17138_s11 + $0x270] sm:$0xf]  ;;  %v10273_v48 = vor.u32 %v10781_v41, %v10272_v27  ;;  %v10827_v27 = vld [vmem:[%s17138_s11 + $0x244] sm:$0xf0]  ;;  %v10249_v41 = vor.u32 %v10775_v16, %v10248_v40 }
 0x749   : > { %7108 = vmatpush.bf16.msra.mxu2 %v10329_v0  ;;  %7121 = vmatpush.bf16.msrb.mxu3 %v10393_v10  ;;  %v6238_v18 = vadd.f32 %v6237_v5, %v6225_v35  ;;  %v6239_v38 = vpop.f32.mrf.mxu2  ;;  %v6252_v45 = vpop.f32.mrf.mxu3  ;;  %v10865_v0 = vld [vmem:[%s17138_s11 + $0x374] sm:$0xf0]  ;;  %v10640_v10 = vld [vmem:[%s17138_s11 + $0x3b0] sm:$0xf]  ;;  %v10481_v24 = vor.u32 %v10833_v2, %v10480_v46  ;;  %v10632_v5 = vld [vmem:[%s17138_s11 + $0x3a0] sm:$0xf]  ;;  %v16461_v30 = vpack.c.bf16 %v1663_v60, %v1663_v60 }
 0x74a   : > { %v10609_v54 = vor.u32 %v10865_v0, %v10608_v59  ;;  %v10585_v45 = vor.u32 %v10859_v34, %v10584_v36  ;;  %v10825_v59 = vld [vmem:[%s17138_s11 + $0x234] sm:$0xf0]  ;;  %v10576_v0 = vld [vmem:[%s17138_s11 + $0x330] sm:$0xf]  ;;  %v10424_v34 = vld [vmem:[%s17138_s11 + $0x200] sm:$0xf] }
 0x74b   : > { %v16413_v44 = vadd.f32 %v6250_v25, %v6238_v18  ;;  %v11590_v25 = vld [vmem:[#allocation1 + $0x36] sm:$0xff]  ;;  %v10616_v18 = vld [vmem:[%s17138_s11 + $0x380] sm:$0xf]  ;;  %v10449_v60 = vor.u32 %v10825_v59, %v10448_v19 }
 0x74c   : > { %6468 = vmatpush.bf16.msrb.mxu0 %v10163_v12  ;;  %7083 = vmatpush.bf16.msra.mxu1 %v10193_v58  ;;  %v10779_v12 = vld [vmem:[%s17138_s11 + $0xc4] sm:$0xf0]  ;;  %v6213_v28 = vpop.f32.mrf.mxu0  ;;  %v1665_v58 = vperm.slane %v16393_v42, 2 }
 0x74d   : > { %7109 = vmatpush.bf16.msra.mxu2 %v10321_v6  ;;  %7122 = vmatpush.bf16.msrb.mxu3 %v10385_v31  ;;  %v10831_v6 = vld [vmem:[%s17138_s11 + $0x264] sm:$0xf0]  ;;  %v10641_v31 = vor.u32 %v10873_v50, %v10640_v10  ;;  %v10265_v62 = vor.u32 %v10779_v12, %v10264_v51  ;;  %v10857_v10 = vld [vmem:[%s17138_s11 + $0x334] sm:$0xf0]  ;;  %v10232_v50 = vld [vmem:[%s17138_s11 + $0x80] sm:$0xf] }
 0x74e   : > { %v10473_v53 = vor.u32 %v10831_v6, %v10472_v7  ;;  %v10771_v51 = vld [vmem:[%s17138_s11 + $0x84] sm:$0xf0]  ;;  %v10782_v12 = vld [vmem:[%s17138_s11 + $0xe4] sm:$0xf]  ;;  %v10282_v28 = vld [vmem:[%s17138_s11 + $0xe8] sm:$0xf0] }
 0x74f   : > { %v1664_v7 = vperm.slane %v16393_v42, 1  ;;  %v10440_v6 = vld [vmem:[%s17138_s11 + $0x220] sm:$0xf] }
 0x750   : > { %6469 = vmatpush.bf16.msrb.mxu0 %v10155_v21  ;;  %7084 = vmatpush.bf16.msra.mxu1 %v10185_v55  ;;  %v10871_v21 = vld [vmem:[%s17138_s11 + $0x3a4] sm:$0xf0]  ;;  %v10601_v55 = vor.u32 %v10863_v8, %v10600_v47  ;;  %v10285_v47 = vor.u32 %v10782_v12, %v10282_v28 }
 0x751   : > { %7110 = vmatpush.bf16.msra.mxu2 %v10313_v29  ;;  %7123 = vmatpush.bf16.msrb.mxu3 %v10377_v56  ;;  %v10633_v57 = vor.u32 %v10871_v21, %v10632_v5  ;;  %v10257_v29 = vor.u32 %v10777_v15, %v10256_v63  ;;  %v10592_v56 = vld [vmem:[%s17138_s11 + $0x350] sm:$0xf]  ;;  %v10568_v5 = vld [vmem:[%s17138_s11 + $0x320] sm:$0xf]  ;;  %v10780_v21 = vld [vmem:[%s17138_s11 + $0xd4] sm:$0xf] }
 0x752   : > { %v10593_v35 = vor.u32 %v10861_v13, %v10592_v56  ;;  %v10274_v63 = vld [vmem:[%s17138_s11 + $0xd8] sm:$0xf0]  ;;  %v10536_v15 = vld [vmem:[%s17138_s11 + $0x2e0] sm:$0xf]  ;;  %v10432_v13 = vld [vmem:[%s17138_s11 + $0x210] sm:$0xf] }
 0x753   : > { %v10277_v40 = vor.u32 %v10780_v21, %v10274_v63  ;;  %v10843_v12 = vld [vmem:[%s17138_s11 + $0x2c4] sm:$0xf0] }
 0x754   : > { %7092 = vmatpush.bf16.msra.mxu0 %v10289_v17  ;;  %7085 = vmatpush.bf16.msra.mxu1 %v10177_v33  ;;  %v16463_v17 = vpack.c.bf16 %v1665_v58, %v1665_v58  ;;  %v10625_v33 = vor.u32 %v10869_v23, %v10624_v22  ;;  %v10233_v58 = vor.u32 %v10771_v51, %v10232_v50  ;;  %v10821_v22 = vld [vmem:[%s17138_s11 + $0x214] sm:$0xf0]  ;;  %v10520_v51 = vld [vmem:[%s17138_s11 + $0x2c0] sm:$0xf] }
 0x755   : > { %7111 = vmatpush.bf16.msra.mxu2 %v10305_v37  ;;  %7124 = vmatpush.bf16.msrb.mxu3 %v10369_v32  ;;  %v10867_v37 = vld [vmem:[%s17138_s11 + $0x384] sm:$0xf0]  ;;  %v10240_v32 = vld [vmem:[%s17138_s11 + $0x90] sm:$0xf]  ;;  %v16589_v23 = vpack.c.bf16 %v1664_v7, %v1664_v7  ;;  %v10433_v36 = vor.u32 %v10821_v22, %v10432_v13  ;;  %v10218_v7 = vld [vmem:[%s17138_s11 + $0x68] sm:$0xf0] }
 0x756   : > { %v10617_v2 = vor.u32 %v10867_v37, %v10616_v18  ;;  %v10242_v13 = vld [vmem:[%s17138_s11 + $0x98] sm:$0xf0]  ;;  %v10812_v22 = vld [vmem:[%s17138_s11 + $0x1d4] sm:$0xf] }
 0x757   : > { %10165 = vmatmul.msk.bf16.vlgmr.msrb.gmra.mxu0 %vm5452_vm12, %v11590_v25  ;;  %v10855_v25 = vld [vmem:[%s17138_s11 + $0x324] sm:$0xf0] }
 0x758   : > { %7093 = vmatpush.bf16.msra.mxu0 %v10281_v9  ;;  %7086 = vmatpush.bf16.msra.mxu1 %v10169_v49  ;;  %v10456_v9 = vld [vmem:[%s17138_s11 + $0x240] sm:$0xf]  ;;  %v6276_v46 = vpop.f32.mrf.mxu1  ;;  %v10293_v49 = vor.u32 %v10784_v20, %v10290_v39  ;;  %v10569_v56 = vor.u32 %v10855_v25, %v10568_v5  ;;  %v10851_v39 = vld [vmem:[%s17138_s11 + $0x304] sm:$0xf0]  ;;  %v10512_v5 = vld [vmem:[%s17138_s11 + $0x2b0] sm:$0xf] }
 0x759   : > { %7112 = vmatpush.bf16.msra.mxu2 %v10297_v52  ;;  %7125 = vmatpush.bf16.msrb.mxu3 %v10361_v43  ;;  %v10457_v38 = vor.u32 %v10827_v27, %v10456_v9  ;;  %v10544_v52 = vld [vmem:[%s17138_s11 + $0x2f0] sm:$0xf]  ;;  %v10849_v43 = vld [vmem:[%s17138_s11 + $0x2f4] sm:$0xf0]  ;;  %v10266_v27 = vld [vmem:[%s17138_s11 + $0xc8] sm:$0xf0] }
 0x75a   : > { %v10545_v8 = vor.u32 %v10849_v43, %v10544_v52  ;;  %v10552_v20 = vld [vmem:[%s17138_s11 + $0x300] sm:$0xf]  ;;  %v10841_v25 = vld [vmem:[%s17138_s11 + $0x2b4] sm:$0xf0] }
 0x75b   : > { %7087 = vmatmul.bf16.vlgmr.msra.gmra.mxu1 %v16461_v30  ;;  %v10553_v52 = vor.u32 %v10851_v39, %v10552_v20  ;;  %v10848_v20 = vld [vmem:[%s17138_s11 + $0x2f4] sm:$0xf]  ;;  %v10546_v39 = vld [vmem:[%s17138_s11 + $0x2f8] sm:$0xf0] }
 0x75c   : > { %7094 = vmatpush.bf16.msra.mxu0 %v10273_v48  ;;  %7131 = vmatpush.bf16.msrb.mxu1 %v10481_v24  ;;  %v10241_v48 = vor.u32 %v10773_v14, %v10240_v32  ;;  %v10577_v24 = vor.u32 %v10857_v10, %v10576_v0  ;;  %v10819_v14 = vld [vmem:[%s17138_s11 + $0x204] sm:$0xf0]  ;;  %v10258_v0 = vld [vmem:[%s17138_s11 + $0xb8] sm:$0xf0]  ;;  %v10816_v10 = vld [vmem:[%s17138_s11 + $0x1f4] sm:$0xf] }
 0x75d   : > { %7157 = vmatpush.bf16.msrb.mxu2 %v10609_v54  ;;  %7174 = vmatpush.bf16.msra.mxu3 %v10641_v31  ;;  %v10823_v31 = vld [vmem:[%s17138_s11 + $0x224] sm:$0xf0]  ;;  %v10425_v50 = vor.u32 %v10819_v14, %v10424_v34  ;;  %v10837_v14 = vld [vmem:[%s17138_s11 + $0x294] sm:$0xf0] }
 0x75e   : > { %7113 = vmatmul.bf16.vlgmr.msra.gmra.mxu2 %v16463_v17  ;;  %7126 = vmatmul.bf16.vlgmr.msrb.gmra.mxu3 %v16471_v4  ;;  %v10441_v3 = vor.u32 %v10823_v31, %v10440_v6  ;;  %v10774_v6 = vld [vmem:[%s17138_s11 + $0xa4] sm:$0xf]  ;;  %v10521_v31 = vor.u32 %v10843_v12, %v10520_v51  ;;  %v10488_v51 = vld [vmem:[%s17138_s11 + $0x280] sm:$0xf]  ;;  %v10835_v12 = vld [vmem:[%s17138_s11 + $0x284] sm:$0xf0] }
 0x760   : > { %7095 = vmatpush.bf16.msra.mxu0 %v10265_v62  ;;  %7132 = vmatpush.bf16.msrb.mxu1 %v10473_v53  ;;  %v10847_v53 = vld [vmem:[%s17138_s11 + $0x2e4] sm:$0xf0]  ;;  %v6278_v1 = vpop.f32.mrf.mxu1 }
 0x761   : > { %7158 = vmatpush.bf16.msrb.mxu2 %v10601_v55  ;;  %7175 = vmatpush.bf16.msra.mxu3 %v10633_v57  ;;  %v6289_v54 = vpop.f32.mrf.mxu2  ;;  %v6302_v62 = vpop.f32.mrf.mxu3  ;;  %v16580_v57 = vpack.c.bf16 %v1670_v61, %v1670_v61  ;;  %v10537_v16 = vor.u32 %v10847_v53, %v10536_v15  ;;  %v10766_v61 = vld [vmem:[%s17138_s11 + $0x64] sm:$0xf]  ;;  %v10210_v1 = vld [vmem:[%s17138_s11 + $0x58] sm:$0xf0] }
 0x762   : > { %v10221_v63 = vor.u32 %v10766_v61, %v10218_v7  ;;  %v10186_v61 = vld [vmem:[%s17138_s11 + $0x28] sm:$0xf0]  ;;  %v10489_v7 = vor.u32 %v10835_v12, %v10488_v51  ;;  %v10794_v12 = vld [vmem:[%s17138_s11 + $0x144] sm:$0xf] }
 0x764   : > { %7096 = vmatpush.bf16.msra.mxu0 %v10257_v29  ;;  %7133 = vmatpush.bf16.msrb.mxu1 %v10465_v26  ;;  %v6263_v55 = vpop.f32.mrf.mxu0  ;;  %v10560_v26 = vld [vmem:[%s17138_s11 + $0x310] sm:$0xf] }
 0x765   : > { %7159 = vmatpush.bf16.msrb.mxu2 %v10593_v35  ;;  %7176 = vmatpush.bf16.msra.mxu3 %v10625_v33  ;;  %v6264_v29 = vadd.f32 %v6263_v55, %v16413_v44  ;;  %v10853_v44 = vld [vmem:[%s17138_s11 + $0x314] sm:$0xf0]  ;;  %v10778_v35 = vld [vmem:[%s17138_s11 + $0xc4] sm:$0xf]  ;;  %v10528_v33 = vld [vmem:[%s17138_s11 + $0x2d0] sm:$0xf] }
 0x766   : > { %v10561_v18 = vor.u32 %v10853_v44, %v10560_v26  ;;  %v10839_v26 = vld [vmem:[%s17138_s11 + $0x2a4] sm:$0xf0] }
 0x767   : > { %v6277_v9 = vadd.f32 %v6276_v46, %v6264_v29  ;;  %v10768_v46 = vld [vmem:[%s17138_s11 + $0x74] sm:$0xf] }
 0x768   : > { %7097 = vmatpush.bf16.msra.mxu0 %v10249_v41  ;;  %7134 = vmatpush.bf16.msrb.mxu1 %v10457_v38  ;;  %v10845_v41 = vld [vmem:[%s17138_s11 + $0x2d4] sm:$0xf0]  ;;  %v10772_v29 = vld [vmem:[%s17138_s11 + $0x94] sm:$0xf] }
 0x769   : > { %7160 = vmatpush.bf16.msrb.mxu2 %v10585_v45  ;;  %7177 = vmatpush.bf16.msra.mxu3 %v10617_v2  ;;  %v6291_v37 = vpop.f32.mrf.mxu2  ;;  %v6290_v32 = vadd.f32 %v6289_v54, %v6277_v9  ;;  %v6304_v38 = vpop.f32.mrf.mxu3  ;;  %v10269_v45 = vor.u32 %v10778_v35, %v10266_v27  ;;  %v10529_v19 = vor.u32 %v10845_v41, %v10528_v33  ;;  %v10226_v2 = vld [vmem:[%s17138_s11 + $0x78] sm:$0xf0]  ;;  %v10762_v35 = vld [vmem:[%s17138_s11 + $0x44] sm:$0xf]  ;;  %v10202_v33 = vld [vmem:[%s17138_s11 + $0x48] sm:$0xf0] }
 0x76a   : > { %v10229_v43 = vor.u32 %v10768_v46, %v10226_v2  ;;  %v10245_v9 = vor.u32 %v10772_v29, %v10242_v13  ;;  %v10770_v41 = vld [vmem:[%s17138_s11 + $0x84] sm:$0xf]  ;;  %v10394_v37 = vld [vmem:[%s17138_s11 + $0x1c8] sm:$0xf0]  ;;  %v10205_v38 = vor.u32 %v10762_v35, %v10202_v33  ;;  %v10760_v46 = vld [vmem:[%s17138_s11 + $0x34] sm:$0xf] }
 0x76b   : > { %v16633_v59 = vadd.f32 %v6302_v62, %v6290_v32  ;;  %v10250_v62 = vld [vmem:[%s17138_s11 + $0xa8] sm:$0xf0]  ;;  %v10496_v32 = vld [vmem:[%s17138_s11 + $0x290] sm:$0xf]  ;;  %v10194_v2 = vld [vmem:[%s17138_s11 + $0x38] sm:$0xf0] }
 0x76c   : > { %7098 = vmatpush.bf16.msra.mxu0 %v10241_v48  ;;  %7135 = vmatpush.bf16.msrb.mxu1 %v10449_v60  ;;  %v10776_v48 = vld [vmem:[%s17138_s11 + $0xb4] sm:$0xf]  ;;  %v6265_v28 = vpop.f32.mrf.mxu0  ;;  %v1667_v60 = vperm.slane %v16393_v42, 4  ;;  %v10253_v53 = vor.u32 %v10774_v6, %v10250_v62  ;;  %v10378_v62 = vld [vmem:[%s17138_s11 + $0x1a8] sm:$0xf0] }
 0x76d   : > { %7196 = vmatpush.bf16.msrb.mxu3 %v10293_v49  ;;  %7161 = vmatpush.bf16.msrb.mxu2 %v10577_v24  ;;  %v10418_v49 = vld [vmem:[%s17138_s11 + $0x1f8] sm:$0xf0]  ;;  %v1669_v24 = vperm.slane %v16393_v42, 6  ;;  %v10261_v54 = vor.u32 %v10776_v48, %v10258_v0  ;;  %v10497_v0 = vor.u32 %v10837_v14, %v10496_v32  ;;  %v10846_v28 = vld [vmem:[%s17138_s11 + $0x2e4] sm:$0xf] }
 0x76e   : > { %10646 = vmatmul.msk.bf16.vlgmr.msra.gmra.mxu3 %vm7075_vm0, %v16580_v57  ;;  %v16676_v21 = vpack.c.bf16 %v1667_v60, %v1667_v60  ;;  %v10800_v60 = vld [vmem:[%s17138_s11 + $0x174] sm:$0xf]  ;;  %v10802_v32 = vld [vmem:[%s17138_s11 + $0x184] sm:$0xf]  ;;  %v10362_v14 = vld [vmem:[%s17138_s11 + $0x188] sm:$0xf0] }
 0x76f   : > { %v16678_v15 = vpack.c.bf16 %v1669_v24, %v1669_v24  ;;  %v10354_v24 = vld [vmem:[%s17138_s11 + $0x178] sm:$0xf0] }
 0x770   : > { %7099 = vmatpush.bf16.msra.mxu0 %v10233_v58  ;;  %7136 = vmatpush.bf16.msrb.mxu1 %v10441_v3  ;;  %v10421_v58 = vor.u32 %v10816_v10, %v10418_v49  ;;  %v10764_v3 = vld [vmem:[%s17138_s11 + $0x54] sm:$0xf]  ;;  %v10549_v10 = vor.u32 %v10848_v20, %v10546_v39 }
 0x771   : > { %7197 = vmatpush.bf16.msrb.mxu3 %v10285_v47  ;;  %7162 = vmatpush.bf16.msrb.mxu2 %v10569_v56  ;;  %v10814_v47 = vld [vmem:[%s17138_s11 + $0x1e4] sm:$0xf]  ;;  %v10513_v56 = vor.u32 %v10841_v25, %v10512_v5  ;;  %v10213_v44 = vor.u32 %v10764_v3, %v10210_v1  ;;  %v10808_v49 = vld [vmem:[%s17138_s11 + $0x1b4] sm:$0xf]  ;;  %v10357_v5 = vor.u32 %v10800_v60, %v10354_v24  ;;  %v1668_v25 = vperm.slane %v16393_v42, 5 }
 0x772   : > { %v10798_v3 = vld [vmem:[%s17138_s11 + $0x164] sm:$0xf]  ;;  %v10346_v42 = vld [vmem:[%s17138_s11 + $0x168] sm:$0xf0] }
 0x773   : > { %7100 = vmatmul.bf16.vlgmr.msra.gmra.mxu0 %v16589_v23  ;;  %v10349_v35 = vor.u32 %v10798_v3, %v10346_v42  ;;  %v10466_v3 = vld [vmem:[%s17138_s11 + $0x258] sm:$0xf0]  ;;  %v10836_v42 = vld [vmem:[%s17138_s11 + $0x294] sm:$0xf] }
 0x774   : > { %7144 = vmatpush.bf16.msrb.mxu0 %v10545_v8  ;;  %7137 = vmatpush.bf16.msrb.mxu1 %v10433_v36  ;;  %v10410_v8 = vld [vmem:[%s17138_s11 + $0x1e8] sm:$0xf0] }
 0x775   : > { %7198 = vmatpush.bf16.msrb.mxu3 %v10277_v40  ;;  %7163 = vmatpush.bf16.msrb.mxu2 %v10561_v18  ;;  %v10413_v55 = vor.u32 %v10814_v47, %v10410_v8  ;;  %v10402_v40 = vld [vmem:[%s17138_s11 + $0x1d8] sm:$0xf0]  ;;  %v10234_v36 = vld [vmem:[%s17138_s11 + $0x88] sm:$0xf0]  ;;  %v10810_v18 = vld [vmem:[%s17138_s11 + $0x1c4] sm:$0xf] }
 0x776   : > { %v10405_v27 = vor.u32 %v10812_v22, %v10402_v40 }
 0x778   : > { %7145 = vmatpush.bf16.msrb.mxu0 %v10537_v16  ;;  %7138 = vmatpush.bf16.msrb.mxu1 %v10425_v50  ;;  %v10504_v16 = vld [vmem:[%s17138_s11 + $0x2a0] sm:$0xf]  ;;  %v6328_v48 = vpop.f32.mrf.mxu1  ;;  %v10386_v50 = vld [vmem:[%s17138_s11 + $0x1b8] sm:$0xf0] }
 0x779   : > { %7199 = vmatpush.bf16.msrb.mxu3 %v10269_v45  ;;  %7164 = vmatpush.bf16.msrb.mxu2 %v10553_v52  ;;  %v10505_v34 = vor.u32 %v10839_v26, %v10504_v16  ;;  %v10237_v45 = vor.u32 %v10770_v41, %v10234_v36  ;;  %v10538_v52 = vld [vmem:[%s17138_s11 + $0x2e8] sm:$0xf0]  ;;  %v10804_v16 = vld [vmem:[%s17138_s11 + $0x194] sm:$0xf]  ;;  %v10370_v26 = vld [vmem:[%s17138_s11 + $0x198] sm:$0xf0] }
 0x77a   : > { %v10541_v6 = vor.u32 %v10846_v28, %v10538_v52  ;;  %v10796_v41 = vld [vmem:[%s17138_s11 + $0x154] sm:$0xf]  ;;  %v10338_v36 = vld [vmem:[%s17138_s11 + $0x158] sm:$0xf0]  ;;  %v10330_v28 = vld [vmem:[%s17138_s11 + $0x148] sm:$0xf0]  ;;  %v10365_v52 = vor.u32 %v10802_v32, %v10362_v14 }
 0x77b   : > { %7139 = vmatmul.bf16.vlgmr.msrb.gmra.mxu1 %v16676_v21  ;;  %v10824_v32 = vld [vmem:[%s17138_s11 + $0x234] sm:$0xf]  ;;  %v10450_v14 = vld [vmem:[%s17138_s11 + $0x238] sm:$0xf0] }
 0x77c   : > { %7146 = vmatpush.bf16.msrb.mxu0 %v10529_v19  ;;  %7183 = vmatpush.bf16.msra.mxu1 %v10229_v43  ;;  %v10397_v19 = vor.u32 %v10810_v18, %v10394_v37  ;;  %v10197_v43 = vor.u32 %v10760_v46, %v10194_v2  ;;  %v10373_v18 = vor.u32 %v10804_v16, %v10370_v26  ;;  %v10170_v37 = vld [vmem:[%s17138_s11 + $0x8] sm:$0xf0]  ;;  %v10826_v26 = vld [vmem:[%s17138_s11 + $0x244] sm:$0xf] }
 0x77d   : > { %7200 = vmatpush.bf16.msrb.mxu3 %v10261_v54  ;;  %7222 = vmatpush.bf16.msra.mxu2 %v10421_v58  ;;  %v10389_v54 = vor.u32 %v10808_v49, %v10386_v50  ;;  %v10758_v58 = vld [vmem:[%s17138_s11 + $0x24] sm:$0xf]  ;;  %v10642_v49 = vld [vmem:[%s17138_s11 + $0x3b8] sm:$0xf0] }
 0x77e   : > { %7165 = vmatmul.bf16.vlgmr.msrb.gmra.mxu2 %v16678_v15 }
 0x780   : > { %7147 = vmatpush.bf16.msrb.mxu0 %v10521_v31  ;;  %7184 = vmatpush.bf16.msra.mxu1 %v10221_v63  ;;  %v10806_v31 = vld [vmem:[%s17138_s11 + $0x1a4] sm:$0xf]  ;;  %v10844_v63 = vld [vmem:[%s17138_s11 + $0x2d4] sm:$0xf]  ;;  %v6330_v13 = vpop.f32.mrf.mxu1 }
 0x781   : > { %7201 = vmatpush.bf16.msrb.mxu3 %v10253_v53  ;;  %7223 = vmatpush.bf16.msra.mxu2 %v10413_v55  ;;  %v6341_v47 = vpop.f32.mrf.mxu2  ;;  %v6354_v8 = vpop.f32.mrf.mxu3  ;;  %v10530_v53 = vld [vmem:[%s17138_s11 + $0x2d8] sm:$0xf0]  ;;  %v10189_v55 = vor.u32 %v10758_v58, %v10186_v61  ;;  %v10381_v29 = vor.u32 %v10806_v31, %v10378_v62  ;;  %v10830_v58 = vld [vmem:[%s17138_s11 + $0x264] sm:$0xf]  ;;  %v10474_v61 = vld [vmem:[%s17138_s11 + $0x268] sm:$0xf0] }
 0x782   : > { %v10533_v40 = vor.u32 %v10844_v63, %v10530_v53  ;;  %v10506_v31 = vld [vmem:[%s17138_s11 + $0x2a8] sm:$0xf0]  ;;  %v10870_v62 = vld [vmem:[%s17138_s11 + $0x3a4] sm:$0xf] }
 0x783   : > { %v10790_v13 = vld [vmem:[%s17138_s11 + $0x124] sm:$0xf] }
 0x784   : > { %7148 = vmatpush.bf16.msrb.mxu0 %v10513_v56  ;;  %7185 = vmatpush.bf16.msra.mxu1 %v10213_v44  ;;  %v6315_v1 = vpop.f32.mrf.mxu0  ;;  %v10756_v56 = vld [vmem:[%s17138_s11 + $0x14] sm:$0xf]  ;;  %v16805_v44 = vpack.c.bf16 %v1668_v25, %v1668_v25  ;;  %v10477_v25 = vor.u32 %v10830_v58, %v10474_v61 }
 0x785   : > { %7202 = vmatpush.bf16.msrb.mxu3 %v10245_v9  ;;  %7224 = vmatpush.bf16.msra.mxu2 %v10405_v27  ;;  %v6316_v22 = vadd.f32 %v6315_v1, %v16633_v59  ;;  %v10842_v9 = vld [vmem:[%s17138_s11 + $0x2c4] sm:$0xf]  ;;  %v10522_v59 = vld [vmem:[%s17138_s11 + $0x2c8] sm:$0xf0] }
 0x786   : > { %v10525_v39 = vor.u32 %v10842_v9, %v10522_v59  ;;  %v10490_v59 = vld [vmem:[%s17138_s11 + $0x288] sm:$0xf0] }
 0x787   : > { %v6329_v27 = vadd.f32 %v6328_v48, %v6316_v22  ;;  %v10341_v48 = vor.u32 %v10796_v41, %v10338_v36  ;;  %v10788_v41 = vld [vmem:[%s17138_s11 + $0x114] sm:$0xf]  ;;  %v10306_v36 = vld [vmem:[%s17138_s11 + $0x118] sm:$0xf0] }
 0x788   : > { %7149 = vmatpush.bf16.msrb.mxu0 %v10505_v34  ;;  %7186 = vmatpush.bf16.msra.mxu1 %v10205_v38  ;;  %v10754_v34 = vld [vmem:[%s17138_s11 + $0x4] sm:$0xf]  ;;  %v10832_v38 = vld [vmem:[%s17138_s11 + $0x274] sm:$0xf] }
 0x789   : > { %7203 = vmatpush.bf16.msrb.mxu3 %v10237_v45  ;;  %7225 = vmatpush.bf16.msra.mxu2 %v10397_v19  ;;  %v6342_v20 = vadd.f32 %v6341_v47, %v6329_v27  ;;  %v10482_v45 = vld [vmem:[%s17138_s11 + $0x278] sm:$0xf0]  ;;  %v10840_v19 = vld [vmem:[%s17138_s11 + $0x2b4] sm:$0xf]  ;;  %v6343_v46 = vpop.f32.mrf.mxu2  ;;  %v6356_v2 = vpop.f32.mrf.mxu3  ;;  %v10173_v51 = vor.u32 %v10754_v34, %v10170_v37  ;;  %v10634_v47 = vld [vmem:[%s17138_s11 + $0x3a8] sm:$0xf0] }
 0x78a   : > { %v10637_v53 = vor.u32 %v10870_v62, %v10634_v47  ;;  %v10866_v27 = vld [vmem:[%s17138_s11 + $0x384] sm:$0xf]  ;;  %v10864_v46 = vld [vmem:[%s17138_s11 + $0x374] sm:$0xf]  ;;  %v10610_v2 = vld [vmem:[%s17138_s11 + $0x378] sm:$0xf0] }
 0x78b   : > { %v16850_v50 = vadd.f32 %v6354_v8, %v6342_v20  ;;  %v10792_v8 = vld [vmem:[%s17138_s11 + $0x134] sm:$0xf]  ;;  %v10309_v20 = vor.u32 %v10788_v41, %v10306_v36 }
 0x78c   : > { %7150 = vmatpush.bf16.msrb.mxu0 %v10497_v0  ;;  %7204 = vmatmul.bf16.vlgmr.msrb.gmra.mxu3 %v16589_v23  ;;  %v10178_v23 = vld [vmem:[%s17138_s11 + $0x18] sm:$0xf0]  ;;  %v6317_v60 = vpop.f32.mrf.mxu0 }
 0x78d   : > { %7248 = vmatpush.bf16.msra.mxu3 %v10549_v10  ;;  %7187 = vmatpush.bf16.msra.mxu1 %v10197_v43  ;;  %v10181_v33 = vor.u32 %v10756_v56, %v10178_v23  ;;  %v10514_v0 = vld [vmem:[%s17138_s11 + $0x2b8] sm:$0xf0]  ;;  %v10872_v10 = vld [vmem:[%s17138_s11 + $0x3b4] sm:$0xf]  ;;  %v10485_v43 = vor.u32 %v10832_v38, %v10482_v45  ;;  %v10786_v38 = vld [vmem:[%s17138_s11 + $0x104] sm:$0xf] }
 0x78e   : > { %7226 = vmatpush.bf16.msra.mxu2 %v10389_v54  ;;  %v10517_v24 = vor.u32 %v10840_v19, %v10514_v0  ;;  %v10645_v54 = vor.u32 %v10872_v10, %v10642_v49  ;;  %v10868_v56 = vld [vmem:[%s17138_s11 + $0x394] sm:$0xf]  ;;  %v10626_v23 = vld [vmem:[%s17138_s11 + $0x398] sm:$0xf0]  ;;  %v10298_v45 = vld [vmem:[%s17138_s11 + $0x108] sm:$0xf0]  ;;  %v10453_v19 = vor.u32 %v10824_v32, %v10450_v14 }
 0x78f   : > { %v10629_v16 = vor.u32 %v10868_v56, %v10626_v23  ;;  %v10442_v0 = vld [vmem:[%s17138_s11 + $0x228] sm:$0xf0]  ;;  %v10301_v10 = vor.u32 %v10786_v38, %v10298_v45  ;;  %v10820_v60 = vld [vmem:[%s17138_s11 + $0x214] sm:$0xf]  ;;  %v10854_v23 = vld [vmem:[%s17138_s11 + $0x324] sm:$0xf] }
 0x790   : > { %7151 = vmatpush.bf16.msrb.mxu0 %v10489_v7  ;;  %v10838_v7 = vld [vmem:[%s17138_s11 + $0x2a4] sm:$0xf]  ;;  %v11492_v45 = vld [vmem:[%s17141_s14 + $0x30] sm:$0xff] }
 0x791   : > { %7249 = vmatpush.bf16.msra.mxu3 %v10541_v6  ;;  %7188 = vmatpush.bf16.msra.mxu1 %v10189_v55  ;;  %v10333_v6 = vor.u32 %v10794_v12, %v10330_v28  ;;  %v10509_v63 = vor.u32 %v10838_v7, %v10506_v31  ;;  %v10828_v55 = vld [vmem:[%s17138_s11 + $0x254] sm:$0xf]  ;;  %v10594_v31 = vld [vmem:[%s17138_s11 + $0x358] sm:$0xf0] }
 0x792   : > { %7227 = vmatpush.bf16.msra.mxu2 %v10381_v29  ;;  %v10498_v29 = vld [vmem:[%s17138_s11 + $0x298] sm:$0xf0]  ;;  %v10469_v22 = vor.u32 %v10828_v55, %v10466_v3 }
 0x793   : > { %7152 = vmatmul.bf16.vlgmr.msrb.gmra.mxu0 %v16805_v44 }
 0x794   : > { %7209 = vmatpush.bf16.msra.mxu0 %v10357_v5  ;;  %v10322_v5 = vld [vmem:[%s17138_s11 + $0x138] sm:$0xf0] }
 0x795   : > { %7250 = vmatpush.bf16.msra.mxu3 %v10533_v40  ;;  %7189 = vmatpush.bf16.msra.mxu1 %v10181_v33  ;;  %v10325_v1 = vor.u32 %v10792_v8, %v10322_v5  ;;  %v10501_v40 = vor.u32 %v10836_v42, %v10498_v29  ;;  %v10618_v33 = vld [vmem:[%s17138_s11 + $0x388] sm:$0xf0]  ;;  %v10578_v29 = vld [vmem:[%s17138_s11 + $0x338] sm:$0xf0] }
 0x796   : > { %7228 = vmatpush.bf16.msra.mxu2 %v10373_v18  ;;  %v10621_v37 = vor.u32 %v10866_v27, %v10618_v33 }
 0x798   : > { %7210 = vmatpush.bf16.msra.mxu0 %v10349_v35  ;;  %v10834_v35 = vld [vmem:[%s17138_s11 + $0x284] sm:$0xf] }
 0x799   : > { %7251 = vmatpush.bf16.msra.mxu3 %v10525_v39  ;;  %7190 = vmatpush.bf16.msra.mxu1 %v10173_v51  ;;  %v10493_v18 = vor.u32 %v10834_v35, %v10490_v59  ;;  %v6380_v39 = vpop.f32.mrf.mxu1  ;;  %v10613_v51 = vor.u32 %v10864_v46, %v10610_v2  ;;  %v11491_v46 = vld [vmem:[%s17141_s14 + $0x28] sm:$0xff] }
 0x79a   : > { %7229 = vmatpush.bf16.msra.mxu2 %v10365_v52  ;;  %v10862_v52 = vld [vmem:[%s17138_s11 + $0x364] sm:$0xf] }
 0x79c   : > { %7211 = vmatpush.bf16.msra.mxu0 %v10341_v48  ;;  %7191 = vmatmul.bf16.vlgmr.msra.gmra.mxu1 %v16461_v30  ;;  %v10314_v30 = vld [vmem:[%s17138_s11 + $0x128] sm:$0xf0]  ;;  %v10822_v48 = vld [vmem:[%s17138_s11 + $0x224] sm:$0xf] }
 0x79d   : > { %7235 = vmatpush.bf16.msrb.mxu1 %v10485_v43  ;;  %7252 = vmatpush.bf16.msra.mxu3 %v10517_v24  ;;  %v10317_v9 = vor.u32 %v10790_v13, %v10314_v30  ;;  %v10445_v28 = vor.u32 %v10822_v48, %v10442_v0  ;;  %v10602_v43 = vld [vmem:[%s17138_s11 + $0x368] sm:$0xf0]  ;;  %v10434_v24 = vld [vmem:[%s17138_s11 + $0x218] sm:$0xf0]  ;;  %v11490_v48 = vld [vmem:[%s17141_s14 + $0x20] sm:$0xff] }
 0x79e   : > { %7278 = vmatpush.bf16.msrb.mxu2 %v10645_v54  ;;  %v10605_v61 = vor.u32 %v10862_v52, %v10602_v43  ;;  %v10437_v7 = vor.u32 %v10820_v60, %v10434_v24  ;;  %v10570_v13 = vld [vmem:[%s17138_s11 + $0x328] sm:$0xf0]  ;;  %v11488_v43 = vld [vmem:[%s17141_s14 + $0x10] sm:$0xff] }
 0x79f   : > { %7230 = vmatmul.bf16.vlgmr.msra.gmra.mxu2 %v16471_v4  ;;  %v10458_v4 = vld [vmem:[%s17138_s11 + $0x248] sm:$0xf0]  ;;  %v10573_v30 = vor.u32 %v10854_v23, %v10570_v13  ;;  %v11496_v13 = vld [vmem:[%s17141_s14 + $0x50] sm:$0xff] }
 0x7a0   : > { %7212 = vmatpush.bf16.msra.mxu0 %v10333_v6  ;;  %v10461_v34 = vor.u32 %v10826_v26, %v10458_v4  ;;  %v10860_v6 = vld [vmem:[%s17138_s11 + $0x354] sm:$0xf]  ;;  %v10554_v26 = vld [vmem:[%s17138_s11 + $0x308] sm:$0xf0] }
 0x7a1   : > { %7236 = vmatpush.bf16.msrb.mxu1 %v10477_v25  ;;  %7253 = vmatpush.bf16.msra.mxu3 %v10509_v63  ;;  %v6393_v49 = vpop.f32.mrf.mxu2  ;;  %v6406_v12 = vpop.f32.mrf.mxu3  ;;  %v10597_v5 = vor.u32 %v10860_v6, %v10594_v31  ;;  %v11487_v24 = vld [vmem:[%s17141_s14 + $0x8] sm:$0xff] }
 0x7a2   : > { %7279 = vmatpush.bf16.msrb.mxu2 %v10637_v53  ;;  %v6382_v54 = vpop.f32.mrf.mxu1  ;;  %v10586_v53 = vld [vmem:[%s17138_s11 + $0x348] sm:$0xf0] }
 0x7a4   : > { %7213 = vmatpush.bf16.msra.mxu0 %v10325_v1  ;;  %v10856_v1 = vld [vmem:[%s17138_s11 + $0x334] sm:$0xf] }
 0x7a5   : > { %7237 = vmatpush.bf16.msrb.mxu1 %v10469_v22  ;;  %7254 = vmatpush.bf16.msra.mxu3 %v10501_v40  ;;  %v10581_v56 = vor.u32 %v10856_v1, %v10578_v29  ;;  %v10852_v22 = vld [vmem:[%s17138_s11 + $0x314] sm:$0xf]  ;;  %v10562_v40 = vld [vmem:[%s17138_s11 + $0x318] sm:$0xf0] }
 0x7a6   : > { %7280 = vmatpush.bf16.msrb.mxu2 %v10629_v16  ;;  %v10850_v16 = vld [vmem:[%s17138_s11 + $0x304] sm:$0xf] }
 0x7a7   : > { %v10557_v35 = vor.u32 %v10850_v16, %v10554_v26  ;;  %v11495_v26 = vld [vmem:[%s17141_s14 + $0x48] sm:$0xff] }
 0x7a8   : > { %7214 = vmatpush.bf16.msra.mxu0 %v10317_v9 }
 0x7a9   : > { %7238 = vmatpush.bf16.msrb.mxu1 %v10461_v34  ;;  %7255 = vmatpush.bf16.msra.mxu3 %v10493_v18  ;;  %v6395_v47 = vpop.f32.mrf.mxu2  ;;  %v6408_v25 = vpop.f32.mrf.mxu3 }
 0x7aa   : > { %7281 = vmatpush.bf16.msrb.mxu2 %v10621_v37 }
 0x7ac   : > { %7215 = vmatpush.bf16.msra.mxu0 %v10309_v20  ;;  %7256 = vmatmul.bf16.vlgmr.msra.gmra.mxu3 %v16805_v44  ;;  %v6367_v44 = vpop.f32.mrf.mxu0  ;;  %v11493_v20 = vld [vmem:[%s17141_s14 + $0x38] sm:$0xff] }
 0x7ad   : > { %7239 = vmatpush.bf16.msrb.mxu1 %v10453_v19  ;;  %v6368_v58 = vadd.f32 %v6367_v44, %v16850_v50  ;;  %v10426_v50 = vld [vmem:[%s17138_s11 + $0x208] sm:$0xf0] }
 0x7ae   : > { %7397 = vmatpush.bf16.msra.mxu2 %v11493_v20 }
 0x7af   : > { %10647 = vmatmul.msk.bf16.vlgmr.msrb.gmra.mxu2 %vm7075_vm0, %v16580_v57  ;;  %v6381_v62 = vadd.f32 %v6380_v39, %v6368_v58  ;;  %v10818_v57 = vld [vmem:[%s17138_s11 + $0x204] sm:$0xf] }
 0x7b0   : > { %7216 = vmatpush.bf16.msra.mxu0 %v10301_v10  ;;  %v10429_v63 = vor.u32 %v10818_v57, %v10426_v50  ;;  %v11486_v58 = vld [vmem:[%s17141_s14] sm:$0xff] }
 0x7b1   : > { %7240 = vmatpush.bf16.msrb.mxu1 %v10445_v28  ;;  %v6394_v8 = vadd.f32 %v6393_v49, %v6381_v62  ;;  %v11489_v49 = vld [vmem:[%s17141_s14 + $0x18] sm:$0xff] }
 0x7b2   : > { %7398 = vmatpush.bf16.msra.mxu2 %v11492_v45 }
 0x7b3   : > { %7217 = vmatmul.bf16.vlgmr.msra.gmra.mxu0 %v16463_v17  ;;  %v10858_v17 = vld [vmem:[%s17138_s11 + $0x344] sm:$0xf]  ;;  %v6407_v55 = vadd.f32 %v6406_v12, %v6394_v8 }
 0x7b4   : > { %7261 = vmatpush.bf16.msrb.mxu0 %v10613_v51  ;;  %v6369_v3 = vpop.f32.mrf.mxu0  ;;  %v10589_v42 = vor.u32 %v10858_v17, %v10586_v53 }
 0x7b5   : > { %7241 = vmatpush.bf16.msrb.mxu1 %v10437_v7 }
 0x7b6   : > { %7399 = vmatpush.bf16.msra.mxu2 %v11491_v46 }
 0x7b8   : > { %7262 = vmatpush.bf16.msrb.mxu0 %v10605_v61  ;;  %v6432_v4 = vpop.f32.mrf.mxu1 }
 0x7b9   : > { %7242 = vmatpush.bf16.msrb.mxu1 %v10429_v63 }
 0x7ba   : > { %7400 = vmatpush.bf16.msra.mxu2 %v11490_v48  ;;  %v11503_v48 = vld [vmem:[%s17143_s16 + $0x28] sm:$0xff] }
 0x7bc   : > { %7263 = vmatpush.bf16.msrb.mxu0 %v10597_v5  ;;  %7243 = vmatmul.bf16.vlgmr.msrb.gmra.mxu1 %v16676_v21  ;;  %v10565_v21 = vor.u32 %v10852_v22, %v10562_v40  ;;  %v7287_v5 = vld [vmem:[%s17140_s13] sm:$0x3] }
 0x7bd   : > { %v7289_v53 = vperm.slane %v7287_v5, 0 }
 0x7be   : > { %7401 = vmatpush.bf16.msra.mxu2 %v11489_v49  ;;  %v11500_v49 = vld [vmem:[%s17143_s16 + $0x10] sm:$0xff] }
 0x7c0   : > { %7264 = vmatpush.bf16.msrb.mxu0 %v10589_v42  ;;  %v6434_v33 = vpop.f32.mrf.mxu1 }
 0x7c1   : > { %v6445_v9 = vpop.f32.mrf.mxu2  ;;  %v6458_v59 = vpop.f32.mrf.mxu3 }
 0x7c2   : > { %7402 = vmatpush.bf16.msra.mxu2 %v11488_v43  ;;  %v7321_v43 = vld [vmem:[%s17142_s15] sm:$0x1] }
 0x7c4   : > { %7265 = vmatpush.bf16.msrb.mxu0 %v10581_v56  ;;  %v6419_v27 = vpop.f32.mrf.mxu0  ;;  %v11497_v56 = vld [vmem:[%s17141_s14 + $0x58] sm:$0xff] }
 0x7c5   : > { %v6420_v41 = vadd.f32 %v6419_v27, %v6407_v55  ;;  %7414 = vmatpush.bf16.msra.mxu1 %v11497_v56 }
 0x7c6   : > { %7403 = vmatpush.bf16.msra.mxu2 %v11487_v24 }
 0x7c7   : > { %v6433_v36 = vadd.f32 %v6432_v4, %v6420_v41  ;;  %v11494_v4 = vld [vmem:[%s17141_s14 + $0x40] sm:$0xff] }
 0x7c8   : > { %7266 = vmatpush.bf16.msrb.mxu0 %v10573_v30 }
 0x7c9   : > { %v6446_v34 = vadd.f32 %v6445_v9, %v6433_v36  ;;  %v6447_v18 = vpop.f32.mrf.mxu2  ;;  %v6460_v37 = vpop.f32.mrf.mxu3  ;;  %7415 = vmatpush.bf16.msra.mxu1 %v11496_v13 }
 0x7ca   : > { %7404 = vmatpush.bf16.msra.mxu2 %v11486_v58 }
 0x7cb   : > { %v6459_v32 = vadd.f32 %v6458_v59, %v6446_v34 }
 0x7cc   : > { %7267 = vmatpush.bf16.msrb.mxu0 %v10565_v21  ;;  %v6421_v14 = vpop.f32.mrf.mxu0 }
 0x7cd   : > { %7416 = vmatpush.bf16.msra.mxu1 %v11495_v26 }
 0x7d0   : > { %7268 = vmatpush.bf16.msrb.mxu0 %v10557_v35 }
 0x7d1   : > { %7417 = vmatpush.bf16.msra.mxu1 %v11494_v4 }
 0x7d3   : > { %7269 = vmatmul.bf16.vlgmr.msrb.gmra.mxu0 %v16678_v15 }
 0x7d4   : > { %v6471_v39 = vpop.f32.mrf.mxu0 }
 0x7d5   : > { %v17020_v38 = vadd.f32 %v6471_v39, %v6459_v32  ;;  %v7290_v39 = vperm.slane %v7287_v5, 1 }
 0x7d8   : > { %v7088_v19 = vpop.f32.mrf.mxu1 }
 0x7d9   : > { %v7089_v61 = vadd.f32 %v7088_v19, %v15436_v11 }
 0x7dc   : > { %v6473_v15 = vpop.f32.mrf.mxu0 }
 0x7e0   : > { %v7090_v10 = vpop.f32.mrf.mxu1 }
 0x7e1   : > { %v7114_v2 = vpop.f32.mrf.mxu2  ;;  %v7127_v0 = vpop.f32.mrf.mxu3  ;;  %v11501_v10 = vld [vmem:[%s17143_s16 + $0x18] sm:$0xff] }
 0x7e9   : > { %v7116_v51 = vpop.f32.mrf.mxu2  ;;  %v7129_v12 = vpop.f32.mrf.mxu3 }
 0x7f0   : > { %v7101_v28 = vpop.f32.mrf.mxu0 }
 0x7f1   : > { %v7179_v52 = vpop.f32.mrf.mxu3  ;;  %v7102_v6 = vadd.f32 %v7101_v28, %v7089_v61  ;;  %v11499_v28 = vld [vmem:[%s17143_s16 + $0x8] sm:$0xff] }
 0x7f3   : > { %v7115_v62 = vadd.f32 %v7114_v2, %v7102_v6  ;;  %v11504_v2 = vld [vmem:[%s17143_s16 + $0x30] sm:$0xff] }
 0x7f5   : > { %v7128_v50 = vadd.f32 %v7127_v0, %v7115_v62  ;;  %v11502_v0 = vld [vmem:[%s17143_s16 + $0x20] sm:$0xff] }
 0x7f8   : > { %v7103_v60 = vpop.f32.mrf.mxu0  ;;  %v7140_v44 = vpop.f32.mrf.mxu1 }
 0x7f9   : > { %v7181_v54 = vpop.f32.mrf.mxu3  ;;  %v7141_v47 = vadd.f32 %v7140_v44, %v7128_v50 }
 0x800   : > { %v7142_v31 = vpop.f32.mrf.mxu1 }
 0x801   : > { %v7166_v7 = vpop.f32.mrf.mxu2 }
 0x809   : > { %v7168_v57 = vpop.f32.mrf.mxu2 }
 0x80f   : > { %v7205_v63 = vpop.f32.mrf.mxu3 }
 0x810   : > { %v7153_v8 = vpop.f32.mrf.mxu0 }
 0x811   : > { %v7154_v25 = vadd.f32 %v7153_v8, %v7141_v47  ;;  %v11685_v47 = vmov 8.0  }
 0x812   : > { %11581 = vrcp.f32 %v11685_v47 }
 0x813   : > { %v7167_v17 = vadd.f32 %v7166_v7, %v7154_v25  ;;  %v7441_v7 = vld [vmem:[%s17144_s17] sm:$0x1] }
 0x815   : > { %v7180_v55 = vadd.f32 %v7179_v52, %v7167_v17  ;;  %v11498_v52 = vld [vmem:[%s17143_s16] sm:$0xff] }
 0x817   : > { %v7293_v3 = vadd.f32 %v7289_v53, %v7180_v55  ;;  %v7207_v1 = vpop.f32.mrf.mxu3 }
 0x818   : > { %v7155_v11 = vpop.f32.mrf.mxu0  ;;  %v11582_v8 = vpop.eup %11581 }
 0x819   : > { %v7319_v42 = vpack.c.bf16 %v7293_v3, %v7293_v3  ;;  %v7192_v29 = vpop.f32.mrf.mxu1  ;;  %v7517_v5 = vmul.f32 8.0, %v11582_v8  ;;  %vm7521_vm8 = vweird.f32 %v11582_v8 }
 0x81a   : > { %v7193_v27 = vadd.f32 %v7192_v29, %v17020_v38  ;;  %v11505_v38 = vld [vmem:[%s17143_s16 + $0x38] sm:$0xff] }
 0x81b   : > { %7405 = vmatmul.bf16.vlgmr.msra.gmra.mxu2 %v7319_v42  ;;  %7490 = vmatpush.bf16.msrb.mxu3 %v11505_v38  ;;  %v7518_v25 = vsub.f32 1.0, %v7517_v5 }
 0x81c   : > { %v7206_v41 = vadd.f32 %v7205_v63, %v7193_v27 }
 0x81d   : > { %v7519_v63 = vmul.f32 %v11582_v8, %v7518_v25 }
 0x81f   : > { %7491 = vmatpush.bf16.msrb.mxu3 %v11504_v2  ;;  %v7520_v17 = vadd.f32 %v11582_v8, %v7519_v63 }
 0x821   : > { %v7194_v30 = vpop.f32.mrf.mxu1  ;;  %v7522_v55 = vsel %vm7521_vm8, %v11582_v8, %v7520_v17 }
 0x822   : > { %v7231_v23 = vpop.f32.mrf.mxu2 }
 0x823   : > { %7492 = vmatpush.bf16.msrb.mxu3 %v11503_v48 }
 0x827   : > { %7493 = vmatpush.bf16.msrb.mxu3 %v11502_v0 }
 0x82a   : > { %v7233_v22 = vpop.f32.mrf.mxu2 }
 0x82b   : > { %7494 = vmatpush.bf16.msrb.mxu3 %v11501_v10 }
 0x82f   : > { %v7257_v21 = vpop.f32.mrf.mxu3  ;;  %7495 = vmatpush.bf16.msrb.mxu3 %v11500_v49 }
 0x830   : > { %v7218_v40 = vpop.f32.mrf.mxu0 }
 0x831   : > { %v7219_v36 = vadd.f32 %v7218_v40, %v7206_v41 }
 0x832   : > { %v7283_v16 = vpop.f32.mrf.mxu2 }
 0x833   : > { %v7232_v18 = vadd.f32 %v7231_v23, %v7219_v36  ;;  %7496 = vmatpush.bf16.msrb.mxu3 %v11499_v28 }
 0x837   : > { %v7259_v9 = vpop.f32.mrf.mxu3  ;;  %7497 = vmatpush.bf16.msrb.mxu3 %v11498_v52 }
 0x838   : > { %v7220_v35 = vpop.f32.mrf.mxu0 }
 0x839   : > { %v7244_v59 = vpop.f32.mrf.mxu1 }
 0x83a   : > { %v7285_v33 = vpop.f32.mrf.mxu2  ;;  %v7245_v37 = vadd.f32 %v7244_v59, %v7232_v18 }
 0x83c   : > { %v7258_v32 = vadd.f32 %v7257_v21, %v7245_v37 }
 0x841   : > { %v7246_v34 = vpop.f32.mrf.mxu1 }
 0x850   : > { %v7270_v14 = vpop.f32.mrf.mxu0 }
 0x851   : > { %v7271_v20 = vadd.f32 %v7270_v14, %v7258_v32 }
 0x853   : > { %v7284_v45 = vadd.f32 %v7283_v16, %v7271_v20 }
 0x855   : > { %v7294_v19 = vadd.f32 %v7290_v39, %v7284_v45 }
 0x857   : > { %v7320_v15 = vpack.c.bf16 %v7294_v19, %v7294_v19 }
 0x858   : > { %v7272_v46 = vpop.f32.mrf.mxu0 }
 0x859   : > { %10696 = vmatmul.msk.bf16.vlgmr.msra.gmra.mxu1 %vm7075_vm0, %v7320_v15 }
 0x89e   : > { %v7406_v51 = vpop.f32.mrf.mxu2 }
 0x89f   : > { %v7407_v60 = vadd.f32 %v7406_v51, %v7321_v43 }
 0x8a6   : > { %v7408_v12 = vpop.f32.mrf.mxu2 }
 0x8d6   : > { %v7419_v24 = vpop.f32.mrf.mxu1 }
 0x8d7   : > { %v7420_v44 = vadd.f32 %v7419_v24, %v7407_v60 }
 0x8d9   : > { %v7423_v54 = vmax.f32 %v7420_v44, 0.0 }
 0x8db   : > { %v7440_v58 = vpack.c.bf16 %v7423_v54, %v7423_v54 }
 0x8dd   : > { %7498 = vmatmul.bf16.vlgmr.msrb.gmra.mxu3 %v7440_v58 }
 0x8de   : > { %v7421_v61 = vpop.f32.mrf.mxu1 }
 0x960   : > { %v7499_v6 = vpop.f32.mrf.mxu3 }
 0x961   : > { %v7500_v31 = vadd.f32 %v7499_v6, %v7441_v7 }
 0x963   : > { %7505 = vperm.xlu2 %11580, %v7500_v31   ;;  %7509 = vrot.lane.b32.xlu0 %v7500_v31, %s17177_s29 }
 0x968   : > { %v7501_v62 = vpop.f32.mrf.mxu3 }
 0x9bd   : > { %v7506_v53 = vpop.permute.xlu2 %7505 }
 0x9be   : > { %v7508_v11 = vadd.f32 %v7506_v53, %v7500_v31 }
 0x9d5   : > { %v7510_v57 = vpop.permute.xlu0 %7509 }
 0x9d6   : > { %v7513_v50 = vsel %vm7512_vm11, %v7510_v57, 0.0 }
 0x9d7   : > { %7514 = vadd.xlane.f32.xlu1 %v7513_v50 }
 0xa4a   : > { %v7515_v3 = vpop.xlane.xlu1 %7514 }
 0xa4b   : > { %v7523_v42 = vmul.f32 %v7522_v55, %v7515_v3 }
 0xa4d   : > { %v7524_v1 = vsub.f32 %v7508_v11, %v7523_v42 }
 0xa4f   : > { %7526 = vrot.lane.b32.xlu0 %v7524_v1, %s17177_s29 }
 0xac1   : > { %v7527_v29 = vpop.permute.xlu0 %7526 }
 0xac2   : > { %7529 = vst.msk [vmem:[%s580_s24] sm:$0x1] %vm7512_vm11, %v7527_v29 }
 0xac3   : > { %11618 = shalt.err (!%p11615_p3)
}
 0xac4   : > { %11508 = dma.vmem_to_hbm [thread:$0]  (%p11819_p5), %s7542_s25, 16, %s7544_s7, %s7531_s26  }
 0xac5 PF: > { %p11514_p4 = scmp.ge.s32.totalorder %s11653_s30, 2  ;;  %s7555_s20 = sand.u32 1, %s11641_s27  }
 0xac6   : > { %s7556_s5 = scalar_lea.sflag [#allocation10], %s7555_s20 }
 0xac7   : > { %p11511_p7 = pnand %p11514_p4, %p11823_p6 }
 0xac9   : > { %p11512_p8 = pneg %p11511_p7 }
 0xacb   : > { %11636 = dma.done.wait (%p11512_p8), %s7556_s5, 16  }
 0xacc   : > { %11638 = vsyncadd (%p11512_p8), %s7556_s5, 4294967280  ;;  %s17241_s30 = sld [smem:[#allocation13_spill]]  ;;  %s17244_s27 = smov %s11645_s28 }
 0xacd   : > { %s17242_s6 = sld [smem:[#allocation12_spill]] }
 0xace   : > { %s17243_s29 = sld [smem:[#allocation14_spill]] }
 0xad2   : > { %p28_p9 = scmp.ge.s32.totalorder %s17241_s30, 4  }
 0xad3   : > { %s17245_s28 = smov %s17242_s6 }
 0xad4   :  { %30 = sbr.rel (!%p28_p9) target bundleno = 12 (0xc), region = 144 }
 0xad9   :  { %7561 = vsyncpa [#allocation10], 1 }
 0xada   :  { %7563 = vsyncpa [#allocation10 + $0x1], 1 }

</bundles_post_ra>
